<compile_context>
chip_gen: v6e
topology: v6e:2x2x1
jax: 0.10.0
libtpu: 0.0.40
codegen_flags: <defaults>
</compile_context>

<pallas_src>
import functools

import jax
import jax.numpy as jnp
from jax import lax
from jax.experimental import pallas as pl
from jax.experimental.pallas import tpu as pltpu


# ----------------------------------------------------------------------------
# Fused kernel: 5 in-kernel convs + MIMBlock gates + MIMS + conv_last
# ----------------------------------------------------------------------------
def _mim_fused_kernel(has_cmims, k, tr, W, nh,
                      ph_ref, pm_ref, px_ref, pc_ref, pd_ref, oc_ref,
                      w_t_ref, w_s_ref, w_x_ref, w_h_ref, w_d_ref, w_last_ref,
                      *rest):
    if has_cmims:
        ct_ref, cm_ref, out_ref = rest
    else:
        (out_ref,) = rest

    p = k // 2
    T = tr * W

    def conv4(blk_ref, w_ref, acc=None):
        """k x k conv (stride 1) with all gates fused on the lane axis.

        blk_ref: (tr + 2p, Wp8, C) halo'd padded rows; w_ref: (k*k, C, 4*nh).
        Returns / accumulates an f32 (T, 4*nh) slab.
        """
        for dy in range(k):
            for dx in range(k):
                win = blk_ref[dy:dy + tr, dx:dx + W, :]          # (tr, W, C)
                win = win.reshape(T, win.shape[-1])              # (T, C)
                part = jnp.dot(win, w_ref[dy * k + dx],
                               preferred_element_type=jnp.float32)
                acc = part if acc is None else acc + part
        return acc

    # Gate lane layout of every 4*nh slab: [ i | g | f | o ] (torch.split order).
    sl_i = slice(0, nh)
    sl_g = slice(nh, 2 * nh)
    sl_f = slice(2 * nh, 3 * nh)
    sl_o = slice(3 * nh, 4 * nh)

    # x_cc computed once, reused in both gate sums.
    xcc = conv4(px_ref, w_x_ref)                     # conv_x_cc(x)
    A = conv4(ph_ref, w_t_ref, acc=xcc)              # x_cc + t_cc (f slot = x_f)
    B = conv4(pm_ref, w_s_ref, acc=xcc)              # x_cc + s_cc

    i = jax.nn.sigmoid(A[:, sl_i])
    g = jnp.tanh(A[:, sl_g])
    i_ = jax.nn.sigmoid(B[:, sl_i])
    g_ = jnp.tanh(B[:, sl_g])
    f_ = jax.nn.sigmoid(B[:, sl_f] + 1.0)            # _forget_bias = 1.0
    o = jax.nn.sigmoid(A[:, sl_o] + B[:, sl_o] - xcc[:, sl_o])   # o_x+o_t+o_s

    # m (unpadded centre) is recovered from the conv_s halo block: no extra
    # HBM read of m.
    m_c = pm_ref[p:p + tr, p:p + W, :].reshape(T, nh).astype(jnp.float32)
    new_m = f_ * m_c + i_ * g_

    # ---- MIMS(x=diff_h, h_t=c, c_t=convlstm_c) ----
    M = conv4(pc_ref, w_h_ref)                       # conv_h_concat(c)
    M = conv4(pd_ref, w_d_ref, acc=M)                # + conv_x_concat(diff_h)
    g_m = jnp.tanh(M[:, sl_g])
    if has_cmims:
        cm = cm_ref[...]
        i_m = jax.nn.sigmoid(M[:, sl_i] + cm * ct_ref[0])
        f_m = jax.nn.sigmoid(M[:, sl_f] + cm * ct_ref[1] + 1.0)
        c_mims = f_m * cm + i_m * g_m
    else:
        # First call: c_t == 0 -> ct_weight terms and f_m * c_t are dead.
        i_m = jax.nn.sigmoid(M[:, sl_i])
        c_mims = i_m * g_m
    o_c = c_mims * oc_ref[...]
    mims_h = jax.nn.sigmoid(M[:, sl_o] + o_c) * jnp.tanh(c_mims)

    new_c = mims_h + i * g

    # conv_last (1x1): cat(new_c, new_m) @ W == new_c @ Wc + new_m @ Wm.
    wdt = w_last_ref.dtype
    last = (jnp.dot(new_c.astype(wdt), w_last_ref[0],
                    preferred_element_type=jnp.float32) +
            jnp.dot(new_m.astype(wdt), w_last_ref[1],
                    preferred_element_type=jnp.float32))
    new_h = o * jnp.tanh(last)

    # Single lane-packed store; the wrapper splits (new_h | new_c | new_m).
    # TODO(synk): for nh >= 128 a (3, T, nh) major-stacked store would avoid
    #             the lane concatenation.
    out_ref[...] = jnp.concatenate([new_h, new_c, new_m], axis=-1)


# ----------------------------------------------------------------------------
# Wrapper-side glue
# ----------------------------------------------------------------------------
def _fuse_gate_weights(w_oihw, n_gates, nh, dtype):
    """(G*nh, Cin, k, k) OIHW -> (k*k, Cin, 4*nh), gate lane order [i|g|f|o]."""
    gout, cin, kh, kw = w_oihw.shape
    w = w_oihw.reshape(n_gates, nh, cin, kh, kw)
    w = jnp.transpose(w, (3, 4, 2, 0, 1)).reshape(kh * kw, cin, n_gates * nh)
    if n_gates == 3:  # conv_t_cc has gates (i, g, o) -> zero-pad the f slot.
        zeros = jnp.zeros((kh * kw, cin, nh), w.dtype)
        w = jnp.concatenate([w[..., :2 * nh], zeros, w[..., 2 * nh:]], axis=-1)
    return w.astype(dtype)


def _halo_row_blocks(x_nchw, p, tr, nblk, Wp8, dtype):
    """(N, C, H, W) -> (N*nblk, tr+2p, Wp8, C) padded NHWC row blocks."""
    N, C, H, W = x_nchw.shape
    x = jnp.transpose(x_nchw, (0, 2, 3, 1))                       # NHWC
    x = jnp.pad(x, ((0, 0), (p, p), (p, Wp8 - W - p), (0, 0)))    # (N, H+2p, Wp8, C)
    trh = tr + 2 * p
    wins = jnp.stack([x[:, rb * tr: rb * tr + trh] for rb in range(nblk)],
                     axis=1)                                      # (N, nblk, trh, Wp8, C)
    return wins.reshape(N * nblk, trh, Wp8, C).astype(dtype)


def _vmem_limit_bytes():
    """Scoped VMEM limit: 75% of physical VMEM, capped at 96 MiB.

    v5e/v6e (128 MiB) -> 96 MiB; v7x (64 MiB per TC) -> 48 MiB headroom-safe.
    """
    cap = 128 * 1024 * 1024
    try:
        cap = int(getattr(pltpu.get_tpu_info(), "vmem_capacity_bytes", cap))
    except Exception:
        pass
    return max(16 * 1024 * 1024, min(int(cap * 0.75), 96 * 1024 * 1024))


def _pick_tile_rows(N, H, W, Wp8, k, cin, nh, cbytes, has_cmims, budget):
    """Largest divisor of H whose per-step working set fits `budget`, preferring
    grid depth >= 4 (pipelining / megacore) and a matmul M dim >= 128."""
    p = k // 2

    def est(tr):
        trh, T = tr + 2 * p, tr * W
        conv = (cin + 4 * nh) * trh * Wp8 * cbytes            # 5 halo blocks
        elem = (nh + (3 * nh if has_cmims else 0)) * T * 4    # oc (+ct, cm)
        out = T * 3 * nh * 4
        wts = (k * k * (cin + 4 * nh) * 4 * nh + 2 * nh * nh) * cbytes
        scratch = 6 * T * 4 * nh * 4                          # live f32 slabs
        return 2 * (conv + elem + out) + 2 * wts + scratch

    divisors = [d for d in range(1, H + 1) if H % d == 0]
    fitting = [d for d in divisors if est(d) <= budget] or [min(divisors)]
    for min_grid in (8, 4, 2, 1):
        cands = [d for d in fitting
                 if N * (H // d) >= min_grid and d * W >= 128]
        if cands:
            return max(cands)
    return max(fitting)


def mim_block_forward(params, x, diff_h, h, c, m, convlstm_c=None, *,
                      compute_dtype=jnp.bfloat16, tile_rows=None,
                      vmem_limit_bytes=None):
    """Pallas implementation of MIMBlock.forward (layer_norm=False).

    convlstm_c=None corresponds to the module's first call (MIMS cell state 0).
    compute_dtype sets the MXU-operand dtype (bf16 default on all chips);
    accumulation and gate math are always f32.
    """
    N, nh, H, W = x.shape
    cin = h.shape[1]
    k = int(params["filter_size"])
    p = k // 2
    Wp8 = ((W + 2 * p + 7) // 8) * 8
    cd = compute_dtype
    cbytes = jnp.dtype(cd).itemsize
    has_cmims = convlstm_c is not None

    if vmem_limit_bytes is None:
        vmem_limit_bytes = _vmem_limit_bytes()
    if tile_rows is not None and H % int(tile_rows) == 0:
        tr = int(tile_rows)
    else:
        tr = _pick_tile_rows(N, H, W, Wp8, k, cin, nh, cbytes, has_cmims,
                             budget=int(vmem_limit_bytes * 0.5))
    nblk = H // tr
    trh = tr + 2 * p
    T = tr * W
    NB = N * nblk

    # Halo'd NHWC row blocks of the five conv inputs (no HBM im2col).
    ph = _halo_row_blocks(h, p, tr, nblk, Wp8, cd)
    pm = _halo_row_blocks(m, p, tr, nblk, Wp8, cd)
    px = _halo_row_blocks(x, p, tr, nblk, Wp8, cd)
    pc = _halo_row_blocks(c, p, tr, nblk, Wp8, cd)
    pd = _halo_row_blocks(diff_h, p, tr, nblk, Wp8, cd)

    # Per-spatial parameters, row-blocked (indexed per tile, no N broadcast).
    oc = jnp.transpose(params["oc_weight"], (1, 2, 0)) \
            .reshape(nblk, T, nh).astype(jnp.float32)

    # Gate-fused conv weights.
    w_t = _fuse_gate_weights(params["w_t_cc"], 3, nh, cd)        # (k*k, cin, 4nh)
    w_s = _fuse_gate_weights(params["w_s_cc"], 4, nh, cd)
    w_x = _fuse_gate_weights(params["w_x_cc"], 4, nh, cd)
    w_h = _fuse_gate_weights(params["w_h_concat"], 4, nh, cd)
    w_d = _fuse_gate_weights(params["w_x_concat"], 4, nh, cd)
    wl = params["w_last"].reshape(nh, 2 * nh)
    w_last = jnp.stack([wl[:, :nh].T, wl[:, nh:].T]).astype(cd)  # (2, nh, nh)

    row4 = lambda b: (b, 0, 0, 0)
    row3 = lambda b: (b, 0, 0)
    whole3 = lambda b: (0, 0, 0)

    in_specs = [
        pl.BlockSpec((None, trh, Wp8, cin), row4),               # h halo
        pl.BlockSpec((None, trh, Wp8, nh), row4),                # m halo
        pl.BlockSpec((None, trh, Wp8, nh), row4),                # x halo
        pl.BlockSpec((None, trh, Wp8, nh), row4),                # c halo
        pl.BlockSpec((None, trh, Wp8, nh), row4),                # diff_h halo
        pl.BlockSpec((None, T, nh), lambda b: (b % nblk, 0, 0)),  # oc_weight
        pl.BlockSpec((k * k, cin, 4 * nh), whole3),              # w_t (f = 0)
        pl.BlockSpec((k * k, nh, 4 * nh), whole3),               # w_s
        pl.BlockSpec((k * k, nh, 4 * nh), whole3),               # w_x
        pl.BlockSpec((k * k, nh, 4 * nh), whole3),               # w_h_concat
        pl.BlockSpec((k * k, nh, 4 * nh), whole3),               # w_x_concat
        pl.BlockSpec((2, nh, nh), whole3),                       # conv_last
    ]
    args = [ph, pm, px, pc, pd, oc, w_t, w_s, w_x, w_h, w_d, w_last]
    if has_cmims:
        ct = params["ct_weight"].reshape(2, nh, H, W).transpose(0, 2, 3, 1) \
                                .reshape(2, nblk, T, nh).astype(jnp.float32)
        cm = convlstm_c.transpose(0, 2, 3, 1).reshape(NB, T, nh) \
                       .astype(jnp.float32)
        in_specs += [
            pl.BlockSpec((2, None, T, nh), lambda b: (0, b % nblk, 0, 0)),
            pl.BlockSpec((None, T, nh), row3),
        ]
        args += [ct, cm]

    out = pl.pallas_call(
        functools.partial(_mim_fused_kernel, has_cmims, k, tr, W, nh),
        out_shape=jax.ShapeDtypeStruct((NB, T, 3 * nh), jnp.float32),
        grid=(NB,),
        in_specs=in_specs,
        out_specs=pl.BlockSpec((None, T, 3 * nh), row3),
        compiler_params=pltpu.CompilerParams(
            dimension_semantics=("parallel",),
            vmem_limit_bytes=int(vmem_limit_bytes)),
    )(*args)

    out = out.reshape(N, nblk, tr, W, 3 * nh).reshape(N, H, W, 3 * nh)
    out = jnp.transpose(out, (0, 3, 1, 2))                       # (N, 3nh, H, W)
    new_h = out[:, :nh]
    new_c = out[:, nh:2 * nh]
    new_m = out[:, 2 * nh:]
    return new_h, new_c, new_m


# ----------------------------------------------------------------------------
# Pure-JAX reference (mirrors the PyTorch module exactly, layer_norm=False)
# ----------------------------------------------------------------------------
def _conv_ref(x, w, k):
    pad = k // 2
    return lax.conv_general_dilated(
        x, w, window_strides=(1, 1), padding=[(pad, pad), (pad, pad)],
        dimension_numbers=("NCHW", "OIHW", "NCHW"),
        precision=lax.Precision.HIGHEST)


def mim_block_reference(params, x, diff_h, h, c, m, convlstm_c=None):
    k = params["filter_size"]
    t_cc = _conv_ref(h, params["w_t_cc"], k)
    s_cc = _conv_ref(m, params["w_s_cc"], k)
    x_cc = _conv_ref(x, params["w_x_cc"], k)
    i_s, g_s, f_s, o_s = jnp.split(s_cc, 4, axis=1)
    i_t, g_t, o_t = jnp.split(t_cc, 3, axis=1)
    i_x, g_x, f_x, o_x = jnp.split(x_cc, 4, axis=1)
    i = jax.nn.sigmoid(i_x + i_t)
    i_ = jax.nn.sigmoid(i_x + i_s)
    g = jnp.tanh(g_x + g_t)
    g_ = jnp.tanh(g_x + g_s)
    f_ = jax.nn.sigmoid(f_x + f_s + 1.0)
    o = jax.nn.sigmoid(o_x + o_t + o_s)
    new_m = f_ * m + i_ * g_
    # MIMS(diff_h, c, convlstm_c)
    c_t = jnp.zeros_like(diff_h) if convlstm_c is None else convlstm_c
    h_concat = _conv_ref(c, params["w_h_concat"], k)
    i_h, g_h, f_h, o_h = jnp.split(h_concat, 4, axis=1)
    ct_act = jnp.tile(c_t, (1, 2, 1, 1)) * params["ct_weight"][None]
    i_c, f_c = jnp.split(ct_act, 2, axis=1)
    x_concat = _conv_ref(diff_h, params["w_x_concat"], k)
    i_x2, g_x2, f_x2, o_x2 = jnp.split(x_concat, 4, axis=1)
    i_m = jax.nn.sigmoid(i_h + i_c + i_x2)
    f_m = jax.nn.sigmoid(f_h + f_c + f_x2 + 1.0)
    g_m = jnp.tanh(g_h + g_x2)
    o_m = o_h + o_x2
    c_new = f_m * c_t + i_m * g_m
    o_c = c_new * params["oc_weight"][None]
    c_state = jax.nn.sigmoid(o_m + o_c) * jnp.tanh(c_new)
    new_c = c_state + i * g
    cell = jnp.concatenate([new_c, new_m], axis=1)
    new_h = o * jnp.tanh(_conv_ref(cell, params["w_last"], 1))
    return new_h, new_c, new_m


# ----------------------------------------------------------------------------
if __name__ == "__main__":
    N, nh, H, W, k = 2, 32, 16, 16, 3
    in_channel = nh  # conv_t_cc input channels (== num_hidden in MIM stacks)

    key = jax.random.PRNGKey(0)
    ks = jax.random.split(key, 16)

    def rnd(kk, shape, scale=0.1):
        return scale * jax.random.normal(kk, shape, dtype=jnp.float32)

    # Module parameters (shapes from MIMBlock.__init__).  ct/oc_weight are
    # zeros in the PyTorch init; use small random values to exercise them.
    params = {
        "filter_size": k,
        "w_t_cc": rnd(ks[0], (nh * 3, in_channel, k, k)),
        "w_s_cc": rnd(ks[1], (nh * 4, nh, k, k)),
        "w_x_cc": rnd(ks[2], (nh * 4, nh, k, k)),
        "w_h_concat": rnd(ks[3], (nh * 4, nh, k, k)),
        "w_x_concat": rnd(ks[4], (nh * 4, nh, k, k)),
        "w_last": rnd(ks[5], (nh, nh * 2, 1, 1)),
        "ct_weight": rnd(ks[6], (nh * 2, H, W)),
        "oc_weight": rnd(ks[7], (nh, H, W)),
    }

    x = rnd(ks[8], (N, nh, H, W), 0.5)
    diff_h = rnd(ks[9], (N, nh, H, W), 0.5)
    h = rnd(ks[10], (N, in_channel, H, W), 0.5)
    c = rnd(ks[11], (N, nh, H, W), 0.5)
    m = rnd(ks[12], (N, nh, H, W), 0.5)
    convlstm_c = rnd(ks[13], (N, nh, H, W), 0.5)

    def check(outs, refs, atol, rtol):
        for got, ref in zip(outs, refs):
            assert got.shape == ref.shape, (got.shape, ref.shape)
            err = float(jnp.max(jnp.abs(got - ref)))
            assert bool(jnp.all(jnp.isfinite(got))), "non-finite output"
            assert jnp.allclose(got, ref, atol=atol, rtol=rtol), err

    # --- first call (convlstm_c is None), f32 MXU operands ------------------
    out1 = mim_block_forward(params, x, diff_h, h, c, m,
                             compute_dtype=jnp.float32)
    jax.block_until_ready(out1)
    ref1 = mim_block_reference(params, x, diff_h, h, c, m)
    jax.block_until_ready(ref1)
    check(out1, ref1, atol=5e-3, rtol=5e-3)

    # --- non-first call: MIMS ct_weight / convlstm_c path, f32 --------------
    out2 = mim_block_forward(params, x, diff_h, h, c, m,
                             convlstm_c=convlstm_c, compute_dtype=jnp.float32)
    jax.block_until_ready(out2)
    ref2 = mim_block_reference(params, x, diff_h, h, c, m,
                               convlstm_c=convlstm_c)
    jax.block_until_ready(ref2)
    check(out2, ref2, atol=5e-3, rtol=5e-3)

    # --- default bf16 MXU-operand path (incl. MIMS state), loose check ------
    out3 = mim_block_forward(params, x, diff_h, h, c, m, convlstm_c=convlstm_c)
    jax.block_until_ready(out3)
    check(out3, ref2, atol=7e-2, rtol=7e-2)

    print("KERNEL_OK")
</pallas_src>

<mosaic_0001>
module attributes {stable_mosaic.version = 11 : i64} {
  func.func @_mim_fused_kernel(%arg0: i32, %arg1: memref<1x10x24x32xf32, #tpu.memory_space<vmem>>, %arg2: memref<1x10x24x32xf32, #tpu.memory_space<vmem>>, %arg3: memref<1x10x24x32xf32, #tpu.memory_space<vmem>>, %arg4: memref<1x10x24x32xf32, #tpu.memory_space<vmem>>, %arg5: memref<1x10x24x32xf32, #tpu.memory_space<vmem>>, %arg6: memref<1x128x32xf32, #tpu.memory_space<vmem>>, %arg7: memref<9x32x128xf32, #tpu.memory_space<vmem>>, %arg8: memref<9x32x128xf32, #tpu.memory_space<vmem>>, %arg9: memref<9x32x128xf32, #tpu.memory_space<vmem>>, %arg10: memref<9x32x128xf32, #tpu.memory_space<vmem>>, %arg11: memref<9x32x128xf32, #tpu.memory_space<vmem>>, %arg12: memref<2x32x32xf32, #tpu.memory_space<vmem>>, %arg13: memref<1x128x96xf32, #tpu.memory_space<vmem>>) attributes {dimension_semantics = [#tpu.dimension_semantics<parallel>], iteration_bounds = array<i64: 4>, scalar_prefetch = 0 : i64, scratch_operands = 0 : i64, tpu.core_type = #tpu.core_type<tc>, window_params = [{transform_indices = @transform_0, window_bounds = array<i64: 1, 10, 24, 32>}, {transform_indices = @transform_1, window_bounds = array<i64: 1, 10, 24, 32>}, {transform_indices = @transform_2, window_bounds = array<i64: 1, 10, 24, 32>}, {transform_indices = @transform_3, window_bounds = array<i64: 1, 10, 24, 32>}, {transform_indices = @transform_4, window_bounds = array<i64: 1, 10, 24, 32>}, {transform_indices = @transform_5, window_bounds = array<i64: 1, 128, 32>}, {pipeline_mode = #tpu.pipeline_mode<synchronous>, transform_indices = @transform_6, window_bounds = array<i64: 9, 32, 128>}, {pipeline_mode = #tpu.pipeline_mode<synchronous>, transform_indices = @transform_7, window_bounds = array<i64: 9, 32, 128>}, {pipeline_mode = #tpu.pipeline_mode<synchronous>, transform_indices = @transform_8, window_bounds = array<i64: 9, 32, 128>}, {pipeline_mode = #tpu.pipeline_mode<synchronous>, transform_indices = @transform_9, window_bounds = array<i64: 9, 32, 128>}, {pipeline_mode = #tpu.pipeline_mode<synchronous>, transform_indices = @transform_10, window_bounds = array<i64: 9, 32, 128>}, {pipeline_mode = #tpu.pipeline_mode<synchronous>, transform_indices = @transform_11, window_bounds = array<i64: 2, 32, 32>}, {transform_indices = @transform_12, window_bounds = array<i64: 1, 128, 96>}]} {
    %c0 = arith.constant 0 : index
    %c0_0 = arith.constant 0 : index
    %c0_1 = arith.constant 0 : index
    %c0_2 = arith.constant 0 : index
    %0 = vector.load %arg3[%c0, %c0_0, %c0_1, %c0_2] : memref<1x10x24x32xf32, #tpu.memory_space<vmem>>, vector<1x8x16x32xf32>
    %1 = vector.shape_cast %0 : vector<1x8x16x32xf32> to vector<8x16x32xf32>
    %2 = vector.shape_cast %1 : vector<8x16x32xf32> to vector<128x32xf32>
    %c0_3 = arith.constant 0 : index
    %c0_4 = arith.constant 0 : index
    %c0_5 = arith.constant 0 : index
    %3 = vector.load %arg9[%c0_3, %c0_4, %c0_5] : memref<9x32x128xf32, #tpu.memory_space<vmem>>, vector<1x32x128xf32>
    %4 = vector.shape_cast %3 : vector<1x32x128xf32> to vector<32x128xf32>
    %cst = arith.constant dense<0.000000e+00> : vector<128x128xf32>
    %5 = tpu.matmul %2, %4, %cst {dimension_numbers = #tpu.dot_dimension_numbers<[1], [0], [0], [1], [0, 0, 1, 1], [], []>} : vector<128x32xf32>, vector<32x128xf32>, vector<128x128xf32> -> vector<128x128xf32>
    %c0_6 = arith.constant 0 : index
    %c0_7 = arith.constant 0 : index
    %c1 = arith.constant 1 : index
    %c0_8 = arith.constant 0 : index
    %6 = vector.load %arg3[%c0_6, %c0_7, %c1, %c0_8] : memref<1x10x24x32xf32, #tpu.memory_space<vmem>>, vector<1x8x16x32xf32>
    %7 = vector.shape_cast %6 : vector<1x8x16x32xf32> to vector<8x16x32xf32>
    %8 = vector.shape_cast %7 : vector<8x16x32xf32> to vector<128x32xf32>
    %c1_9 = arith.constant 1 : index
    %c0_10 = arith.constant 0 : index
    %c0_11 = arith.constant 0 : index
    %9 = vector.load %arg9[%c1_9, %c0_10, %c0_11] : memref<9x32x128xf32, #tpu.memory_space<vmem>>, vector<1x32x128xf32>
    %10 = vector.shape_cast %9 : vector<1x32x128xf32> to vector<32x128xf32>
    %cst_12 = arith.constant dense<0.000000e+00> : vector<128x128xf32>
    %11 = tpu.matmul %8, %10, %cst_12 {dimension_numbers = #tpu.dot_dimension_numbers<[1], [0], [0], [1], [0, 0, 1, 1], [], []>} : vector<128x32xf32>, vector<32x128xf32>, vector<128x128xf32> -> vector<128x128xf32>
    %12 = arith.addf %5, %11 : vector<128x128xf32>
    %c0_13 = arith.constant 0 : index
    %c0_14 = arith.constant 0 : index
    %c2 = arith.constant 2 : index
    %c0_15 = arith.constant 0 : index
    %13 = vector.load %arg3[%c0_13, %c0_14, %c2, %c0_15] : memref<1x10x24x32xf32, #tpu.memory_space<vmem>>, vector<1x8x16x32xf32>
    %14 = vector.shape_cast %13 : vector<1x8x16x32xf32> to vector<8x16x32xf32>
    %15 = vector.shape_cast %14 : vector<8x16x32xf32> to vector<128x32xf32>
    %c2_16 = arith.constant 2 : index
    %c0_17 = arith.constant 0 : index
    %c0_18 = arith.constant 0 : index
    %16 = vector.load %arg9[%c2_16, %c0_17, %c0_18] : memref<9x32x128xf32, #tpu.memory_space<vmem>>, vector<1x32x128xf32>
    %17 = vector.shape_cast %16 : vector<1x32x128xf32> to vector<32x128xf32>
    %cst_19 = arith.constant dense<0.000000e+00> : vector<128x128xf32>
    %18 = tpu.matmul %15, %17, %cst_19 {dimension_numbers = #tpu.dot_dimension_numbers<[1], [0], [0], [1], [0, 0, 1, 1], [], []>} : vector<128x32xf32>, vector<32x128xf32>, vector<128x128xf32> -> vector<128x128xf32>
    %19 = arith.addf %12, %18 : vector<128x128xf32>
    %c0_20 = arith.constant 0 : index
    %c1_21 = arith.constant 1 : index
    %c0_22 = arith.constant 0 : index
    %c0_23 = arith.constant 0 : index
    %20 = vector.load %arg3[%c0_20, %c1_21, %c0_22, %c0_23] : memref<1x10x24x32xf32, #tpu.memory_space<vmem>>, vector<1x8x16x32xf32>
    %21 = vector.shape_cast %20 : vector<1x8x16x32xf32> to vector<8x16x32xf32>
    %22 = vector.shape_cast %21 : vector<8x16x32xf32> to vector<128x32xf32>
    %c3 = arith.constant 3 : index
    %c0_24 = arith.constant 0 : index
    %c0_25 = arith.constant 0 : index
    %23 = vector.load %arg9[%c3, %c0_24, %c0_25] : memref<9x32x128xf32, #tpu.memory_space<vmem>>, vector<1x32x128xf32>
    %24 = vector.shape_cast %23 : vector<1x32x128xf32> to vector<32x128xf32>
    %cst_26 = arith.constant dense<0.000000e+00> : vector<128x128xf32>
    %25 = tpu.matmul %22, %24, %cst_26 {dimension_numbers = #tpu.dot_dimension_numbers<[1], [0], [0], [1], [0, 0, 1, 1], [], []>} : vector<128x32xf32>, vector<32x128xf32>, vector<128x128xf32> -> vector<128x128xf32>
    %26 = arith.addf %19, %25 : vector<128x128xf32>
    %c0_27 = arith.constant 0 : index
    %c1_28 = arith.constant 1 : index
    %c1_29 = arith.constant 1 : index
    %c0_30 = arith.constant 0 : index
    %27 = vector.load %arg3[%c0_27, %c1_28, %c1_29, %c0_30] : memref<1x10x24x32xf32, #tpu.memory_space<vmem>>, vector<1x8x16x32xf32>
    %28 = vector.shape_cast %27 : vector<1x8x16x32xf32> to vector<8x16x32xf32>
    %29 = vector.shape_cast %28 : vector<8x16x32xf32> to vector<128x32xf32>
    %c4 = arith.constant 4 : index
    %c0_31 = arith.constant 0 : index
    %c0_32 = arith.constant 0 : index
    %30 = vector.load %arg9[%c4, %c0_31, %c0_32] : memref<9x32x128xf32, #tpu.memory_space<vmem>>, vector<1x32x128xf32>
    %31 = vector.shape_cast %30 : vector<1x32x128xf32> to vector<32x128xf32>
    %cst_33 = arith.constant dense<0.000000e+00> : vector<128x128xf32>
    %32 = tpu.matmul %29, %31, %cst_33 {dimension_numbers = #tpu.dot_dimension_numbers<[1], [0], [0], [1], [0, 0, 1, 1], [], []>} : vector<128x32xf32>, vector<32x128xf32>, vector<128x128xf32> -> vector<128x128xf32>
    %33 = arith.addf %26, %32 : vector<128x128xf32>
    %c0_34 = arith.constant 0 : index
    %c1_35 = arith.constant 1 : index
    %c2_36 = arith.constant 2 : index
    %c0_37 = arith.constant 0 : index
    %34 = vector.load %arg3[%c0_34, %c1_35, %c2_36, %c0_37] : memref<1x10x24x32xf32, #tpu.memory_space<vmem>>, vector<1x8x16x32xf32>
    %35 = vector.shape_cast %34 : vector<1x8x16x32xf32> to vector<8x16x32xf32>
    %36 = vector.shape_cast %35 : vector<8x16x32xf32> to vector<128x32xf32>
    %c5 = arith.constant 5 : index
    %c0_38 = arith.constant 0 : index
    %c0_39 = arith.constant 0 : index
    %37 = vector.load %arg9[%c5, %c0_38, %c0_39] : memref<9x32x128xf32, #tpu.memory_space<vmem>>, vector<1x32x128xf32>
    %38 = vector.shape_cast %37 : vector<1x32x128xf32> to vector<32x128xf32>
    %cst_40 = arith.constant dense<0.000000e+00> : vector<128x128xf32>
    %39 = tpu.matmul %36, %38, %cst_40 {dimension_numbers = #tpu.dot_dimension_numbers<[1], [0], [0], [1], [0, 0, 1, 1], [], []>} : vector<128x32xf32>, vector<32x128xf32>, vector<128x128xf32> -> vector<128x128xf32>
    %40 = arith.addf %33, %39 : vector<128x128xf32>
    %c0_41 = arith.constant 0 : index
    %c2_42 = arith.constant 2 : index
    %c0_43 = arith.constant 0 : index
    %c0_44 = arith.constant 0 : index
    %41 = vector.load %arg3[%c0_41, %c2_42, %c0_43, %c0_44] : memref<1x10x24x32xf32, #tpu.memory_space<vmem>>, vector<1x8x16x32xf32>
    %42 = vector.shape_cast %41 : vector<1x8x16x32xf32> to vector<8x16x32xf32>
    %43 = vector.shape_cast %42 : vector<8x16x32xf32> to vector<128x32xf32>
    %c6 = arith.constant 6 : index
    %c0_45 = arith.constant 0 : index
    %c0_46 = arith.constant 0 : index
    %44 = vector.load %arg9[%c6, %c0_45, %c0_46] : memref<9x32x128xf32, #tpu.memory_space<vmem>>, vector<1x32x128xf32>
    %45 = vector.shape_cast %44 : vector<1x32x128xf32> to vector<32x128xf32>
    %cst_47 = arith.constant dense<0.000000e+00> : vector<128x128xf32>
    %46 = tpu.matmul %43, %45, %cst_47 {dimension_numbers = #tpu.dot_dimension_numbers<[1], [0], [0], [1], [0, 0, 1, 1], [], []>} : vector<128x32xf32>, vector<32x128xf32>, vector<128x128xf32> -> vector<128x128xf32>
    %47 = arith.addf %40, %46 : vector<128x128xf32>
    %c0_48 = arith.constant 0 : index
    %c2_49 = arith.constant 2 : index
    %c1_50 = arith.constant 1 : index
    %c0_51 = arith.constant 0 : index
    %48 = vector.load %arg3[%c0_48, %c2_49, %c1_50, %c0_51] : memref<1x10x24x32xf32, #tpu.memory_space<vmem>>, vector<1x8x16x32xf32>
    %49 = vector.shape_cast %48 : vector<1x8x16x32xf32> to vector<8x16x32xf32>
    %50 = vector.shape_cast %49 : vector<8x16x32xf32> to vector<128x32xf32>
    %c7 = arith.constant 7 : index
    %c0_52 = arith.constant 0 : index
    %c0_53 = arith.constant 0 : index
    %51 = vector.load %arg9[%c7, %c0_52, %c0_53] : memref<9x32x128xf32, #tpu.memory_space<vmem>>, vector<1x32x128xf32>
    %52 = vector.shape_cast %51 : vector<1x32x128xf32> to vector<32x128xf32>
    %cst_54 = arith.constant dense<0.000000e+00> : vector<128x128xf32>
    %53 = tpu.matmul %50, %52, %cst_54 {dimension_numbers = #tpu.dot_dimension_numbers<[1], [0], [0], [1], [0, 0, 1, 1], [], []>} : vector<128x32xf32>, vector<32x128xf32>, vector<128x128xf32> -> vector<128x128xf32>
    %54 = arith.addf %47, %53 : vector<128x128xf32>
    %c0_55 = arith.constant 0 : index
    %c2_56 = arith.constant 2 : index
    %c2_57 = arith.constant 2 : index
    %c0_58 = arith.constant 0 : index
    %55 = vector.load %arg3[%c0_55, %c2_56, %c2_57, %c0_58] : memref<1x10x24x32xf32, #tpu.memory_space<vmem>>, vector<1x8x16x32xf32>
    %56 = vector.shape_cast %55 : vector<1x8x16x32xf32> to vector<8x16x32xf32>
    %57 = vector.shape_cast %56 : vector<8x16x32xf32> to vector<128x32xf32>
    %c8 = arith.constant 8 : index
    %c0_59 = arith.constant 0 : index
    %c0_60 = arith.constant 0 : index
    %58 = vector.load %arg9[%c8, %c0_59, %c0_60] : memref<9x32x128xf32, #tpu.memory_space<vmem>>, vector<1x32x128xf32>
    %59 = vector.shape_cast %58 : vector<1x32x128xf32> to vector<32x128xf32>
    %cst_61 = arith.constant dense<0.000000e+00> : vector<128x128xf32>
    %60 = tpu.matmul %57, %59, %cst_61 {dimension_numbers = #tpu.dot_dimension_numbers<[1], [0], [0], [1], [0, 0, 1, 1], [], []>} : vector<128x32xf32>, vector<32x128xf32>, vector<128x128xf32> -> vector<128x128xf32>
    %61 = arith.addf %54, %60 : vector<128x128xf32>
    %c0_62 = arith.constant 0 : index
    %c0_63 = arith.constant 0 : index
    %c0_64 = arith.constant 0 : index
    %c0_65 = arith.constant 0 : index
    %62 = vector.load %arg1[%c0_62, %c0_63, %c0_64, %c0_65] : memref<1x10x24x32xf32, #tpu.memory_space<vmem>>, vector<1x8x16x32xf32>
    %63 = vector.shape_cast %62 : vector<1x8x16x32xf32> to vector<8x16x32xf32>
    %64 = vector.shape_cast %63 : vector<8x16x32xf32> to vector<128x32xf32>
    %c0_66 = arith.constant 0 : index
    %c0_67 = arith.constant 0 : index
    %c0_68 = arith.constant 0 : index
    %65 = vector.load %arg7[%c0_66, %c0_67, %c0_68] : memref<9x32x128xf32, #tpu.memory_space<vmem>>, vector<1x32x128xf32>
    %66 = vector.shape_cast %65 : vector<1x32x128xf32> to vector<32x128xf32>
    %cst_69 = arith.constant dense<0.000000e+00> : vector<128x128xf32>
    %67 = tpu.matmul %64, %66, %cst_69 {dimension_numbers = #tpu.dot_dimension_numbers<[1], [0], [0], [1], [0, 0, 1, 1], [], []>} : vector<128x32xf32>, vector<32x128xf32>, vector<128x128xf32> -> vector<128x128xf32>
    %68 = arith.addf %61, %67 : vector<128x128xf32>
    %c0_70 = arith.constant 0 : index
    %c0_71 = arith.constant 0 : index
    %c1_72 = arith.constant 1 : index
    %c0_73 = arith.constant 0 : index
    %69 = vector.load %arg1[%c0_70, %c0_71, %c1_72, %c0_73] : memref<1x10x24x32xf32, #tpu.memory_space<vmem>>, vector<1x8x16x32xf32>
    %70 = vector.shape_cast %69 : vector<1x8x16x32xf32> to vector<8x16x32xf32>
    %71 = vector.shape_cast %70 : vector<8x16x32xf32> to vector<128x32xf32>
    %c1_74 = arith.constant 1 : index
    %c0_75 = arith.constant 0 : index
    %c0_76 = arith.constant 0 : index
    %72 = vector.load %arg7[%c1_74, %c0_75, %c0_76] : memref<9x32x128xf32, #tpu.memory_space<vmem>>, vector<1x32x128xf32>
    %73 = vector.shape_cast %72 : vector<1x32x128xf32> to vector<32x128xf32>
    %cst_77 = arith.constant dense<0.000000e+00> : vector<128x128xf32>
    %74 = tpu.matmul %71, %73, %cst_77 {dimension_numbers = #tpu.dot_dimension_numbers<[1], [0], [0], [1], [0, 0, 1, 1], [], []>} : vector<128x32xf32>, vector<32x128xf32>, vector<128x128xf32> -> vector<128x128xf32>
    %75 = arith.addf %68, %74 : vector<128x128xf32>
    %c0_78 = arith.constant 0 : index
    %c0_79 = arith.constant 0 : index
    %c2_80 = arith.constant 2 : index
    %c0_81 = arith.constant 0 : index
    %76 = vector.load %arg1[%c0_78, %c0_79, %c2_80, %c0_81] : memref<1x10x24x32xf32, #tpu.memory_space<vmem>>, vector<1x8x16x32xf32>
    %77 = vector.shape_cast %76 : vector<1x8x16x32xf32> to vector<8x16x32xf32>
    %78 = vector.shape_cast %77 : vector<8x16x32xf32> to vector<128x32xf32>
    %c2_82 = arith.constant 2 : index
    %c0_83 = arith.constant 0 : index
    %c0_84 = arith.constant 0 : index
    %79 = vector.load %arg7[%c2_82, %c0_83, %c0_84] : memref<9x32x128xf32, #tpu.memory_space<vmem>>, vector<1x32x128xf32>
    %80 = vector.shape_cast %79 : vector<1x32x128xf32> to vector<32x128xf32>
    %cst_85 = arith.constant dense<0.000000e+00> : vector<128x128xf32>
    %81 = tpu.matmul %78, %80, %cst_85 {dimension_numbers = #tpu.dot_dimension_numbers<[1], [0], [0], [1], [0, 0, 1, 1], [], []>} : vector<128x32xf32>, vector<32x128xf32>, vector<128x128xf32> -> vector<128x128xf32>
    %82 = arith.addf %75, %81 : vector<128x128xf32>
    %c0_86 = arith.constant 0 : index
    %c1_87 = arith.constant 1 : index
    %c0_88 = arith.constant 0 : index
    %c0_89 = arith.constant 0 : index
    %83 = vector.load %arg1[%c0_86, %c1_87, %c0_88, %c0_89] : memref<1x10x24x32xf32, #tpu.memory_space<vmem>>, vector<1x8x16x32xf32>
    %84 = vector.shape_cast %83 : vector<1x8x16x32xf32> to vector<8x16x32xf32>
    %85 = vector.shape_cast %84 : vector<8x16x32xf32> to vector<128x32xf32>
    %c3_90 = arith.constant 3 : index
    %c0_91 = arith.constant 0 : index
    %c0_92 = arith.constant 0 : index
    %86 = vector.load %arg7[%c3_90, %c0_91, %c0_92] : memref<9x32x128xf32, #tpu.memory_space<vmem>>, vector<1x32x128xf32>
    %87 = vector.shape_cast %86 : vector<1x32x128xf32> to vector<32x128xf32>
    %cst_93 = arith.constant dense<0.000000e+00> : vector<128x128xf32>
    %88 = tpu.matmul %85, %87, %cst_93 {dimension_numbers = #tpu.dot_dimension_numbers<[1], [0], [0], [1], [0, 0, 1, 1], [], []>} : vector<128x32xf32>, vector<32x128xf32>, vector<128x128xf32> -> vector<128x128xf32>
    %89 = arith.addf %82, %88 : vector<128x128xf32>
    %c0_94 = arith.constant 0 : index
    %c1_95 = arith.constant 1 : index
    %c1_96 = arith.constant 1 : index
    %c0_97 = arith.constant 0 : index
    %90 = vector.load %arg1[%c0_94, %c1_95, %c1_96, %c0_97] : memref<1x10x24x32xf32, #tpu.memory_space<vmem>>, vector<1x8x16x32xf32>
    %91 = vector.shape_cast %90 : vector<1x8x16x32xf32> to vector<8x16x32xf32>
    %92 = vector.shape_cast %91 : vector<8x16x32xf32> to vector<128x32xf32>
    %c4_98 = arith.constant 4 : index
    %c0_99 = arith.constant 0 : index
    %c0_100 = arith.constant 0 : index
    %93 = vector.load %arg7[%c4_98, %c0_99, %c0_100] : memref<9x32x128xf32, #tpu.memory_space<vmem>>, vector<1x32x128xf32>
    %94 = vector.shape_cast %93 : vector<1x32x128xf32> to vector<32x128xf32>
    %cst_101 = arith.constant dense<0.000000e+00> : vector<128x128xf32>
    %95 = tpu.matmul %92, %94, %cst_101 {dimension_numbers = #tpu.dot_dimension_numbers<[1], [0], [0], [1], [0, 0, 1, 1], [], []>} : vector<128x32xf32>, vector<32x128xf32>, vector<128x128xf32> -> vector<128x128xf32>
    %96 = arith.addf %89, %95 : vector<128x128xf32>
    %c0_102 = arith.constant 0 : index
    %c1_103 = arith.constant 1 : index
    %c2_104 = arith.constant 2 : index
    %c0_105 = arith.constant 0 : index
    %97 = vector.load %arg1[%c0_102, %c1_103, %c2_104, %c0_105] : memref<1x10x24x32xf32, #tpu.memory_space<vmem>>, vector<1x8x16x32xf32>
    %98 = vector.shape_cast %97 : vector<1x8x16x32xf32> to vector<8x16x32xf32>
    %99 = vector.shape_cast %98 : vector<8x16x32xf32> to vector<128x32xf32>
    %c5_106 = arith.constant 5 : index
    %c0_107 = arith.constant 0 : index
    %c0_108 = arith.constant 0 : index
    %100 = vector.load %arg7[%c5_106, %c0_107, %c0_108] : memref<9x32x128xf32, #tpu.memory_space<vmem>>, vector<1x32x128xf32>
    %101 = vector.shape_cast %100 : vector<1x32x128xf32> to vector<32x128xf32>
    %cst_109 = arith.constant dense<0.000000e+00> : vector<128x128xf32>
    %102 = tpu.matmul %99, %101, %cst_109 {dimension_numbers = #tpu.dot_dimension_numbers<[1], [0], [0], [1], [0, 0, 1, 1], [], []>} : vector<128x32xf32>, vector<32x128xf32>, vector<128x128xf32> -> vector<128x128xf32>
    %103 = arith.addf %96, %102 : vector<128x128xf32>
    %c0_110 = arith.constant 0 : index
    %c2_111 = arith.constant 2 : index
    %c0_112 = arith.constant 0 : index
    %c0_113 = arith.constant 0 : index
    %104 = vector.load %arg1[%c0_110, %c2_111, %c0_112, %c0_113] : memref<1x10x24x32xf32, #tpu.memory_space<vmem>>, vector<1x8x16x32xf32>
    %105 = vector.shape_cast %104 : vector<1x8x16x32xf32> to vector<8x16x32xf32>
    %106 = vector.shape_cast %105 : vector<8x16x32xf32> to vector<128x32xf32>
    %c6_114 = arith.constant 6 : index
    %c0_115 = arith.constant 0 : index
    %c0_116 = arith.constant 0 : index
    %107 = vector.load %arg7[%c6_114, %c0_115, %c0_116] : memref<9x32x128xf32, #tpu.memory_space<vmem>>, vector<1x32x128xf32>
    %108 = vector.shape_cast %107 : vector<1x32x128xf32> to vector<32x128xf32>
    %cst_117 = arith.constant dense<0.000000e+00> : vector<128x128xf32>
    %109 = tpu.matmul %106, %108, %cst_117 {dimension_numbers = #tpu.dot_dimension_numbers<[1], [0], [0], [1], [0, 0, 1, 1], [], []>} : vector<128x32xf32>, vector<32x128xf32>, vector<128x128xf32> -> vector<128x128xf32>
    %110 = arith.addf %103, %109 : vector<128x128xf32>
    %c0_118 = arith.constant 0 : index
    %c2_119 = arith.constant 2 : index
    %c1_120 = arith.constant 1 : index
    %c0_121 = arith.constant 0 : index
    %111 = vector.load %arg1[%c0_118, %c2_119, %c1_120, %c0_121] : memref<1x10x24x32xf32, #tpu.memory_space<vmem>>, vector<1x8x16x32xf32>
    %112 = vector.shape_cast %111 : vector<1x8x16x32xf32> to vector<8x16x32xf32>
    %113 = vector.shape_cast %112 : vector<8x16x32xf32> to vector<128x32xf32>
    %c7_122 = arith.constant 7 : index
    %c0_123 = arith.constant 0 : index
    %c0_124 = arith.constant 0 : index
    %114 = vector.load %arg7[%c7_122, %c0_123, %c0_124] : memref<9x32x128xf32, #tpu.memory_space<vmem>>, vector<1x32x128xf32>
    %115 = vector.shape_cast %114 : vector<1x32x128xf32> to vector<32x128xf32>
    %cst_125 = arith.constant dense<0.000000e+00> : vector<128x128xf32>
    %116 = tpu.matmul %113, %115, %cst_125 {dimension_numbers = #tpu.dot_dimension_numbers<[1], [0], [0], [1], [0, 0, 1, 1], [], []>} : vector<128x32xf32>, vector<32x128xf32>, vector<128x128xf32> -> vector<128x128xf32>
    %117 = arith.addf %110, %116 : vector<128x128xf32>
    %c0_126 = arith.constant 0 : index
    %c2_127 = arith.constant 2 : index
    %c2_128 = arith.constant 2 : index
    %c0_129 = arith.constant 0 : index
    %118 = vector.load %arg1[%c0_126, %c2_127, %c2_128, %c0_129] : memref<1x10x24x32xf32, #tpu.memory_space<vmem>>, vector<1x8x16x32xf32>
    %119 = vector.shape_cast %118 : vector<1x8x16x32xf32> to vector<8x16x32xf32>
    %120 = vector.shape_cast %119 : vector<8x16x32xf32> to vector<128x32xf32>
    %c8_130 = arith.constant 8 : index
    %c0_131 = arith.constant 0 : index
    %c0_132 = arith.constant 0 : index
    %121 = vector.load %arg7[%c8_130, %c0_131, %c0_132] : memref<9x32x128xf32, #tpu.memory_space<vmem>>, vector<1x32x128xf32>
    %122 = vector.shape_cast %121 : vector<1x32x128xf32> to vector<32x128xf32>
    %cst_133 = arith.constant dense<0.000000e+00> : vector<128x128xf32>
    %123 = tpu.matmul %120, %122, %cst_133 {dimension_numbers = #tpu.dot_dimension_numbers<[1], [0], [0], [1], [0, 0, 1, 1], [], []>} : vector<128x32xf32>, vector<32x128xf32>, vector<128x128xf32> -> vector<128x128xf32>
    %124 = arith.addf %117, %123 : vector<128x128xf32>
    %c0_134 = arith.constant 0 : index
    %c0_135 = arith.constant 0 : index
    %c0_136 = arith.constant 0 : index
    %c0_137 = arith.constant 0 : index
    %125 = vector.load %arg2[%c0_134, %c0_135, %c0_136, %c0_137] : memref<1x10x24x32xf32, #tpu.memory_space<vmem>>, vector<1x8x16x32xf32>
    %126 = vector.shape_cast %125 : vector<1x8x16x32xf32> to vector<8x16x32xf32>
    %127 = vector.shape_cast %126 : vector<8x16x32xf32> to vector<128x32xf32>
    %c0_138 = arith.constant 0 : index
    %c0_139 = arith.constant 0 : index
    %c0_140 = arith.constant 0 : index
    %128 = vector.load %arg8[%c0_138, %c0_139, %c0_140] : memref<9x32x128xf32, #tpu.memory_space<vmem>>, vector<1x32x128xf32>
    %129 = vector.shape_cast %128 : vector<1x32x128xf32> to vector<32x128xf32>
    %cst_141 = arith.constant dense<0.000000e+00> : vector<128x128xf32>
    %130 = tpu.matmul %127, %129, %cst_141 {dimension_numbers = #tpu.dot_dimension_numbers<[1], [0], [0], [1], [0, 0, 1, 1], [], []>} : vector<128x32xf32>, vector<32x128xf32>, vector<128x128xf32> -> vector<128x128xf32>
    %131 = arith.addf %61, %130 : vector<128x128xf32>
    %c0_142 = arith.constant 0 : index
    %c0_143 = arith.constant 0 : index
    %c1_144 = arith.constant 1 : index
    %c0_145 = arith.constant 0 : index
    %132 = vector.load %arg2[%c0_142, %c0_143, %c1_144, %c0_145] : memref<1x10x24x32xf32, #tpu.memory_space<vmem>>, vector<1x8x16x32xf32>
    %133 = vector.shape_cast %132 : vector<1x8x16x32xf32> to vector<8x16x32xf32>
    %134 = vector.shape_cast %133 : vector<8x16x32xf32> to vector<128x32xf32>
    %c1_146 = arith.constant 1 : index
    %c0_147 = arith.constant 0 : index
    %c0_148 = arith.constant 0 : index
    %135 = vector.load %arg8[%c1_146, %c0_147, %c0_148] : memref<9x32x128xf32, #tpu.memory_space<vmem>>, vector<1x32x128xf32>
    %136 = vector.shape_cast %135 : vector<1x32x128xf32> to vector<32x128xf32>
    %cst_149 = arith.constant dense<0.000000e+00> : vector<128x128xf32>
    %137 = tpu.matmul %134, %136, %cst_149 {dimension_numbers = #tpu.dot_dimension_numbers<[1], [0], [0], [1], [0, 0, 1, 1], [], []>} : vector<128x32xf32>, vector<32x128xf32>, vector<128x128xf32> -> vector<128x128xf32>
    %138 = arith.addf %131, %137 : vector<128x128xf32>
    %c0_150 = arith.constant 0 : index
    %c0_151 = arith.constant 0 : index
    %c2_152 = arith.constant 2 : index
    %c0_153 = arith.constant 0 : index
    %139 = vector.load %arg2[%c0_150, %c0_151, %c2_152, %c0_153] : memref<1x10x24x32xf32, #tpu.memory_space<vmem>>, vector<1x8x16x32xf32>
    %140 = vector.shape_cast %139 : vector<1x8x16x32xf32> to vector<8x16x32xf32>
    %141 = vector.shape_cast %140 : vector<8x16x32xf32> to vector<128x32xf32>
    %c2_154 = arith.constant 2 : index
    %c0_155 = arith.constant 0 : index
    %c0_156 = arith.constant 0 : index
    %142 = vector.load %arg8[%c2_154, %c0_155, %c0_156] : memref<9x32x128xf32, #tpu.memory_space<vmem>>, vector<1x32x128xf32>
    %143 = vector.shape_cast %142 : vector<1x32x128xf32> to vector<32x128xf32>
    %cst_157 = arith.constant dense<0.000000e+00> : vector<128x128xf32>
    %144 = tpu.matmul %141, %143, %cst_157 {dimension_numbers = #tpu.dot_dimension_numbers<[1], [0], [0], [1], [0, 0, 1, 1], [], []>} : vector<128x32xf32>, vector<32x128xf32>, vector<128x128xf32> -> vector<128x128xf32>
    %145 = arith.addf %138, %144 : vector<128x128xf32>
    %c0_158 = arith.constant 0 : index
    %c1_159 = arith.constant 1 : index
    %c0_160 = arith.constant 0 : index
    %c0_161 = arith.constant 0 : index
    %146 = vector.load %arg2[%c0_158, %c1_159, %c0_160, %c0_161] : memref<1x10x24x32xf32, #tpu.memory_space<vmem>>, vector<1x8x16x32xf32>
    %147 = vector.shape_cast %146 : vector<1x8x16x32xf32> to vector<8x16x32xf32>
    %148 = vector.shape_cast %147 : vector<8x16x32xf32> to vector<128x32xf32>
    %c3_162 = arith.constant 3 : index
    %c0_163 = arith.constant 0 : index
    %c0_164 = arith.constant 0 : index
    %149 = vector.load %arg8[%c3_162, %c0_163, %c0_164] : memref<9x32x128xf32, #tpu.memory_space<vmem>>, vector<1x32x128xf32>
    %150 = vector.shape_cast %149 : vector<1x32x128xf32> to vector<32x128xf32>
    %cst_165 = arith.constant dense<0.000000e+00> : vector<128x128xf32>
    %151 = tpu.matmul %148, %150, %cst_165 {dimension_numbers = #tpu.dot_dimension_numbers<[1], [0], [0], [1], [0, 0, 1, 1], [], []>} : vector<128x32xf32>, vector<32x128xf32>, vector<128x128xf32> -> vector<128x128xf32>
    %152 = arith.addf %145, %151 : vector<128x128xf32>
    %c0_166 = arith.constant 0 : index
    %c1_167 = arith.constant 1 : index
    %c1_168 = arith.constant 1 : index
    %c0_169 = arith.constant 0 : index
    %153 = vector.load %arg2[%c0_166, %c1_167, %c1_168, %c0_169] : memref<1x10x24x32xf32, #tpu.memory_space<vmem>>, vector<1x8x16x32xf32>
    %154 = vector.shape_cast %153 : vector<1x8x16x32xf32> to vector<8x16x32xf32>
    %155 = vector.shape_cast %154 : vector<8x16x32xf32> to vector<128x32xf32>
    %c4_170 = arith.constant 4 : index
    %c0_171 = arith.constant 0 : index
    %c0_172 = arith.constant 0 : index
    %156 = vector.load %arg8[%c4_170, %c0_171, %c0_172] : memref<9x32x128xf32, #tpu.memory_space<vmem>>, vector<1x32x128xf32>
    %157 = vector.shape_cast %156 : vector<1x32x128xf32> to vector<32x128xf32>
    %cst_173 = arith.constant dense<0.000000e+00> : vector<128x128xf32>
    %158 = tpu.matmul %155, %157, %cst_173 {dimension_numbers = #tpu.dot_dimension_numbers<[1], [0], [0], [1], [0, 0, 1, 1], [], []>} : vector<128x32xf32>, vector<32x128xf32>, vector<128x128xf32> -> vector<128x128xf32>
    %159 = arith.addf %152, %158 : vector<128x128xf32>
    %c0_174 = arith.constant 0 : index
    %c1_175 = arith.constant 1 : index
    %c2_176 = arith.constant 2 : index
    %c0_177 = arith.constant 0 : index
    %160 = vector.load %arg2[%c0_174, %c1_175, %c2_176, %c0_177] : memref<1x10x24x32xf32, #tpu.memory_space<vmem>>, vector<1x8x16x32xf32>
    %161 = vector.shape_cast %160 : vector<1x8x16x32xf32> to vector<8x16x32xf32>
    %162 = vector.shape_cast %161 : vector<8x16x32xf32> to vector<128x32xf32>
    %c5_178 = arith.constant 5 : index
    %c0_179 = arith.constant 0 : index
    %c0_180 = arith.constant 0 : index
    %163 = vector.load %arg8[%c5_178, %c0_179, %c0_180] : memref<9x32x128xf32, #tpu.memory_space<vmem>>, vector<1x32x128xf32>
    %164 = vector.shape_cast %163 : vector<1x32x128xf32> to vector<32x128xf32>
    %cst_181 = arith.constant dense<0.000000e+00> : vector<128x128xf32>
    %165 = tpu.matmul %162, %164, %cst_181 {dimension_numbers = #tpu.dot_dimension_numbers<[1], [0], [0], [1], [0, 0, 1, 1], [], []>} : vector<128x32xf32>, vector<32x128xf32>, vector<128x128xf32> -> vector<128x128xf32>
    %166 = arith.addf %159, %165 : vector<128x128xf32>
    %c0_182 = arith.constant 0 : index
    %c2_183 = arith.constant 2 : index
    %c0_184 = arith.constant 0 : index
    %c0_185 = arith.constant 0 : index
    %167 = vector.load %arg2[%c0_182, %c2_183, %c0_184, %c0_185] : memref<1x10x24x32xf32, #tpu.memory_space<vmem>>, vector<1x8x16x32xf32>
    %168 = vector.shape_cast %167 : vector<1x8x16x32xf32> to vector<8x16x32xf32>
    %169 = vector.shape_cast %168 : vector<8x16x32xf32> to vector<128x32xf32>
    %c6_186 = arith.constant 6 : index
    %c0_187 = arith.constant 0 : index
    %c0_188 = arith.constant 0 : index
    %170 = vector.load %arg8[%c6_186, %c0_187, %c0_188] : memref<9x32x128xf32, #tpu.memory_space<vmem>>, vector<1x32x128xf32>
    %171 = vector.shape_cast %170 : vector<1x32x128xf32> to vector<32x128xf32>
    %cst_189 = arith.constant dense<0.000000e+00> : vector<128x128xf32>
    %172 = tpu.matmul %169, %171, %cst_189 {dimension_numbers = #tpu.dot_dimension_numbers<[1], [0], [0], [1], [0, 0, 1, 1], [], []>} : vector<128x32xf32>, vector<32x128xf32>, vector<128x128xf32> -> vector<128x128xf32>
    %173 = arith.addf %166, %172 : vector<128x128xf32>
    %c0_190 = arith.constant 0 : index
    %c2_191 = arith.constant 2 : index
    %c1_192 = arith.constant 1 : index
    %c0_193 = arith.constant 0 : index
    %174 = vector.load %arg2[%c0_190, %c2_191, %c1_192, %c0_193] : memref<1x10x24x32xf32, #tpu.memory_space<vmem>>, vector<1x8x16x32xf32>
    %175 = vector.shape_cast %174 : vector<1x8x16x32xf32> to vector<8x16x32xf32>
    %176 = vector.shape_cast %175 : vector<8x16x32xf32> to vector<128x32xf32>
    %c7_194 = arith.constant 7 : index
    %c0_195 = arith.constant 0 : index
    %c0_196 = arith.constant 0 : index
    %177 = vector.load %arg8[%c7_194, %c0_195, %c0_196] : memref<9x32x128xf32, #tpu.memory_space<vmem>>, vector<1x32x128xf32>
    %178 = vector.shape_cast %177 : vector<1x32x128xf32> to vector<32x128xf32>
    %cst_197 = arith.constant dense<0.000000e+00> : vector<128x128xf32>
    %179 = tpu.matmul %176, %178, %cst_197 {dimension_numbers = #tpu.dot_dimension_numbers<[1], [0], [0], [1], [0, 0, 1, 1], [], []>} : vector<128x32xf32>, vector<32x128xf32>, vector<128x128xf32> -> vector<128x128xf32>
    %180 = arith.addf %173, %179 : vector<128x128xf32>
    %c0_198 = arith.constant 0 : index
    %c2_199 = arith.constant 2 : index
    %c2_200 = arith.constant 2 : index
    %c0_201 = arith.constant 0 : index
    %181 = vector.load %arg2[%c0_198, %c2_199, %c2_200, %c0_201] : memref<1x10x24x32xf32, #tpu.memory_space<vmem>>, vector<1x8x16x32xf32>
    %182 = vector.shape_cast %181 : vector<1x8x16x32xf32> to vector<8x16x32xf32>
    %183 = vector.shape_cast %182 : vector<8x16x32xf32> to vector<128x32xf32>
    %c8_202 = arith.constant 8 : index
    %c0_203 = arith.constant 0 : index
    %c0_204 = arith.constant 0 : index
    %184 = vector.load %arg8[%c8_202, %c0_203, %c0_204] : memref<9x32x128xf32, #tpu.memory_space<vmem>>, vector<1x32x128xf32>
    %185 = vector.shape_cast %184 : vector<1x32x128xf32> to vector<32x128xf32>
    %cst_205 = arith.constant dense<0.000000e+00> : vector<128x128xf32>
    %186 = tpu.matmul %183, %185, %cst_205 {dimension_numbers = #tpu.dot_dimension_numbers<[1], [0], [0], [1], [0, 0, 1, 1], [], []>} : vector<128x32xf32>, vector<32x128xf32>, vector<128x128xf32> -> vector<128x128xf32>
    %187 = arith.addf %180, %186 : vector<128x128xf32>
    %188 = vector.extract_strided_slice %124 {offsets = [0, 0], sizes = [128, 32], strides = [1, 1]} : vector<128x128xf32> to vector<128x32xf32>
    %189 = arith.negf %188 : vector<128x32xf32>
    %190 = math.exp %189 : vector<128x32xf32>
    %cst_206 = arith.constant 1.000000e+00 : f32
    %191 = vector.broadcast %cst_206 : f32 to vector<128x32xf32>
    %192 = arith.addf %191, %190 : vector<128x32xf32>
    %193 = arith.divf %191, %192 : vector<128x32xf32>
    %194 = vector.extract_strided_slice %124 {offsets = [0, 32], sizes = [128, 32], strides = [1, 1]} : vector<128x128xf32> to vector<128x32xf32>
    %195 = math.tanh %194 : vector<128x32xf32>
    %196 = vector.extract_strided_slice %187 {offsets = [0, 0], sizes = [128, 32], strides = [1, 1]} : vector<128x128xf32> to vector<128x32xf32>
    %197 = arith.negf %196 : vector<128x32xf32>
    %198 = math.exp %197 : vector<128x32xf32>
    %cst_207 = arith.constant 1.000000e+00 : f32
    %199 = vector.broadcast %cst_207 : f32 to vector<128x32xf32>
    %200 = arith.addf %199, %198 : vector<128x32xf32>
    %201 = arith.divf %199, %200 : vector<128x32xf32>
    %202 = vector.extract_strided_slice %187 {offsets = [0, 32], sizes = [128, 32], strides = [1, 1]} : vector<128x128xf32> to vector<128x32xf32>
    %203 = math.tanh %202 : vector<128x32xf32>
    %204 = vector.extract_strided_slice %187 {offsets = [0, 64], sizes = [128, 32], strides = [1, 1]} : vector<128x128xf32> to vector<128x32xf32>
    %cst_208 = arith.constant 1.000000e+00 : f32
    %205 = vector.broadcast %cst_208 : f32 to vector<128x32xf32>
    %206 = arith.addf %204, %205 : vector<128x32xf32>
    %207 = arith.negf %206 : vector<128x32xf32>
    %208 = math.exp %207 : vector<128x32xf32>
    %cst_209 = arith.constant 1.000000e+00 : f32
    %209 = vector.broadcast %cst_209 : f32 to vector<128x32xf32>
    %210 = arith.addf %209, %208 : vector<128x32xf32>
    %211 = arith.divf %209, %210 : vector<128x32xf32>
    %212 = vector.extract_strided_slice %124 {offsets = [0, 96], sizes = [128, 32], strides = [1, 1]} : vector<128x128xf32> to vector<128x32xf32>
    %213 = vector.extract_strided_slice %187 {offsets = [0, 96], sizes = [128, 32], strides = [1, 1]} : vector<128x128xf32> to vector<128x32xf32>
    %214 = arith.addf %212, %213 : vector<128x32xf32>
    %215 = vector.extract_strided_slice %61 {offsets = [0, 96], sizes = [128, 32], strides = [1, 1]} : vector<128x128xf32> to vector<128x32xf32>
    %216 = arith.subf %214, %215 : vector<128x32xf32>
    %217 = arith.negf %216 : vector<128x32xf32>
    %218 = math.exp %217 : vector<128x32xf32>
    %cst_210 = arith.constant 1.000000e+00 : f32
    %219 = vector.broadcast %cst_210 : f32 to vector<128x32xf32>
    %220 = arith.addf %219, %218 : vector<128x32xf32>
    %221 = arith.divf %219, %220 : vector<128x32xf32>
    %c0_211 = arith.constant 0 : index
    %c1_212 = arith.constant 1 : index
    %c1_213 = arith.constant 1 : index
    %c0_214 = arith.constant 0 : index
    %222 = vector.load %arg2[%c0_211, %c1_212, %c1_213, %c0_214] : memref<1x10x24x32xf32, #tpu.memory_space<vmem>>, vector<1x8x16x32xf32>
    %223 = vector.shape_cast %222 : vector<1x8x16x32xf32> to vector<8x16x32xf32>
    %224 = vector.shape_cast %223 : vector<8x16x32xf32> to vector<128x32xf32>
    %225 = arith.mulf %211, %224 : vector<128x32xf32>
    %226 = arith.mulf %201, %203 : vector<128x32xf32>
    %227 = arith.addf %225, %226 : vector<128x32xf32>
    %c0_215 = arith.constant 0 : index
    %c0_216 = arith.constant 0 : index
    %c0_217 = arith.constant 0 : index
    %c0_218 = arith.constant 0 : index
    %228 = vector.load %arg4[%c0_215, %c0_216, %c0_217, %c0_218] : memref<1x10x24x32xf32, #tpu.memory_space<vmem>>, vector<1x8x16x32xf32>
    %229 = vector.shape_cast %228 : vector<1x8x16x32xf32> to vector<8x16x32xf32>
    %230 = vector.shape_cast %229 : vector<8x16x32xf32> to vector<128x32xf32>
    %c0_219 = arith.constant 0 : index
    %c0_220 = arith.constant 0 : index
    %c0_221 = arith.constant 0 : index
    %231 = vector.load %arg10[%c0_219, %c0_220, %c0_221] : memref<9x32x128xf32, #tpu.memory_space<vmem>>, vector<1x32x128xf32>
    %232 = vector.shape_cast %231 : vector<1x32x128xf32> to vector<32x128xf32>
    %cst_222 = arith.constant dense<0.000000e+00> : vector<128x128xf32>
    %233 = tpu.matmul %230, %232, %cst_222 {dimension_numbers = #tpu.dot_dimension_numbers<[1], [0], [0], [1], [0, 0, 1, 1], [], []>} : vector<128x32xf32>, vector<32x128xf32>, vector<128x128xf32> -> vector<128x128xf32>
    %c0_223 = arith.constant 0 : index
    %c0_224 = arith.constant 0 : index
    %c1_225 = arith.constant 1 : index
    %c0_226 = arith.constant 0 : index
    %234 = vector.load %arg4[%c0_223, %c0_224, %c1_225, %c0_226] : memref<1x10x24x32xf32, #tpu.memory_space<vmem>>, vector<1x8x16x32xf32>
    %235 = vector.shape_cast %234 : vector<1x8x16x32xf32> to vector<8x16x32xf32>
    %236 = vector.shape_cast %235 : vector<8x16x32xf32> to vector<128x32xf32>
    %c1_227 = arith.constant 1 : index
    %c0_228 = arith.constant 0 : index
    %c0_229 = arith.constant 0 : index
    %237 = vector.load %arg10[%c1_227, %c0_228, %c0_229] : memref<9x32x128xf32, #tpu.memory_space<vmem>>, vector<1x32x128xf32>
    %238 = vector.shape_cast %237 : vector<1x32x128xf32> to vector<32x128xf32>
    %cst_230 = arith.constant dense<0.000000e+00> : vector<128x128xf32>
    %239 = tpu.matmul %236, %238, %cst_230 {dimension_numbers = #tpu.dot_dimension_numbers<[1], [0], [0], [1], [0, 0, 1, 1], [], []>} : vector<128x32xf32>, vector<32x128xf32>, vector<128x128xf32> -> vector<128x128xf32>
    %240 = arith.addf %233, %239 : vector<128x128xf32>
    %c0_231 = arith.constant 0 : index
    %c0_232 = arith.constant 0 : index
    %c2_233 = arith.constant 2 : index
    %c0_234 = arith.constant 0 : index
    %241 = vector.load %arg4[%c0_231, %c0_232, %c2_233, %c0_234] : memref<1x10x24x32xf32, #tpu.memory_space<vmem>>, vector<1x8x16x32xf32>
    %242 = vector.shape_cast %241 : vector<1x8x16x32xf32> to vector<8x16x32xf32>
    %243 = vector.shape_cast %242 : vector<8x16x32xf32> to vector<128x32xf32>
    %c2_235 = arith.constant 2 : index
    %c0_236 = arith.constant 0 : index
    %c0_237 = arith.constant 0 : index
    %244 = vector.load %arg10[%c2_235, %c0_236, %c0_237] : memref<9x32x128xf32, #tpu.memory_space<vmem>>, vector<1x32x128xf32>
    %245 = vector.shape_cast %244 : vector<1x32x128xf32> to vector<32x128xf32>
    %cst_238 = arith.constant dense<0.000000e+00> : vector<128x128xf32>
    %246 = tpu.matmul %243, %245, %cst_238 {dimension_numbers = #tpu.dot_dimension_numbers<[1], [0], [0], [1], [0, 0, 1, 1], [], []>} : vector<128x32xf32>, vector<32x128xf32>, vector<128x128xf32> -> vector<128x128xf32>
    %247 = arith.addf %240, %246 : vector<128x128xf32>
    %c0_239 = arith.constant 0 : index
    %c1_240 = arith.constant 1 : index
    %c0_241 = arith.constant 0 : index
    %c0_242 = arith.constant 0 : index
    %248 = vector.load %arg4[%c0_239, %c1_240, %c0_241, %c0_242] : memref<1x10x24x32xf32, #tpu.memory_space<vmem>>, vector<1x8x16x32xf32>
    %249 = vector.shape_cast %248 : vector<1x8x16x32xf32> to vector<8x16x32xf32>
    %250 = vector.shape_cast %249 : vector<8x16x32xf32> to vector<128x32xf32>
    %c3_243 = arith.constant 3 : index
    %c0_244 = arith.constant 0 : index
    %c0_245 = arith.constant 0 : index
    %251 = vector.load %arg10[%c3_243, %c0_244, %c0_245] : memref<9x32x128xf32, #tpu.memory_space<vmem>>, vector<1x32x128xf32>
    %252 = vector.shape_cast %251 : vector<1x32x128xf32> to vector<32x128xf32>
    %cst_246 = arith.constant dense<0.000000e+00> : vector<128x128xf32>
    %253 = tpu.matmul %250, %252, %cst_246 {dimension_numbers = #tpu.dot_dimension_numbers<[1], [0], [0], [1], [0, 0, 1, 1], [], []>} : vector<128x32xf32>, vector<32x128xf32>, vector<128x128xf32> -> vector<128x128xf32>
    %254 = arith.addf %247, %253 : vector<128x128xf32>
    %c0_247 = arith.constant 0 : index
    %c1_248 = arith.constant 1 : index
    %c1_249 = arith.constant 1 : index
    %c0_250 = arith.constant 0 : index
    %255 = vector.load %arg4[%c0_247, %c1_248, %c1_249, %c0_250] : memref<1x10x24x32xf32, #tpu.memory_space<vmem>>, vector<1x8x16x32xf32>
    %256 = vector.shape_cast %255 : vector<1x8x16x32xf32> to vector<8x16x32xf32>
    %257 = vector.shape_cast %256 : vector<8x16x32xf32> to vector<128x32xf32>
    %c4_251 = arith.constant 4 : index
    %c0_252 = arith.constant 0 : index
    %c0_253 = arith.constant 0 : index
    %258 = vector.load %arg10[%c4_251, %c0_252, %c0_253] : memref<9x32x128xf32, #tpu.memory_space<vmem>>, vector<1x32x128xf32>
    %259 = vector.shape_cast %258 : vector<1x32x128xf32> to vector<32x128xf32>
    %cst_254 = arith.constant dense<0.000000e+00> : vector<128x128xf32>
    %260 = tpu.matmul %257, %259, %cst_254 {dimension_numbers = #tpu.dot_dimension_numbers<[1], [0], [0], [1], [0, 0, 1, 1], [], []>} : vector<128x32xf32>, vector<32x128xf32>, vector<128x128xf32> -> vector<128x128xf32>
    %261 = arith.addf %254, %260 : vector<128x128xf32>
    %c0_255 = arith.constant 0 : index
    %c1_256 = arith.constant 1 : index
    %c2_257 = arith.constant 2 : index
    %c0_258 = arith.constant 0 : index
    %262 = vector.load %arg4[%c0_255, %c1_256, %c2_257, %c0_258] : memref<1x10x24x32xf32, #tpu.memory_space<vmem>>, vector<1x8x16x32xf32>
    %263 = vector.shape_cast %262 : vector<1x8x16x32xf32> to vector<8x16x32xf32>
    %264 = vector.shape_cast %263 : vector<8x16x32xf32> to vector<128x32xf32>
    %c5_259 = arith.constant 5 : index
    %c0_260 = arith.constant 0 : index
    %c0_261 = arith.constant 0 : index
    %265 = vector.load %arg10[%c5_259, %c0_260, %c0_261] : memref<9x32x128xf32, #tpu.memory_space<vmem>>, vector<1x32x128xf32>
    %266 = vector.shape_cast %265 : vector<1x32x128xf32> to vector<32x128xf32>
    %cst_262 = arith.constant dense<0.000000e+00> : vector<128x128xf32>
    %267 = tpu.matmul %264, %266, %cst_262 {dimension_numbers = #tpu.dot_dimension_numbers<[1], [0], [0], [1], [0, 0, 1, 1], [], []>} : vector<128x32xf32>, vector<32x128xf32>, vector<128x128xf32> -> vector<128x128xf32>
    %268 = arith.addf %261, %267 : vector<128x128xf32>
    %c0_263 = arith.constant 0 : index
    %c2_264 = arith.constant 2 : index
    %c0_265 = arith.constant 0 : index
    %c0_266 = arith.constant 0 : index
    %269 = vector.load %arg4[%c0_263, %c2_264, %c0_265, %c0_266] : memref<1x10x24x32xf32, #tpu.memory_space<vmem>>, vector<1x8x16x32xf32>
    %270 = vector.shape_cast %269 : vector<1x8x16x32xf32> to vector<8x16x32xf32>
    %271 = vector.shape_cast %270 : vector<8x16x32xf32> to vector<128x32xf32>
    %c6_267 = arith.constant 6 : index
    %c0_268 = arith.constant 0 : index
    %c0_269 = arith.constant 0 : index
    %272 = vector.load %arg10[%c6_267, %c0_268, %c0_269] : memref<9x32x128xf32, #tpu.memory_space<vmem>>, vector<1x32x128xf32>
    %273 = vector.shape_cast %272 : vector<1x32x128xf32> to vector<32x128xf32>
    %cst_270 = arith.constant dense<0.000000e+00> : vector<128x128xf32>
    %274 = tpu.matmul %271, %273, %cst_270 {dimension_numbers = #tpu.dot_dimension_numbers<[1], [0], [0], [1], [0, 0, 1, 1], [], []>} : vector<128x32xf32>, vector<32x128xf32>, vector<128x128xf32> -> vector<128x128xf32>
    %275 = arith.addf %268, %274 : vector<128x128xf32>
    %c0_271 = arith.constant 0 : index
    %c2_272 = arith.constant 2 : index
    %c1_273 = arith.constant 1 : index
    %c0_274 = arith.constant 0 : index
    %276 = vector.load %arg4[%c0_271, %c2_272, %c1_273, %c0_274] : memref<1x10x24x32xf32, #tpu.memory_space<vmem>>, vector<1x8x16x32xf32>
    %277 = vector.shape_cast %276 : vector<1x8x16x32xf32> to vector<8x16x32xf32>
    %278 = vector.shape_cast %277 : vector<8x16x32xf32> to vector<128x32xf32>
    %c7_275 = arith.constant 7 : index
    %c0_276 = arith.constant 0 : index
    %c0_277 = arith.constant 0 : index
    %279 = vector.load %arg10[%c7_275, %c0_276, %c0_277] : memref<9x32x128xf32, #tpu.memory_space<vmem>>, vector<1x32x128xf32>
    %280 = vector.shape_cast %279 : vector<1x32x128xf32> to vector<32x128xf32>
    %cst_278 = arith.constant dense<0.000000e+00> : vector<128x128xf32>
    %281 = tpu.matmul %278, %280, %cst_278 {dimension_numbers = #tpu.dot_dimension_numbers<[1], [0], [0], [1], [0, 0, 1, 1], [], []>} : vector<128x32xf32>, vector<32x128xf32>, vector<128x128xf32> -> vector<128x128xf32>
    %282 = arith.addf %275, %281 : vector<128x128xf32>
    %c0_279 = arith.constant 0 : index
    %c2_280 = arith.constant 2 : index
    %c2_281 = arith.constant 2 : index
    %c0_282 = arith.constant 0 : index
    %283 = vector.load %arg4[%c0_279, %c2_280, %c2_281, %c0_282] : memref<1x10x24x32xf32, #tpu.memory_space<vmem>>, vector<1x8x16x32xf32>
    %284 = vector.shape_cast %283 : vector<1x8x16x32xf32> to vector<8x16x32xf32>
    %285 = vector.shape_cast %284 : vector<8x16x32xf32> to vector<128x32xf32>
    %c8_283 = arith.constant 8 : index
    %c0_284 = arith.constant 0 : index
    %c0_285 = arith.constant 0 : index
    %286 = vector.load %arg10[%c8_283, %c0_284, %c0_285] : memref<9x32x128xf32, #tpu.memory_space<vmem>>, vector<1x32x128xf32>
    %287 = vector.shape_cast %286 : vector<1x32x128xf32> to vector<32x128xf32>
    %cst_286 = arith.constant dense<0.000000e+00> : vector<128x128xf32>
    %288 = tpu.matmul %285, %287, %cst_286 {dimension_numbers = #tpu.dot_dimension_numbers<[1], [0], [0], [1], [0, 0, 1, 1], [], []>} : vector<128x32xf32>, vector<32x128xf32>, vector<128x128xf32> -> vector<128x128xf32>
    %289 = arith.addf %282, %288 : vector<128x128xf32>
    %c0_287 = arith.constant 0 : index
    %c0_288 = arith.constant 0 : index
    %c0_289 = arith.constant 0 : index
    %c0_290 = arith.constant 0 : index
    %290 = vector.load %arg5[%c0_287, %c0_288, %c0_289, %c0_290] : memref<1x10x24x32xf32, #tpu.memory_space<vmem>>, vector<1x8x16x32xf32>
    %291 = vector.shape_cast %290 : vector<1x8x16x32xf32> to vector<8x16x32xf32>
    %292 = vector.shape_cast %291 : vector<8x16x32xf32> to vector<128x32xf32>
    %c0_291 = arith.constant 0 : index
    %c0_292 = arith.constant 0 : index
    %c0_293 = arith.constant 0 : index
    %293 = vector.load %arg11[%c0_291, %c0_292, %c0_293] : memref<9x32x128xf32, #tpu.memory_space<vmem>>, vector<1x32x128xf32>
    %294 = vector.shape_cast %293 : vector<1x32x128xf32> to vector<32x128xf32>
    %cst_294 = arith.constant dense<0.000000e+00> : vector<128x128xf32>
    %295 = tpu.matmul %292, %294, %cst_294 {dimension_numbers = #tpu.dot_dimension_numbers<[1], [0], [0], [1], [0, 0, 1, 1], [], []>} : vector<128x32xf32>, vector<32x128xf32>, vector<128x128xf32> -> vector<128x128xf32>
    %296 = arith.addf %289, %295 : vector<128x128xf32>
    %c0_295 = arith.constant 0 : index
    %c0_296 = arith.constant 0 : index
    %c1_297 = arith.constant 1 : index
    %c0_298 = arith.constant 0 : index
    %297 = vector.load %arg5[%c0_295, %c0_296, %c1_297, %c0_298] : memref<1x10x24x32xf32, #tpu.memory_space<vmem>>, vector<1x8x16x32xf32>
    %298 = vector.shape_cast %297 : vector<1x8x16x32xf32> to vector<8x16x32xf32>
    %299 = vector.shape_cast %298 : vector<8x16x32xf32> to vector<128x32xf32>
    %c1_299 = arith.constant 1 : index
    %c0_300 = arith.constant 0 : index
    %c0_301 = arith.constant 0 : index
    %300 = vector.load %arg11[%c1_299, %c0_300, %c0_301] : memref<9x32x128xf32, #tpu.memory_space<vmem>>, vector<1x32x128xf32>
    %301 = vector.shape_cast %300 : vector<1x32x128xf32> to vector<32x128xf32>
    %cst_302 = arith.constant dense<0.000000e+00> : vector<128x128xf32>
    %302 = tpu.matmul %299, %301, %cst_302 {dimension_numbers = #tpu.dot_dimension_numbers<[1], [0], [0], [1], [0, 0, 1, 1], [], []>} : vector<128x32xf32>, vector<32x128xf32>, vector<128x128xf32> -> vector<128x128xf32>
    %303 = arith.addf %296, %302 : vector<128x128xf32>
    %c0_303 = arith.constant 0 : index
    %c0_304 = arith.constant 0 : index
    %c2_305 = arith.constant 2 : index
    %c0_306 = arith.constant 0 : index
    %304 = vector.load %arg5[%c0_303, %c0_304, %c2_305, %c0_306] : memref<1x10x24x32xf32, #tpu.memory_space<vmem>>, vector<1x8x16x32xf32>
    %305 = vector.shape_cast %304 : vector<1x8x16x32xf32> to vector<8x16x32xf32>
    %306 = vector.shape_cast %305 : vector<8x16x32xf32> to vector<128x32xf32>
    %c2_307 = arith.constant 2 : index
    %c0_308 = arith.constant 0 : index
    %c0_309 = arith.constant 0 : index
    %307 = vector.load %arg11[%c2_307, %c0_308, %c0_309] : memref<9x32x128xf32, #tpu.memory_space<vmem>>, vector<1x32x128xf32>
    %308 = vector.shape_cast %307 : vector<1x32x128xf32> to vector<32x128xf32>
    %cst_310 = arith.constant dense<0.000000e+00> : vector<128x128xf32>
    %309 = tpu.matmul %306, %308, %cst_310 {dimension_numbers = #tpu.dot_dimension_numbers<[1], [0], [0], [1], [0, 0, 1, 1], [], []>} : vector<128x32xf32>, vector<32x128xf32>, vector<128x128xf32> -> vector<128x128xf32>
    %310 = arith.addf %303, %309 : vector<128x128xf32>
    %c0_311 = arith.constant 0 : index
    %c1_312 = arith.constant 1 : index
    %c0_313 = arith.constant 0 : index
    %c0_314 = arith.constant 0 : index
    %311 = vector.load %arg5[%c0_311, %c1_312, %c0_313, %c0_314] : memref<1x10x24x32xf32, #tpu.memory_space<vmem>>, vector<1x8x16x32xf32>
    %312 = vector.shape_cast %311 : vector<1x8x16x32xf32> to vector<8x16x32xf32>
    %313 = vector.shape_cast %312 : vector<8x16x32xf32> to vector<128x32xf32>
    %c3_315 = arith.constant 3 : index
    %c0_316 = arith.constant 0 : index
    %c0_317 = arith.constant 0 : index
    %314 = vector.load %arg11[%c3_315, %c0_316, %c0_317] : memref<9x32x128xf32, #tpu.memory_space<vmem>>, vector<1x32x128xf32>
    %315 = vector.shape_cast %314 : vector<1x32x128xf32> to vector<32x128xf32>
    %cst_318 = arith.constant dense<0.000000e+00> : vector<128x128xf32>
    %316 = tpu.matmul %313, %315, %cst_318 {dimension_numbers = #tpu.dot_dimension_numbers<[1], [0], [0], [1], [0, 0, 1, 1], [], []>} : vector<128x32xf32>, vector<32x128xf32>, vector<128x128xf32> -> vector<128x128xf32>
    %317 = arith.addf %310, %316 : vector<128x128xf32>
    %c0_319 = arith.constant 0 : index
    %c1_320 = arith.constant 1 : index
    %c1_321 = arith.constant 1 : index
    %c0_322 = arith.constant 0 : index
    %318 = vector.load %arg5[%c0_319, %c1_320, %c1_321, %c0_322] : memref<1x10x24x32xf32, #tpu.memory_space<vmem>>, vector<1x8x16x32xf32>
    %319 = vector.shape_cast %318 : vector<1x8x16x32xf32> to vector<8x16x32xf32>
    %320 = vector.shape_cast %319 : vector<8x16x32xf32> to vector<128x32xf32>
    %c4_323 = arith.constant 4 : index
    %c0_324 = arith.constant 0 : index
    %c0_325 = arith.constant 0 : index
    %321 = vector.load %arg11[%c4_323, %c0_324, %c0_325] : memref<9x32x128xf32, #tpu.memory_space<vmem>>, vector<1x32x128xf32>
    %322 = vector.shape_cast %321 : vector<1x32x128xf32> to vector<32x128xf32>
    %cst_326 = arith.constant dense<0.000000e+00> : vector<128x128xf32>
    %323 = tpu.matmul %320, %322, %cst_326 {dimension_numbers = #tpu.dot_dimension_numbers<[1], [0], [0], [1], [0, 0, 1, 1], [], []>} : vector<128x32xf32>, vector<32x128xf32>, vector<128x128xf32> -> vector<128x128xf32>
    %324 = arith.addf %317, %323 : vector<128x128xf32>
    %c0_327 = arith.constant 0 : index
    %c1_328 = arith.constant 1 : index
    %c2_329 = arith.constant 2 : index
    %c0_330 = arith.constant 0 : index
    %325 = vector.load %arg5[%c0_327, %c1_328, %c2_329, %c0_330] : memref<1x10x24x32xf32, #tpu.memory_space<vmem>>, vector<1x8x16x32xf32>
    %326 = vector.shape_cast %325 : vector<1x8x16x32xf32> to vector<8x16x32xf32>
    %327 = vector.shape_cast %326 : vector<8x16x32xf32> to vector<128x32xf32>
    %c5_331 = arith.constant 5 : index
    %c0_332 = arith.constant 0 : index
    %c0_333 = arith.constant 0 : index
    %328 = vector.load %arg11[%c5_331, %c0_332, %c0_333] : memref<9x32x128xf32, #tpu.memory_space<vmem>>, vector<1x32x128xf32>
    %329 = vector.shape_cast %328 : vector<1x32x128xf32> to vector<32x128xf32>
    %cst_334 = arith.constant dense<0.000000e+00> : vector<128x128xf32>
    %330 = tpu.matmul %327, %329, %cst_334 {dimension_numbers = #tpu.dot_dimension_numbers<[1], [0], [0], [1], [0, 0, 1, 1], [], []>} : vector<128x32xf32>, vector<32x128xf32>, vector<128x128xf32> -> vector<128x128xf32>
    %331 = arith.addf %324, %330 : vector<128x128xf32>
    %c0_335 = arith.constant 0 : index
    %c2_336 = arith.constant 2 : index
    %c0_337 = arith.constant 0 : index
    %c0_338 = arith.constant 0 : index
    %332 = vector.load %arg5[%c0_335, %c2_336, %c0_337, %c0_338] : memref<1x10x24x32xf32, #tpu.memory_space<vmem>>, vector<1x8x16x32xf32>
    %333 = vector.shape_cast %332 : vector<1x8x16x32xf32> to vector<8x16x32xf32>
    %334 = vector.shape_cast %333 : vector<8x16x32xf32> to vector<128x32xf32>
    %c6_339 = arith.constant 6 : index
    %c0_340 = arith.constant 0 : index
    %c0_341 = arith.constant 0 : index
    %335 = vector.load %arg11[%c6_339, %c0_340, %c0_341] : memref<9x32x128xf32, #tpu.memory_space<vmem>>, vector<1x32x128xf32>
    %336 = vector.shape_cast %335 : vector<1x32x128xf32> to vector<32x128xf32>
    %cst_342 = arith.constant dense<0.000000e+00> : vector<128x128xf32>
    %337 = tpu.matmul %334, %336, %cst_342 {dimension_numbers = #tpu.dot_dimension_numbers<[1], [0], [0], [1], [0, 0, 1, 1], [], []>} : vector<128x32xf32>, vector<32x128xf32>, vector<128x128xf32> -> vector<128x128xf32>
    %338 = arith.addf %331, %337 : vector<128x128xf32>
    %c0_343 = arith.constant 0 : index
    %c2_344 = arith.constant 2 : index
    %c1_345 = arith.constant 1 : index
    %c0_346 = arith.constant 0 : index
    %339 = vector.load %arg5[%c0_343, %c2_344, %c1_345, %c0_346] : memref<1x10x24x32xf32, #tpu.memory_space<vmem>>, vector<1x8x16x32xf32>
    %340 = vector.shape_cast %339 : vector<1x8x16x32xf32> to vector<8x16x32xf32>
    %341 = vector.shape_cast %340 : vector<8x16x32xf32> to vector<128x32xf32>
    %c7_347 = arith.constant 7 : index
    %c0_348 = arith.constant 0 : index
    %c0_349 = arith.constant 0 : index
    %342 = vector.load %arg11[%c7_347, %c0_348, %c0_349] : memref<9x32x128xf32, #tpu.memory_space<vmem>>, vector<1x32x128xf32>
    %343 = vector.shape_cast %342 : vector<1x32x128xf32> to vector<32x128xf32>
    %cst_350 = arith.constant dense<0.000000e+00> : vector<128x128xf32>
    %344 = tpu.matmul %341, %343, %cst_350 {dimension_numbers = #tpu.dot_dimension_numbers<[1], [0], [0], [1], [0, 0, 1, 1], [], []>} : vector<128x32xf32>, vector<32x128xf32>, vector<128x128xf32> -> vector<128x128xf32>
    %345 = arith.addf %338, %344 : vector<128x128xf32>
    %c0_351 = arith.constant 0 : index
    %c2_352 = arith.constant 2 : index
    %c2_353 = arith.constant 2 : index
    %c0_354 = arith.constant 0 : index
    %346 = vector.load %arg5[%c0_351, %c2_352, %c2_353, %c0_354] : memref<1x10x24x32xf32, #tpu.memory_space<vmem>>, vector<1x8x16x32xf32>
    %347 = vector.shape_cast %346 : vector<1x8x16x32xf32> to vector<8x16x32xf32>
    %348 = vector.shape_cast %347 : vector<8x16x32xf32> to vector<128x32xf32>
    %c8_355 = arith.constant 8 : index
    %c0_356 = arith.constant 0 : index
    %c0_357 = arith.constant 0 : index
    %349 = vector.load %arg11[%c8_355, %c0_356, %c0_357] : memref<9x32x128xf32, #tpu.memory_space<vmem>>, vector<1x32x128xf32>
    %350 = vector.shape_cast %349 : vector<1x32x128xf32> to vector<32x128xf32>
    %cst_358 = arith.constant dense<0.000000e+00> : vector<128x128xf32>
    %351 = tpu.matmul %348, %350, %cst_358 {dimension_numbers = #tpu.dot_dimension_numbers<[1], [0], [0], [1], [0, 0, 1, 1], [], []>} : vector<128x32xf32>, vector<32x128xf32>, vector<128x128xf32> -> vector<128x128xf32>
    %352 = arith.addf %345, %351 : vector<128x128xf32>
    %353 = vector.extract_strided_slice %352 {offsets = [0, 32], sizes = [128, 32], strides = [1, 1]} : vector<128x128xf32> to vector<128x32xf32>
    %354 = math.tanh %353 : vector<128x32xf32>
    %355 = vector.extract_strided_slice %352 {offsets = [0, 0], sizes = [128, 32], strides = [1, 1]} : vector<128x128xf32> to vector<128x32xf32>
    %356 = arith.negf %355 : vector<128x32xf32>
    %357 = math.exp %356 : vector<128x32xf32>
    %cst_359 = arith.constant 1.000000e+00 : f32
    %358 = vector.broadcast %cst_359 : f32 to vector<128x32xf32>
    %359 = arith.addf %358, %357 : vector<128x32xf32>
    %360 = arith.divf %358, %359 : vector<128x32xf32>
    %361 = arith.mulf %360, %354 : vector<128x32xf32>
    %c0_360 = arith.constant 0 : index
    %c0_361 = arith.constant 0 : index
    %c0_362 = arith.constant 0 : index
    %362 = vector.load %arg6[%c0_360, %c0_361, %c0_362] : memref<1x128x32xf32, #tpu.memory_space<vmem>>, vector<1x128x32xf32>
    %363 = vector.shape_cast %362 : vector<1x128x32xf32> to vector<128x32xf32>
    %364 = arith.mulf %361, %363 : vector<128x32xf32>
    %365 = vector.extract_strided_slice %352 {offsets = [0, 96], sizes = [128, 32], strides = [1, 1]} : vector<128x128xf32> to vector<128x32xf32>
    %366 = arith.addf %365, %364 : vector<128x32xf32>
    %367 = arith.negf %366 : vector<128x32xf32>
    %368 = math.exp %367 : vector<128x32xf32>
    %cst_363 = arith.constant 1.000000e+00 : f32
    %369 = vector.broadcast %cst_363 : f32 to vector<128x32xf32>
    %370 = arith.addf %369, %368 : vector<128x32xf32>
    %371 = arith.divf %369, %370 : vector<128x32xf32>
    %372 = math.tanh %361 : vector<128x32xf32>
    %373 = arith.mulf %371, %372 : vector<128x32xf32>
    %374 = arith.mulf %193, %195 : vector<128x32xf32>
    %375 = arith.addf %373, %374 : vector<128x32xf32>
    %c0_364 = arith.constant 0 : index
    %c0_365 = arith.constant 0 : index
    %c0_366 = arith.constant 0 : index
    %376 = vector.load %arg12[%c0_364, %c0_365, %c0_366] : memref<2x32x32xf32, #tpu.memory_space<vmem>>, vector<1x32x32xf32>
    %377 = vector.shape_cast %376 : vector<1x32x32xf32> to vector<32x32xf32>
    %cst_367 = arith.constant dense<0.000000e+00> : vector<128x32xf32>
    %378 = tpu.matmul %375, %377, %cst_367 {dimension_numbers = #tpu.dot_dimension_numbers<[1], [0], [0], [1], [0, 0, 1, 1], [], []>} : vector<128x32xf32>, vector<32x32xf32>, vector<128x32xf32> -> vector<128x32xf32>
    %c1_368 = arith.constant 1 : index
    %c0_369 = arith.constant 0 : index
    %c0_370 = arith.constant 0 : index
    %379 = vector.load %arg12[%c1_368, %c0_369, %c0_370] : memref<2x32x32xf32, #tpu.memory_space<vmem>>, vector<1x32x32xf32>
    %380 = vector.shape_cast %379 : vector<1x32x32xf32> to vector<32x32xf32>
    %cst_371 = arith.constant dense<0.000000e+00> : vector<128x32xf32>
    %381 = tpu.matmul %227, %380, %cst_371 {dimension_numbers = #tpu.dot_dimension_numbers<[1], [0], [0], [1], [0, 0, 1, 1], [], []>} : vector<128x32xf32>, vector<32x32xf32>, vector<128x32xf32> -> vector<128x32xf32>
    %382 = arith.addf %378, %381 : vector<128x32xf32>
    %383 = math.tanh %382 : vector<128x32xf32>
    %384 = arith.mulf %221, %383 : vector<128x32xf32>
    %385 = tpu.concatenate %384, %375, %227 in 1 : vector<128x32xf32>, vector<128x32xf32>, vector<128x32xf32> -> vector<128x96xf32>
    %c0_372 = arith.constant 0 : index
    %c0_373 = arith.constant 0 : index
    %c0_374 = arith.constant 0 : index
    %386 = vector.load %arg13[%c0_372, %c0_373, %c0_374] : memref<1x128x96xf32, #tpu.memory_space<vmem>>, vector<1x128x96xf32>
    %387 = vector.shape_cast %386 : vector<1x128x96xf32> to vector<128x96xf32>
    %388 = vector.shape_cast %385 : vector<128x96xf32> to vector<1x128x96xf32>
    tpu.vector_store %arg13[%c0_372, %c0_373, %c0_374], %388 {strides = array<i32>} : memref<1x128x96xf32, #tpu.memory_space<vmem>>, vector<1x128x96xf32>,
    return
  }
  func.func @transform_0(%arg0: i32) -> (i32, i32, i32, i32) {
    %c0_i32 = arith.constant 0 : i32
    %c0_i32_0 = arith.constant 0 : i32
    %c0_i32_1 = arith.constant 0 : i32
    %c0_i32_2 = arith.constant 0 : i32
    return %arg0, %c0_i32, %c0_i32_0, %c0_i32_1 : i32, i32, i32, i32
  }
  func.func @transform_1(%arg0: i32) -> (i32, i32, i32, i32) {
    %c0_i32 = arith.constant 0 : i32
    %c0_i32_0 = arith.constant 0 : i32
    %c0_i32_1 = arith.constant 0 : i32
    %c0_i32_2 = arith.constant 0 : i32
    return %arg0, %c0_i32, %c0_i32_0, %c0_i32_1 : i32, i32, i32, i32
  }
  func.func @transform_2(%arg0: i32) -> (i32, i32, i32, i32) {
    %c0_i32 = arith.constant 0 : i32
    %c0_i32_0 = arith.constant 0 : i32
    %c0_i32_1 = arith.constant 0 : i32
    %c0_i32_2 = arith.constant 0 : i32
    return %arg0, %c0_i32, %c0_i32_0, %c0_i32_1 : i32, i32, i32, i32
  }
  func.func @transform_3(%arg0: i32) -> (i32, i32, i32, i32) {
    %c0_i32 = arith.constant 0 : i32
    %c0_i32_0 = arith.constant 0 : i32
    %c0_i32_1 = arith.constant 0 : i32
    %c0_i32_2 = arith.constant 0 : i32
    return %arg0, %c0_i32, %c0_i32_0, %c0_i32_1 : i32, i32, i32, i32
  }
  func.func @transform_4(%arg0: i32) -> (i32, i32, i32, i32) {
    %c0_i32 = arith.constant 0 : i32
    %c0_i32_0 = arith.constant 0 : i32
    %c0_i32_1 = arith.constant 0 : i32
    %c0_i32_2 = arith.constant 0 : i32
    return %arg0, %c0_i32, %c0_i32_0, %c0_i32_1 : i32, i32, i32, i32
  }
  func.func @transform_5(%arg0: i32) -> (i32, i32, i32) {
    %c2_i32 = arith.constant 2 : i32
    %c0_i32 = arith.constant 0 : i32
    %0 = arith.cmpi eq, %c2_i32, %c0_i32 : i32
    %c1_i32 = arith.constant 1 : i32
    %1 = arith.select %0, %c1_i32, %c2_i32 : i32
    %2 = arith.remsi %arg0, %1 : i32
    %c0_i32_0 = arith.constant 0 : i32
    %3 = arith.cmpi ne, %2, %c0_i32_0 : i32
    %c0_i32_1 = arith.constant 0 : i32
    %4 = arith.cmpi slt, %2, %c0_i32_1 : i32
    %c0_i32_2 = arith.constant 0 : i32
    %5 = arith.cmpi slt, %1, %c0_i32_2 : i32
    %6 = arith.xori %4, %5 : i1
    %7 = arith.andi %6, %3 : i1
    %8 = arith.addi %2, %1 : i32
    %9 = arith.select %7, %8, %2 : i32
    %c0_i32_3 = arith.constant 0 : i32
    %c0_i32_4 = arith.constant 0 : i32
    %c0_i32_5 = arith.constant 0 : i32
    return %9, %c0_i32_3, %c0_i32_4 : i32, i32, i32
  }
  func.func @transform_6(%arg0: i32) -> (i32, i32, i32) {
    %c0_i32 = arith.constant 0 : i32
    %c0_i32_0 = arith.constant 0 : i32
    %c0_i32_1 = arith.constant 0 : i32
    %c0_i32_2 = arith.constant 0 : i32
    return %c0_i32, %c0_i32_0, %c0_i32_1 : i32, i32, i32
  }
  func.func @transform_7(%arg0: i32) -> (i32, i32, i32) {
    %c0_i32 = arith.constant 0 : i32
    %c0_i32_0 = arith.constant 0 : i32
    %c0_i32_1 = arith.constant 0 : i32
    %c0_i32_2 = arith.constant 0 : i32
    return %c0_i32, %c0_i32_0, %c0_i32_1 : i32, i32, i32
  }
  func.func @transform_8(%arg0: i32) -> (i32, i32, i32) {
    %c0_i32 = arith.constant 0 : i32
    %c0_i32_0 = arith.constant 0 : i32
    %c0_i32_1 = arith.constant 0 : i32
    %c0_i32_2 = arith.constant 0 : i32
    return %c0_i32, %c0_i32_0, %c0_i32_1 : i32, i32, i32
  }
  func.func @transform_9(%arg0: i32) -> (i32, i32, i32) {
    %c0_i32 = arith.constant 0 : i32
    %c0_i32_0 = arith.constant 0 : i32
    %c0_i32_1 = arith.constant 0 : i32
    %c0_i32_2 = arith.constant 0 : i32
    return %c0_i32, %c0_i32_0, %c0_i32_1 : i32, i32, i32
  }
  func.func @transform_10(%arg0: i32) -> (i32, i32, i32) {
    %c0_i32 = arith.constant 0 : i32
    %c0_i32_0 = arith.constant 0 : i32
    %c0_i32_1 = arith.constant 0 : i32
    %c0_i32_2 = arith.constant 0 : i32
    return %c0_i32, %c0_i32_0, %c0_i32_1 : i32, i32, i32
  }
  func.func @transform_11(%arg0: i32) -> (i32, i32, i32) {
    %c0_i32 = arith.constant 0 : i32
    %c0_i32_0 = arith.constant 0 : i32
    %c0_i32_1 = arith.constant 0 : i32
    %c0_i32_2 = arith.constant 0 : i32
    return %c0_i32, %c0_i32_0, %c0_i32_1 : i32, i32, i32
  }
  func.func @transform_12(%arg0: i32) -> (i32, i32, i32) {
    %c0_i32 = arith.constant 0 : i32
    %c0_i32_0 = arith.constant 0 : i32
    %c0_i32_1 = arith.constant 0 : i32
    return %arg0, %c0_i32, %c0_i32_0 : i32, i32, i32
  }
}

</mosaic_0001>

<bundles_post_ra>
// kernel: tpu_custom_call.1
= control target key start
LH: loop header
LB: loop body
LE: loop exit
PB: predicated region body
PF: predicated region fallthrough
CT: control target
= control target key end

     0   :  { %s23199_s0 = inlined_call_operand.hbm [shape: f32[4,10,24,32], index: 0, kind: input, shape index: {}]   ;;  %s23200_s1 = inlined_call_operand.hbm [shape: f32[4,10,24,32], index: 1, kind: input, shape index: {}]   ;;  %s23201_s2 = inlined_call_operand.hbm [shape: f32[4,10,24,32], index: 2, kind: input, shape index: {}]   ;;  %s23202_s3 = inlined_call_operand.hbm [shape: f32[4,10,24,32], index: 3, kind: input, shape index: {}]   ;;  %s23203_s4 = inlined_call_operand.hbm [shape: f32[4,10,24,32], index: 4, kind: input, shape index: {}]   ;;  %s23204_s5 = inlined_call_operand.vmem [shape: f32[2,128,32], index: 5, kind: input, shape index: {}]   ;;  %s23205_s6 = inlined_call_operand.vmem [shape: f32[9,32,128], index: 6, kind: input, shape index: {}]   ;;  %s23206_s7 = inlined_call_operand.hbm [shape: f32[9,32,128], index: 7, kind: input, shape index: {}]   ;;  %s23207_s8 = inlined_call_operand.hbm [shape: f32[9,32,128], index: 8, kind: input, shape index: {}]   ;;  %s23208_s9 = inlined_call_operand.hbm [shape: f32[9,32,128], index: 9, kind: input, shape index: {}]   ;;  %s23209_s10 = inlined_call_operand.hbm [shape: f32[9,32,128], index: 10, kind: input, shape index: {}]   ;;  %s23210_s11 = inlined_call_operand.hbm [shape: f32[2,32,32], index: 11, kind: input, shape index: {}]   ;;  %s23211_s12 = inlined_call_operand.vmem [shape: f32[4,128,96], index: 12, kind: output, shape index: {}]  }
   0x1   :  { %23387 = sst [smem:[#allocation99_spill]] %s23200_s1 }
   0x2   :  { %23388 = sst [smem:[#allocation100_spill]] %s23204_s5 }
   0x3   :  { %23389 = sst [smem:[#allocation101_spill]] %s23205_s6 }
   0x4   :  { %23390 = sst [smem:[#allocation102_spill]] %s23206_s7 }
   0x5   :  { %23391 = sst [smem:[#allocation103_spill]] %s23208_s9 }
   0x6   :  { %23392 = sst [smem:[#allocation104_spill]] %s23211_s12 }
   0x7   :  { %17 = vsyncpa [#allocation3], 0 }
   0x8   :  { %19 = vsyncpa [#allocation3 + $0x1], 0 }
   0x9   :  { %20 = vsyncpa [#allocation5], 0 }
   0xa   :  { %22 = vsyncpa [#allocation5 + $0x1], 0 }
   0xb   :  { %23 = vsyncpa [#allocation8], 0 }
   0xc   :  { %25 = vsyncpa [#allocation8 + $0x1], 0 }
   0xd   :  { %26 = vsyncpa [#allocation11], 0 }
   0xe   :  { %27 = vsyncpa [#allocation14], 0 }
   0xf   :  { %28 = vsyncpa [#allocation17], 0  ;;  %s18263_s21 = smov 0   ;;  %s18265_s22 = smov 0  }
  0x10   :  { %s18267_s23 = smov 0   ;;  %s18269_s24 = smov 0  }
  0x11 LB: > { %23393 = sst [smem:[#allocation24_spill]] %s18173_s22  ;;  %s18282_s25 = sadd.s32 4294967295, %s18181_s24   ;;  %s18181_s24 = sphi %s18269_s24, %s23754_s24   ;;  %s18177_s23 = sphi %s18267_s23, %s23758_s23   ;;  %s18173_s22 = sphi %s18265_s22, %s23757_s22   ;;  %s18169_s21 = sphi %s18263_s21, %s23755_s21  }
  0x12   : > { %23394 = sst [smem:[#allocation25_spill]] %s18282_s25  ;;  %p54_p0 = scmp.ne.s32.totalorder %s18173_s22, %s18169_s21 }
  0x13   : > { %p23220_p1 = scmp.eq.s32.totalorder %s18282_s25, 0  ;;  %p13338_p2 = scmp.ge.s32.totalorder %s18181_s24, 1 }
  0x14   : > { %p371_p3 = scmp.lt.s32.totalorder %s18181_s24, 5  ;;  %s18183_s28 = smov [#allocation10]  }
  0x15   : > { %p18290_p4 = por %p23220_p1, %p54_p0  ;;  %s386_s29 = sshll.u32 %s18183_s28, 4  ;;  %s387_s29 = int_to_ptr.vmem [resolvable:$true] %s386_s29 }
  0x16   : > { %p18294_p5 = pnand %p13338_p2, %p371_p3  ;;  %s18184_s13 = smov [#allocation13]  }
  0x17   : > { %s23395_s26 = scalar_select %p18290_p4, 1, 0 }
  0x18   : > { %s23397_s27 = scalar_select %p18294_p5, 1, 0 }
  0x19   : > { %23396 = sst [smem:[#allocation26_spill]] %s23395_s26  ;;  %p17220_p6 = pneg %p18294_p5 }
  0x1a   : > { %23398 = sst [smem:[#allocation27_spill]] %s23397_s27  ;;  %s412_s14 = sshll.u32 %s18184_s13, 4  ;;  %s413_s14 = int_to_ptr.vmem [resolvable:$true] %s412_s14 }
  0x1b   : > { %p18302_p7 = pnand %p17220_p6, %p23220_p1  ;;  %s17868_s16 = scalar_lea.vmem %s387_s29, 4608 }
  0x1c   : > { %p17869_p9 = scmp.ne.s32.totalorder %s387_s29, %s17868_s16  ;;  %p17876_p12 = scmp.lt.s32.totalorder %s387_s29, %s387_s29 }
  0x1d   : > { %s23399_s30 = scalar_select %p18302_p7, 1, 0 }
  0x1e   : > { %p18308_p8 = pneg %p18302_p7  ;;  %p17877_p13 = scmp.lt.s32.totalorder %s17868_s16, %s17868_s16 }
  0x20   : > { %s23400_s15 = scalar_select %p18308_p8, 1, 0 }
  0x21   : > { %p17871_p10 = pnand %p17869_p9, %p18308_p8  ;;  %p17878_p0 = por %p17877_p13, %p17876_p12 }
  0x23   : > { %p17872_p11 = pneg %p17871_p10 }
  0x25   : > { %p17879_p2 = pnand %p17878_p0, %p17872_p11 }
  0x27   : > { %17882 = shalt.err (!%p17879_p2)
}
  0x28   : > { %s23212_s17 = smov 128   ;;  %s23214_s18 = smov 8  }
  0x29   : > { %s23401_s7 = sld [smem:[#allocation102_spill]]  ;;  %s17894_s21 = scalar_lea.vmem %s413_s14, 4608 }
  0x2a   : > { %p17895_p3 = scmp.ne.s32.totalorder %s413_s14, %s17894_s21  ;;  %p17902_p10 = scmp.lt.s32.totalorder %s413_s14, %s413_s14 }
  0x2b   : > { %p17903_p11 = scmp.lt.s32.totalorder %s17894_s21, %s17894_s21 }
  0x2c   : > { %p17897_p6 = pnand %p17895_p3, %p18308_p8 }
  0x2d   : > { %p17904_p12 = por %p17903_p11, %p17902_p10 }
  0x2e   : > { %p17898_p9 = pneg %p17897_p6 }
  0x2f   : > { %17223 = dma.hbm_to_vmem [thread:$0]  (!%p18302_p7), %s23401_s7, 4608, %s387_s29, [#allocation11], %s23212_s17, %s23212_s17, %s23214_s18  }
  0x30   : > { %p17905_p13 = pnand %p17904_p12, %p17898_p9 }
  0x32   : > { %17908 = shalt.err (!%p17905_p13)
}
  0x33   : > { %s23402_s9 = sld [smem:[#allocation103_spill]]  ;;  %s18333_s29 = sadd.s32 1, %s18181_s24  }
  0x34   : > { %23403 = sst [smem:[#allocation28_spill]] %s18333_s29  ;;  %s41_s16 = sadd.s32 1, %s18177_s23 }
  0x35   : > { %s38_s19 = ssub.s32 %s18181_s24, %s18333_s29  ;;  %p48_p0 = scmp.ne.s32.totalorder %s18177_s23, %s18173_s22 }
  0x36   : > { %p39_p2 = scmp.eq.s32.totalorder %s38_s19, 0  ;;  %p49_p3 = scmp.eq.s32.totalorder %s18181_s24, 0 }
  0x37   : > { %p17257_p6 = scmp.lt.s32.totalorder %s18181_s24, 4  ;;  %s23216_s20 = sand.u32 1, %s18177_s23  }
  0x38   : > { %s18344_s21 = scalar_select %p39_p2, %s18177_s23, %s41_s16  }
  0x39   : > { %17229 = dma.hbm_to_vmem [thread:$0]  (!%p18302_p7), %s23402_s9, 4608, %s413_s14, [#allocation14], %s23212_s17, %s23212_s17, %s23214_s18  }
  0x3a   : > { %23404 = sst [smem:[#allocation29_spill]] %s18344_s21  ;;  %p50_p9 = por %p49_p3, %p48_p0 }
  0x3b   : > { %s18348_s28 = smul.u32 240, %s23216_s20  ;;  %s23219_s14 = sand.u32 1, %s18181_s24  }
  0x3c   : > { %s18351_s13 = smul.u32 3840, %s18181_s24  ;;  %p18354_p10 = pnand %p17257_p6, %p50_p9 }
  0x3d   : > { %s23406_s1 = sld [smem:[#allocation99_spill]]  ;;  %s477_s16 = scalar_lea.vmem [#allocation4], %s18348_s28 }
  0x3e   : > { %s484_s20 = sshll.u32 %s477_s16, 4  ;;  %s18369_s9 = scalar_lea.sflag [#allocation5], %s23219_s14  ;;  %s18365_s20 = int_to_ptr.vmem [resolvable:$true] %s484_s20 }
  0x3f   : > { %p18375_p12 = pneg %p18354_p10 }
  0x43   : > { %s18362_s7 = scalar_lea.hbm %s23406_s1, %s18351_s13  ;;  %s17914_s16 = scalar_lea.hbm %s23406_s1, 15360 }
  0x44   : > { %s17909_s21 = scalar_lea.hbm %s18362_s7, 3840  ;;  %p17915_p2 = scmp.lt.s32.totalorder %s18362_s7, %s23406_s1 }
  0x45   : > { %p17910_p11 = scmp.ne.s32.totalorder %s18362_s7, %s17909_s21  ;;  %p17916_p3 = scmp.lt.s32.totalorder %s17914_s16, %s17909_s21 }
  0x47   : > { %p17912_p13 = pnand %p18375_p12, %p17910_p11  ;;  %p17917_p6 = por %p17916_p3, %p17915_p2 }
  0x49   : > { %p17913_p0 = pneg %p17912_p13 }
  0x4b   : > { %p17918_p9 = pnand %p17917_p6, %p17913_p0 }
  0x4d   : > { %17921 = shalt.err (!%p17918_p9)
}
  0x4e   : > { %s17922_s14 = scalar_lea.vmem %s18365_s20, 3840  ;;  %s18187_s6 = smov [#allocation4]  }
  0x4f   : > { %p17923_p1 = scmp.ne.s32.totalorder %s18365_s20, %s17922_s14  ;;  %s17927_s18 = sshll.u32 %s18187_s6, 4  ;;  %s17928_s18 = int_to_ptr.vmem [resolvable:$false] %s17927_s18 }
  0x50   : > { %s17929_s19 = scalar_lea.vmem %s17928_s18, 7680  ;;  %p17930_p4 = scmp.lt.s32.totalorder %s18365_s20, %s17928_s18 }
  0x51   : > { %p17925_p11 = pnand %p17923_p1, %p18375_p12  ;;  %p17931_p5 = scmp.lt.s32.totalorder %s17929_s19, %s17922_s14 }
  0x53   : > { %p17926_p13 = pneg %p17925_p11  ;;  %p17932_p7 = por %p17931_p5, %p17930_p4 }
  0x55   : > { %p17933_p8 = pnand %p17932_p7, %p17926_p13 }
  0x57   : > { %17936 = shalt.err (!%p17933_p8)
}
  0x58   : > { %s23408_s5 = smov 8   ;;  %s23409_s12 = smov 128  }
  0x59   : > { %17242 = dma.hbm_to_vmem [thread:$0]  (!%p18354_p10), %s18362_s7, 3840, %s18365_s20, %s18369_s9, %s23409_s12, %s23409_s12, %s23408_s5  }
  0x5a   : > { %s18405_s14 = scalar_lea.hbm %s23202_s3, %s18351_s13  ;;  %s519_s16 = scalar_lea.vmem [#allocation7], %s18348_s28 }
  0x5b   : > { %s526_s18 = sshll.u32 %s519_s16, 4  ;;  %s18188_s19 = smov [#allocation12]   ;;  %s18408_s18 = int_to_ptr.vmem [resolvable:$true] %s526_s18 }
  0x5c   : > { %s18410_s1 = sshll.u32 %s18188_s19, 4  ;;  %s23410_s25 = sand.u32 1, %s18181_s24   ;;  %s400_s1 = int_to_ptr.vmem [resolvable:$true] %s18410_s1 }
  0x5d   : > { %s18414_s26 = scalar_lea.sflag [#allocation8], %s23410_s25  ;;  %s17937_s22 = scalar_lea.hbm %s18405_s14, 3840 }
  0x5e   : > { %p17938_p1 = scmp.ne.s32.totalorder %s18405_s14, %s17937_s22  ;;  %s17942_s6 = scalar_lea.hbm %s23202_s3, 15360 }
  0x5f   : > { %p17943_p7 = scmp.lt.s32.totalorder %s18405_s14, %s23202_s3  ;;  %p17944_p8 = scmp.lt.s32.totalorder %s17942_s6, %s17937_s22 }
  0x60   : > { %p17940_p4 = pnand %p17938_p1, %p18375_p12 }
  0x61   : > { %p17945_p0 = por %p17944_p8, %p17943_p7 }
  0x62   : > { %p17941_p5 = pneg %p17940_p4 }
  0x64   : > { %p17946_p2 = pnand %p17945_p0, %p17941_p5 }
  0x66   : > { %17949 = shalt.err (!%p17946_p2)
}
  0x67   : > { %s17950_s24 = scalar_lea.vmem %s18408_s18, 3840  ;;  %s18189_s25 = smov [#allocation7]  }
  0x68   : > { %p17951_p3 = scmp.ne.s32.totalorder %s18408_s18, %s17950_s24  ;;  %s17955_s16 = sshll.u32 %s18189_s25, 4  ;;  %s17956_s16 = int_to_ptr.vmem [resolvable:$false] %s17955_s16 }
  0x69   : > { %s17957_s19 = scalar_lea.vmem %s17956_s16, 7680  ;;  %p17958_p11 = scmp.lt.s32.totalorder %s18408_s18, %s17956_s16 }
  0x6a   : > { %p17953_p6 = pnand %p17951_p3, %p18375_p12  ;;  %p17959_p13 = scmp.lt.s32.totalorder %s17957_s19, %s17950_s24 }
  0x6c   : > { %p17954_p9 = pneg %p17953_p6  ;;  %p17960_p1 = por %p17959_p13, %p17958_p11 }
  0x6e   : > { %p17961_p4 = pnand %p17960_p1, %p17954_p9 }
  0x70   : > { %17964 = shalt.err (!%p17961_p4)
}
  0x71   : > { %17248 = dma.hbm_to_vmem [thread:$0]  (!%p18354_p10), %s18405_s14, 3840, %s18408_s18, %s18414_s26, %s23409_s12, %s23409_s12, %s23408_s5  }
  0x72   : > { %s17976_s22 = scalar_lea.vmem %s400_s1, 4608  ;;  %p23411_p7 = scmp.ne.s32.totalorder %s23400_s15, 0 }
  0x73   : > { %p17977_p5 = scmp.ne.s32.totalorder %s400_s1, %s17976_s22  ;;  %p17984_p2 = scmp.lt.s32.totalorder %s400_s1, %s400_s1 }
  0x74   : > { %p17985_p3 = scmp.lt.s32.totalorder %s17976_s22, %s17976_s22 }
  0x75   : > { %p17979_p8 = pnand %p17977_p5, %p23411_p7 }
  0x76   : > { %p17986_p6 = por %p17985_p3, %p17984_p2 }
  0x77   : > { %p17980_p0 = pneg %p17979_p8 }
  0x79   : > { %p17987_p9 = pnand %p17986_p6, %p17980_p0 }
  0x7b   : > { %17990 = shalt.err (!%p17987_p9)
}
  0x7c   : > { %p23412_p11 = scmp.ne.s32.totalorder %s23399_s30, 0  ;;  %s18190_s14 = smov [#allocation15]  }
  0x7d   : > { %s425_s18 = sshll.u32 %s18190_s14, 4  ;;  %s18191_s20 = smov [#allocation16]   ;;  %s426_s18 = int_to_ptr.vmem [resolvable:$true] %s425_s18 }
  0x7e   : > { %17226 = dma.hbm_to_vmem [thread:$0]  (!%p23412_p11), %s23207_s8, 4608, %s400_s1, [#allocation11], %s23409_s12, %s23409_s12, %s23408_s5  }
  0x7f   : > { %s438_s6 = sshll.u32 %s18191_s20, 4  ;;  %s18002_s21 = scalar_lea.vmem %s426_s18, 4608  ;;  %s439_s6 = int_to_ptr.vmem [resolvable:$true] %s438_s6 }
  0x80   : > { %p18003_p13 = scmp.ne.s32.totalorder %s426_s18, %s18002_s21  ;;  %p18010_p5 = scmp.lt.s32.totalorder %s426_s18, %s426_s18 }
  0x81   : > { %p18011_p8 = scmp.lt.s32.totalorder %s18002_s21, %s18002_s21 }
  0x82   : > { %p18005_p1 = pnand %p18003_p13, %p23411_p7 }
  0x83   : > { %p18012_p0 = por %p18011_p8, %p18010_p5 }
  0x84   : > { %p18006_p4 = pneg %p18005_p1 }
  0x86   : > { %p18013_p2 = pnand %p18012_p0, %p18006_p4 }
  0x88   : > { %18016 = shalt.err (!%p18013_p2)
}
  0x89   : > { %17232 = dma.hbm_to_vmem [thread:$0]  (!%p23412_p11), %s23209_s10, 4608, %s426_s18, [#allocation14], %s23409_s12, %s23409_s12, %s23408_s5  }
  0x8a   : > { %s18028_s25 = scalar_lea.vmem %s439_s6, 1024  ;;  %p18036_p13 = scmp.lt.s32.totalorder %s439_s6, %s439_s6 }
  0x8b   : > { %p18029_p3 = scmp.ne.s32.totalorder %s439_s6, %s18028_s25  ;;  %p18037_p1 = scmp.lt.s32.totalorder %s18028_s25, %s18028_s25 }
  0x8d   : > { %p18031_p6 = pnand %p18029_p3, %p23411_p7  ;;  %p18038_p4 = por %p18037_p1, %p18036_p13 }
  0x8f   : > { %p18032_p9 = pneg %p18031_p6 }
  0x91   : > { %p18039_p5 = pnand %p18038_p4, %p18032_p9 }
  0x93   : > { %18042 = shalt.err (!%p18039_p5)
}
  0x94   : > { %17235 = dma.hbm_to_vmem [thread:$0]  (!%p23412_p11), %s23210_s11, 1024, %s439_s6, [#allocation17], %s23409_s12, %s23409_s12, %s23408_s5  }
  0x95   : > { %s18475_s27 = scalar_lea.hbm %s23199_s0, %s18351_s13  ;;  %s456_s30 = scalar_lea.vmem [#allocation2], %s18348_s28 }
  0x96   : > { %s463_s7 = sshll.u32 %s456_s30, 4  ;;  %s18484_s20 = scalar_lea.hbm %s23201_s2, %s18351_s13  ;;  %s18478_s7 = int_to_ptr.vmem [resolvable:$true] %s463_s7 }
  0x97   : > { %s23413_s21 = sand.u32 1, %s18177_s23   ;;  %s18043_s6 = scalar_lea.hbm %s18475_s27, 3840 }
  0x98   : > { %s453_s1 = scalar_lea.sflag [#allocation3], %s23413_s21  ;;  %p18044_p7 = scmp.ne.s32.totalorder %s18475_s27, %s18043_s6 }
  0x99   : > { %s18048_s16 = scalar_lea.hbm %s23199_s0, 15360  ;;  %p18049_p0 = scmp.lt.s32.totalorder %s18475_s27, %s23199_s0 }
  0x9a   : > { %p18046_p11 = pnand %p18044_p7, %p18375_p12  ;;  %p18050_p2 = scmp.lt.s32.totalorder %s18048_s16, %s18043_s6 }
  0x9c   : > { %p18047_p8 = pneg %p18046_p11  ;;  %p18051_p3 = por %p18050_p2, %p18049_p0 }
  0x9e   : > { %p18052_p6 = pnand %p18051_p3, %p18047_p8 }
  0xa0   : > { %18055 = shalt.err (!%p18052_p6)
}
  0xa1   : > { %s18056_s22 = scalar_lea.vmem %s18478_s7, 3840  ;;  %s18192_s30 = smov [#allocation2]  }
  0xa2   : > { %p18057_p9 = scmp.ne.s32.totalorder %s18478_s7, %s18056_s22  ;;  %s18061_s14 = sshll.u32 %s18192_s30, 4  ;;  %s18062_s14 = int_to_ptr.vmem [resolvable:$false] %s18061_s14 }
  0xa3   : > { %s18063_s18 = scalar_lea.vmem %s18062_s14, 7680  ;;  %p18064_p4 = scmp.lt.s32.totalorder %s18478_s7, %s18062_s14 }
  0xa4   : > { %p18059_p13 = pnand %p18057_p9, %p18375_p12  ;;  %p18065_p5 = scmp.lt.s32.totalorder %s18063_s18, %s18056_s22 }
  0xa6   : > { %p18060_p1 = pneg %p18059_p13  ;;  %p18066_p7 = por %p18065_p5, %p18064_p4 }
  0xa8   : > { %p18067_p11 = pnand %p18066_p7, %p18060_p1 }
  0xaa   : > { %18070 = shalt.err (!%p18067_p11)
}
  0xab   : > { %17239 = dma.hbm_to_vmem [thread:$0]  (!%p18354_p10), %s18475_s27, 3840, %s18478_s7, %s453_s1, %s23409_s12, %s23409_s12, %s23408_s5  }
  0xac   : > { %s498_s21 = scalar_lea.vmem [#allocation6], %s18348_s28  ;;  %s18518_s16 = scalar_lea.hbm %s23203_s4, %s18351_s13 }
  0xad   : > { %s505_s6 = sshll.u32 %s498_s21, 4  ;;  %s18071_s19 = scalar_lea.hbm %s18484_s20, 3840  ;;  %s18512_s6 = int_to_ptr.vmem [resolvable:$true] %s505_s6 }
  0xae   : > { %p18072_p8 = scmp.ne.s32.totalorder %s18484_s20, %s18071_s19  ;;  %s18076_s30 = scalar_lea.hbm %s23201_s2, 15360 }
  0xaf   : > { %p18077_p3 = scmp.lt.s32.totalorder %s18484_s20, %s23201_s2  ;;  %p18078_p6 = scmp.lt.s32.totalorder %s18076_s30, %s18071_s19 }
  0xb0   : > { %p18074_p0 = pnand %p18072_p8, %p18375_p12 }
  0xb1   : > { %p18079_p9 = por %p18078_p6, %p18077_p3 }
  0xb2   : > { %p18075_p2 = pneg %p18074_p0 }
  0xb4   : > { %p18080_p13 = pnand %p18079_p9, %p18075_p2 }
  0xb6   : > { %18083 = shalt.err (!%p18080_p13)
}
  0xb7   : > { %s18084_s13 = scalar_lea.vmem %s18512_s6, 3840  ;;  %s18193_s7 = smov [#allocation6]  }
  0xb8   : > { %p18085_p1 = scmp.ne.s32.totalorder %s18512_s6, %s18084_s13  ;;  %s18089_s1 = sshll.u32 %s18193_s7, 4  ;;  %s18090_s1 = int_to_ptr.vmem [resolvable:$false] %s18089_s1 }
  0xb9   : > { %s18091_s18 = scalar_lea.vmem %s18090_s1, 7680  ;;  %p18092_p7 = scmp.lt.s32.totalorder %s18512_s6, %s18090_s1 }
  0xba   : > { %p18087_p4 = pnand %p18085_p1, %p18375_p12  ;;  %p18093_p11 = scmp.lt.s32.totalorder %s18091_s18, %s18084_s13 }
  0xbc   : > { %p18088_p5 = pneg %p18087_p4  ;;  %p18094_p8 = por %p18093_p11, %p18092_p7 }
  0xbe   : > { %p18095_p0 = pnand %p18094_p8, %p18088_p5 }
  0xc0   : > { %18098 = shalt.err (!%p18095_p0)
}
  0xc1   : > { %17245 = dma.hbm_to_vmem [thread:$0]  (!%p18354_p10), %s18484_s20, 3840, %s18512_s6, %s18369_s9, %s23409_s12, %s23409_s12, %s23408_s5  }
  0xc2   : > { %s540_s21 = scalar_lea.vmem [#allocation9], %s18348_s28  ;;  %s18099_s25 = scalar_lea.hbm %s18518_s16, 3840 }
  0xc3   : > { %s547_s24 = sshll.u32 %s540_s21, 4  ;;  %p18100_p2 = scmp.ne.s32.totalorder %s18518_s16, %s18099_s25  ;;  %s548_s24 = int_to_ptr.vmem [resolvable:$true] %s547_s24 }
  0xc4   : > { %s18104_s22 = scalar_lea.hbm %s23203_s4, 15360  ;;  %p18105_p9 = scmp.lt.s32.totalorder %s18518_s16, %s23203_s4 }
  0xc5   : > { %p18102_p3 = pnand %p18100_p2, %p18375_p12  ;;  %p18106_p13 = scmp.lt.s32.totalorder %s18104_s22, %s18099_s25 }
  0xc7   : > { %p18103_p6 = pneg %p18102_p3  ;;  %p18107_p1 = por %p18106_p13, %p18105_p9 }
  0xc9   : > { %p18108_p4 = pnand %p18107_p1, %p18103_p6 }
  0xcb   : > { %18111 = shalt.err (!%p18108_p4)
}
  0xcc   : > { %s18112_s9 = scalar_lea.vmem %s548_s24, 3840  ;;  %s18194_s28 = smov [#allocation9]  }
  0xcd   : > { %p18113_p5 = scmp.ne.s32.totalorder %s548_s24, %s18112_s9  ;;  %s18117_s20 = sshll.u32 %s18194_s28, 4  ;;  %s18118_s20 = int_to_ptr.vmem [resolvable:$false] %s18117_s20 }
  0xce   : > { %s18119_s6 = scalar_lea.vmem %s18118_s20, 7680  ;;  %p18120_p8 = scmp.lt.s32.totalorder %s548_s24, %s18118_s20 }
  0xcf   : > { %p18115_p7 = pnand %p18113_p5, %p18375_p12  ;;  %p18121_p0 = scmp.lt.s32.totalorder %s18119_s6, %s18112_s9 }
  0xd1   : > { %p18116_p11 = pneg %p18115_p7  ;;  %p18122_p2 = por %p18121_p0, %p18120_p8 }
  0xd3   : > { %p18123_p3 = pnand %p18122_p2, %p18116_p11 }
  0xd5   : > { %18126 = shalt.err (!%p18123_p3)
}
  0xd6   : > { %17251 = dma.hbm_to_vmem [thread:$0]  (!%p18354_p10), %s18518_s16, 3840, %s548_s24, %s18414_s26, %s23409_s12, %s23409_s12, %s23408_s5  }
  0xd7   : > { %s23414_s29 = sld [smem:[#allocation27_spill]] }
  0xdd   : > { %p23415_p12 = scmp.ne.s32.totalorder %s23414_s29, 0 }
  0xdf   : > { %591 = sbr.rel (%p23415_p12) target bundleno = 2093 (0x82d), region = 68 }
  0xe4   : > { %s23416_s27 = sld [smem:[#allocation24_spill]] }
  0xe5   : > { %s23417_s13 = sld [smem:[#allocation26_spill]] }
  0xea   : > { %s593_s7 = sand.u32 1, %s23416_s27  }
  0xeb   : > { %s17189_s1 = smul.u32 240, %s593_s7  ;;  %s594_s18 = scalar_lea.sflag [#allocation3], %s593_s7 }
  0xec   : > { %p23418_p6 = scmp.ne.s32.totalorder %s23417_s13, 0 }
  0xed   : > { %s18568_s21 = scalar_lea.vmem [#allocation2], %s17189_s1 }
  0xee   : > { %18144 = dma.done.wait (%p23418_p6), %s594_s18, 3840  }
  0xef   : > { %18146 = vsyncadd (%p23418_p6), %s594_s18, 4294963456  ;;  %s23419_s17 = sld [smem:[#allocation25_spill]]  ;;  %s18575_s26 = scalar_lea.vmem [#allocation4], %s17189_s1 }
  0xf5   : > { %s602_s25 = sand.u32 1, %s23419_s17  }
  0xf6   : > { %s603_s19 = scalar_lea.sflag [#allocation5], %s602_s25 }
  0xf7   : > { %18148 = dma.done.wait (%p23418_p6), %s603_s19, 7680  }
  0xf8   : > { %18150 = vsyncadd (%p23418_p6), %s603_s19, 4294959616  ;;  %s18581_s5 = scalar_lea.vmem [#allocation6], %s17189_s1  ;;  %s621_s12 = scalar_lea.sflag [#allocation8], %s602_s25 }
  0xf9   : > { %s18583_s16 = scalar_lea.vmem [#allocation7], %s17189_s1 }
  0xfa   : > { %18152 = dma.done.wait (%p23418_p6), %s621_s12, 7680  }
  0xfb   : > { %18154 = vsyncadd (%p23418_p6), %s621_s12, 4294959616  ;;  %s18589_s24 = scalar_lea.vmem [#allocation9], %s17189_s1  ;;  %p23420_p10 = scmp.eq.s32.totalorder %s23419_s17, 0 }
  0xfd   : > { %18156 = dma.done.wait (%p23420_p10), [#allocation11], 9216   ;;  %p23421_p9 = pmov %p23420_p10 }
  0xff   : > { %18158 = vsyncadd (%p23421_p9), [#allocation11], 4294958080  ;;  %p23422_p13 = pmov %p23421_p9 }
 0x100   : > { %p23423_p1 = pmov %p23421_p9 }
 0x101   : > { %18160 = dma.done.wait (%p23422_p13), [#allocation14], 9216  }
 0x102   : > { %18162 = vsyncadd (%p23423_p1), [#allocation14], 4294958080  ;;  %p23424_p4 = pmov %p23423_p1 }
 0x103   : > { %p23425_p5 = pmov %p23423_p1 }
 0x104   : > { %18164 = dma.done.wait (%p23424_p4), [#allocation17], 1024  }
 0x105   : > { %18166 = vsyncadd (%p23425_p5), [#allocation17], 4294966272  ;;  %v805_v0 = vld [vmem:[#allocation12 + $0x38] sm:$0xff]  ;;  %v804_v1 = vld [vmem:[#allocation12 + $0x30] sm:$0xff]  ;;  %vm806_vm0 = vcmask 261120   ;;  %s23426_s30 = sld [smem:[#allocation101_spill]] }
 0x106   : > { %15667 = vmatprep.subr.mxu0 %v805_v0  ;;  %17171 = vmatprep.subr.mxu1 %v805_v0  ;;  %v803_v2 = vld [vmem:[#allocation12 + $0x28] sm:$0xff]  ;;  %v802_v3 = vld [vmem:[#allocation12 + $0x20] sm:$0xff]  ;;  %v784_v8 = vld [vmem:[#allocation12 + $0x18] sm:$0xff]  ;;  %s18196_s28 = smov 96   ;;  %p731_p7 = scmp.lt.s32.totalorder %s23419_s17, 0  ;;  %vm13084_vm1 = vcmask 523264  }
 0x107   : > { %15668 = vmatpush3.msra.mxu0 %v805_v0  ;;  %17175 = vmatpush3.msra.mxu1 %v805_v0  ;;  %v785_v4 = vld [vmem:[%s18581_s5 + $0x1] sm:$0xff]  ;;  %v786_v6 = vld [vmem:[%s18581_s5 + $0x9] sm:$0xff]  ;;  %v18615_v10 = vld [vmem:[%s18581_s5 + $0x19] sm:$0xff]  ;;  %s23674_s1 = sld [smem:[#allocation100_spill]]  ;;  %p760_p0 = scmp.lt.s32.totalorder %s23419_s17, 3  ;;  %vm13101_vm2 = vcmask 785408  }
 0x108   : > { %15669 = vmatprep.subr.mxu0 %v804_v1  ;;  %17172 = vmatprep.subr.mxu1 %v804_v1  ;;  %v18605_v5 = vld [vmem:[%s18581_s5 + $0x61] sm:$0xff]  ;;  %v18609_v7 = vld [vmem:[%s18581_s5 + $0x69] sm:$0xff]  ;;  %v18621_v11 = vld [vmem:[%s18581_s5 + $0x79] sm:$0xff]  ;;  %s23753_s15 = sld [smem:[#allocation104_spill]] }
 0x109   : > { %15670 = vmatpush3.msra.mxu0 %v804_v1  ;;  %17176 = vmatpush3.msra.mxu1 %v804_v1  ;;  %v1213_v9 = vld [vmem:[#allocation12 + $0x58] sm:$0xff]  ;;  %v783_v14 = vld [vmem:[#allocation12 + $0x10] sm:$0xff]  ;;  %v782_v20 = vld [vmem:[#allocation12 + $0x8] sm:$0xff] }
 0x10a   : > { %15671 = vmatprep.subr.mxu0 %v803_v2  ;;  %17173 = vmatprep.subr.mxu1 %v803_v2  ;;  %v18624_v12 = vld [vmem:[%s18581_s5 + $0x21] sm:$0xff]  ;;  %v18634_v16 = vld [vmem:[%s18581_s5 + $0x31] sm:$0xff]  ;;  %v18644_v18 = vld [vmem:[%s18581_s5 + $0x39] sm:$0xff] }
 0x10b   : > { %15672 = vmatpush3.msra.mxu0 %v803_v2  ;;  %17177 = vmatpush3.msra.mxu1 %v803_v2  ;;  %v18627_v13 = vld [vmem:[%s18581_s5 + $0x81] sm:$0xff]  ;;  %v18641_v17 = vld [vmem:[%s18581_s5 + $0x91] sm:$0xff]  ;;  %v18647_v19 = vld [vmem:[%s18581_s5 + $0x99] sm:$0xff] }
 0x10c   : > { %15673 = vmatprep.subr.mxu0 %v802_v3  ;;  %17174 = vmatprep.subr.mxu1 %v802_v3  ;;  %v1212_v15 = vld [vmem:[#allocation12 + $0x50] sm:$0xff]  ;;  %v1211_v21 = vld [vmem:[#allocation12 + $0x48] sm:$0xff]  ;;  %v781_v26 = vld [vmem:[#allocation12] sm:$0xff] }
 0x10d   : > { %15674 = vmatpush3.msra.mxu0 %v802_v3  ;;  %17178 = vmatpush3.msra.mxu1 %v802_v3  ;;  %v18654_v22 = vld [vmem:[%s18581_s5 + $0x49] sm:$0xff]  ;;  %v18664_v24 = vld [vmem:[%s18581_s5 + $0x51] sm:$0xff]  ;;  %v765_v28 = vld [vmem:[%s18581_s5] sm:$0xff] }
 0x10e   : > { %15675 = vmatprep.mubr.msk.f32.mxu0 %vm806_vm0, %v785_v4  ;;  %15687 = vmatprep.mubr.msk.f32.mxu1 %vm806_vm0, %v18605_v5  ;;  %v18661_v23 = vld [vmem:[%s18581_s5 + $0xa9] sm:$0xff]  ;;  %v18667_v25 = vld [vmem:[%s18581_s5 + $0xb1] sm:$0xff]  ;;  %v18689_v35 = vld [vmem:[%s18581_s5 + $0x1a] sm:$0xff] }
 0x10f   : > { %15676 = vmatmul.mubr.msk.f32.vlgmr.msra.gmra.mxu0 %vm806_vm0, %v786_v6  ;;  %15688 = vmatmul.mubr.msk.f32.vlgmr.msra.gmra.mxu1 %vm806_vm0, %v18609_v7  ;;  %v1210_v27 = vld [vmem:[#allocation12 + $0x40] sm:$0xff]  ;;  %v766_v30 = vld [vmem:[%s18581_s5 + $0x8] sm:$0xff]  ;;  %v18684_v34 = vld [vmem:[%s18581_s5 + $0x18] sm:$0xff] }
 0x110   : > { %15699 = vmatprep.subr.mxu1 %v784_v8  ;;  %15731 = vmatprep.subr.mxu0 %v1213_v9  ;;  %v1193_v29 = vld [vmem:[%s18581_s5 + $0x2] sm:$0xff]  ;;  %v1194_v31 = vld [vmem:[%s18581_s5 + $0xa] sm:$0xff]  ;;  %v18703_v39 = vld [vmem:[%s18581_s5 + $0x32] sm:$0xff] }
 0x111   : > { %15700 = vmatpush3.msra.mxu1 %v784_v8  ;;  %15678 = vmatprep.mubr.msk.f32.mxu0 %vm806_vm0, %v18615_v10  ;;  %v1444_v32 = vld [vmem:[#allocation12 + $0x78] sm:$0xff]  ;;  %v18692_v36 = vld [vmem:[%s18581_s5 + $0x20] sm:$0xff]  ;;  %v18700_v38 = vld [vmem:[%s18581_s5 + $0x30] sm:$0xff] }
 0x112   : > { %15690 = vmatprep.mubr.msk.f32.mxu1 %vm806_vm0, %v18621_v11  ;;  %15732 = vmatpush3.msra.mxu0 %v1213_v9  ;;  %v1674_v33 = vld [vmem:[#allocation12 + $0x98] sm:$0xff]  ;;  %v1443_v40 = vld [vmem:[#allocation12 + $0x70] sm:$0xff]  ;;  %v1442_v46 = vld [vmem:[#allocation12 + $0x68] sm:$0xff] }
 0x113   : > { %15679 = vmatmul.mubr.msk.f32.gmra.mxu0 %vm806_vm0, %v18624_v12  ;;  %15691 = vmatmul.mubr.msk.f32.gmra.mxu1 %vm806_vm0, %v18627_v13  ;;  %v18695_v37 = vld [vmem:[%s18581_s5 + $0x22] sm:$0xff]  ;;  %v18716_v42 = vld [vmem:[%s18581_s5 + $0x38] sm:$0xff]  ;;  %v18725_v45 = vld [vmem:[%s18581_s5 + $0x4a] sm:$0xff] }
 0x114   : > { %15701 = vmatprep.subr.mxu1 %v783_v14  ;;  %15733 = vmatprep.subr.mxu0 %v1212_v15  ;;  %v1673_v41 = vld [vmem:[#allocation12 + $0x90] sm:$0xff]  ;;  %v18722_v44 = vld [vmem:[%s18581_s5 + $0x48] sm:$0xff]  ;;  %v1441_v52 = vld [vmem:[#allocation12 + $0x60] sm:$0xff] }
 0x115   : > { %15702 = vmatpush3.msra.mxu1 %v783_v14  ;;  %15681 = vmatprep.mubr.msk.f32.mxu0 %vm806_vm0, %v18634_v16  ;;  %v18719_v43 = vld [vmem:[%s18581_s5 + $0x3a] sm:$0xff]  ;;  %v18736_v48 = vld [vmem:[%s18581_s5 + $0x50] sm:$0xff]  ;;  %v18745_v51 = vld [vmem:[%s18581_s5 + $0x62] sm:$0xff] }
 0x116   : > { %15693 = vmatprep.mubr.msk.f32.mxu1 %vm806_vm0, %v18641_v17  ;;  %15734 = vmatpush3.msra.mxu0 %v1212_v15  ;;  %v1672_v47 = vld [vmem:[#allocation12 + $0x88] sm:$0xff]  ;;  %v18742_v50 = vld [vmem:[%s18581_s5 + $0x60] sm:$0xff]  ;;  %v1904_v58 = vld [vmem:[#allocation12 + $0xb8] sm:$0xff] }
 0x117   : > { %15682 = vmatmul.mubr.msk.f32.gmra.mxu0 %vm806_vm0, %v18644_v18  ;;  %15694 = vmatmul.mubr.msk.f32.gmra.mxu1 %vm806_vm0, %v18647_v19  ;;  %v18739_v49 = vld [vmem:[%s18581_s5 + $0x52] sm:$0xff]  ;;  %v18756_v54 = vld [vmem:[%s18581_s5 + $0x68] sm:$0xff]  ;;  %v18765_v57 = vld [vmem:[%s18581_s5 + $0x7a] sm:$0xff] }
 0x118   : > { %15703 = vmatprep.subr.mxu1 %v782_v20  ;;  %15735 = vmatprep.subr.mxu0 %v1211_v21  ;;  %v1671_v53 = vld [vmem:[#allocation12 + $0x80] sm:$0xff]  ;;  %v18762_v56 = vld [vmem:[%s18581_s5 + $0x78] sm:$0xff]  ;;  %v18802_v2 = vld [vmem:[%s18581_s5 + $0xa8] sm:$0xff] }
 0x119   : > { %15704 = vmatpush3.msra.mxu1 %v782_v20  ;;  %15684 = vmatprep.mubr.msk.f32.mxu0 %vm806_vm0, %v18654_v22  ;;  %v18759_v55 = vld [vmem:[%s18581_s5 + $0x6a] sm:$0xff]  ;;  %v18776_v60 = vld [vmem:[%s18581_s5 + $0x80] sm:$0xff]  ;;  %v18785_v63 = vld [vmem:[%s18581_s5 + $0x92] sm:$0xff] }
 0x11a   : > { %15696 = vmatprep.mubr.msk.f32.mxu1 %vm806_vm0, %v18661_v23  ;;  %15736 = vmatpush3.msra.mxu0 %v1211_v21  ;;  %v2135_v59 = vld [vmem:[#allocation12 + $0xd8] sm:$0xff]  ;;  %v18782_v62 = vld [vmem:[%s18581_s5 + $0x90] sm:$0xff] }
 0x11b   : > { %15685 = vmatmul.mubr.msk.f32.gmra.mxu0 %vm806_vm0, %v18664_v24  ;;  %15697 = vmatmul.mubr.msk.f32.gmra.mxu1 %vm806_vm0, %v18667_v25  ;;  %v18779_v61 = vld [vmem:[%s18581_s5 + $0x82] sm:$0xff]  ;;  %v18796_v0 = vld [vmem:[%s18581_s5 + $0x98] sm:$0xff]  ;;  %v18805_v3 = vld [vmem:[%s18581_s5 + $0xaa] sm:$0xff] }
 0x11c   : > { %15705 = vmatprep.subr.mxu1 %v781_v26  ;;  %15737 = vmatprep.subr.mxu0 %v1210_v27  ;;  %v18799_v1 = vld [vmem:[%s18581_s5 + $0x9a] sm:$0xff]  ;;  %v18816_v4 = vld [vmem:[%s18581_s5 + $0xb0] sm:$0xff] }
 0x11d   : > { %15706 = vmatpush3.msra.mxu1 %v781_v26  ;;  %15707 = vmatprep.mubr.msk.f32.mxu1 %vm806_vm0, %v765_v28  ;;  %v18819_v6 = vld [vmem:[%s18581_s5 + $0xb2] sm:$0xff]  ;;  %v13425_v26 = vld [vmem:[%s18581_s5 + $0xc0] sm:$0xff]  ;;  %v13426_v28 = vld [vmem:[%s18581_s5 + $0xc8] sm:$0xff] }
 0x11e   : > { %15738 = vmatpush3.msra.mxu0 %v1210_v27  ;;  %15739 = vmatprep.mubr.msk.f32.mxu0 %vm806_vm0, %v1193_v29  ;;  %v1903_v8 = vld [vmem:[#allocation12 + $0xb0] sm:$0xff]  ;;  %v1901_v14 = vld [vmem:[#allocation12 + $0xa0] sm:$0xff]  ;;  %v2365_v20 = vld [vmem:[#allocation12 + $0xf8] sm:$0xff] }
 0x11f   : > { %15708 = vmatmul.mubr.msk.f32.vlgmr.msra.gmra.mxu1 %vm806_vm0, %v766_v30  ;;  %15740 = vmatmul.mubr.msk.f32.vlgmr.msra.gmra.mxu0 %vm806_vm0, %v1194_v31  ;;  %v2134_v9 = vld [vmem:[#allocation12 + $0xd0] sm:$0xff]  ;;  %v2132_v15 = vld [vmem:[#allocation12 + $0xc0] sm:$0xff]  ;;  %v2595_v21 = vld [vmem:[#allocation12 + $0x118] sm:$0xff] }
 0x120   : > { %15763 = vmatprep.subr.mxu1 %v1444_v32  ;;  %15795 = vmatprep.subr.mxu0 %v1674_v33  ;;  %v18879_v27 = vld [vmem:[%s18581_s5 + $0xc1] sm:$0xff]  ;;  %v18890_v29 = vld [vmem:[%s18581_s5 + $0xc9] sm:$0xff] }
 0x121   : > { %15764 = vmatpush3.msra.mxu1 %v1444_v32  ;;  %15710 = vmatprep.mubr.msk.f32.mxu1 %vm806_vm0, %v18684_v34  ;;  %v2364_v30 = vld [vmem:[#allocation12 + $0xf0] sm:$0xff]  ;;  %v2363_v32 = vld [vmem:[#allocation12 + $0xe8] sm:$0xff] }
 0x122   : > { %15742 = vmatprep.mubr.msk.f32.mxu0 %vm806_vm0, %v18689_v35  ;;  %15796 = vmatpush3.msra.mxu0 %v1674_v33  ;;  %v2594_v31 = vld [vmem:[#allocation12 + $0x110] sm:$0xff]  ;;  %v2593_v33 = vld [vmem:[#allocation12 + $0x108] sm:$0xff] }
 0x123   : > { %15711 = vmatmul.mubr.msk.f32.gmra.mxu1 %vm806_vm0, %v18692_v36  ;;  %15743 = vmatmul.mubr.msk.f32.gmra.mxu0 %vm806_vm0, %v18695_v37 }
 0x124   : > { %15713 = vmatprep.mubr.msk.f32.mxu1 %vm806_vm0, %v18700_v38  ;;  %15745 = vmatprep.mubr.msk.f32.mxu0 %vm806_vm0, %v18703_v39 }
 0x125   : > { %15765 = vmatprep.subr.mxu1 %v1443_v40  ;;  %15797 = vmatprep.subr.mxu0 %v1673_v41 }
 0x126   : > { %15766 = vmatpush3.msra.mxu1 %v1443_v40  ;;  %15798 = vmatpush3.msra.mxu0 %v1673_v41  ;;  %v13521_v40 = vld [vmem:[%s18581_s5 + $0xd8] sm:$0xff]  ;;  %v13490_v41 = vld [vmem:[%s18581_s5 + $0xca] sm:$0xff] }
 0x127   : > { %15714 = vmatmul.mubr.msk.f32.gmra.mxu1 %vm806_vm0, %v18716_v42  ;;  %15746 = vmatmul.mubr.msk.f32.gmra.mxu0 %vm806_vm0, %v18719_v43 }
 0x128   : > { %15716 = vmatprep.mubr.msk.f32.mxu1 %vm806_vm0, %v18722_v44  ;;  %15748 = vmatprep.mubr.msk.f32.mxu0 %vm806_vm0, %v18725_v45 }
 0x129   : > { %15767 = vmatprep.subr.mxu1 %v1442_v46  ;;  %15799 = vmatprep.subr.mxu0 %v1672_v47 }
 0x12a   : > { %15768 = vmatpush3.msra.mxu1 %v1442_v46  ;;  %15800 = vmatpush3.msra.mxu0 %v1672_v47  ;;  %v13621_v46 = vld [vmem:[%s23426_s30 + $0x30] sm:$0xff] }
 0x12b   : > { %15717 = vmatmul.mubr.msk.f32.gmra.mxu1 %vm806_vm0, %v18736_v48  ;;  %15749 = vmatmul.mubr.msk.f32.gmra.mxu0 %vm806_vm0, %v18739_v49  ;;  %v19059_v47 = vld [vmem:[%s18568_s21 + $0x19] sm:$0xff] }
 0x12c   : > { %15719 = vmatprep.mubr.msk.f32.mxu1 %vm806_vm0, %v18742_v50  ;;  %15751 = vmatprep.mubr.msk.f32.mxu0 %vm806_vm0, %v18745_v51 }
 0x12d   : > { %15769 = vmatprep.subr.mxu1 %v1441_v52  ;;  %15801 = vmatprep.subr.mxu0 %v1671_v53 }
 0x12e   : > { %15770 = vmatpush3.msra.mxu1 %v1441_v52  ;;  %15802 = vmatpush3.msra.mxu0 %v1671_v53  ;;  %v19080_v52 = vld [vmem:[%s18568_s21 + $0x30] sm:$0xff] }
 0x12f   : > { %15720 = vmatmul.mubr.msk.f32.gmra.mxu1 %vm806_vm0, %v18756_v54  ;;  %15752 = vmatmul.mubr.msk.f32.gmra.mxu0 %vm806_vm0, %v18759_v55  ;;  %v19083_v53 = vld [vmem:[%s18568_s21 + $0x31] sm:$0xff] }
 0x130   : > { %15722 = vmatprep.mubr.msk.f32.mxu1 %vm806_vm0, %v18762_v56  ;;  %15754 = vmatprep.mubr.msk.f32.mxu0 %vm806_vm0, %v18765_v57 }
 0x131   : > { %15827 = vmatprep.subr.mxu1 %v1904_v58  ;;  %15859 = vmatprep.subr.mxu0 %v2135_v59 }
 0x133   : > { %15723 = vmatmul.mubr.msk.f32.gmra.mxu1 %vm806_vm0, %v18776_v60  ;;  %15755 = vmatmul.mubr.msk.f32.gmra.mxu0 %vm806_vm0, %v18779_v61 }
 0x134   : > { %15725 = vmatprep.mubr.msk.f32.mxu1 %vm806_vm0, %v18782_v62  ;;  %15757 = vmatprep.mubr.msk.f32.mxu0 %vm806_vm0, %v18785_v63 }
 0x137   : > { %15726 = vmatmul.mubr.msk.f32.gmra.mxu1 %vm806_vm0, %v18796_v0  ;;  %15758 = vmatmul.mubr.msk.f32.gmra.mxu0 %vm806_vm0, %v18799_v1 }
 0x138   : > { %15728 = vmatprep.mubr.msk.f32.mxu1 %vm806_vm0, %v18802_v2  ;;  %15760 = vmatprep.mubr.msk.f32.mxu0 %vm806_vm0, %v18805_v3 }
 0x13b   : > { %15729 = vmatmul.mubr.msk.f32.gmra.mxu1 %vm806_vm0, %v18816_v4  ;;  %15761 = vmatmul.mubr.msk.f32.gmra.mxu0 %vm806_vm0, %v18819_v6 }
 0x13c   : > { %15771 = vmatprep.mubr.msk.f32.mxu1 %vm806_vm0, %v18684_v34  ;;  %15803 = vmatprep.mubr.msk.f32.mxu0 %vm806_vm0, %v18615_v10  ;;  %v1902_v10 = vld [vmem:[#allocation12 + $0xa8] sm:$0xff]  ;;  %v2362_v34 = vld [vmem:[#allocation12 + $0xe0] sm:$0xff] }
 0x13f   : > { %15772 = vmatmul.mubr.msk.f32.vlgmr.msra.gmra.mxu1 %vm806_vm0, %v18692_v36  ;;  %15804 = vmatmul.mubr.msk.f32.vlgmr.msra.gmra.mxu0 %vm806_vm0, %v18624_v12  ;;  %v2133_v12 = vld [vmem:[#allocation12 + $0xc8] sm:$0xff]  ;;  %v2824_v36 = vld [vmem:[%s23426_s30 + $0x18] sm:$0xff] }
 0x140   : > { %15828 = vmatpush3.msra.mxu1 %v1904_v58  ;;  %15774 = vmatprep.mubr.msk.f32.mxu1 %vm806_vm0, %v18700_v38  ;;  %v19106_v58 = vld [vmem:[%s18568_s21 + $0x48] sm:$0xff] }
 0x141   : > { %15806 = vmatprep.mubr.msk.f32.mxu0 %vm806_vm0, %v18634_v16  ;;  %15860 = vmatpush3.msra.mxu0 %v2135_v59  ;;  %v19109_v59 = vld [vmem:[%s18568_s21 + $0x49] sm:$0xff] }
 0x142   : > { %15829 = vmatprep.subr.mxu1 %v1903_v8  ;;  %15861 = vmatprep.subr.mxu0 %v2134_v9 }
 0x143   : > { %15775 = vmatmul.mubr.msk.f32.gmra.mxu1 %vm806_vm0, %v18716_v42  ;;  %15807 = vmatmul.mubr.msk.f32.gmra.mxu0 %vm806_vm0, %v18644_v18 }
 0x144   : > { %15777 = vmatprep.mubr.msk.f32.mxu1 %vm806_vm0, %v18722_v44  ;;  %15809 = vmatprep.mubr.msk.f32.mxu0 %vm806_vm0, %v18654_v22 }
 0x145   : > { %15830 = vmatpush3.msra.mxu1 %v1903_v8  ;;  %15862 = vmatpush3.msra.mxu0 %v2134_v9  ;;  %v19158_v8 = vld [vmem:[%s18568_s21 + $0x78] sm:$0xff] }
 0x146   : > { %15831 = vmatprep.subr.mxu1 %v1902_v10  ;;  %15863 = vmatprep.subr.mxu0 %v2133_v12  ;;  %v19161_v9 = vld [vmem:[%s18568_s21 + $0x79] sm:$0xff] }
 0x147   : > { %15778 = vmatmul.mubr.msk.f32.gmra.mxu1 %vm806_vm0, %v18736_v48  ;;  %15810 = vmatmul.mubr.msk.f32.gmra.mxu0 %vm806_vm0, %v18664_v24 }
 0x148   : > { %15780 = vmatprep.mubr.msk.f32.mxu1 %vm806_vm0, %v18742_v50  ;;  %15812 = vmatprep.mubr.msk.f32.mxu0 %vm806_vm0, %v18605_v5 }
 0x149   : > { %15832 = vmatpush3.msra.mxu1 %v1902_v10  ;;  %15864 = vmatpush3.msra.mxu0 %v2133_v12  ;;  %v19172_v10 = vld [vmem:[%s18568_s21 + $0x80] sm:$0xff] }
 0x14a   : > { %15833 = vmatprep.subr.mxu1 %v1901_v14  ;;  %15865 = vmatprep.subr.mxu0 %v2132_v15  ;;  %v19175_v12 = vld [vmem:[%s18568_s21 + $0x81] sm:$0xff] }
 0x14b   : > { %15781 = vmatmul.mubr.msk.f32.gmra.mxu1 %vm806_vm0, %v18756_v54  ;;  %15813 = vmatmul.mubr.msk.f32.gmra.mxu0 %vm806_vm0, %v18609_v7 }
 0x14c   : > { %15783 = vmatprep.mubr.msk.f32.mxu1 %vm806_vm0, %v18762_v56  ;;  %15815 = vmatprep.mubr.msk.f32.mxu0 %vm806_vm0, %v18621_v11 }
 0x14d   : > { %15834 = vmatpush3.msra.mxu1 %v1901_v14  ;;  %15866 = vmatpush3.msra.mxu0 %v2132_v15  ;;  %v19178_v14 = vld [vmem:[%s18568_s21 + $0x90] sm:$0xff] }
 0x14e   : > { %15891 = vmatprep.subr.mxu1 %v2365_v20  ;;  %15923 = vmatprep.subr.mxu0 %v2595_v21  ;;  %v19181_v15 = vld [vmem:[%s18568_s21 + $0x91] sm:$0xff] }
 0x14f   : > { %15784 = vmatmul.mubr.msk.f32.gmra.mxu1 %vm806_vm0, %v18776_v60  ;;  %15816 = vmatmul.mubr.msk.f32.gmra.mxu0 %vm806_vm0, %v18627_v13 }
 0x150   : > { %15786 = vmatprep.mubr.msk.f32.mxu1 %vm806_vm0, %v18782_v62  ;;  %15818 = vmatprep.mubr.msk.f32.mxu0 %vm806_vm0, %v18641_v17 }
 0x153   : > { %15787 = vmatmul.mubr.msk.f32.gmra.mxu1 %vm806_vm0, %v18796_v0  ;;  %15819 = vmatmul.mubr.msk.f32.gmra.mxu0 %vm806_vm0, %v18647_v19 }
 0x154   : > { %15789 = vmatprep.mubr.msk.f32.mxu1 %vm806_vm0, %v18802_v2  ;;  %15821 = vmatprep.mubr.msk.f32.mxu0 %vm806_vm0, %v18661_v23 }
 0x157   : > { %15790 = vmatmul.mubr.msk.f32.gmra.mxu1 %vm806_vm0, %v18816_v4  ;;  %15822 = vmatmul.mubr.msk.f32.gmra.mxu0 %vm806_vm0, %v18667_v25 }
 0x158   : > { %15792 = vmatprep.mubr.msk.f32.mxu1 %vm806_vm0, %v13425_v26  ;;  %15824 = vmatprep.mubr.msk.f32.mxu0 %vm806_vm0, %v18879_v27 }
 0x15b   : > { %15793 = vmatmul.mubr.msk.f32.gmra.mxu1 %vm806_vm0, %v13426_v28  ;;  %15825 = vmatmul.mubr.msk.f32.gmra.mxu0 %vm806_vm0, %v18890_v29 }
 0x15c   : > { %15835 = vmatprep.mubr.msk.f32.mxu1 %vm806_vm0, %v18689_v35  ;;  %15867 = vmatprep.mubr.msk.f32.mxu0 %vm806_vm0, %v18700_v38  ;;  %v2592_v35 = vld [vmem:[#allocation12 + $0x100] sm:$0xff] }
 0x15d   : > { %v13489_v38 = vld [vmem:[%s18581_s5 + $0xc2] sm:$0xff] }
 0x15f   : > { %15836 = vmatmul.mubr.msk.f32.vlgmr.msra.gmra.mxu1 %vm806_vm0, %v18695_v37  ;;  %15868 = vmatmul.mubr.msk.f32.vlgmr.msra.gmra.mxu0 %vm806_vm0, %v18716_v42  ;;  %v13622_v37 = vld [vmem:[%s23426_s30 + $0x38] sm:$0xff]  ;;  %v13522_v42 = vld [vmem:[%s18581_s5 + $0xe0] sm:$0xff] }
 0x160   : > { %15892 = vmatpush3.msra.mxu1 %v2365_v20  ;;  %15838 = vmatprep.mubr.msk.f32.mxu1 %vm806_vm0, %v18703_v39  ;;  %v19192_v20 = vld [vmem:[%s18568_s21 + $0x98] sm:$0xff] }
 0x161   : > { %15870 = vmatprep.mubr.msk.f32.mxu0 %vm806_vm0, %v18722_v44  ;;  %15924 = vmatpush3.msra.mxu0 %v2595_v21  ;;  %v2823_v44 = vld [vmem:[%s23426_s30 + $0x10] sm:$0xff] }
 0x162   : > { %15893 = vmatprep.subr.mxu1 %v2364_v30  ;;  %15925 = vmatprep.subr.mxu0 %v2594_v31  ;;  %v19195_v21 = vld [vmem:[%s18568_s21 + $0x99] sm:$0xff] }
 0x163   : > { %15839 = vmatmul.mubr.msk.f32.gmra.mxu1 %vm806_vm0, %v18719_v43  ;;  %15871 = vmatmul.mubr.msk.f32.gmra.mxu0 %vm806_vm0, %v18736_v48  ;;  %v13641_v48 = vld [vmem:[%s23426_s30 + $0x50] sm:$0xff] }
 0x164   : > { %15841 = vmatprep.mubr.msk.f32.mxu1 %vm806_vm0, %v18725_v45  ;;  %15873 = vmatprep.mubr.msk.f32.mxu0 %vm806_vm0, %v18742_v50  ;;  %v19072_v50 = vld [vmem:[%s18568_s21 + $0x20] sm:$0xff] }
 0x165   : > { %15894 = vmatpush3.msra.mxu1 %v2364_v30  ;;  %15926 = vmatpush3.msra.mxu0 %v2594_v31  ;;  %v3264_v30 = vld [vmem:[%s18568_s21 + $0x2] sm:$0xff]  ;;  %v3265_v31 = vld [vmem:[%s18568_s21 + $0xa] sm:$0xff] }
 0x166   : > { %15895 = vmatprep.subr.mxu1 %v2363_v32  ;;  %15927 = vmatprep.subr.mxu0 %v2593_v33 }
 0x167   : > { %15842 = vmatmul.mubr.msk.f32.gmra.mxu1 %vm806_vm0, %v18739_v49  ;;  %15874 = vmatmul.mubr.msk.f32.gmra.mxu0 %vm806_vm0, %v18756_v54  ;;  %v13640_v54 = vld [vmem:[%s23426_s30 + $0x48] sm:$0xff] }
 0x168   : > { %15844 = vmatprep.mubr.msk.f32.mxu1 %vm806_vm0, %v18745_v51  ;;  %15876 = vmatprep.mubr.msk.f32.mxu0 %vm806_vm0, %v18762_v56  ;;  %v19100_v56 = vld [vmem:[%s18568_s21 + $0x38] sm:$0xff] }
 0x169   : > { %15896 = vmatpush3.msra.mxu1 %v2363_v32  ;;  %15928 = vmatpush3.msra.mxu0 %v2593_v33  ;;  %v19227_v32 = vld [vmem:[%s18568_s21 + $0x1a] sm:$0xff] }
 0x16a   : > { %15897 = vmatprep.subr.mxu1 %v2362_v34  ;;  %15929 = vmatprep.subr.mxu0 %v2592_v35  ;;  %v13713_v33 = vld [vmem:[%s23426_s30 + $0x90] sm:$0xff] }
 0x16b   : > { %15845 = vmatmul.mubr.msk.f32.gmra.mxu1 %vm806_vm0, %v18759_v55  ;;  %15877 = vmatmul.mubr.msk.f32.gmra.mxu0 %vm806_vm0, %v18776_v60  ;;  %v13639_v60 = vld [vmem:[%s23426_s30 + $0x40] sm:$0xff] }
 0x16c   : > { %15847 = vmatprep.mubr.msk.f32.mxu1 %vm806_vm0, %v18765_v57  ;;  %15879 = vmatprep.mubr.msk.f32.mxu0 %vm806_vm0, %v18782_v62  ;;  %v19126_v62 = vld [vmem:[%s18568_s21 + $0x50] sm:$0xff] }
 0x16d   : > { %15898 = vmatpush3.msra.mxu1 %v2362_v34  ;;  %15930 = vmatpush3.msra.mxu0 %v2592_v35  ;;  %v13749_v34 = vld [vmem:[%s23426_s30 + $0xb0] sm:$0xff] }
 0x16e   : > { %15955 = vmatprep.subr.mxu1 %v2824_v36  ;;  %15987 = vmatprep.subr.mxu0 %v13622_v37  ;;  %v19241_v35 = vld [vmem:[%s18568_s21 + $0x22] sm:$0xff] }
 0x16f   : > { %15848 = vmatmul.mubr.msk.f32.gmra.mxu1 %vm806_vm0, %v18779_v61  ;;  %15880 = vmatmul.mubr.msk.f32.gmra.mxu0 %vm806_vm0, %v18796_v0  ;;  %v19132_v0 = vld [vmem:[%s18568_s21 + $0x60] sm:$0xff] }
 0x170   : > { %15850 = vmatprep.mubr.msk.f32.mxu1 %vm806_vm0, %v18785_v63  ;;  %15882 = vmatprep.mubr.msk.f32.mxu0 %vm806_vm0, %v18802_v2  ;;  %v13714_v2 = vld [vmem:[%s23426_s30 + $0x98] sm:$0xff] }
 0x173   : > { %15851 = vmatmul.mubr.msk.f32.gmra.mxu1 %vm806_vm0, %v18799_v1  ;;  %15883 = vmatmul.mubr.msk.f32.gmra.mxu0 %vm806_vm0, %v18816_v4  ;;  %v19152_v4 = vld [vmem:[%s18568_s21 + $0x68] sm:$0xff] }
 0x174   : > { %15853 = vmatprep.mubr.msk.f32.mxu1 %vm806_vm0, %v18805_v3  ;;  %15885 = vmatprep.mubr.msk.f32.mxu0 %vm806_vm0, %v13425_v26  ;;  %v19198_v26 = vld [vmem:[%s18568_s21 + $0xa8] sm:$0xff] }
 0x177   : > { %15854 = vmatmul.mubr.msk.f32.gmra.mxu1 %vm806_vm0, %v18819_v6  ;;  %15886 = vmatmul.mubr.msk.f32.gmra.mxu0 %vm806_vm0, %v13426_v28  ;;  %v19212_v28 = vld [vmem:[%s18568_s21 + $0xb0] sm:$0xff] }
 0x178   : > { %15856 = vmatprep.mubr.msk.f32.mxu1 %vm806_vm0, %v13489_v38  ;;  %15888 = vmatprep.mubr.msk.f32.mxu0 %vm806_vm0, %v13521_v40  ;;  %23427 = vst [vmem:[#allocation30_spill] sm:$0xff] %v19212_v28  ;;  %v19263_v40 = vld [vmem:[%s18568_s21 + $0x3a] sm:$0xff] }
 0x179   : > { %23429 = vst [vmem:[#allocation32_spill] sm:$0xff] %v19263_v40 }
 0x17b   : > { %15857 = vmatmul.mubr.msk.f32.gmra.mxu1 %vm806_vm0, %v13490_v41  ;;  %15889 = vmatmul.mubr.msk.f32.gmra.mxu0 %vm806_vm0, %v13522_v42  ;;  %v13711_v42 = vld [vmem:[%s23426_s30 + $0x80] sm:$0xff] }
 0x17c   : > { %15899 = vmatprep.mubr.msk.f32.mxu1 %vm806_vm0, %v18634_v16  ;;  %15931 = vmatprep.mubr.msk.f32.mxu0 %vm806_vm0, %v18703_v39  ;;  %v2822_v16 = vld [vmem:[%s23426_s30 + $0x8] sm:$0xff] }
 0x17d   : > { %v2806_v39 = vld [vmem:[%s18568_s21 + $0x8] sm:$0xff] }
 0x17f   : > { %15900 = vmatmul.mubr.msk.f32.vlgmr.msra.gmra.mxu1 %vm806_vm0, %v18644_v18  ;;  %15932 = vmatmul.mubr.msk.f32.vlgmr.msra.gmra.mxu0 %vm806_vm0, %v18719_v43  ;;  %v13620_v18 = vld [vmem:[%s23426_s30 + $0x28] sm:$0xff] }
 0x180   : > { %15956 = vmatpush3.msra.mxu1 %v2824_v36  ;;  %15902 = vmatprep.mubr.msk.f32.mxu1 %vm806_vm0, %v18654_v22  ;;  %v2821_v22 = vld [vmem:[%s23426_s30] sm:$0xff] }
 0x181   : > { %15934 = vmatprep.mubr.msk.f32.mxu0 %vm806_vm0, %v18725_v45  ;;  %15988 = vmatpush3.msra.mxu0 %v13622_v37  ;;  %v3035_v43 = vld [vmem:[%s18568_s21 + $0x9] sm:$0xff]  ;;  %v19056_v45 = vld [vmem:[%s18568_s21 + $0x18] sm:$0xff] }
 0x182   : > { %15957 = vmatprep.subr.mxu1 %v2823_v44  ;;  %15989 = vmatprep.subr.mxu0 %v13621_v46  ;;  %v19246_v36 = vld [vmem:[%s18568_s21 + $0x32] sm:$0xff] }
 0x183   : > { %15903 = vmatmul.mubr.msk.f32.gmra.mxu1 %vm806_vm0, %v18664_v24  ;;  %15935 = vmatmul.mubr.msk.f32.gmra.mxu0 %vm806_vm0, %v18739_v49  ;;  %v2805_v24 = vld [vmem:[%s18568_s21] sm:$0xff]  ;;  %23428 = vst [vmem:[#allocation31_spill] sm:$0xff] %v19246_v36  ;;  %v13712_v37 = vld [vmem:[%s23426_s30 + $0x88] sm:$0xff] }
 0x184   : > { %15905 = vmatprep.mubr.msk.f32.mxu1 %vm806_vm0, %v18605_v5  ;;  %15937 = vmatprep.mubr.msk.f32.mxu0 %vm806_vm0, %v18745_v51  ;;  %v13619_v5 = vld [vmem:[%s23426_s30 + $0x20] sm:$0xff]  ;;  %v13677_v49 = vld [vmem:[%s23426_s30 + $0x70] sm:$0xff] }
 0x185   : > { %15958 = vmatpush3.msra.mxu1 %v2823_v44  ;;  %15990 = vmatpush3.msra.mxu0 %v13621_v46  ;;  %v19075_v51 = vld [vmem:[%s18568_s21 + $0x21] sm:$0xff]  ;;  %v19283_v46 = vld [vmem:[%s18568_s21 + $0x52] sm:$0xff] }
 0x186   : > { %15959 = vmatprep.subr.mxu1 %v2822_v16  ;;  %15991 = vmatprep.subr.mxu0 %v13620_v18  ;;  %v13747_v44 = vld [vmem:[%s23426_s30 + $0xa0] sm:$0xff] }
 0x187   : > { %15906 = vmatmul.mubr.msk.f32.gmra.mxu1 %vm806_vm0, %v18609_v7  ;;  %15938 = vmatmul.mubr.msk.f32.gmra.mxu0 %vm806_vm0, %v18759_v55  ;;  %v13642_v7 = vld [vmem:[%s23426_s30 + $0x58] sm:$0xff]  ;;  %v13676_v55 = vld [vmem:[%s23426_s30 + $0x68] sm:$0xff] }
 0x188   : > { %15908 = vmatprep.mubr.msk.f32.mxu1 %vm806_vm0, %v18621_v11  ;;  %15940 = vmatprep.mubr.msk.f32.mxu0 %vm806_vm0, %v18765_v57  ;;  %v13678_v11 = vld [vmem:[%s23426_s30 + $0x78] sm:$0xff] }
 0x189   : > { %15960 = vmatpush3.msra.mxu1 %v2822_v16  ;;  %15992 = vmatpush3.msra.mxu0 %v13620_v18  ;;  %v19103_v57 = vld [vmem:[%s18568_s21 + $0x39] sm:$0xff]  ;;  %v19286_v16 = vld [vmem:[%s18568_s21 + $0x62] sm:$0xff] }
 0x18a   : > { %15961 = vmatprep.subr.mxu1 %v2821_v22  ;;  %15993 = vmatprep.subr.mxu0 %v13619_v5  ;;  %v13786_v18 = vld [vmem:[%s23426_s30 + $0xd8] sm:$0xff] }
 0x18b   : > { %15909 = vmatmul.mubr.msk.f32.gmra.mxu1 %vm806_vm0, %v18627_v13  ;;  %15941 = vmatmul.mubr.msk.f32.gmra.mxu0 %vm806_vm0, %v18779_v61  ;;  %v13553_v13 = vld [vmem:[%s18581_s5 + $0xd9] sm:$0xff] }
 0x18c   : > { %15911 = vmatprep.mubr.msk.f32.mxu1 %vm806_vm0, %v18641_v17  ;;  %15943 = vmatprep.mubr.msk.f32.mxu0 %vm806_vm0, %v18785_v63  ;;  %v13585_v17 = vld [vmem:[%s18581_s5 + $0xda] sm:$0xff]  ;;  %v19129_v63 = vld [vmem:[%s18568_s21 + $0x51] sm:$0xff] }
 0x18d   : > { %15962 = vmatpush3.msra.mxu1 %v2821_v22  ;;  %15994 = vmatpush3.msra.mxu0 %v13619_v5  ;;  %v13675_v61 = vld [vmem:[%s23426_s30 + $0x60] sm:$0xff]  ;;  %v13822_v22 = vld [vmem:[%s23426_s30 + $0xf8] sm:$0xff] }
 0x18e   : > { %16019 = vmatprep.subr.mxu1 %v13642_v7  ;;  %16051 = vmatprep.subr.mxu0 %v13678_v11  ;;  %v19303_v5 = vld [vmem:[%s18568_s21 + $0x6a] sm:$0xff] }
 0x18f   : > { %15912 = vmatmul.mubr.msk.f32.gmra.mxu1 %vm806_vm0, %v18647_v19  ;;  %15944 = vmatmul.mubr.msk.f32.gmra.mxu0 %vm806_vm0, %v18799_v1  ;;  %v13554_v19 = vld [vmem:[%s18581_s5 + $0xe1] sm:$0xff] }
 0x190   : > { %15914 = vmatprep.mubr.msk.f32.mxu1 %vm806_vm0, %v18661_v23  ;;  %15946 = vmatprep.mubr.msk.f32.mxu0 %vm806_vm0, %v18805_v3  ;;  %v13586_v23 = vld [vmem:[%s18581_s5 + $0xe2] sm:$0xff] }
 0x191   : > { %v19135_v1 = vld [vmem:[%s18568_s21 + $0x61] sm:$0xff] }
 0x192   : > { %v13750_v3 = vld [vmem:[%s23426_s30 + $0xb8] sm:$0xff] }
 0x193   : > { %15915 = vmatmul.mubr.msk.f32.gmra.mxu1 %vm806_vm0, %v18667_v25  ;;  %15947 = vmatmul.mubr.msk.f32.gmra.mxu0 %vm806_vm0, %v18819_v6  ;;  %v3034_v25 = vld [vmem:[%s18568_s21 + $0x1] sm:$0xff]  ;;  %v19155_v6 = vld [vmem:[%s18568_s21 + $0x69] sm:$0xff] }
 0x194   : > { %15917 = vmatprep.mubr.msk.f32.mxu1 %vm806_vm0, %v18879_v27  ;;  %15949 = vmatprep.mubr.msk.f32.mxu0 %vm806_vm0, %v13489_v38  ;;  %v19201_v27 = vld [vmem:[%s18568_s21 + $0xa9] sm:$0xff] }
 0x195   : > { %v13748_v38 = vld [vmem:[%s23426_s30 + $0xa8] sm:$0xff] }
 0x197   : > { %15918 = vmatmul.mubr.msk.f32.gmra.mxu1 %vm806_vm0, %v18890_v29  ;;  %15950 = vmatmul.mubr.msk.f32.gmra.mxu0 %vm806_vm0, %v13490_v41  ;;  %v19215_v29 = vld [vmem:[%s18568_s21 + $0xb1] sm:$0xff] }
 0x198   : > { %15920 = vmatprep.mubr.msk.f32.mxu1 %vm806_vm0, %v13553_v13  ;;  %15952 = vmatprep.mubr.msk.f32.mxu0 %vm806_vm0, %v13585_v17  ;;  %v19266_v41 = vld [vmem:[%s18568_s21 + $0x4a] sm:$0xff]  ;;  %v19319_v17 = vld [vmem:[%s18568_s21 + $0x82] sm:$0xff] }
 0x19b   : > { %15921 = vmatmul.mubr.msk.f32.gmra.mxu1 %vm806_vm0, %v13554_v19  ;;  %15953 = vmatmul.mubr.msk.f32.gmra.mxu0 %vm806_vm0, %v13586_v23 }
 0x19c   : > { %15963 = vmatprep.mubr.msk.f32.mxu1 %vm806_vm0, %v2805_v24  ;;  %15995 = vmatprep.mubr.msk.f32.mxu0 %vm806_vm0, %v3034_v25  ;;  %v19324_v24 = vld [vmem:[%s18568_s21 + $0x92] sm:$0xff] }
 0x19f   : > { %15964 = vmatmul.mubr.msk.f32.vlgmr.msra.gmra.mxu1 %vm806_vm0, %v2806_v39  ;;  %15996 = vmatmul.mubr.msk.f32.vlgmr.msra.gmra.mxu0 %vm806_vm0, %v3035_v43  ;;  %v19337_v43 = vld [vmem:[%s18568_s21 + $0x9a] sm:$0xff] }
 0x1a0   : > { %16020 = vmatpush3.msra.mxu1 %v13642_v7  ;;  %15966 = vmatprep.mubr.msk.f32.mxu1 %vm806_vm0, %v19056_v45  ;;  %v19306_v7 = vld [vmem:[%s18568_s21 + $0x7a] sm:$0xff] }
 0x1a1   : > { %15998 = vmatprep.mubr.msk.f32.mxu0 %vm806_vm0, %v19059_v47  ;;  %16052 = vmatpush3.msra.mxu0 %v13678_v11 }
 0x1a2   : > { %16021 = vmatprep.subr.mxu1 %v13641_v48  ;;  %16053 = vmatprep.subr.mxu0 %v13677_v49 }
 0x1a3   : > { %15967 = vmatmul.mubr.msk.f32.gmra.mxu1 %vm806_vm0, %v19072_v50  ;;  %15999 = vmatmul.mubr.msk.f32.gmra.mxu0 %vm806_vm0, %v19075_v51 }
 0x1a4   : > { %15969 = vmatprep.mubr.msk.f32.mxu1 %vm806_vm0, %v19080_v52  ;;  %16001 = vmatprep.mubr.msk.f32.mxu0 %vm806_vm0, %v19083_v53 }
 0x1a5   : > { %16022 = vmatpush3.msra.mxu1 %v13641_v48  ;;  %16054 = vmatpush3.msra.mxu0 %v13677_v49  ;;  %v19342_v49 = vld [vmem:[%s18568_s21 + $0xaa] sm:$0xff] }
 0x1a6   : > { %16023 = vmatprep.subr.mxu1 %v13640_v54  ;;  %16055 = vmatprep.subr.mxu0 %v13676_v55 }
 0x1a7   : > { %15970 = vmatmul.mubr.msk.f32.gmra.mxu1 %vm806_vm0, %v19100_v56  ;;  %16002 = vmatmul.mubr.msk.f32.gmra.mxu0 %vm806_vm0, %v19103_v57 }
 0x1a8   : > { %15972 = vmatprep.mubr.msk.f32.mxu1 %vm806_vm0, %v19106_v58  ;;  %16004 = vmatprep.mubr.msk.f32.mxu0 %vm806_vm0, %v19109_v59 }
 0x1a9   : > { %16024 = vmatpush3.msra.mxu1 %v13640_v54  ;;  %16056 = vmatpush3.msra.mxu0 %v13676_v55 }
 0x1aa   : > { %16025 = vmatprep.subr.mxu1 %v13639_v60  ;;  %16057 = vmatprep.subr.mxu0 %v13675_v61 }
 0x1ab   : > { %15973 = vmatmul.mubr.msk.f32.gmra.mxu1 %vm806_vm0, %v19126_v62  ;;  %16005 = vmatmul.mubr.msk.f32.gmra.mxu0 %vm806_vm0, %v19129_v63 }
 0x1ac   : > { %15975 = vmatprep.mubr.msk.f32.mxu1 %vm806_vm0, %v19132_v0  ;;  %16007 = vmatprep.mubr.msk.f32.mxu0 %vm806_vm0, %v19135_v1 }
 0x1ad   : > { %16026 = vmatpush3.msra.mxu1 %v13639_v60  ;;  %16058 = vmatpush3.msra.mxu0 %v13675_v61  ;;  %v19358_v60 = vld [vmem:[%s18568_s21 + $0xb2] sm:$0xff]  ;;  %v19361_v61 = vld [vmem:[%s18568_s21 + $0xc8] sm:$0xff] }
 0x1ae   : > { %16083 = vmatprep.subr.mxu1 %v13714_v2  ;;  %16115 = vmatprep.subr.mxu0 %v13750_v3  ;;  %23431 = vst [vmem:[#allocation34_spill] sm:$0xff] %v19358_v60  ;;  %23432 = vst [vmem:[#allocation35_spill] sm:$0xff] %v19361_v61 }
 0x1af   : > { %15976 = vmatmul.mubr.msk.f32.gmra.mxu1 %vm806_vm0, %v19152_v4  ;;  %16008 = vmatmul.mubr.msk.f32.gmra.mxu0 %vm806_vm0, %v19155_v6 }
 0x1b0   : > { %15978 = vmatprep.mubr.msk.f32.mxu1 %vm806_vm0, %v19158_v8  ;;  %16010 = vmatprep.mubr.msk.f32.mxu0 %vm806_vm0, %v19161_v9 }
 0x1b3   : > { %15979 = vmatmul.mubr.msk.f32.gmra.mxu1 %vm806_vm0, %v19172_v10  ;;  %16011 = vmatmul.mubr.msk.f32.gmra.mxu0 %vm806_vm0, %v19175_v12 }
 0x1b4   : > { %15981 = vmatprep.mubr.msk.f32.mxu1 %vm806_vm0, %v19178_v14  ;;  %16013 = vmatprep.mubr.msk.f32.mxu0 %vm806_vm0, %v19181_v15 }
 0x1b7   : > { %15982 = vmatmul.mubr.msk.f32.gmra.mxu1 %vm806_vm0, %v19192_v20  ;;  %16014 = vmatmul.mubr.msk.f32.gmra.mxu0 %vm806_vm0, %v19195_v21 }
 0x1b8   : > { %15984 = vmatprep.mubr.msk.f32.mxu1 %vm806_vm0, %v19198_v26  ;;  %16016 = vmatprep.mubr.msk.f32.mxu0 %vm806_vm0, %v19201_v27 }
 0x1bb   : > { %15985 = vmatmul.mubr.msk.f32.gmra.mxu1 %vm806_vm0, %v19212_v28  ;;  %16017 = vmatmul.mubr.msk.f32.gmra.mxu0 %vm806_vm0, %v19215_v29 }
 0x1bc   : > { %16027 = vmatprep.mubr.msk.f32.mxu1 %vm806_vm0, %v3264_v30  ;;  %16059 = vmatprep.mubr.msk.f32.mxu0 %vm806_vm0, %v19056_v45 }
 0x1bf   : > { %16028 = vmatmul.mubr.msk.f32.vlgmr.msra.gmra.mxu1 %vm806_vm0, %v3265_v31  ;;  %16060 = vmatmul.mubr.msk.f32.vlgmr.msra.gmra.mxu0 %vm806_vm0, %v19072_v50  ;;  %v19345_v50 = vld [vmem:[%s18568_s21 + $0xc0] sm:$0xff] }
 0x1c0   : > { %16084 = vmatpush3.msra.mxu1 %v13714_v2  ;;  %16030 = vmatprep.mubr.msk.f32.mxu1 %vm806_vm0, %v19227_v32  ;;  %23430 = vst [vmem:[#allocation33_spill] sm:$0xff] %v19345_v50 }
 0x1c1   : > { %16062 = vmatprep.mubr.msk.f32.mxu0 %vm806_vm0, %v19080_v52  ;;  %16116 = vmatpush3.msra.mxu0 %v13750_v3 }
 0x1c2   : > { %16085 = vmatprep.subr.mxu1 %v13713_v33  ;;  %16117 = vmatprep.subr.mxu0 %v13749_v34 }
 0x1c3   : > { %16031 = vmatmul.mubr.msk.f32.gmra.mxu1 %vm806_vm0, %v19241_v35  ;;  %16063 = vmatmul.mubr.msk.f32.gmra.mxu0 %vm806_vm0, %v19100_v56 }
 0x1c4   : > { %16033 = vmatprep.mubr.msk.f32.mxu1 %vm806_vm0, %v19246_v36  ;;  %16065 = vmatprep.mubr.msk.f32.mxu0 %vm806_vm0, %v19106_v58 }
 0x1c5   : > { %16086 = vmatpush3.msra.mxu1 %v13713_v33  ;;  %16118 = vmatpush3.msra.mxu0 %v13749_v34 }
 0x1c6   : > { %16087 = vmatprep.subr.mxu1 %v13712_v37  ;;  %16119 = vmatprep.subr.mxu0 %v13748_v38 }
 0x1c7   : > { %16034 = vmatmul.mubr.msk.f32.gmra.mxu1 %vm806_vm0, %v19263_v40  ;;  %16066 = vmatmul.mubr.msk.f32.gmra.mxu0 %vm806_vm0, %v19126_v62 }
 0x1c8   : > { %16036 = vmatprep.mubr.msk.f32.mxu1 %vm806_vm0, %v19266_v41  ;;  %16068 = vmatprep.mubr.msk.f32.mxu0 %vm806_vm0, %v19132_v0 }
 0x1c9   : > { %16088 = vmatpush3.msra.mxu1 %v13712_v37  ;;  %16120 = vmatpush3.msra.mxu0 %v13748_v38 }
 0x1ca   : > { %16089 = vmatprep.subr.mxu1 %v13711_v42  ;;  %16121 = vmatprep.subr.mxu0 %v13747_v44 }
 0x1cb   : > { %16037 = vmatmul.mubr.msk.f32.gmra.mxu1 %vm806_vm0, %v19283_v46  ;;  %16069 = vmatmul.mubr.msk.f32.gmra.mxu0 %vm806_vm0, %v19152_v4 }
 0x1cc   : > { %16039 = vmatprep.mubr.msk.f32.mxu1 %vm806_vm0, %v19286_v16  ;;  %16071 = vmatprep.mubr.msk.f32.mxu0 %vm806_vm0, %v19158_v8 }
 0x1cd   : > { %16090 = vmatpush3.msra.mxu1 %v13711_v42  ;;  %16122 = vmatpush3.msra.mxu0 %v13747_v44  ;;  %v13785_v42 = vld [vmem:[%s23426_s30 + $0xd0] sm:$0xff] }
 0x1ce   : > { %16147 = vmatprep.subr.mxu1 %v13786_v18  ;;  %16179 = vmatprep.subr.mxu0 %v13822_v22 }
 0x1cf   : > { %v15677_v11 = vpop.f32.mrf.mxu0  ;;  %v19308_v13 = vpop.f32.mrf.mxu1  ;;  %16040 = vmatmul.mubr.msk.f32.gmra.mxu1 %vm806_vm0, %v19303_v5  ;;  %16072 = vmatmul.mubr.msk.f32.gmra.mxu0 %vm806_vm0, %v19172_v10 }
 0x1d0   : > { %16042 = vmatprep.mubr.msk.f32.mxu1 %vm806_vm0, %v19306_v7  ;;  %16074 = vmatprep.mubr.msk.f32.mxu0 %vm806_vm0, %v19178_v14 }
 0x1d1   : > { %v921_v19 = vpop.f32.mrf.mxu0  ;;  %v19321_v23 = vpop.f32.mrf.mxu1 }
 0x1d3   : > { %v15680_v25 = vpop.f32.mrf.mxu0  ;;  %v19326_v39 = vpop.f32.mrf.mxu1  ;;  %16043 = vmatmul.mubr.msk.f32.gmra.mxu1 %vm806_vm0, %v19319_v17  ;;  %16075 = vmatmul.mubr.msk.f32.gmra.mxu0 %vm806_vm0, %v19192_v20 }
 0x1d4   : > { %16045 = vmatprep.mubr.msk.f32.mxu1 %vm806_vm0, %v19324_v24  ;;  %16077 = vmatprep.mubr.msk.f32.mxu0 %vm806_vm0, %v19198_v26 }
 0x1d5   : > { %v931_v45 = vpop.f32.mrf.mxu0  ;;  %v19339_v48 = vpop.f32.mrf.mxu1 }
 0x1d7   : > { %v15683_v54 = vpop.f32.mrf.mxu0  ;;  %v19347_v55 = vpop.f32.mrf.mxu1  ;;  %16046 = vmatmul.mubr.msk.f32.gmra.mxu1 %vm806_vm0, %v19337_v43  ;;  %16078 = vmatmul.mubr.msk.f32.gmra.mxu0 %vm806_vm0, %v19212_v28 }
 0x1d8   : > { %16048 = vmatprep.mubr.msk.f32.mxu1 %vm806_vm0, %v19342_v49  ;;  %16080 = vmatprep.mubr.msk.f32.mxu0 %vm806_vm0, %v19345_v50 }
 0x1d9   : > { %v941_v2 = vpop.f32.mrf.mxu0  ;;  %v19363_v3 = vpop.f32.mrf.mxu1 }
 0x1db   : > { %v19365_v30 = vpop.f32.mrf.mxu0  ;;  %v19367_v31 = vpop.f32.mrf.mxu1  ;;  %16049 = vmatmul.mubr.msk.f32.gmra.mxu1 %vm806_vm0, %v19358_v60  ;;  %16081 = vmatmul.mubr.msk.f32.gmra.mxu0 %vm806_vm0, %v19361_v61 }
 0x1dc   : > { %16091 = vmatprep.mubr.msk.f32.mxu1 %vm806_vm0, %v19059_v47  ;;  %16123 = vmatprep.mubr.msk.f32.mxu0 %vm806_vm0, %v19227_v32  ;;  %v13821_v47 = vld [vmem:[%s23426_s30 + $0xf0] sm:$0xff] }
 0x1dd   : > { %v19377_v33 = vpop.f32.mrf.mxu0  ;;  %v19379_v34 = vpop.f32.mrf.mxu1 }
 0x1df   : > { %v15709_v37 = vpop.f32.mrf.mxu1  ;;  %v15741_v38 = vpop.f32.mrf.mxu0  ;;  %16092 = vmatmul.mubr.msk.f32.vlgmr.msra.gmra.mxu1 %vm806_vm0, %v19075_v51  ;;  %16124 = vmatmul.mubr.msk.f32.vlgmr.msra.gmra.mxu0 %vm806_vm0, %v19241_v35 }
 0x1e0   : > { %v1120_v32 = vadd.f32 %v15709_v37, %v15677_v11  ;;  %16148 = vmatpush3.msra.mxu1 %v13786_v18  ;;  %16094 = vmatprep.mubr.msk.f32.mxu1 %vm806_vm0, %v19083_v53  ;;  %v13784_v18 = vld [vmem:[%s23426_s30 + $0xc8] sm:$0xff] }
 0x1e1   : > { %v1114_v44 = vpop.f32.mrf.mxu1  ;;  %v1328_v61 = vpop.f32.mrf.mxu0  ;;  %16126 = vmatprep.mubr.msk.f32.mxu0 %vm806_vm0, %v19246_v36  ;;  %16180 = vmatpush3.msra.mxu0 %v13822_v22  ;;  %v13820_v22 = vld [vmem:[%s23426_s30 + $0xe8] sm:$0xff] }
 0x1e2   : > { %v19395_v51 = vadd.f32 %v15741_v38, %v1120_v32  ;;  %v1115_v35 = vadd.f32 %v1114_v44, %v921_v19  ;;  %16149 = vmatprep.subr.mxu1 %v13785_v42  ;;  %16181 = vmatprep.subr.mxu0 %v13821_v47 }
 0x1e3   : > { %v15712_v50 = vpop.f32.mrf.mxu1  ;;  %v15744_v28 = vpop.f32.mrf.mxu0  ;;  %16095 = vmatmul.mubr.msk.f32.gmra.mxu1 %vm806_vm0, %v19103_v57  ;;  %16127 = vmatmul.mubr.msk.f32.gmra.mxu0 %vm806_vm0, %v19263_v40 }
 0x1e4   : > { %v19407_v11 = vadd.f32 %v1328_v61, %v1115_v35  ;;  %v1130_v19 = vadd.f32 %v15712_v50, %v15680_v25  ;;  %16097 = vmatprep.mubr.msk.f32.mxu1 %vm806_vm0, %v19109_v59  ;;  %16129 = vmatprep.mubr.msk.f32.mxu0 %vm806_vm0, %v19266_v41  ;;  %v13783_v25 = vld [vmem:[%s23426_s30 + $0xc0] sm:$0xff] }
 0x1e5   : > { %v1124_v37 = vpop.f32.mrf.mxu1  ;;  %v1338_v38 = vpop.f32.mrf.mxu0  ;;  %16150 = vmatpush3.msra.mxu1 %v13785_v42  ;;  %16182 = vmatpush3.msra.mxu0 %v13821_v47 }
 0x1e6   : > { %v19413_v32 = vadd.f32 %v15744_v28, %v1130_v19  ;;  %v1125_v44 = vadd.f32 %v1124_v37, %v931_v45  ;;  %16151 = vmatprep.subr.mxu1 %v13784_v18  ;;  %16183 = vmatprep.subr.mxu0 %v13820_v22  ;;  %v13819_v28 = vld [vmem:[%s23426_s30 + $0xe0] sm:$0xff] }
 0x1e7   : > { %v15715_v40 = vpop.f32.mrf.mxu1  ;;  %v15747_v36 = vpop.f32.mrf.mxu0  ;;  %16098 = vmatmul.mubr.msk.f32.gmra.mxu1 %vm806_vm0, %v19129_v63  ;;  %16130 = vmatmul.mubr.msk.f32.gmra.mxu0 %vm806_vm0, %v19283_v46 }
 0x1e8   : > { %v19425_v50 = vadd.f32 %v1338_v38, %v1125_v44  ;;  %v1140_v45 = vadd.f32 %v15715_v40, %v15683_v54  ;;  %16100 = vmatprep.mubr.msk.f32.mxu1 %vm806_vm0, %v19135_v1  ;;  %16132 = vmatprep.mubr.msk.f32.mxu0 %vm806_vm0, %v19286_v16  ;;  %v19440_v40 = vld [vmem:[%s23426_s30 + $0x118] sm:$0xff] }
 0x1e9   : > { %v1134_v61 = vpop.f32.mrf.mxu1  ;;  %v1348_v42 = vpop.f32.mrf.mxu0  ;;  %16152 = vmatpush3.msra.mxu1 %v13784_v18  ;;  %16184 = vmatpush3.msra.mxu0 %v13820_v22  ;;  %v19442_v54 = vld [vmem:[#allocation10 + $0x18] sm:$0xff] }
 0x1ea   : > { %v19431_v47 = vadd.f32 %v15747_v36, %v1140_v45  ;;  %v1135_v35 = vadd.f32 %v1134_v61, %v941_v2  ;;  %16153 = vmatprep.subr.mxu1 %v13783_v25  ;;  %16185 = vmatprep.subr.mxu0 %v13819_v28 }
 0x1eb   : > { %v15718_v19 = vpop.f32.mrf.mxu1  ;;  %v15750_v37 = vpop.f32.mrf.mxu0  ;;  %16101 = vmatmul.mubr.msk.f32.gmra.mxu1 %vm806_vm0, %v19155_v6  ;;  %16133 = vmatmul.mubr.msk.f32.gmra.mxu0 %vm806_vm0, %v19303_v5 }
 0x1ec   : > { %v19444_v36 = vadd.f32 %v1348_v42, %v1135_v35  ;;  %v1150_v2 = vadd.f32 %v15718_v19, %v19365_v30  ;;  %16103 = vmatprep.mubr.msk.f32.mxu1 %vm806_vm0, %v19161_v9  ;;  %16135 = vmatprep.mubr.msk.f32.mxu0 %vm806_vm0, %v19306_v7 }
 0x1ed   : > { %v1144_v18 = vpop.f32.mrf.mxu1  ;;  %v1358_v22 = vpop.f32.mrf.mxu0  ;;  %16154 = vmatpush3.msra.mxu1 %v13783_v25  ;;  %16186 = vmatpush3.msra.mxu0 %v13819_v28 }
 0x1ee   : > { %v19451_v38 = vadd.f32 %v15750_v37, %v1150_v2  ;;  %v1145_v44 = vadd.f32 %v1144_v18, %v19377_v33  ;;  %16211 = vmatprep.subr.mxu1 %v19440_v40  ;;  %16243 = vmatprep.subr.mxu0 %v19442_v54 }
 0x1ef   : > { %v15721_v45 = vpop.f32.mrf.mxu1  ;;  %v15753_v30 = vpop.f32.mrf.mxu0  ;;  %16104 = vmatmul.mubr.msk.f32.gmra.mxu1 %vm806_vm0, %v19175_v12  ;;  %16136 = vmatmul.mubr.msk.f32.gmra.mxu0 %vm806_vm0, %v19319_v17 }
 0x1f0   : > { %v19460_v61 = vadd.f32 %v1358_v22, %v1145_v44  ;;  %v1160_v25 = vadd.f32 %v15721_v45, %v19308_v13  ;;  %16106 = vmatprep.mubr.msk.f32.mxu1 %vm806_vm0, %v19181_v15  ;;  %16138 = vmatprep.mubr.msk.f32.mxu0 %vm806_vm0, %v19324_v24  ;;  %v19482_v22 = vld [vmem:[%s18568_s21 + $0xc1] sm:$0xff] }
 0x1f1   : > { %v1154_v33 = vpop.f32.mrf.mxu1  ;;  %v1368_v28 = vpop.f32.mrf.mxu0  ;;  %v19485_v44 = vld [vmem:[%s18568_s21 + $0xc2] sm:$0xff] }
 0x1f2   : > { %v19467_v42 = vadd.f32 %v15753_v30, %v1160_v25  ;;  %v1155_v35 = vadd.f32 %v1154_v33, %v19321_v23  ;;  %23433 = vst [vmem:[#allocation36_spill] sm:$0xff] %v19485_v44 }
 0x1f3   : > { %v15724_v19 = vpop.f32.mrf.mxu1  ;;  %v15756_v37 = vpop.f32.mrf.mxu0  ;;  %16107 = vmatmul.mubr.msk.f32.gmra.mxu1 %vm806_vm0, %v19195_v21  ;;  %16139 = vmatmul.mubr.msk.f32.gmra.mxu0 %vm806_vm0, %v19337_v43 }
 0x1f4   : > { %v19474_v13 = vadd.f32 %v1368_v28, %v1155_v35  ;;  %v1170_v2 = vadd.f32 %v15724_v19, %v19326_v39  ;;  %16109 = vmatprep.mubr.msk.f32.mxu1 %vm806_vm0, %v19201_v27  ;;  %16141 = vmatprep.mubr.msk.f32.mxu0 %vm806_vm0, %v19342_v49  ;;  %v19502_v35 = vld [vmem:[%s18568_s21 + $0xc9] sm:$0xff] }
 0x1f5   : > { %v1164_v23 = vpop.f32.mrf.mxu1  ;;  %v1378_v18 = vpop.f32.mrf.mxu0 }
 0x1f6   : > { %v19487_v45 = vadd.f32 %v15756_v37, %v1170_v2  ;;  %v1165_v30 = vadd.f32 %v1164_v23, %v19339_v48  ;;  %v19505_v48 = vld [vmem:[%s18568_s21 + $0xca] sm:$0xff] }
 0x1f7   : > { %v15727_v25 = vpop.f32.mrf.mxu1  ;;  %v15759_v39 = vpop.f32.mrf.mxu0  ;;  %16110 = vmatmul.mubr.msk.f32.gmra.mxu1 %vm806_vm0, %v19215_v29  ;;  %16142 = vmatmul.mubr.msk.f32.gmra.mxu0 %vm806_vm0, %v19358_v60 }
 0x1f8   : > { %v19494_v33 = vadd.f32 %v1378_v18, %v1165_v30  ;;  %v1180_v28 = vadd.f32 %v15727_v25, %v19347_v55  ;;  %16112 = vmatprep.mubr.msk.f32.mxu1 %vm806_vm0, %v19482_v22  ;;  %16144 = vmatprep.mubr.msk.f32.mxu0 %vm806_vm0, %v19485_v44 }
 0x1f9   : > { %v1174_v19 = vpop.f32.mrf.mxu1  ;;  %v1388_v37 = vpop.f32.mrf.mxu0 }
 0x1fa   : > { %v19507_v2 = vadd.f32 %v15759_v39, %v1180_v28  ;;  %v1175_v23 = vadd.f32 %v1174_v19, %v19363_v3 }
 0x1fb   : > { %v15730_v18 = vpop.f32.mrf.mxu1  ;;  %v15762_v30 = vpop.f32.mrf.mxu0  ;;  %16113 = vmatmul.mubr.msk.f32.gmra.mxu1 %vm806_vm0, %v19502_v35  ;;  %16145 = vmatmul.mubr.msk.f32.gmra.mxu0 %vm806_vm0, %v19505_v48 }
 0x1fc   : > { %v19514_v55 = vadd.f32 %v1388_v37, %v1175_v23  ;;  %v1190_v25 = vadd.f32 %v15730_v18, %v19367_v31  ;;  %16155 = vmatprep.mubr.msk.f32.mxu1 %vm806_vm0, %v19080_v52  ;;  %16187 = vmatprep.mubr.msk.f32.mxu0 %vm806_vm0, %v19083_v53  ;;  %v13857_v52 = vld [vmem:[%s23426_s30 + $0x110] sm:$0xff] }
 0x1fd   : > { %v1184_v39 = vpop.f32.mrf.mxu1  ;;  %v1398_v3 = vpop.f32.mrf.mxu0  ;;  %v4894_v31 = vld [vmem:[#allocation10 + $0x10] sm:$0xff] }
 0x1fe   : > { %v19521_v28 = vadd.f32 %v15762_v30, %v1190_v25  ;;  %v1185_v19 = vadd.f32 %v1184_v39, %v19379_v34 }
 0x1ff   : > { %v15773_v44 = vpop.f32.mrf.mxu1  ;;  %v15805_v60 = vpop.f32.mrf.mxu0  ;;  %16156 = vmatmul.mubr.msk.f32.vlgmr.msra.gmra.mxu1 %vm806_vm0, %v19100_v56  ;;  %16188 = vmatmul.mubr.msk.f32.vlgmr.msra.gmra.mxu0 %vm806_vm0, %v19103_v57 }
 0x200   : > { %v19531_v53 = vadd.f32 %v1398_v3, %v1185_v19  ;;  %v1639_v37 = vadd.f32 %v15773_v44, %v19395_v51  ;;  %16212 = vmatpush3.msra.mxu1 %v19440_v40  ;;  %16158 = vmatprep.mubr.msk.f32.mxu1 %vm806_vm0, %v19106_v58  ;;  %v13856_v58 = vld [vmem:[%s23426_s30 + $0x108] sm:$0xff] }
 0x201   : > { %v1559_v34 = vpop.f32.mrf.mxu1  ;;  %v1789_v23 = vpop.f32.mrf.mxu0  ;;  %16190 = vmatprep.mubr.msk.f32.mxu0 %vm806_vm0, %v19109_v59  ;;  %16244 = vmatpush3.msra.mxu0 %v19442_v54  ;;  %v4893_v59 = vld [vmem:[#allocation10 + $0x8] sm:$0xff] }
 0x202   : > { %v19540_v56 = vadd.f32 %v15805_v60, %v1639_v37  ;;  %v1638_v57 = vadd.f32 %v1559_v34, %v19407_v11  ;;  %16213 = vmatprep.subr.mxu1 %v13857_v52  ;;  %16245 = vmatprep.subr.mxu0 %v4894_v31 }
 0x203   : > { %v15776_v18 = vpop.f32.mrf.mxu1  ;;  %v15808_v51 = vpop.f32.mrf.mxu0  ;;  %16159 = vmatmul.mubr.msk.f32.gmra.mxu1 %vm806_vm0, %v19126_v62  ;;  %16191 = vmatmul.mubr.msk.f32.gmra.mxu0 %vm806_vm0, %v19129_v63 }
 0x204   : > { %v19550_v40 = vadd.f32 %v1789_v23, %v1638_v57  ;;  %v1641_v60 = vadd.f32 %v15776_v18, %v19413_v32  ;;  %16161 = vmatprep.mubr.msk.f32.mxu1 %vm806_vm0, %v19132_v0  ;;  %16193 = vmatprep.mubr.msk.f32.mxu0 %vm806_vm0, %v19135_v1  ;;  %v13855_v0 = vld [vmem:[%s23426_s30 + $0x100] sm:$0xff] }
 0x205   : > { %v1569_v11 = vpop.f32.mrf.mxu1  ;;  %v1799_v62 = vpop.f32.mrf.mxu0  ;;  %16214 = vmatpush3.msra.mxu1 %v13857_v52  ;;  %16246 = vmatpush3.msra.mxu0 %v4894_v31  ;;  %v4892_v1 = vld [vmem:[#allocation10] sm:$0xff] }
 0x206   : > { %v19557_v63 = vadd.f32 %v15808_v51, %v1641_v60  ;;  %v1640_v54 = vadd.f32 %v1569_v11, %v19425_v50  ;;  %16215 = vmatprep.subr.mxu1 %v13856_v58  ;;  %16247 = vmatprep.subr.mxu0 %v4893_v59  ;;  %v23434_v18 = vld [vmem:[#allocation30_spill] sm:$0xff] }
 0x207   : > { %v15779_v44 = vpop.f32.mrf.mxu1  ;;  %v15811_v30 = vpop.f32.mrf.mxu0  ;;  %16162 = vmatmul.mubr.msk.f32.gmra.mxu1 %vm806_vm0, %v19152_v4  ;;  %16194 = vmatmul.mubr.msk.f32.gmra.mxu0 %vm806_vm0, %v19155_v6 }
 0x208   : > { %v19567_v32 = vadd.f32 %v1799_v62, %v1640_v54  ;;  %v1643_v25 = vadd.f32 %v15779_v44, %v19431_v47  ;;  %16164 = vmatprep.mubr.msk.f32.mxu1 %vm806_vm0, %v19158_v8  ;;  %16196 = vmatprep.mubr.msk.f32.mxu0 %vm806_vm0, %v19161_v9  ;;  %v19581_v8 = vld [vmem:[#allocation10 + $0x38] sm:$0xff]  ;;  %v13782_v44 = vld [vmem:[%s18568_s21 + $0xe0] sm:$0xff] }
 0x209   : > { %v1579_v50 = vpop.f32.mrf.mxu1  ;;  %v1809_v4 = vpop.f32.mrf.mxu0  ;;  %16216 = vmatpush3.msra.mxu1 %v13856_v58  ;;  %16248 = vmatpush3.msra.mxu0 %v4893_v59  ;;  %v19583_v9 = vld [vmem:[#allocation10 + $0x58] sm:$0xff] }
 0x20a   : > { %v19574_v6 = vadd.f32 %v15811_v30, %v1643_v25  ;;  %v1642_v39 = vadd.f32 %v1579_v50, %v19444_v36  ;;  %16217 = vmatprep.subr.mxu1 %v13855_v0  ;;  %16249 = vmatprep.subr.mxu0 %v4892_v1  ;;  %v13781_v58 = vld [vmem:[%s18568_s21 + $0xd8] sm:$0xff]  ;;  %v13818_v30 = vld [vmem:[%s18568_s21 + $0xe1] sm:$0xff] }
 0x20b   : > { %v15782_v3 = vpop.f32.mrf.mxu1  ;;  %v15814_v19 = vpop.f32.mrf.mxu0  ;;  %16165 = vmatmul.mubr.msk.f32.gmra.mxu1 %vm806_vm0, %v19172_v10  ;;  %16197 = vmatmul.mubr.msk.f32.gmra.mxu0 %vm806_vm0, %v19175_v12  ;;  %v13817_v59 = vld [vmem:[%s18568_s21 + $0xd9] sm:$0xff] }
 0x20c   : > { %v19585_v47 = vadd.f32 %v1809_v4, %v1642_v39  ;;  %v1645_v52 = vadd.f32 %v15782_v3, %v19451_v38  ;;  %16167 = vmatprep.mubr.msk.f32.mxu1 %vm806_vm0, %v19178_v14  ;;  %16199 = vmatprep.mubr.msk.f32.mxu0 %vm806_vm0, %v19181_v15  ;;  %v23437_v3 = vld [vmem:[#allocation31_spill] sm:$0xff] }
 0x20d   : > { %v1589_v36 = vpop.f32.mrf.mxu1  ;;  %v1819_v31 = vpop.f32.mrf.mxu0  ;;  %16218 = vmatpush3.msra.mxu1 %v13855_v0  ;;  %16250 = vmatpush3.msra.mxu0 %v4892_v1  ;;  %v4876_v1 = vld [vmem:[%s18575_s26] sm:$0xff] }
 0x20e   : > { %v19592_v10 = vadd.f32 %v15814_v19, %v1645_v52  ;;  %v1644_v12 = vadd.f32 %v1589_v36, %v19460_v61  ;;  %16275 = vmatprep.subr.mxu1 %v19581_v8  ;;  %16307 = vmatprep.subr.mxu0 %v19583_v9  ;;  %v4877_v19 = vld [vmem:[%s18575_s26 + $0x8] sm:$0xff] }
 0x20f   : > { %v15785_v37 = vpop.f32.mrf.mxu1  ;;  %v15817_v38 = vpop.f32.mrf.mxu0  ;;  %16168 = vmatmul.mubr.msk.f32.gmra.mxu1 %vm806_vm0, %v19192_v20  ;;  %16200 = vmatmul.mubr.msk.f32.gmra.mxu0 %vm806_vm0, %v19195_v21 }
 0x210   : > { %v19601_v14 = vadd.f32 %v1819_v31, %v1644_v12  ;;  %v1647_v15 = vadd.f32 %v15785_v37, %v19467_v42  ;;  %16170 = vmatprep.mubr.msk.f32.mxu1 %vm806_vm0, %v19198_v26  ;;  %16202 = vmatprep.mubr.msk.f32.mxu0 %vm806_vm0, %v19201_v27  ;;  %v23435_v27 = vld [vmem:[#allocation33_spill] sm:$0xff] }
 0x211   : > { %v1599_v61 = vpop.f32.mrf.mxu1  ;;  %v1829_v34 = vpop.f32.mrf.mxu0  ;;  %v19655_v12 = vld [vmem:[%s18575_s26 + $0x18] sm:$0xff] }
 0x212   : > { %v19608_v23 = vadd.f32 %v15817_v38, %v1647_v15  ;;  %v1646_v20 = vadd.f32 %v1599_v61, %v19474_v13  ;;  %v23438_v15 = vld [vmem:[#allocation32_spill] sm:$0xff] }
 0x213   : > { %v15788_v57 = vpop.f32.mrf.mxu1  ;;  %v15820_v21 = vpop.f32.mrf.mxu0  ;;  %16171 = vmatmul.mubr.msk.f32.gmra.mxu1 %vm806_vm0, %v23434_v18  ;;  %16203 = vmatmul.mubr.msk.f32.gmra.mxu0 %vm806_vm0, %v19215_v29  ;;  %v5354_v61 = vld [vmem:[#allocation10 + $0x50] sm:$0xff] }
 0x214   : > { %v19615_v26 = vadd.f32 %v1829_v34, %v1646_v20  ;;  %v1649_v42 = vadd.f32 %v15788_v57, %v19487_v45  ;;  %16173 = vmatprep.mubr.msk.f32.mxu1 %vm806_vm0, %v23435_v27  ;;  %16205 = vmatprep.mubr.msk.f32.mxu0 %vm806_vm0, %v19482_v22  ;;  %v23436_v45 = vld [vmem:[#allocation35_spill] sm:$0xff]  ;;  %v19673_v18 = vld [vmem:[%s18575_s26 + $0x30] sm:$0xff] }
 0x215   : > { %v1609_v13 = vpop.f32.mrf.mxu1  ;;  %v1839_v51 = vpop.f32.mrf.mxu0  ;;  %v5123_v27 = vld [vmem:[#allocation10 + $0x28] sm:$0xff] }
 0x216   : > { %v19624_v60 = vadd.f32 %v15820_v21, %v1649_v42  ;;  %v1648_v29 = vadd.f32 %v1609_v13, %v19494_v33 }
 0x217   : > { %v15791_v11 = vpop.f32.mrf.mxu1  ;;  %v15823_v62 = vpop.f32.mrf.mxu0  ;;  %16174 = vmatmul.mubr.msk.f32.gmra.mxu1 %vm806_vm0, %v23436_v45  ;;  %16206 = vmatmul.mubr.msk.f32.gmra.mxu0 %vm806_vm0, %v19502_v35  ;;  %v5352_v45 = vld [vmem:[#allocation10 + $0x40] sm:$0xff] }
 0x218   : > { %v19631_v54 = vadd.f32 %v1839_v51, %v1648_v29  ;;  %v1651_v22 = vadd.f32 %v15791_v11, %v19507_v2  ;;  %16176 = vmatprep.mubr.msk.f32.mxu1 %vm806_vm0, %v13781_v58  ;;  %16208 = vmatprep.mubr.msk.f32.mxu0 %vm806_vm0, %v13817_v59 }
 0x219   : > { %v1619_v33 = vpop.f32.mrf.mxu1  ;;  %v1849_v0 = vpop.f32.mrf.mxu0 }
 0x21a   : > { %v19639_v25 = vadd.f32 %v15823_v62, %v1651_v22  ;;  %v1650_v50 = vadd.f32 %v1619_v33, %v19514_v55  ;;  %v5122_v62 = vld [vmem:[#allocation10 + $0x20] sm:$0xff] }
 0x21b   : > { %v15794_v35 = vpop.f32.mrf.mxu1  ;;  %v15826_v4 = vpop.f32.mrf.mxu0  ;;  %16177 = vmatmul.mubr.msk.f32.gmra.mxu1 %vm806_vm0, %v13782_v44  ;;  %16209 = vmatmul.mubr.msk.f32.gmra.mxu0 %vm806_vm0, %v13818_v30 }
 0x21c   : > { %v19644_v2 = vadd.f32 %v1849_v0, %v1650_v50  ;;  %v1653_v39 = vadd.f32 %v15794_v35, %v19521_v28  ;;  %16219 = vmatprep.mubr.msk.f32.mxu1 %vm806_vm0, %v23437_v3  ;;  %16251 = vmatprep.mubr.msk.f32.mxu0 %vm806_vm0, %v4876_v1  ;;  %v5124_v28 = vld [vmem:[#allocation10 + $0x30] sm:$0xff]  ;;  %v19722_v50 = vld [vmem:[#allocation10 + $0x78] sm:$0xff] }
 0x21d   : > { %v1629_v52 = vpop.f32.mrf.mxu1  ;;  %v1859_v36 = vpop.f32.mrf.mxu0  ;;  %v19724_v35 = vld [vmem:[#allocation10 + $0x98] sm:$0xff] }
 0x21e   : > { %v19651_v55 = vadd.f32 %v15826_v4, %v1653_v39  ;;  %v1652_v31 = vadd.f32 %v1629_v52, %v19531_v53  ;;  %v19667_v53 = vld [vmem:[%s18575_s26 + $0x20] sm:$0xff] }
 0x21f   : > { %v15837_v37 = vpop.f32.mrf.mxu1  ;;  %v15869_v38 = vpop.f32.mrf.mxu0  ;;  %16220 = vmatmul.mubr.msk.f32.vlgmr.msra.gmra.mxu1 %vm806_vm0, %v23438_v15  ;;  %16252 = vmatmul.mubr.msk.f32.vlgmr.msra.gmra.mxu0 %vm806_vm0, %v4877_v19  ;;  %v19737_v19 = vld [vmem:[%s18575_s26 + $0x78] sm:$0xff] }
 0x220   : > { %v19660_v34 = vadd.f32 %v1859_v36, %v1652_v31  ;;  %v2099_v20 = vadd.f32 %v15837_v37, %v19540_v56  ;;  %16276 = vmatpush3.msra.mxu1 %v19581_v8  ;;  %16222 = vmatprep.mubr.msk.f32.mxu1 %vm806_vm0, %v19266_v41 }
 0x221   : > { %v2019_v57 = vpop.f32.mrf.mxu1  ;;  %v2250_v21 = vpop.f32.mrf.mxu0  ;;  %16254 = vmatprep.mubr.msk.f32.mxu0 %vm806_vm0, %v19655_v12  ;;  %16308 = vmatpush3.msra.mxu0 %v19583_v9  ;;  %v5353_v9 = vld [vmem:[#allocation10 + $0x48] sm:$0xff] }
 0x222   : > { %v19675_v42 = vadd.f32 %v15869_v38, %v2099_v20  ;;  %v2098_v56 = vadd.f32 %v2019_v57, %v19550_v40  ;;  %16277 = vmatprep.subr.mxu1 %v5124_v28  ;;  %16309 = vmatprep.subr.mxu0 %v5354_v61  ;;  %v19690_v40 = vld [vmem:[%s18575_s26 + $0x38] sm:$0xff]  ;;  %v23439_v57 = vld [vmem:[#allocation34_spill] sm:$0xff] }
 0x223   : > { %v15840_v41 = vpop.f32.mrf.mxu1  ;;  %v15872_v8 = vpop.f32.mrf.mxu0  ;;  %16223 = vmatmul.mubr.msk.f32.gmra.mxu1 %vm806_vm0, %v19283_v46  ;;  %16255 = vmatmul.mubr.msk.f32.gmra.mxu0 %vm806_vm0, %v19667_v53  ;;  %v19693_v46 = vld [vmem:[%s18575_s26 + $0x48] sm:$0xff] }
 0x224   : > { %v19682_v13 = vadd.f32 %v2250_v21, %v2098_v56  ;;  %v2101_v51 = vadd.f32 %v15840_v41, %v19557_v63  ;;  %16225 = vmatprep.mubr.msk.f32.mxu1 %vm806_vm0, %v19286_v16  ;;  %16257 = vmatprep.mubr.msk.f32.mxu0 %vm806_vm0, %v19673_v18  ;;  %v23440_v56 = vld [vmem:[#allocation36_spill] sm:$0xff] }
 0x225   : > { %v2029_v58 = vpop.f32.mrf.mxu1  ;;  %v2260_v59 = vpop.f32.mrf.mxu0  ;;  %16278 = vmatpush3.msra.mxu1 %v5124_v28  ;;  %16310 = vmatpush3.msra.mxu0 %v5354_v61 }
 0x226   : > { %v19695_v29 = vadd.f32 %v15872_v8, %v2101_v51  ;;  %v2100_v11 = vadd.f32 %v2029_v58, %v19567_v32  ;;  %16279 = vmatprep.subr.mxu1 %v5123_v27  ;;  %16311 = vmatprep.subr.mxu0 %v5353_v9  ;;  %v19710_v32 = vld [vmem:[%s18575_s26 + $0x50] sm:$0xff] }
 0x227   : > { %v15843_v16 = vpop.f32.mrf.mxu1  ;;  %v15875_v63 = vpop.f32.mrf.mxu0  ;;  %16226 = vmatmul.mubr.msk.f32.gmra.mxu1 %vm806_vm0, %v19303_v5  ;;  %16258 = vmatmul.mubr.msk.f32.gmra.mxu0 %vm806_vm0, %v19690_v40  ;;  %v19713_v5 = vld [vmem:[%s18575_s26 + $0x60] sm:$0xff] }
 0x228   : > { %v19702_v22 = vadd.f32 %v2260_v59, %v2100_v11  ;;  %v2103_v44 = vadd.f32 %v15843_v16, %v19574_v6  ;;  %16228 = vmatprep.mubr.msk.f32.mxu1 %vm806_vm0, %v19306_v7  ;;  %16260 = vmatprep.mubr.msk.f32.mxu0 %vm806_vm0, %v19693_v46 }
 0x229   : > { %v2039_v30 = vpop.f32.mrf.mxu1  ;;  %v2270_v33 = vpop.f32.mrf.mxu0  ;;  %16280 = vmatpush3.msra.mxu1 %v5123_v27  ;;  %16312 = vmatpush3.msra.mxu0 %v5353_v9  ;;  %v13853_v27 = vld [vmem:[%s18568_s21 + $0xda] sm:$0xff]  ;;  %v19780_v9 = vld [vmem:[%s18575_s26 + $0xa8] sm:$0xff] }
 0x22a   : > { %v19715_v0 = vadd.f32 %v15875_v63, %v2103_v44  ;;  %v2102_v1 = vadd.f32 %v2039_v30, %v19585_v47  ;;  %16281 = vmatprep.subr.mxu1 %v5122_v62  ;;  %16313 = vmatprep.subr.mxu0 %v5352_v45  ;;  %v19734_v47 = vld [vmem:[%s18575_s26 + $0x68] sm:$0xff] }
 0x22b   : > { %v15846_v7 = vpop.f32.mrf.mxu1  ;;  %v15878_v6 = vpop.f32.mrf.mxu0  ;;  %16229 = vmatmul.mubr.msk.f32.gmra.mxu1 %vm806_vm0, %v19319_v17  ;;  %16261 = vmatmul.mubr.msk.f32.gmra.mxu0 %vm806_vm0, %v19710_v32  ;;  %v13854_v63 = vld [vmem:[%s18568_s21 + $0xe2] sm:$0xff]  ;;  %s18195_s21 = smov 64  }
 0x22c   : > { %v19726_v4 = vadd.f32 %v2270_v33, %v2102_v1  ;;  %v2105_v39 = vadd.f32 %v15846_v7, %v19592_v10  ;;  %16231 = vmatprep.mubr.msk.f32.mxu1 %vm806_vm0, %v19324_v24  ;;  %16263 = vmatprep.mubr.msk.f32.mxu0 %vm806_vm0, %v19713_v5  ;;  %v5335_v44 = vld [vmem:[%s18575_s26 + $0x2] sm:$0xff] }
 0x22d   : > { %v2049_v17 = vpop.f32.mrf.mxu1  ;;  %v2280_v3 = vpop.f32.mrf.mxu0  ;;  %16282 = vmatpush3.msra.mxu1 %v5122_v62  ;;  %16314 = vmatpush3.msra.mxu0 %v5352_v45 }
 0x22e   : > { %v19739_v52 = vadd.f32 %v15878_v6, %v2105_v39  ;;  %v2104_v10 = vadd.f32 %v2049_v17, %v19601_v14  ;;  %16339 = vmatprep.subr.mxu1 %v19722_v50  ;;  %16371 = vmatprep.subr.mxu0 %v19724_v35  ;;  %v19756_v14 = vld [vmem:[%s18575_s26 + $0x80] sm:$0xff]  ;;  %v5106_v39 = vld [vmem:[%s18575_s26 + $0x9] sm:$0xff] }
 0x22f   : > { %v15849_v24 = vpop.f32.mrf.mxu1  ;;  %v15881_v36 = vpop.f32.mrf.mxu0  ;;  %16232 = vmatmul.mubr.msk.f32.gmra.mxu1 %vm806_vm0, %v19337_v43  ;;  %16264 = vmatmul.mubr.msk.f32.gmra.mxu0 %vm806_vm0, %v19734_v47  ;;  %v19759_v43 = vld [vmem:[%s18575_s26 + $0x90] sm:$0xff] }
 0x230   : > { %v19748_v31 = vadd.f32 %v2280_v3, %v2104_v10  ;;  %v2107_v37 = vadd.f32 %v15849_v24, %v19608_v23  ;;  %16234 = vmatprep.mubr.msk.f32.mxu1 %vm806_vm0, %v19342_v49  ;;  %16266 = vmatprep.mubr.msk.f32.mxu0 %vm806_vm0, %v19737_v19  ;;  %v5336_v17 = vld [vmem:[%s18575_s26 + $0xa] sm:$0xff]  ;;  %v19815_v10 = vld [vmem:[%s18575_s26 + $0x19] sm:$0xff] }
 0x231   : > { %v2059_v38 = vpop.f32.mrf.mxu1  ;;  %v2290_v15 = vpop.f32.mrf.mxu0  ;;  %7411 = vrot.lane.b32.xlu0 %v19815_v10, %s18195_s21 }
 0x232   : > { %v19761_v28 = vadd.f32 %v15881_v36, %v2107_v37  ;;  %v2106_v61 = vadd.f32 %v2059_v38, %v19615_v26  ;;  %v19776_v26 = vld [vmem:[%s18575_s26 + $0x98] sm:$0xff] }
 0x233   : > { %v15852_v23 = vpop.f32.mrf.mxu1  ;;  %v15884_v20 = vpop.f32.mrf.mxu0  ;;  %16235 = vmatmul.mubr.msk.f32.gmra.mxu1 %vm806_vm0, %v23439_v57  ;;  %16267 = vmatmul.mubr.msk.f32.gmra.mxu0 %vm806_vm0, %v19756_v14  ;;  %v19821_v37 = vld [vmem:[%s18575_s26 + $0x1a] sm:$0xff]  ;;  %v19835_v57 = vld [vmem:[%s18575_s26 + $0x22] sm:$0xff] }
 0x234   : > { %v19768_v49 = vadd.f32 %v2290_v15, %v2106_v61  ;;  %v2109_v21 = vadd.f32 %v15852_v23, %v19624_v60  ;;  %16237 = vmatprep.mubr.msk.f32.mxu1 %vm806_vm0, %v23440_v56  ;;  %16269 = vmatprep.mubr.msk.f32.mxu0 %vm806_vm0, %v19759_v43  ;;  %v5585_v15 = vld [vmem:[#allocation10 + $0x70] sm:$0xff] }
 0x235   : > { %v2069_v41 = vpop.f32.mrf.mxu1  ;;  %v2300_v8 = vpop.f32.mrf.mxu0  ;;  %v5815_v61 = vld [vmem:[#allocation10 + $0x90] sm:$0xff] }
 0x236   : > { %v19782_v51 = vadd.f32 %v15884_v20, %v2109_v21  ;;  %v2108_v60 = vadd.f32 %v2069_v41, %v19631_v54  ;;  %v19797_v54 = vld [vmem:[%s18575_s26 + $0xb0] sm:$0xff] }
 0x237   : > { %v15855_v58 = vpop.f32.mrf.mxu1  ;;  %v15887_v59 = vpop.f32.mrf.mxu0  ;;  %16238 = vmatmul.mubr.msk.f32.gmra.mxu1 %vm806_vm0, %v19505_v48  ;;  %16270 = vmatmul.mubr.msk.f32.gmra.mxu0 %vm806_vm0, %v19776_v26  ;;  %v5105_v48 = vld [vmem:[%s18575_s26 + $0x1] sm:$0xff]  ;;  %v19841_v41 = vld [vmem:[%s18575_s26 + $0x31] sm:$0xff] }
 0x238   : > { %v19789_v11 = vadd.f32 %v2300_v8, %v2108_v60  ;;  %v2111_v16 = vadd.f32 %v15855_v58, %v19639_v25  ;;  %16240 = vmatprep.mubr.msk.f32.mxu1 %vm806_vm0, %v13853_v27  ;;  %16272 = vmatprep.mubr.msk.f32.mxu0 %vm806_vm0, %v19780_v9  ;;  %v5814_v58 = vld [vmem:[#allocation10 + $0x88] sm:$0xff] }
 0x239   : > { %v2079_v62 = vpop.f32.mrf.mxu1  ;;  %v2310_v45 = vpop.f32.mrf.mxu0 }
 0x23a   : > { %v19801_v30 = vadd.f32 %v15887_v59, %v2111_v16  ;;  %v2110_v33 = vadd.f32 %v2079_v62, %v19644_v2 }
 0x23b   : > { %v15858_v25 = vpop.f32.mrf.mxu1  ;;  %v15890_v1 = vpop.f32.mrf.mxu0  ;;  %16241 = vmatmul.mubr.msk.f32.gmra.mxu1 %vm806_vm0, %v13854_v63  ;;  %16273 = vmatmul.mubr.msk.f32.gmra.mxu0 %vm806_vm0, %v19797_v54  ;;  %v19864_v63 = vld [vmem:[%s18575_s26 + $0x3a] sm:$0xff] }
 0x23c   : > { %v19807_v7 = vadd.f32 %v2310_v45, %v2110_v33  ;;  %v2113_v6 = vadd.f32 %v15858_v25, %v19651_v55  ;;  %16283 = vmatprep.mubr.msk.f32.mxu1 %vm806_vm0, %v5105_v48  ;;  %16315 = vmatprep.mubr.msk.f32.mxu0 %vm806_vm0, %v5335_v44  ;;  %v19867_v48 = vld [vmem:[%s18575_s26 + $0x49] sm:$0xff] }
 0x23d   : > { %v2089_v3 = vpop.f32.mrf.mxu1  ;;  %v2320_v2 = vpop.f32.mrf.mxu0  ;;  %v19870_v44 = vld [vmem:[%s18575_s26 + $0x4a] sm:$0xff] }
 0x23e   : > { %v19817_v24 = vadd.f32 %v15890_v1, %v2113_v6  ;;  %v2112_v36 = vadd.f32 %v2089_v3, %v19660_v34  ;;  %v19832_v34 = vld [vmem:[%s18575_s26 + $0x21] sm:$0xff] }
 0x23f   : > { %v15901_v38 = vpop.f32.mrf.mxu1  ;;  %v15933_v55 = vpop.f32.mrf.mxu0  ;;  %16284 = vmatmul.mubr.msk.f32.vlgmr.msra.gmra.mxu1 %vm806_vm0, %v5106_v39  ;;  %16316 = vmatmul.mubr.msk.f32.vlgmr.msra.gmra.mxu0 %vm806_vm0, %v5336_v17  ;;  %v5583_v6 = vld [vmem:[#allocation10 + $0x60] sm:$0xff] }
 0x240   : > { %v19825_v23 = vadd.f32 %v2320_v2, %v2112_v36  ;;  %v2560_v20 = vadd.f32 %v15901_v38, %v19675_v42  ;;  %16340 = vmatpush3.msra.mxu1 %v19722_v50  ;;  %16286 = vmatprep.mubr.msk.f32.mxu1 %vm806_vm0, %v19815_v10  ;;  %v19844_v42 = vld [vmem:[%s18575_s26 + $0x32] sm:$0xff] }
 0x241   : > { %v2480_v21 = vpop.f32.mrf.mxu1  ;;  %v2710_v56 = vpop.f32.mrf.mxu0  ;;  %16318 = vmatprep.mubr.msk.f32.mxu0 %vm806_vm0, %v19821_v37  ;;  %16372 = vmatpush3.msra.mxu0 %v19724_v35  ;;  %v5584_v35 = vld [vmem:[#allocation10 + $0x68] sm:$0xff]  ;;  %v5813_v39 = vld [vmem:[#allocation10 + $0x80] sm:$0xff] }
 0x242   : > { %v19846_v50 = vadd.f32 %v15933_v55, %v2560_v20  ;;  %v2559_v8 = vadd.f32 %v2480_v21, %v19682_v13  ;;  %16341 = vmatprep.subr.mxu1 %v5585_v15  ;;  %16373 = vmatprep.subr.mxu0 %v5815_v61  ;;  %v19861_v13 = vld [vmem:[%s18575_s26 + $0x39] sm:$0xff]  ;;  %v19893_v55 = vld [vmem:[%s18575_s26 + $0x61] sm:$0xff] }
 0x243   : > { %v15904_v27 = vpop.f32.mrf.mxu1  ;;  %v15936_v60 = vpop.f32.mrf.mxu0  ;;  %16287 = vmatmul.mubr.msk.f32.gmra.mxu1 %vm806_vm0, %v19832_v34  ;;  %16319 = vmatmul.mubr.msk.f32.gmra.mxu0 %vm806_vm0, %v19835_v57  ;;  %v19890_v2 = vld [vmem:[%s18575_s26 + $0x52] sm:$0xff] }
 0x244   : > { %23441 = vst [vmem:[#allocation30_spill] sm:$0xff] %v19846_v50  ;;  %v19853_v59 = vadd.f32 %v2710_v56, %v2559_v8  ;;  %v2562_v16 = vadd.f32 %v15904_v27, %v19695_v29  ;;  %16289 = vmatprep.mubr.msk.f32.mxu1 %vm806_vm0, %v19841_v41  ;;  %16321 = vmatprep.mubr.msk.f32.mxu0 %vm806_vm0, %v19844_v42  ;;  %v19905_v56 = vld [vmem:[#allocation10 + $0xb8] sm:$0xff] }
 0x245   : > { %v2490_v62 = vpop.f32.mrf.mxu1  ;;  %v2720_v45 = vpop.f32.mrf.mxu0  ;;  %16342 = vmatpush3.msra.mxu1 %v5585_v15  ;;  %16374 = vmatpush3.msra.mxu0 %v5815_v61  ;;  %v19896_v15 = vld [vmem:[%s18575_s26 + $0x62] sm:$0xff] }
 0x246   : > { %23442 = vst [vmem:[#allocation33_spill] sm:$0xff] %v19853_v59  ;;  %v19872_v29 = vadd.f32 %v15936_v60, %v2562_v16  ;;  %v2561_v33 = vadd.f32 %v2490_v62, %v19702_v22  ;;  %16343 = vmatprep.subr.mxu1 %v5584_v35  ;;  %16375 = vmatprep.subr.mxu0 %v5814_v58  ;;  %v19887_v22 = vld [vmem:[%s18575_s26 + $0x51] sm:$0xff]  ;;  %23445 = vst [vmem:[#allocation32_spill] sm:$0xff] %v19896_v15  ;;  %v19917_v60 = vld [vmem:[%s18575_s26 + $0x69] sm:$0xff] }
 0x247   : > { %v15907_v25 = vpop.f32.mrf.mxu1  ;;  %v15939_v1 = vpop.f32.mrf.mxu0  ;;  %16290 = vmatmul.mubr.msk.f32.gmra.mxu1 %vm806_vm0, %v19861_v13  ;;  %16322 = vmatmul.mubr.msk.f32.gmra.mxu0 %vm806_vm0, %v19864_v63  ;;  %v19907_v8 = vld [vmem:[#allocation10 + $0xd8] sm:$0xff] }
 0x248   : > { %23443 = vst [vmem:[#allocation35_spill] sm:$0xff] %v19872_v29  ;;  %v19879_v17 = vadd.f32 %v2720_v45, %v2561_v33  ;;  %v2564_v3 = vadd.f32 %v15907_v25, %v19715_v0  ;;  %16292 = vmatprep.mubr.msk.f32.mxu1 %vm806_vm0, %v19867_v48  ;;  %16324 = vmatprep.mubr.msk.f32.mxu0 %vm806_vm0, %v19870_v44  ;;  %v19923_v62 = vld [vmem:[%s18575_s26 + $0x79] sm:$0xff] }
 0x249   : > { %v2500_v36 = vpop.f32.mrf.mxu1  ;;  %v2730_v38 = vpop.f32.mrf.mxu0  ;;  %16344 = vmatpush3.msra.mxu1 %v5584_v35  ;;  %16376 = vmatpush3.msra.mxu0 %v5814_v58  ;;  %v19920_v35 = vld [vmem:[%s18575_s26 + $0x6a] sm:$0xff]  ;;  %v19926_v45 = vld [vmem:[%s18575_s26 + $0x7a] sm:$0xff] }
 0x24a   : > { %23444 = vst [vmem:[#allocation31_spill] sm:$0xff] %v19879_v17  ;;  %v19898_v0 = vadd.f32 %v15939_v1, %v2564_v3  ;;  %v2563_v61 = vadd.f32 %v2500_v36, %v19726_v4  ;;  %16345 = vmatprep.subr.mxu1 %v5583_v6  ;;  %16377 = vmatprep.subr.mxu0 %v5813_v39  ;;  %23448 = vst [vmem:[#allocation37_spill] sm:$0xff] %v19920_v35  ;;  %v19948_v3 = vld [vmem:[%s18575_s26 + $0x82] sm:$0xff] }
 0x24b   : > { %v15910_v20 = vpop.f32.mrf.mxu1  ;;  %v15942_v21 = vpop.f32.mrf.mxu0  ;;  %16293 = vmatmul.mubr.msk.f32.gmra.mxu1 %vm806_vm0, %v19887_v22  ;;  %16325 = vmatmul.mubr.msk.f32.gmra.mxu0 %vm806_vm0, %v19890_v2  ;;  %23449 = vst [vmem:[#allocation38_spill] sm:$0xff] %v19926_v45  ;;  %23452 = vst [vmem:[#allocation41_spill] sm:$0xff] %v19948_v3 }
 0x24c   : > { %23446 = vst [vmem:[#allocation34_spill] sm:$0xff] %v19898_v0  ;;  %v19909_v27 = vadd.f32 %v2730_v38, %v2563_v61  ;;  %v2566_v4 = vadd.f32 %v15910_v20, %v19739_v52  ;;  %16295 = vmatprep.mubr.msk.f32.mxu1 %vm806_vm0, %v19893_v55  ;;  %16327 = vmatprep.mubr.msk.f32.mxu0 %vm806_vm0, %v19896_v15  ;;  %v19951_v61 = vld [vmem:[%s18575_s26 + $0x91] sm:$0xff] }
 0x24d   : > { %v2510_v58 = vpop.f32.mrf.mxu1  ;;  %v2740_v16 = vpop.f32.mrf.mxu0  ;;  %16346 = vmatpush3.msra.mxu1 %v5583_v6  ;;  %16378 = vmatpush3.msra.mxu0 %v5813_v39  ;;  %v19954_v20 = vld [vmem:[%s18575_s26 + $0x92] sm:$0xff] }
 0x24e   : > { %23447 = vst [vmem:[#allocation36_spill] sm:$0xff] %v19909_v27  ;;  %v19928_v52 = vadd.f32 %v15942_v21, %v2566_v4  ;;  %v2565_v33 = vadd.f32 %v2510_v58, %v19748_v31  ;;  %16403 = vmatprep.subr.mxu1 %v19905_v56  ;;  %16435 = vmatprep.subr.mxu0 %v19907_v8  ;;  %v19945_v31 = vld [vmem:[%s18575_s26 + $0x81] sm:$0xff]  ;;  %23453 = vst [vmem:[#allocation42_spill] sm:$0xff] %v19954_v20 }
 0x24f   : > { %v15913_v25 = vpop.f32.mrf.mxu1  ;;  %v15945_v1 = vpop.f32.mrf.mxu0  ;;  %16296 = vmatmul.mubr.msk.f32.gmra.mxu1 %vm806_vm0, %v19917_v60  ;;  %16328 = vmatmul.mubr.msk.f32.gmra.mxu0 %vm806_vm0, %v19920_v35 }
 0x250   : > { %23450 = vst [vmem:[#allocation39_spill] sm:$0xff] %v19928_v52  ;;  %v19937_v6 = vadd.f32 %v2740_v16, %v2565_v33  ;;  %v2568_v39 = vadd.f32 %v15913_v25, %v19761_v28  ;;  %16298 = vmatprep.mubr.msk.f32.mxu1 %vm806_vm0, %v19923_v62  ;;  %16330 = vmatprep.mubr.msk.f32.mxu0 %vm806_vm0, %v19926_v45  ;;  %v19971_v25 = vld [vmem:[%s18575_s26 + $0x99] sm:$0xff] }
 0x251   : > { %v2520_v36 = vpop.f32.mrf.mxu1  ;;  %v2750_v38 = vpop.f32.mrf.mxu0  ;;  %7413 = vrot.lane.b32.xlu0 %v19832_v34, %s18195_s21 }
 0x252   : > { %23451 = vst [vmem:[#allocation40_spill] sm:$0xff] %v19937_v6  ;;  %v19956_v28 = vadd.f32 %v15945_v1, %v2568_v39  ;;  %v2567_v21 = vadd.f32 %v2520_v36, %v19768_v49  ;;  %v19974_v49 = vld [vmem:[%s18575_s26 + $0x9a] sm:$0xff]  ;;  %v19977_v36 = vld [vmem:[%s18575_s26 + $0xa9] sm:$0xff] }
 0x253   : > { %v15916_v4 = vpop.f32.mrf.mxu1  ;;  %v15948_v58 = vpop.f32.mrf.mxu0  ;;  %16299 = vmatmul.mubr.msk.f32.gmra.mxu1 %vm806_vm0, %v19945_v31  ;;  %16331 = vmatmul.mubr.msk.f32.gmra.mxu0 %vm806_vm0, %v19948_v3  ;;  %23456 = vst [vmem:[#allocation45_spill] sm:$0xff] %v19974_v49 }
 0x254   : > { %23454 = vst [vmem:[#allocation43_spill] sm:$0xff] %v19956_v28  ;;  %v19963_v16 = vadd.f32 %v2750_v38, %v2567_v21  ;;  %v2570_v33 = vadd.f32 %v15916_v4, %v19782_v51  ;;  %16301 = vmatprep.mubr.msk.f32.mxu1 %vm806_vm0, %v19951_v61  ;;  %16333 = vmatprep.mubr.msk.f32.mxu0 %vm806_vm0, %v19954_v20  ;;  %v19980_v38 = vld [vmem:[%s18575_s26 + $0xaa] sm:$0xff] }
 0x255   : > { %v2530_v1 = vpop.f32.mrf.mxu1  ;;  %v2760_v39 = vpop.f32.mrf.mxu0  ;;  %23457 = vst [vmem:[#allocation46_spill] sm:$0xff] %v19980_v38  ;;  %7415 = vrot.lane.b32.xlu0 %v19841_v41, %s18195_s21 }
 0x256   : > { %23455 = vst [vmem:[#allocation44_spill] sm:$0xff] %v19963_v16  ;;  %v19982_v21 = vadd.f32 %v15948_v58, %v2570_v33  ;;  %v2569_v51 = vadd.f32 %v2530_v1, %v19789_v11  ;;  %v19997_v58 = vld [vmem:[%s18575_s26 + $0xb1] sm:$0xff] }
 0x257   : > { %v15919_v4 = vpop.f32.mrf.mxu1  ;;  %v15951_v3 = vpop.f32.mrf.mxu0  ;;  %16302 = vmatmul.mubr.msk.f32.gmra.mxu1 %vm806_vm0, %v19971_v25  ;;  %16334 = vmatmul.mubr.msk.f32.gmra.mxu0 %vm806_vm0, %v19974_v49  ;;  %v20000_v11 = vld [vmem:[%s18575_s26 + $0xb2] sm:$0xff] }
 0x258   : > { %23458 = vst [vmem:[#allocation47_spill] sm:$0xff] %v19982_v21  ;;  %v19989_v20 = vadd.f32 %v2760_v39, %v2569_v51  ;;  %v2572_v45 = vadd.f32 %v15919_v4, %v19801_v30  ;;  %16304 = vmatprep.mubr.msk.f32.mxu1 %vm806_vm0, %v19977_v36  ;;  %16336 = vmatprep.mubr.msk.f32.mxu0 %vm806_vm0, %v19980_v38 }
 0x259   : > { %v2540_v33 = vpop.f32.mrf.mxu1  ;;  %v2770_v1 = vpop.f32.mrf.mxu0  ;;  %7417 = vrot.lane.b32.xlu0 %v19861_v13, %s18195_s21 }
 0x25a   : > { %23459 = vst [vmem:[#allocation48_spill] sm:$0xff] %v19989_v20  ;;  %v20002_v35 = vadd.f32 %v15951_v3, %v2572_v45  ;;  %v2571_v49 = vadd.f32 %v2540_v33, %v19807_v7 }
 0x25b   : > { %v15922_v39 = vpop.f32.mrf.mxu1  ;;  %v15954_v51 = vpop.f32.mrf.mxu0  ;;  %16305 = vmatmul.mubr.msk.f32.gmra.mxu1 %vm806_vm0, %v19997_v58  ;;  %16337 = vmatmul.mubr.msk.f32.gmra.mxu0 %vm806_vm0, %v20000_v11 }
 0x25c   : > { %23460 = vst [vmem:[#allocation49_spill] sm:$0xff] %v20002_v35  ;;  %v20009_v30 = vadd.f32 %v2770_v1, %v2571_v49  ;;  %v2574_v4 = vadd.f32 %v15922_v39, %v19817_v24  ;;  %16347 = vmatprep.mubr.msk.f32.mxu1 %vm806_vm0, %v19655_v12  ;;  %16379 = vmatprep.mubr.msk.f32.mxu0 %vm806_vm0, %v19815_v10  ;;  %v6045_v24 = vld [vmem:[#allocation10 + $0xb0] sm:$0xff] }
 0x25d   : > { %v2550_v45 = vpop.f32.mrf.mxu1  ;;  %v2780_v7 = vpop.f32.mrf.mxu0  ;;  %v6276_v49 = vld [vmem:[#allocation10 + $0xd0] sm:$0xff]  ;;  %7419 = vrot.lane.b32.xlu0 %v19867_v48, %s18195_s21 }
 0x25e   : > { %23461 = vst [vmem:[#allocation50_spill] sm:$0xff] %v20009_v30  ;;  %v20016_v3 = vadd.f32 %v15954_v51, %v2574_v4  ;;  %v2573_v33 = vadd.f32 %v2550_v45, %v19825_v23  ;;  %v6275_v45 = vld [vmem:[#allocation10 + $0xc8] sm:$0xff] }
 0x25f   : > { %v15965_v38 = vpop.f32.mrf.mxu1  ;;  %v15997_v15 = vpop.f32.mrf.mxu0  ;;  %16348 = vmatmul.mubr.msk.f32.vlgmr.msra.gmra.mxu1 %vm806_vm0, %v19667_v53  ;;  %16380 = vmatmul.mubr.msk.f32.vlgmr.msra.gmra.mxu0 %vm806_vm0, %v19832_v34  ;;  %v20133_v34 = vld [vmem:[%s18575_s26 + $0xc8] sm:$0xff] }
 0x260   : > { %23462 = vst [vmem:[#allocation51_spill] sm:$0xff] %v20016_v3  ;;  %v20023_v12 = vadd.f32 %v2780_v7, %v2573_v33  ;;  %v3019_v1 = vadd.f32 %v15965_v38, %v19846_v50  ;;  %16404 = vmatpush3.msra.mxu1 %v19905_v56  ;;  %16350 = vmatprep.mubr.msk.f32.mxu1 %vm806_vm0, %v19673_v18  ;;  %v6044_v56 = vld [vmem:[#allocation10 + $0xa8] sm:$0xff] }
 0x261   : > { %v2939_v23 = vpop.f32.mrf.mxu1  ;;  %v3169_v39 = vpop.f32.mrf.mxu0  ;;  %16382 = vmatprep.mubr.msk.f32.mxu0 %vm806_vm0, %v19841_v41  ;;  %16436 = vmatpush3.msra.mxu0 %v19907_v8 }
 0x262   : > { %23463 = vst [vmem:[#allocation52_spill] sm:$0xff] %v20023_v12  ;;  %v20032_v53 = vadd.f32 %v15997_v15, %v3019_v1  ;;  %v3018_v51 = vadd.f32 %v2939_v23, %v19853_v59  ;;  %16405 = vmatprep.subr.mxu1 %v6045_v24  ;;  %16437 = vmatprep.subr.mxu0 %v6276_v49 }
 0x263   : > { %v15968_v4 = vpop.f32.mrf.mxu1  ;;  %v16000_v38 = vpop.f32.mrf.mxu0  ;;  %16351 = vmatmul.mubr.msk.f32.gmra.mxu1 %vm806_vm0, %v19690_v40  ;;  %16383 = vmatmul.mubr.msk.f32.gmra.mxu0 %vm806_vm0, %v19861_v13 }
 0x264   : > { %v20039_v7 = vadd.f32 %v3169_v39, %v3018_v51  ;;  %v3021_v8 = vadd.f32 %v15968_v4, %v19872_v29  ;;  %16353 = vmatprep.mubr.msk.f32.mxu1 %vm806_vm0, %v19693_v46  ;;  %16385 = vmatprep.mubr.msk.f32.mxu0 %vm806_vm0, %v19867_v48  ;;  %v6043_v4 = vld [vmem:[#allocation10 + $0xa0] sm:$0xff] }
 0x265   : > { %v2949_v15 = vpop.f32.mrf.mxu1  ;;  %v3179_v33 = vpop.f32.mrf.mxu0  ;;  %16406 = vmatpush3.msra.mxu1 %v6045_v24  ;;  %16438 = vmatpush3.msra.mxu0 %v6276_v49  ;;  %v6274_v29 = vld [vmem:[#allocation10 + $0xc0] sm:$0xff] }
 0x266   : > { %v20046_v1 = vadd.f32 %v16000_v38, %v3021_v8  ;;  %v3020_v23 = vadd.f32 %v2949_v15, %v19879_v17  ;;  %16407 = vmatprep.subr.mxu1 %v6044_v56  ;;  %16439 = vmatprep.subr.mxu0 %v6275_v45 }
 0x267   : > { %v15971_v39 = vpop.f32.mrf.mxu1  ;;  %v16003_v51 = vpop.f32.mrf.mxu0  ;;  %16354 = vmatmul.mubr.msk.f32.gmra.mxu1 %vm806_vm0, %v19710_v32  ;;  %16386 = vmatmul.mubr.msk.f32.gmra.mxu0 %vm806_vm0, %v19887_v22 }
 0x268   : > { %v20053_v59 = vadd.f32 %v3179_v33, %v3020_v23  ;;  %v3023_v24 = vadd.f32 %v15971_v39, %v19898_v0  ;;  %16356 = vmatprep.mubr.msk.f32.mxu1 %vm806_vm0, %v19713_v5  ;;  %16388 = vmatprep.mubr.msk.f32.mxu0 %vm806_vm0, %v19893_v55  ;;  %v20067_v39 = vld [vmem:[#allocation10 + $0xf8] sm:$0xff] }
 0x269   : > { %v2959_v49 = vpop.f32.mrf.mxu1  ;;  %v3189_v38 = vpop.f32.mrf.mxu0  ;;  %16408 = vmatpush3.msra.mxu1 %v6044_v56  ;;  %16440 = vmatpush3.msra.mxu0 %v6275_v45  ;;  %v20069_v0 = vld [vmem:[#allocation10 + $0x118] sm:$0xff] }
 0x26a   : > { %v20060_v8 = vadd.f32 %v16003_v51, %v3023_v24  ;;  %v3022_v15 = vadd.f32 %v2959_v49, %v19909_v27  ;;  %16409 = vmatprep.subr.mxu1 %v6043_v4  ;;  %16441 = vmatprep.subr.mxu0 %v6274_v29 }
 0x26b   : > { %v15974_v33 = vpop.f32.mrf.mxu1  ;;  %v16006_v23 = vpop.f32.mrf.mxu0  ;;  %16357 = vmatmul.mubr.msk.f32.gmra.mxu1 %vm806_vm0, %v19734_v47  ;;  %16389 = vmatmul.mubr.msk.f32.gmra.mxu0 %vm806_vm0, %v19917_v60 }
 0x26c   : > { %v20071_v56 = vadd.f32 %v3189_v38, %v3022_v15  ;;  %v3025_v45 = vadd.f32 %v15974_v33, %v19928_v52  ;;  %16359 = vmatprep.mubr.msk.f32.mxu1 %vm806_vm0, %v19737_v19  ;;  %16391 = vmatprep.mubr.msk.f32.mxu0 %vm806_vm0, %v19923_v62 }
 0x26d   : > { %v2969_v51 = vpop.f32.mrf.mxu1  ;;  %v3199_v24 = vpop.f32.mrf.mxu0  ;;  %16410 = vmatpush3.msra.mxu1 %v6043_v4  ;;  %16442 = vmatpush3.msra.mxu0 %v6274_v29 }
 0x26e   : > { %v20078_v49 = vadd.f32 %v16006_v23, %v3025_v45  ;;  %v3024_v27 = vadd.f32 %v2969_v51, %v19937_v6  ;;  %16467 = vmatprep.subr.mxu1 %v20067_v39  ;;  %16499 = vmatprep.subr.mxu0 %v20069_v0 }
 0x26f   : > { %v15977_v38 = vpop.f32.mrf.mxu1  ;;  %v16009_v15 = vpop.f32.mrf.mxu0  ;;  %16360 = vmatmul.mubr.msk.f32.gmra.mxu1 %vm806_vm0, %v19756_v14  ;;  %16392 = vmatmul.mubr.msk.f32.gmra.mxu0 %vm806_vm0, %v19945_v31 }
 0x270   : > { %v20087_v33 = vadd.f32 %v3199_v24, %v3024_v27  ;;  %v3027_v29 = vadd.f32 %v15977_v38, %v19956_v28  ;;  %16362 = vmatprep.mubr.msk.f32.mxu1 %vm806_vm0, %v19759_v43  ;;  %16394 = vmatprep.mubr.msk.f32.mxu0 %vm806_vm0, %v19951_v61 }
 0x271   : > { %v2979_v4 = vpop.f32.mrf.mxu1  ;;  %v3209_v23 = vpop.f32.mrf.mxu0  ;;  %7421 = vrot.lane.b32.xlu0 %v19887_v22, %s18195_s21 }
 0x272   : > { %v20096_v45 = vadd.f32 %v16009_v15, %v3027_v29  ;;  %v3026_v27 = vadd.f32 %v2979_v4, %v19963_v16  ;;  %v20111_v29 = vld [vmem:[%s18575_s26 + $0xc0] sm:$0xff] }
 0x273   : > { %v15980_v51 = vpop.f32.mrf.mxu1  ;;  %v16012_v24 = vpop.f32.mrf.mxu0  ;;  %16363 = vmatmul.mubr.msk.f32.gmra.mxu1 %vm806_vm0, %v19776_v26  ;;  %16395 = vmatmul.mubr.msk.f32.gmra.mxu0 %vm806_vm0, %v19971_v25  ;;  %v20114_v4 = vld [vmem:[%s18575_s26 + $0xc1] sm:$0xff] }
 0x274   : > { %v20103_v38 = vadd.f32 %v3209_v23, %v3026_v27  ;;  %v3029_v28 = vadd.f32 %v15980_v51, %v19982_v21  ;;  %16365 = vmatprep.mubr.msk.f32.mxu1 %vm806_vm0, %v19780_v9  ;;  %16397 = vmatprep.mubr.msk.f32.mxu0 %vm806_vm0, %v19977_v36 }
 0x275   : > { %v2989_v10 = vpop.f32.mrf.mxu1  ;;  %v3219_v15 = vpop.f32.mrf.mxu0  ;;  %7423 = vrot.lane.b32.xlu0 %v19893_v55, %s18195_s21 }
 0x276   : > { %v20118_v23 = vadd.f32 %v16012_v24, %v3029_v28  ;;  %v3028_v27 = vadd.f32 %v2989_v10, %v19989_v20  ;;  %v20136_v28 = vld [vmem:[%s18575_s26 + $0xc9] sm:$0xff] }
 0x277   : > { %v15983_v51 = vpop.f32.mrf.mxu1  ;;  %v16015_v21 = vpop.f32.mrf.mxu0  ;;  %16366 = vmatmul.mubr.msk.f32.gmra.mxu1 %vm806_vm0, %v19797_v54  ;;  %16398 = vmatmul.mubr.msk.f32.gmra.mxu0 %vm806_vm0, %v19997_v58 }
 0x278   : > { %v20125_v16 = vadd.f32 %v3219_v15, %v3028_v27  ;;  %v3031_v6 = vadd.f32 %v15983_v51, %v20002_v35  ;;  %16368 = vmatprep.mubr.msk.f32.mxu1 %vm806_vm0, %v20111_v29  ;;  %16400 = vmatprep.mubr.msk.f32.mxu0 %vm806_vm0, %v20114_v4 }
 0x279   : > { %v2999_v24 = vpop.f32.mrf.mxu1  ;;  %v3229_v10 = vpop.f32.mrf.mxu0  ;;  %7425 = vrot.lane.b32.xlu0 %v19917_v60, %s18195_s21 }
 0x27a   : > { %v20140_v20 = vadd.f32 %v16015_v21, %v3031_v6  ;;  %v3030_v15 = vadd.f32 %v2999_v24, %v20009_v30 }
 0x27b   : > { %v15986_v27 = vpop.f32.mrf.mxu1  ;;  %v16018_v51 = vpop.f32.mrf.mxu0  ;;  %16369 = vmatmul.mubr.msk.f32.gmra.mxu1 %vm806_vm0, %v20133_v34  ;;  %16401 = vmatmul.mubr.msk.f32.gmra.mxu0 %vm806_vm0, %v20136_v28 }
 0x27c   : > { %v20147_v35 = vadd.f32 %v3229_v10, %v3030_v15  ;;  %v3033_v52 = vadd.f32 %v15986_v27, %v20016_v3  ;;  %16411 = vmatprep.mubr.msk.f32.mxu1 %vm806_vm0, %v19821_v37  ;;  %16443 = vmatprep.mubr.msk.f32.mxu0 %vm806_vm0, %v19673_v18  ;;  %v6506_v37 = vld [vmem:[#allocation10 + $0xf0] sm:$0xff] }
 0x27d   : > { %v3009_v6 = vpop.f32.mrf.mxu1  ;;  %v3239_v21 = vpop.f32.mrf.mxu0  ;;  %v6736_v15 = vld [vmem:[#allocation10 + $0x110] sm:$0xff] }
 0x27e   : > { %v20156_v24 = vadd.f32 %v16018_v51, %v3033_v52  ;;  %v3032_v30 = vadd.f32 %v3009_v6, %v20023_v12  ;;  %v20541_v12 = vld [vmem:[%s18583_s16 + $0x78] sm:$0xff] }
 0x27f   : > { %v16029_v17 = vpop.f32.mrf.mxu1  ;;  %v16061_v10 = vpop.f32.mrf.mxu0  ;;  %16412 = vmatmul.mubr.msk.f32.vlgmr.msra.gmra.mxu1 %vm806_vm0, %v19835_v57  ;;  %16444 = vmatmul.mubr.msk.f32.vlgmr.msra.gmra.mxu0 %vm806_vm0, %v19690_v40 }
 0x280   : > { %v20163_v18 = vadd.f32 %v3239_v21, %v3032_v30  ;;  %v3479_v27 = vadd.f32 %v16029_v17, %v20032_v53  ;;  %16468 = vmatpush3.msra.mxu1 %v20067_v39  ;;  %16414 = vmatprep.mubr.msk.f32.mxu1 %vm806_vm0, %v19844_v42  ;;  %v6505_v53 = vld [vmem:[#allocation10 + $0xe8] sm:$0xff] }
 0x281   : > { %v3399_v52 = vpop.f32.mrf.mxu1  ;;  %v3630_v51 = vpop.f32.mrf.mxu0  ;;  %16446 = vmatprep.mubr.msk.f32.mxu0 %vm806_vm0, %v19693_v46  ;;  %16500 = vmatpush3.msra.mxu0 %v20069_v0  ;;  %v6735_v39 = vld [vmem:[#allocation10 + $0x108] sm:$0xff] }
 0x282   : > { %v20172_v57 = vadd.f32 %v16061_v10, %v3479_v27  ;;  %v3478_v40 = vadd.f32 %v3399_v52, %v20039_v7  ;;  %16469 = vmatprep.subr.mxu1 %v6506_v37  ;;  %16501 = vmatprep.subr.mxu0 %v6736_v15 }
 0x283   : > { %v16032_v30 = vpop.f32.mrf.mxu1  ;;  %v16064_v17 = vpop.f32.mrf.mxu0  ;;  %16415 = vmatmul.mubr.msk.f32.gmra.mxu1 %vm806_vm0, %v19864_v63  ;;  %16447 = vmatmul.mubr.msk.f32.gmra.mxu0 %vm806_vm0, %v19710_v32 }
 0x284   : > { %v20179_v6 = vadd.f32 %v3630_v51, %v3478_v40  ;;  %v3481_v46 = vadd.f32 %v16032_v30, %v20046_v1  ;;  %16417 = vmatprep.mubr.msk.f32.mxu1 %vm806_vm0, %v19870_v44  ;;  %16449 = vmatprep.mubr.msk.f32.mxu0 %vm806_vm0, %v19713_v5  ;;  %v6504_v1 = vld [vmem:[#allocation10 + $0xe0] sm:$0xff] }
 0x285   : > { %v3409_v0 = vpop.f32.mrf.mxu1  ;;  %v3640_v7 = vpop.f32.mrf.mxu0  ;;  %16470 = vmatpush3.msra.mxu1 %v6506_v37  ;;  %16502 = vmatpush3.msra.mxu0 %v6736_v15  ;;  %v6734_v5 = vld [vmem:[#allocation10 + $0x100] sm:$0xff]  ;;  %v23464_v15 = vld [vmem:[#allocation32_spill] sm:$0xff] }
 0x286   : > { %v20186_v21 = vadd.f32 %v16064_v17, %v3481_v46  ;;  %v3480_v32 = vadd.f32 %v3409_v0, %v20053_v59  ;;  %16471 = vmatprep.subr.mxu1 %v6505_v53  ;;  %16503 = vmatprep.subr.mxu0 %v6735_v39  ;;  %v23465_v46 = vld [vmem:[#allocation37_spill] sm:$0xff]  ;;  %v23466_v0 = vld [vmem:[#allocation38_spill] sm:$0xff] }
 0x287   : > { %v16035_v10 = vpop.f32.mrf.mxu1  ;;  %v16067_v27 = vpop.f32.mrf.mxu0  ;;  %16418 = vmatmul.mubr.msk.f32.gmra.mxu1 %vm806_vm0, %v19890_v2  ;;  %16450 = vmatmul.mubr.msk.f32.gmra.mxu0 %vm806_vm0, %v19734_v47 }
 0x288   : > { %v20193_v52 = vadd.f32 %v3640_v7, %v3480_v32  ;;  %v3483_v37 = vadd.f32 %v16035_v10, %v20060_v8  ;;  %16420 = vmatprep.mubr.msk.f32.mxu1 %vm806_vm0, %v23464_v15  ;;  %16452 = vmatprep.mubr.msk.f32.mxu0 %vm806_vm0, %v19737_v19  ;;  %v20207_v8 = vld [vmem:[#allocation13 + $0x38] sm:$0xff] }
 0x289   : > { %v3419_v59 = vpop.f32.mrf.mxu1  ;;  %v3650_v51 = vpop.f32.mrf.mxu0  ;;  %16472 = vmatpush3.msra.mxu1 %v6505_v53  ;;  %16504 = vmatpush3.msra.mxu0 %v6735_v39  ;;  %v20209_v19 = vld [vmem:[#allocation13 + $0x18] sm:$0xff] }
 0x28a   : > { %v20200_v40 = vadd.f32 %v16067_v27, %v3483_v37  ;;  %v3482_v47 = vadd.f32 %v3419_v59, %v20071_v56  ;;  %16473 = vmatprep.subr.mxu1 %v6504_v1  ;;  %16505 = vmatprep.subr.mxu0 %v6734_v5  ;;  %v23467_v27 = vld [vmem:[#allocation41_spill] sm:$0xff] }
 0x28b   : > { %v16038_v30 = vpop.f32.mrf.mxu1  ;;  %v16070_v17 = vpop.f32.mrf.mxu0  ;;  %16421 = vmatmul.mubr.msk.f32.gmra.mxu1 %vm806_vm0, %v23465_v46  ;;  %16453 = vmatmul.mubr.msk.f32.gmra.mxu0 %vm806_vm0, %v19756_v14 }
 0x28c   : > { %v20211_v53 = vadd.f32 %v3650_v51, %v3482_v47  ;;  %v3485_v39 = vadd.f32 %v16038_v30, %v20078_v49  ;;  %16423 = vmatprep.mubr.msk.f32.mxu1 %vm806_vm0, %v23466_v0  ;;  %16455 = vmatprep.mubr.msk.f32.mxu0 %vm806_vm0, %v19759_v43 }
 0x28d   : > { %v3429_v56 = vpop.f32.mrf.mxu1  ;;  %v3660_v7 = vpop.f32.mrf.mxu0  ;;  %16474 = vmatpush3.msra.mxu1 %v6504_v1  ;;  %16506 = vmatpush3.msra.mxu0 %v6734_v5  ;;  %v23468_v5 = vld [vmem:[#allocation42_spill] sm:$0xff] }
 0x28e   : > { %v20218_v32 = vadd.f32 %v16070_v17, %v3485_v39  ;;  %v3484_v14 = vadd.f32 %v3429_v56, %v20087_v33  ;;  %16531 = vmatprep.subr.mxu1 %v20207_v8  ;;  %16563 = vmatprep.subr.mxu0 %v20209_v19  ;;  %v23470_v17 = vld [vmem:[#allocation46_spill] sm:$0xff] }
 0x28f   : > { %v16041_v10 = vpop.f32.mrf.mxu1  ;;  %v16073_v49 = vpop.f32.mrf.mxu0  ;;  %16424 = vmatmul.mubr.msk.f32.gmra.mxu1 %vm806_vm0, %v23467_v27  ;;  %16456 = vmatmul.mubr.msk.f32.gmra.mxu0 %vm806_vm0, %v19776_v26  ;;  %v20251_v56 = vld [vmem:[%s18575_s26 + $0xc2] sm:$0xff] }
 0x290   : > { %v20227_v43 = vadd.f32 %v3660_v7, %v3484_v14  ;;  %v3487_v1 = vadd.f32 %v16041_v10, %v20096_v45  ;;  %16426 = vmatprep.mubr.msk.f32.mxu1 %vm806_vm0, %v23468_v5  ;;  %16458 = vmatprep.mubr.msk.f32.mxu0 %vm806_vm0, %v19780_v9  ;;  %v23469_v45 = vld [vmem:[#allocation45_spill] sm:$0xff] }
 0x291   : > { %v3439_v33 = vpop.f32.mrf.mxu1  ;;  %v3670_v37 = vpop.f32.mrf.mxu0  ;;  %v14033_v7 = vld [vmem:[%s18575_s26 + $0xd8] sm:$0xff] }
 0x292   : > { %v20236_v59 = vadd.f32 %v16073_v49, %v3487_v1  ;;  %v3486_v26 = vadd.f32 %v3439_v33, %v20103_v38  ;;  %v20270_v1 = vld [vmem:[%s18575_s26 + $0xca] sm:$0xff] }
 0x293   : > { %v16044_v51 = vpop.f32.mrf.mxu1  ;;  %v16076_v47 = vpop.f32.mrf.mxu0  ;;  %16427 = vmatmul.mubr.msk.f32.gmra.mxu1 %vm806_vm0, %v23469_v45  ;;  %16459 = vmatmul.mubr.msk.f32.gmra.mxu0 %vm806_vm0, %v19797_v54 }
 0x294   : > { %v20243_v9 = vadd.f32 %v3670_v37, %v3486_v26  ;;  %v3489_v30 = vadd.f32 %v16044_v51, %v20118_v23  ;;  %16429 = vmatprep.mubr.msk.f32.mxu1 %vm806_vm0, %v23470_v17  ;;  %16461 = vmatprep.mubr.msk.f32.mxu0 %vm806_vm0, %v20111_v29 }
 0x295   : > { %v3449_v38 = vpop.f32.mrf.mxu1  ;;  %v3680_v39 = vpop.f32.mrf.mxu0 }
 0x296   : > { %v20256_v54 = vadd.f32 %v16076_v47, %v3489_v30  ;;  %v3488_v23 = vadd.f32 %v3449_v38, %v20125_v16  ;;  %v14034_v16 = vld [vmem:[%s18575_s26 + $0xe0] sm:$0xff] }
 0x297   : > { %v16047_v14 = vpop.f32.mrf.mxu1  ;;  %v16079_v10 = vpop.f32.mrf.mxu0  ;;  %16430 = vmatmul.mubr.msk.f32.gmra.mxu1 %vm806_vm0, %v20000_v11  ;;  %16462 = vmatmul.mubr.msk.f32.gmra.mxu0 %vm806_vm0, %v20133_v34 }
 0x298   : > { %v20263_v29 = vadd.f32 %v3680_v39, %v3488_v23  ;;  %v3491_v49 = vadd.f32 %v16047_v14, %v20140_v20  ;;  %16432 = vmatprep.mubr.msk.f32.mxu1 %vm806_vm0, %v20251_v56  ;;  %16464 = vmatprep.mubr.msk.f32.mxu0 %vm806_vm0, %v14033_v7 }
 0x299   : > { %v3459_v33 = vpop.f32.mrf.mxu1  ;;  %v3690_v37 = vpop.f32.mrf.mxu0 }
 0x29a   : > { %v20275_v26 = vadd.f32 %v16079_v10, %v3491_v49  ;;  %v3490_v34 = vadd.f32 %v3459_v33, %v20147_v35 }
 0x29b   : > { %v16050_v51 = vpop.f32.mrf.mxu1  ;;  %v16082_v47 = vpop.f32.mrf.mxu0  ;;  %16433 = vmatmul.mubr.msk.f32.gmra.mxu1 %vm806_vm0, %v20270_v1  ;;  %16465 = vmatmul.mubr.msk.f32.gmra.mxu0 %vm806_vm0, %v14034_v16 }
 0x29c   : > { %v20281_v20 = vadd.f32 %v3690_v37, %v3490_v34  ;;  %v3493_v30 = vadd.f32 %v16050_v51, %v20156_v24  ;;  %16475 = vmatprep.mubr.msk.f32.mxu1 %vm806_vm0, %v19841_v41  ;;  %16507 = vmatprep.mubr.msk.f32.mxu0 %vm806_vm0, %v19844_v42  ;;  %v7674_v41 = vld [vmem:[#allocation13 + $0x30] sm:$0xff] }
 0x29d   : > { %v3469_v38 = vpop.f32.mrf.mxu1  ;;  %v3700_v39 = vpop.f32.mrf.mxu0  ;;  %v7653_v42 = vld [vmem:[#allocation13 + $0x10] sm:$0xff] }
 0x29e   : > { %v20290_v35 = vadd.f32 %v16082_v47, %v3493_v30  ;;  %v3492_v7 = vadd.f32 %v3469_v38, %v20163_v18 }
 0x29f   : > { %v20293_v23 = vpop.f32.mrf.mxu1  ;;  %v20295_v14 = vpop.f32.mrf.mxu0  ;;  %16476 = vmatmul.mubr.msk.f32.vlgmr.msra.gmra.mxu1 %vm806_vm0, %v19861_v13  ;;  %16508 = vmatmul.mubr.msk.f32.vlgmr.msra.gmra.mxu0 %vm806_vm0, %v19864_v63 }
 0x2a0   : > { %v20301_v24 = vadd.f32 %v3700_v39, %v3492_v7  ;;  %16532 = vmatpush3.msra.mxu1 %v20207_v8  ;;  %16478 = vmatprep.mubr.msk.f32.mxu1 %vm806_vm0, %v19867_v48  ;;  %v7673_v48 = vld [vmem:[#allocation13 + $0x28] sm:$0xff] }
 0x2a1   : > { %v20306_v18 = vpop.f32.mrf.mxu1  ;;  %v20308_v10 = vpop.f32.mrf.mxu0  ;;  %16510 = vmatprep.mubr.msk.f32.mxu0 %vm806_vm0, %v19870_v44  ;;  %16564 = vmatpush3.msra.mxu0 %v20209_v19  ;;  %v7652_v8 = vld [vmem:[#allocation13 + $0x8] sm:$0xff] }
 0x2a2   : > { %16533 = vmatprep.subr.mxu1 %v7674_v41  ;;  %16565 = vmatprep.subr.mxu0 %v7653_v42 }
 0x2a3   : > { %v20313_v13 = vpop.f32.mrf.mxu1  ;;  %v20315_v63 = vpop.f32.mrf.mxu0  ;;  %16479 = vmatmul.mubr.msk.f32.gmra.mxu1 %vm806_vm0, %v19887_v22  ;;  %16511 = vmatmul.mubr.msk.f32.gmra.mxu0 %vm806_vm0, %v19890_v2  ;;  %v7672_v2 = vld [vmem:[#allocation13 + $0x20] sm:$0xff] }
 0x2a4   : > { %16481 = vmatprep.mubr.msk.f32.mxu1 %vm806_vm0, %v19893_v55  ;;  %16513 = vmatprep.mubr.msk.f32.mxu0 %vm806_vm0, %v23464_v15  ;;  %v7651_v55 = vld [vmem:[#allocation13] sm:$0xff] }
 0x2a5   : > { %v20325_v44 = vpop.f32.mrf.mxu1  ;;  %v20327_v19 = vpop.f32.mrf.mxu0  ;;  %16534 = vmatpush3.msra.mxu1 %v7674_v41  ;;  %16566 = vmatpush3.msra.mxu0 %v7653_v42  ;;  %v14065_v41 = vld [vmem:[%s18575_s26 + $0xd9] sm:$0xff] }
 0x2a6   : > { %16535 = vmatprep.subr.mxu1 %v7673_v48  ;;  %16567 = vmatprep.subr.mxu0 %v7652_v8 }
 0x2a7   : > { %v16099_v22 = vpop.f32.mrf.mxu1  ;;  %v16131_v49 = vpop.f32.mrf.mxu0  ;;  %16482 = vmatmul.mubr.msk.f32.gmra.mxu1 %vm806_vm0, %v19917_v60  ;;  %16514 = vmatmul.mubr.msk.f32.gmra.mxu0 %vm806_vm0, %v23465_v46 }
 0x2a8   : > { %v3944_v15 = vadd.f32 %v16099_v22, %v20200_v40  ;;  %16484 = vmatprep.mubr.msk.f32.mxu1 %vm806_vm0, %v19923_v62  ;;  %16516 = vmatprep.mubr.msk.f32.mxu0 %vm806_vm0, %v23466_v0  ;;  %v20345_v62 = vld [vmem:[#allocation13 + $0x58] sm:$0xff] }
 0x2a9   : > { %v3880_v16 = vpop.f32.mrf.mxu1  ;;  %v4110_v33 = vpop.f32.mrf.mxu0  ;;  %16536 = vmatpush3.msra.mxu1 %v7673_v48  ;;  %16568 = vmatpush3.msra.mxu0 %v7652_v8  ;;  %v20347_v40 = vld [vmem:[#allocation13 + $0x78] sm:$0xff] }
 0x2aa   : > { %v20338_v37 = vadd.f32 %v16131_v49, %v3944_v15  ;;  %v3943_v60 = vadd.f32 %v3880_v16, %v20211_v53  ;;  %16537 = vmatprep.subr.mxu1 %v7672_v2  ;;  %16569 = vmatprep.subr.mxu0 %v7651_v55  ;;  %v14066_v8 = vld [vmem:[%s18575_s26 + $0xe1] sm:$0xff] }
 0x2ab   : > { %v16102_v46 = vpop.f32.mrf.mxu1  ;;  %v16134_v34 = vpop.f32.mrf.mxu0  ;;  %16485 = vmatmul.mubr.msk.f32.gmra.mxu1 %vm806_vm0, %v19945_v31  ;;  %16517 = vmatmul.mubr.msk.f32.gmra.mxu0 %vm806_vm0, %v23467_v27  ;;  %v14098_v22 = vld [vmem:[%s18575_s26 + $0xe2] sm:$0xff] }
 0x2ac   : > { %v20349_v0 = vadd.f32 %v4110_v33, %v3943_v60  ;;  %v3946_v51 = vadd.f32 %v16102_v46, %v20218_v32  ;;  %16487 = vmatprep.mubr.msk.f32.mxu1 %vm806_vm0, %v19951_v61  ;;  %16519 = vmatprep.mubr.msk.f32.mxu0 %vm806_vm0, %v23468_v5  ;;  %v7656_v60 = vld [vmem:[%s18583_s16 + $0x9] sm:$0xff] }
 0x2ad   : > { %v3890_v53 = vpop.f32.mrf.mxu1  ;;  %v4120_v47 = vpop.f32.mrf.mxu0  ;;  %16538 = vmatpush3.msra.mxu1 %v7672_v2  ;;  %16570 = vmatpush3.msra.mxu0 %v7651_v55  ;;  %v7655_v2 = vld [vmem:[%s18583_s16 + $0x1] sm:$0xff] }
 0x2ae   : > { %v20356_v31 = vadd.f32 %v16134_v34, %v3946_v51  ;;  %v3945_v27 = vadd.f32 %v3890_v53, %v20227_v43  ;;  %16595 = vmatprep.subr.mxu1 %v20345_v62  ;;  %16627 = vmatprep.subr.mxu0 %v20347_v40  ;;  %v7636_v46 = vld [vmem:[%s18583_s16 + $0x8] sm:$0xff]  ;;  %v20417_v51 = vld [vmem:[%s18583_s16 + $0x19] sm:$0xff] }
 0x2af   : > { %v16105_v30 = vpop.f32.mrf.mxu1  ;;  %v16137_v32 = vpop.f32.mrf.mxu0  ;;  %16488 = vmatmul.mubr.msk.f32.gmra.mxu1 %vm806_vm0, %v19971_v25  ;;  %16520 = vmatmul.mubr.msk.f32.gmra.mxu0 %vm806_vm0, %v23469_v45 }
 0x2b0   : > { %v20365_v61 = vadd.f32 %v4120_v47, %v3945_v27  ;;  %v3948_v5 = vadd.f32 %v16105_v30, %v20236_v59  ;;  %16490 = vmatprep.mubr.msk.f32.mxu1 %vm806_vm0, %v19977_v36  ;;  %16522 = vmatprep.mubr.msk.f32.mxu0 %vm806_vm0, %v23470_v17  ;;  %v20423_v27 = vld [vmem:[%s18583_s16 + $0x18] sm:$0xff] }
 0x2b1   : > { %v3900_v43 = vpop.f32.mrf.mxu1  ;;  %v4130_v38 = vpop.f32.mrf.mxu0 }
 0x2b2   : > { %v20372_v39 = vadd.f32 %v16137_v32, %v3948_v5  ;;  %v3947_v25 = vadd.f32 %v3900_v43, %v20243_v9  ;;  %v8081_v32 = vld [vmem:[#allocation13 + $0x50] sm:$0xff] }
 0x2b3   : > { %v16108_v7 = vpop.f32.mrf.mxu1  ;;  %v16140_v45 = vpop.f32.mrf.mxu0  ;;  %16491 = vmatmul.mubr.msk.f32.gmra.mxu1 %vm806_vm0, %v19997_v58  ;;  %16523 = vmatmul.mubr.msk.f32.gmra.mxu0 %vm806_vm0, %v20000_v11  ;;  %v14097_v58 = vld [vmem:[%s18575_s26 + $0xda] sm:$0xff] }
 0x2b4   : > { %v20379_v36 = vadd.f32 %v4130_v38, %v3947_v25  ;;  %v3950_v59 = vadd.f32 %v16108_v7, %v20256_v54  ;;  %16493 = vmatprep.mubr.msk.f32.mxu1 %vm806_vm0, %v20114_v4  ;;  %16525 = vmatprep.mubr.msk.f32.mxu0 %vm806_vm0, %v20251_v56  ;;  %v8312_v5 = vld [vmem:[#allocation13 + $0x70] sm:$0xff] }
 0x2b5   : > { %v3910_v9 = vpop.f32.mrf.mxu1  ;;  %v4140_v17 = vpop.f32.mrf.mxu0  ;;  %v20440_v38 = vld [vmem:[%s18583_s16 + $0x20] sm:$0xff] }
 0x2b6   : > { %v20388_v42 = vadd.f32 %v16140_v45, %v3950_v59  ;;  %v3949_v11 = vadd.f32 %v3910_v9, %v20263_v29  ;;  %v20450_v45 = vld [vmem:[%s18583_s16 + $0x31] sm:$0xff] }
 0x2b7   : > { %v16111_v48 = vpop.f32.mrf.mxu1  ;;  %v16143_v54 = vpop.f32.mrf.mxu0  ;;  %16494 = vmatmul.mubr.msk.f32.gmra.mxu1 %vm806_vm0, %v20136_v28  ;;  %16526 = vmatmul.mubr.msk.f32.gmra.mxu0 %vm806_vm0, %v20270_v1  ;;  %v7635_v28 = vld [vmem:[%s18583_s16] sm:$0xff]  ;;  %23476 = vst [vmem:[#allocation45_spill] sm:$0xff] %v20450_v45 }
 0x2b8   : > { %v20395_v4 = vadd.f32 %v4140_v17, %v3949_v11  ;;  %v3952_v56 = vadd.f32 %v16111_v48, %v20275_v26  ;;  %16496 = vmatprep.mubr.msk.f32.mxu1 %vm806_vm0, %v14065_v41  ;;  %16528 = vmatprep.mubr.msk.f32.mxu0 %vm806_vm0, %v14097_v58  ;;  %v8080_v17 = vld [vmem:[#allocation13 + $0x48] sm:$0xff] }
 0x2b9   : > { %v3920_v29 = vpop.f32.mrf.mxu1  ;;  %v4150_v49 = vpop.f32.mrf.mxu0  ;;  %v20468_v41 = vld [vmem:[%s18583_s16 + $0x39] sm:$0xff] }
 0x2ba   : > { %23471 = vst [vmem:[#allocation32_spill] sm:$0xff] %v20395_v4  ;;  %v20404_v55 = vadd.f32 %v16143_v54, %v3952_v56  ;;  %v3951_v1 = vadd.f32 %v3920_v29, %v20281_v20  ;;  %23477 = vst [vmem:[#allocation46_spill] sm:$0xff] %v20468_v41  ;;  %v20471_v58 = vld [vmem:[%s18583_s16 + $0x38] sm:$0xff]  ;;  %v20478_v54 = vld [vmem:[%s18583_s16 + $0x49] sm:$0xff] }
 0x2bb   : > { %v16114_v15 = vpop.f32.mrf.mxu1  ;;  %v16146_v26 = vpop.f32.mrf.mxu0  ;;  %16497 = vmatmul.mubr.msk.f32.gmra.mxu1 %vm806_vm0, %v14066_v8  ;;  %16529 = vmatmul.mubr.msk.f32.gmra.mxu0 %vm806_vm0, %v14098_v22  ;;  %23478 = vst [vmem:[#allocation53_spill] sm:$0xff] %v20478_v54  ;;  %v20481_v56 = vld [vmem:[%s18583_s16 + $0x48] sm:$0xff]  ;;  %v8079_v29 = vld [vmem:[#allocation13 + $0x40] sm:$0xff]  ;;  %v20591_v4 = vld [vmem:[%s18583_s16 + $0x98] sm:$0xff] }
 0x2bc   : > { %23472 = vst [vmem:[#allocation37_spill] sm:$0xff] %v20404_v55  ;;  %v20409_v16 = vadd.f32 %v4150_v49, %v3951_v1  ;;  %v3954_v33 = vadd.f32 %v16114_v15, %v20290_v35  ;;  %16539 = vmatprep.mubr.msk.f32.mxu1 %vm806_vm0, %v7655_v2  ;;  %16571 = vmatprep.mubr.msk.f32.mxu0 %vm806_vm0, %v7635_v28  ;;  %v8310_v49 = vld [vmem:[#allocation13 + $0x60] sm:$0xff] }
 0x2bd   : > { %v3930_v34 = vpop.f32.mrf.mxu1  ;;  %v4160_v20 = vpop.f32.mrf.mxu0  ;;  %v20496_v2 = vld [vmem:[%s18583_s16 + $0x51] sm:$0xff] }
 0x2be   : > { %v20419_v53 = vadd.f32 %v16146_v26, %v3954_v33  ;;  %v3953_v47 = vadd.f32 %v3930_v34, %v20301_v24  ;;  %v20437_v24 = vld [vmem:[%s18583_s16 + $0x21] sm:$0xff]  ;;  %23479 = vst [vmem:[#allocation54_spill] sm:$0xff] %v20496_v2  ;;  %v20499_v28 = vld [vmem:[%s18583_s16 + $0x50] sm:$0xff] }
 0x2bf   : > { %v20425_v35 = vpop.f32.mrf.mxu1  ;;  %v20427_v30 = vpop.f32.mrf.mxu0  ;;  %16540 = vmatmul.mubr.msk.f32.vlgmr.msra.gmra.mxu1 %vm806_vm0, %v7656_v60  ;;  %16572 = vmatmul.mubr.msk.f32.vlgmr.msra.gmra.mxu0 %vm806_vm0, %v7636_v46  ;;  %23475 = vst [vmem:[#allocation42_spill] sm:$0xff] %v20437_v24  ;;  %v20506_v26 = vld [vmem:[%s18583_s16 + $0x61] sm:$0xff] }
 0x2c0   : > { %23473 = vst [vmem:[#allocation38_spill] sm:$0xff] %v20419_v53  ;;  %v20431_v43 = vadd.f32 %v4160_v20, %v3953_v47  ;;  %16596 = vmatpush3.msra.mxu1 %v20345_v62  ;;  %16542 = vmatprep.mubr.msk.f32.mxu1 %vm806_vm0, %v20417_v51  ;;  %v20453_v62 = vld [vmem:[%s18583_s16 + $0x30] sm:$0xff]  ;;  %23480 = vst [vmem:[#allocation55_spill] sm:$0xff] %v20506_v26  ;;  %v20509_v33 = vld [vmem:[%s18583_s16 + $0x60] sm:$0xff] }
 0x2c1   : > { %v20442_v25 = vpop.f32.mrf.mxu1  ;;  %v20444_v7 = vpop.f32.mrf.mxu0  ;;  %16574 = vmatprep.mubr.msk.f32.mxu0 %vm806_vm0, %v20423_v27  ;;  %16628 = vmatpush3.msra.mxu0 %v20347_v40  ;;  %v8311_v40 = vld [vmem:[#allocation13 + $0x68] sm:$0xff]  ;;  %v20519_v34 = vld [vmem:[#allocation13 + $0x98] sm:$0xff] }
 0x2c2   : > { %23474 = vst [vmem:[#allocation41_spill] sm:$0xff] %v20431_v43  ;;  %16597 = vmatprep.subr.mxu1 %v8081_v32  ;;  %16629 = vmatprep.subr.mxu0 %v8312_v5  ;;  %v20521_v20 = vld [vmem:[#allocation13 + $0xb8] sm:$0xff] }
 0x2c3   : > { %v20455_v59 = vpop.f32.mrf.mxu1  ;;  %v20457_v9 = vpop.f32.mrf.mxu0  ;;  %16543 = vmatmul.mubr.msk.f32.gmra.mxu1 %vm806_vm0, %v20437_v24  ;;  %16575 = vmatmul.mubr.msk.f32.gmra.mxu0 %vm806_vm0, %v20440_v38  ;;  %v20528_v47 = vld [vmem:[%s18583_s16 + $0x69] sm:$0xff]  ;;  %v20588_v43 = vld [vmem:[%s18583_s16 + $0x99] sm:$0xff] }
 0x2c4   : > { %16545 = vmatprep.mubr.msk.f32.mxu1 %vm806_vm0, %v20450_v45  ;;  %16577 = vmatprep.mubr.msk.f32.mxu0 %vm806_vm0, %v20453_v62  ;;  %23481 = vst [vmem:[#allocation56_spill] sm:$0xff] %v20528_v47  ;;  %23487 = vst [vmem:[#allocation62_spill] sm:$0xff] %v20588_v43 }
 0x2c5   : > { %v20473_v11 = vpop.f32.mrf.mxu1  ;;  %v20475_v48 = vpop.f32.mrf.mxu0  ;;  %16598 = vmatpush3.msra.mxu1 %v8081_v32  ;;  %16630 = vmatpush3.msra.mxu0 %v8312_v5  ;;  %v20531_v32 = vld [vmem:[%s18583_s16 + $0x68] sm:$0xff] }
 0x2c6   : > { %16599 = vmatprep.subr.mxu1 %v8080_v17  ;;  %16631 = vmatprep.subr.mxu0 %v8311_v40 }
 0x2c7   : > { %v20483_v8 = vpop.f32.mrf.mxu1  ;;  %v20485_v22 = vpop.f32.mrf.mxu0  ;;  %16546 = vmatmul.mubr.msk.f32.gmra.mxu1 %vm806_vm0, %v20468_v41  ;;  %16578 = vmatmul.mubr.msk.f32.gmra.mxu0 %vm806_vm0, %v20471_v58  ;;  %v3940_v41 = vadd.f32 %v20293_v23, %v20172_v57  ;;  %v20601_v57 = vld [vmem:[%s18583_s16 + $0xa8] sm:$0xff]  ;;  %v3939_v23 = vadd.f32 %v20306_v18, %v20179_v6  ;;  %v20619_v6 = vld [vmem:[%s18583_s16 + $0xb1] sm:$0xff] }
 0x2c8   : > { %16548 = vmatprep.mubr.msk.f32.mxu1 %vm806_vm0, %v20478_v54  ;;  %16580 = vmatprep.mubr.msk.f32.mxu0 %vm806_vm0, %v20481_v56  ;;  %23493 = vst [vmem:[#allocation68_spill] sm:$0xff] %v20619_v6  ;;  %v20622_v18 = vld [vmem:[%s18583_s16 + $0xb0] sm:$0xff] }
 0x2c9   : > { %v20501_v1 = vpop.f32.mrf.mxu1  ;;  %v20503_v15 = vpop.f32.mrf.mxu0  ;;  %16600 = vmatpush3.msra.mxu1 %v8080_v17  ;;  %16632 = vmatpush3.msra.mxu0 %v8311_v40  ;;  %v20538_v40 = vld [vmem:[%s18583_s16 + $0x79] sm:$0xff] }
 0x2ca   : > { %16601 = vmatprep.subr.mxu1 %v8079_v29  ;;  %16633 = vmatprep.subr.mxu0 %v8310_v49  ;;  %23482 = vst [vmem:[#allocation57_spill] sm:$0xff] %v20538_v40 }
 0x2cb   : > { %v20511_v60 = vpop.f32.mrf.mxu1  ;;  %v20513_v46 = vpop.f32.mrf.mxu0  ;;  %16549 = vmatmul.mubr.msk.f32.gmra.mxu1 %vm806_vm0, %v20496_v2  ;;  %16581 = vmatmul.mubr.msk.f32.gmra.mxu0 %vm806_vm0, %v20499_v28  ;;  %v20571_v2 = vld [vmem:[%s18583_s16 + $0x90] sm:$0xff] }
 0x2cc   : > { %16551 = vmatprep.mubr.msk.f32.mxu1 %vm806_vm0, %v20506_v26  ;;  %16583 = vmatprep.mubr.msk.f32.mxu0 %vm806_vm0, %v20509_v33  ;;  %v20568_v26 = vld [vmem:[%s18583_s16 + $0x91] sm:$0xff] }
 0x2cd   : > { %v20533_v5 = vpop.f32.mrf.mxu1  ;;  %v20535_v17 = vpop.f32.mrf.mxu0  ;;  %16602 = vmatpush3.msra.mxu1 %v8079_v29  ;;  %16634 = vmatpush3.msra.mxu0 %v8310_v49  ;;  %v20558_v29 = vld [vmem:[%s18583_s16 + $0x81] sm:$0xff]  ;;  %23485 = vst [vmem:[#allocation60_spill] sm:$0xff] %v20568_v26 }
 0x2ce   : > { %16659 = vmatprep.subr.mxu1 %v20519_v34  ;;  %16691 = vmatprep.subr.mxu0 %v20521_v20  ;;  %23483 = vst [vmem:[#allocation58_spill] sm:$0xff] %v20558_v29  ;;  %v20561_v49 = vld [vmem:[%s18583_s16 + $0x80] sm:$0xff] }
 0x2cf   : > { %v20545_v3 = vpop.f32.mrf.mxu1  ;;  %v20547_v53 = vpop.f32.mrf.mxu0  ;;  %16552 = vmatmul.mubr.msk.f32.gmra.mxu1 %vm806_vm0, %v20528_v47  ;;  %16584 = vmatmul.mubr.msk.f32.gmra.mxu0 %vm806_vm0, %v20531_v32 }
 0x2d0   : > { %16554 = vmatprep.mubr.msk.f32.mxu1 %vm806_vm0, %v20538_v40  ;;  %16586 = vmatprep.mubr.msk.f32.mxu0 %vm806_vm0, %v20541_v12 }
 0x2d1   : > { %v20563_v55 = vpop.f32.mrf.mxu1  ;;  %v20565_v47 = vpop.f32.mrf.mxu0 }
 0x2d2   : > { %23484 = vst [vmem:[#allocation59_spill] sm:$0xff] %v20565_v47 }
 0x2d3   : > { %v20573_v54 = vpop.f32.mrf.mxu1  ;;  %v20575_v40 = vpop.f32.mrf.mxu0  ;;  %16555 = vmatmul.mubr.msk.f32.gmra.mxu1 %vm806_vm0, %v20558_v29  ;;  %16587 = vmatmul.mubr.msk.f32.gmra.mxu0 %vm806_vm0, %v20561_v49 }
 0x2d4   : > { %23486 = vst [vmem:[#allocation61_spill] sm:$0xff] %v20575_v40  ;;  %16557 = vmatprep.mubr.msk.f32.mxu1 %vm806_vm0, %v20568_v26  ;;  %16589 = vmatprep.mubr.msk.f32.mxu0 %vm806_vm0, %v20571_v2  ;;  %v20598_v40 = vld [vmem:[%s18583_s16 + $0xa9] sm:$0xff] }
 0x2d5   : > { %v20593_v45 = vpop.f32.mrf.mxu1  ;;  %v20595_v29 = vpop.f32.mrf.mxu0  ;;  %23490 = vst [vmem:[#allocation65_spill] sm:$0xff] %v20598_v40 }
 0x2d6   : > { %23488 = vst [vmem:[#allocation63_spill] sm:$0xff] %v20593_v45  ;;  %23489 = vst [vmem:[#allocation64_spill] sm:$0xff] %v20595_v29  ;;  %v4170_v45 = vadd.f32 %v20295_v14, %v3940_v41  ;;  %v4169_v29 = vadd.f32 %v20308_v10, %v3939_v23  ;;  %v3942_v14 = vadd.f32 %v20313_v13, %v20186_v21  ;;  %v8063_v10 = vld [vmem:[%s18583_s16 + $0xa] sm:$0xff] }
 0x2d7   : > { %v20605_v26 = vpop.f32.mrf.mxu1  ;;  %v20607_v47 = vpop.f32.mrf.mxu0  ;;  %16558 = vmatmul.mubr.msk.f32.gmra.mxu1 %vm806_vm0, %v20588_v43  ;;  %16590 = vmatmul.mubr.msk.f32.gmra.mxu0 %vm806_vm0, %v20591_v4  ;;  %v3941_v23 = vadd.f32 %v20325_v44, %v20193_v52  ;;  %v20670_v52 = vld [vmem:[%s18583_s16 + $0x22] sm:$0xff] }
 0x2d8   : > { %23491 = vst [vmem:[#allocation66_spill] sm:$0xff] %v20605_v26  ;;  %23492 = vst [vmem:[#allocation67_spill] sm:$0xff] %v20607_v47  ;;  %16560 = vmatprep.mubr.msk.f32.mxu1 %vm806_vm0, %v20598_v40  ;;  %16592 = vmatprep.mubr.msk.f32.mxu0 %vm806_vm0, %v20601_v57  ;;  %v8062_v26 = vld [vmem:[%s18583_s16 + $0x2] sm:$0xff]  ;;  %v4401_v41 = vadd.f32 %v20425_v35, %v4170_v45  ;;  %v20651_v35 = vld [vmem:[%s18583_s16 + $0x1a] sm:$0xff]  ;;  %v4172_v45 = vadd.f32 %v20315_v63, %v3942_v14 }
 0x2d9   : > { %v20624_v47 = vpop.f32.mrf.mxu1  ;;  %v20626_v43 = vpop.f32.mrf.mxu0 }
 0x2da   : > { %23494 = vst [vmem:[#allocation69_spill] sm:$0xff] %v20626_v43  ;;  %v4400_v43 = vadd.f32 %v20442_v25, %v4169_v29  ;;  %v4631_v25 = vadd.f32 %v20427_v30, %v4401_v41  ;;  %v4403_v63 = vadd.f32 %v20455_v59, %v4172_v45 }
 0x2db   : > { %v20633_v40 = vpop.f32.mrf.mxu1  ;;  %v20635_v24 = vpop.f32.mrf.mxu0  ;;  %16561 = vmatmul.mubr.msk.f32.gmra.mxu1 %vm806_vm0, %v20619_v6  ;;  %16593 = vmatmul.mubr.msk.f32.gmra.mxu0 %vm806_vm0, %v20622_v18  ;;  %v8772_v6 = vld [vmem:[#allocation13 + $0xb0] sm:$0xff] }
 0x2dc   : > { %23495 = vst [vmem:[#allocation70_spill] sm:$0xff] %v20635_v24  ;;  %16603 = vmatprep.mubr.msk.f32.mxu1 %vm806_vm0, %v8062_v26  ;;  %16635 = vmatprep.mubr.msk.f32.mxu0 %vm806_vm0, %v20423_v27  ;;  %v8542_v27 = vld [vmem:[#allocation13 + $0x90] sm:$0xff]  ;;  %v4630_v24 = vadd.f32 %v20444_v7, %v4400_v43 }
 0x2dd   : > { %v20646_v21 = vpop.f32.mrf.mxu1  ;;  %v20648_v13 = vpop.f32.mrf.mxu0  ;;  %v20678_v43 = vld [vmem:[%s18583_s16 + $0x32] sm:$0xff] }
 0x2df   : > { %v16221_v29 = vpop.f32.mrf.mxu1  ;;  %v20657_v26 = vpop.f32.mrf.mxu0  ;;  %16604 = vmatmul.mubr.msk.f32.vlgmr.msra.gmra.mxu1 %vm806_vm0, %v8063_v10  ;;  %16636 = vmatmul.mubr.msk.f32.vlgmr.msra.gmra.mxu0 %vm806_vm0, %v20440_v38  ;;  %v4171_v38 = vadd.f32 %v20327_v19, %v3941_v23  ;;  %v4633_v19 = vadd.f32 %v20457_v9, %v4403_v63 }
 0x2e0   : > { %v20664_v14 = vadd.f32 %v16221_v29, %v4631_v25  ;;  %16660 = vmatpush3.msra.mxu1 %v20519_v34  ;;  %16606 = vmatprep.mubr.msk.f32.mxu1 %vm806_vm0, %v20651_v35  ;;  %v8770_v25 = vld [vmem:[#allocation13 + $0xa0] sm:$0xff]  ;;  %v4405_v29 = vadd.f32 %v20483_v8, %v20338_v37 }
 0x2e1   : > { %v4781_v44 = vpop.f32.mrf.mxu1  ;;  %v20672_v30 = vpop.f32.mrf.mxu0  ;;  %16692 = vmatpush3.msra.mxu0 %v20521_v20  ;;  %16638 = vmatprep.mubr.msk.f32.mxu0 %vm806_vm0, %v20453_v62  ;;  %v8541_v62 = vld [vmem:[#allocation13 + $0x88] sm:$0xff]  ;;  %v4402_v41 = vadd.f32 %v20473_v11, %v4171_v38 }
 0x2e2   : > { %23496 = vst [vmem:[#allocation71_spill] sm:$0xff] %v20664_v14  ;;  %17305 = vtanh.f32 %v20664_v14  ;;  %v20682_v7 = vadd.f32 %v4781_v44, %v4630_v24  ;;  %16661 = vmatprep.subr.mxu1 %v8542_v27  ;;  %16693 = vmatprep.subr.mxu0 %v8772_v6  ;;  %v8771_v20 = vld [vmem:[#allocation13 + $0xa8] sm:$0xff]  ;;  %v23511_v14 = vld [vmem:[#allocation45_spill] sm:$0xff] }
 0x2e3   : > { %v16224_v59 = vpop.f32.mrf.mxu1  ;;  %v20684_v34 = vpop.f32.mrf.mxu0  ;;  %16607 = vmatmul.mubr.msk.f32.gmra.mxu1 %vm806_vm0, %v20670_v52  ;;  %16639 = vmatmul.mubr.msk.f32.gmra.mxu0 %vm806_vm0, %v20471_v58  ;;  %v20695_v24 = vld [vmem:[%s18583_s16 + $0x3a] sm:$0xff]  ;;  %v20702_v58 = vld [vmem:[%s18583_s16 + $0x4a] sm:$0xff]  ;;  %v20726_v38 = vld [vmem:[%s18583_s16 + $0x62] sm:$0xff] }
 0x2e4   : > { %23497 = vst [vmem:[#allocation72_spill] sm:$0xff] %v20682_v7  ;;  %16609 = vmatprep.mubr.msk.f32.mxu1 %vm806_vm0, %v20678_v43  ;;  %16641 = vmatprep.mubr.msk.f32.mxu0 %vm806_vm0, %v20481_v56  ;;  %17307 = vtanh.f32 %v20682_v7  ;;  %v20705_v9 = vadd.f32 %v16224_v59, %v4633_v19  ;;  %v8540_v56 = vld [vmem:[#allocation13 + $0x80] sm:$0xff]  ;;  %v4635_v59 = vadd.f32 %v20485_v22, %v4405_v29 }
 0x2e5   : > { %v4791_v10 = vpop.f32.mrf.mxu1  ;;  %v20699_v45 = vpop.f32.mrf.mxu0  ;;  %16662 = vmatpush3.msra.mxu1 %v8542_v27  ;;  %16694 = vmatpush3.msra.mxu0 %v8772_v6  ;;  %v4632_v6 = vadd.f32 %v20475_v48, %v4402_v41  ;;  %v20719_v27 = vld [vmem:[%s18583_s16 + $0x52] sm:$0xff] }
 0x2e6   : > { %23498 = vst [vmem:[#allocation73_spill] sm:$0xff] %v20705_v9  ;;  %16663 = vmatprep.subr.mxu1 %v8541_v62  ;;  %16695 = vmatprep.subr.mxu0 %v8771_v20  ;;  %17309 = vtanh.f32 %v20705_v9  ;;  %v23510_v9 = vld [vmem:[#allocation35_spill] sm:$0xff] }
 0x2e7   : > { %v16227_v11 = vpop.f32.mrf.mxu1  ;;  %v20707_v23 = vpop.f32.mrf.mxu0  ;;  %16610 = vmatmul.mubr.msk.f32.gmra.mxu1 %vm806_vm0, %v20695_v24  ;;  %16642 = vmatmul.mubr.msk.f32.gmra.mxu0 %vm806_vm0, %v20499_v28  ;;  %v20729_v48 = vadd.f32 %v4791_v10, %v4632_v6  ;;  %v20737_v28 = vld [vmem:[#allocation13 + $0xd8] sm:$0xff] }
 0x2e8   : > { %16612 = vmatprep.mubr.msk.f32.mxu1 %vm806_vm0, %v20702_v58  ;;  %16644 = vmatprep.mubr.msk.f32.mxu0 %vm806_vm0, %v20509_v33  ;;  %v20739_v33 = vld [vmem:[#allocation13 + $0xf8] sm:$0xff]  ;;  %v20757_v22 = vadd.f32 %v16227_v11, %v4635_v59  ;;  %v4407_v11 = vadd.f32 %v20511_v60, %v20356_v31  ;;  %v4406_v59 = vadd.f32 %v20533_v5, %v20365_v61 }
 0x2e9   : > { %v4801_v63 = vpop.f32.mrf.mxu1  ;;  %v20723_v44 = vpop.f32.mrf.mxu0  ;;  %16664 = vmatpush3.msra.mxu1 %v8541_v62  ;;  %16696 = vmatpush3.msra.mxu0 %v8771_v20  ;;  %23499 = vst [vmem:[#allocation74_spill] sm:$0xff] %v20729_v48  ;;  %v4404_v62 = vadd.f32 %v20501_v1, %v20349_v0  ;;  %v20747_v20 = vld [vmem:[%s18583_s16 + $0x6a] sm:$0xff]  ;;  %17311 = vtanh.f32 %v20729_v48 }
 0x2ea   : > { %16665 = vmatprep.subr.mxu1 %v8540_v56  ;;  %16697 = vmatprep.subr.mxu0 %v8770_v25  ;;  %23500 = vst [vmem:[#allocation75_spill] sm:$0xff] %v20757_v22  ;;  %17313 = vtanh.f32 %v20757_v22 }
 0x2eb   : > { %v16230_v37 = vpop.f32.mrf.mxu1  ;;  %v20731_v8 = vpop.f32.mrf.mxu0  ;;  %16613 = vmatmul.mubr.msk.f32.gmra.mxu1 %vm806_vm0, %v20719_v27  ;;  %16645 = vmatmul.mubr.msk.f32.gmra.mxu0 %vm806_vm0, %v20531_v32  ;;  %v20754_v32 = vld [vmem:[%s18583_s16 + $0x7a] sm:$0xff]  ;;  %v4634_v10 = vadd.f32 %v20503_v15, %v4404_v62  ;;  %v20785_v15 = vld [vmem:[%s18583_s16 + $0x92] sm:$0xff] }
 0x2ec   : > { %16615 = vmatprep.mubr.msk.f32.mxu1 %vm806_vm0, %v20726_v38  ;;  %16647 = vmatprep.mubr.msk.f32.mxu0 %vm806_vm0, %v20541_v12 }
 0x2ed   : > { %v4811_v19 = vpop.f32.mrf.mxu1  ;;  %v20751_v41 = vpop.f32.mrf.mxu0  ;;  %16666 = vmatpush3.msra.mxu1 %v8540_v56  ;;  %16698 = vmatpush3.msra.mxu0 %v8770_v25  ;;  %v20776_v56 = vld [vmem:[%s18583_s16 + $0x82] sm:$0xff]  ;;  %v20788_v31 = vadd.f32 %v4801_v63, %v4634_v10  ;;  %v20805_v63 = vld [vmem:[%s18583_s16 + $0x9a] sm:$0xff] }
 0x2ee   : > { %16723 = vmatprep.subr.mxu1 %v20737_v28  ;;  %16755 = vmatprep.subr.mxu0 %v20739_v33 }
 0x2ef   : > { %v17306_v0 = vpop.eup %17305  ;;  %v20761_v1 = vpop.f32.mrf.mxu1  ;;  %16616 = vmatmul.mubr.msk.f32.gmra.mxu1 %vm806_vm0, %v20747_v20  ;;  %16648 = vmatmul.mubr.msk.f32.gmra.mxu0 %vm806_vm0, %v20561_v49  ;;  %23501 = vst [vmem:[#allocation76_spill] sm:$0xff] %v20788_v31  ;;  %17315 = vtanh.f32 %v20788_v31 }
 0x2f0   : > { %v20763_v12 = vpop.f32.mrf.mxu0  ;;  %12259 = vrot.lane.b32.xlu1 %v17306_v0, %s18196_s28  ;;  %16618 = vmatprep.mubr.msk.f32.mxu1 %vm806_vm0, %v20754_v32 }
 0x2f1   : > { %v20778_v25 = vpop.f32.mrf.mxu1  ;;  %16650 = vmatprep.mubr.msk.f32.mxu0 %vm806_vm0, %v20571_v2  ;;  %v17308_v60 = vpop.eup %17307  ;;  %v4637_v2 = vadd.f32 %v20513_v46, %v4407_v11  ;;  %v20820_v46 = vld [vmem:[%s18583_s16 + $0xc0] sm:$0xff] }
 0x2f2   : > { %v20780_v6 = vpop.f32.mrf.mxu0 }
 0x2f3   : > { %v20790_v49 = vpop.f32.mrf.mxu1  ;;  %16619 = vmatmul.mubr.msk.f32.gmra.mxu1 %vm806_vm0, %v20776_v56  ;;  %16651 = vmatmul.mubr.msk.f32.gmra.mxu0 %vm806_vm0, %v20591_v4  ;;  %v20814_v4 = vld [vmem:[%s18583_s16 + $0xaa] sm:$0xff]  ;;  %v20817_v61 = vadd.f32 %v16230_v37, %v4637_v2  ;;  %v17310_v5 = vpop.eup %17309  ;;  %v20837_v37 = vld [vmem:[%s18583_s16 + $0xb2] sm:$0xff] }
 0x2f4   : > { %v20792_v29 = vpop.f32.mrf.mxu0  ;;  %12257 = vrot.lane.b32.xlu1 %v17308_v60, %s18196_s28  ;;  %16621 = vmatprep.mubr.msk.f32.mxu1 %vm806_vm0, %v20785_v15  ;;  %v4409_v60 = vadd.f32 %v20545_v3, %v20372_v39  ;;  %v20840_v2 = vld [vmem:[%s18583_s16 + $0xc8] sm:$0xff] }
 0x2f5   : > { %v20807_v62 = vpop.f32.mrf.mxu1  ;;  %16653 = vmatprep.mubr.msk.f32.mxu0 %vm806_vm0, %v20601_v57  ;;  %23502 = vst [vmem:[#allocation77_spill] sm:$0xff] %v20817_v61  ;;  %v4636_v57 = vadd.f32 %v20535_v17, %v4406_v59  ;;  %17317 = vtanh.f32 %v20817_v61 }
 0x2f6   : > { %v20809_v0 = vpop.f32.mrf.mxu0  ;;  %v17312_v3 = vpop.eup %17311  ;;  %v4639_v59 = vadd.f32 %v20547_v53, %v4409_v60  ;;  %v23507_v60 = vld [vmem:[#allocation33_spill] sm:$0xff] }
 0x2f7   : > { %v20822_v10 = vpop.f32.mrf.mxu1  ;;  %16622 = vmatmul.mubr.msk.f32.gmra.mxu1 %vm806_vm0, %v20805_v63  ;;  %16654 = vmatmul.mubr.msk.f32.gmra.mxu0 %vm806_vm0, %v20622_v18  ;;  %v20847_v17 = vadd.f32 %v4811_v19, %v4636_v57  ;;  %v4411_v19 = vadd.f32 %v20573_v54, %v20388_v42  ;;  %v4412_v57 = vadd.f32 %v20624_v47, %v20409_v16  ;;  %v23505_v54 = vld [vmem:[#allocation42_spill] sm:$0xff]  ;;  %v9003_v16 = vld [vmem:[#allocation13 + $0xd0] sm:$0xff]  ;;  %v23506_v47 = vld [vmem:[#allocation59_spill] sm:$0xff] }
 0x2f8   : > { %v20824_v11 = vpop.f32.mrf.mxu0  ;;  %12263 = vrot.lane.b32.xlu1 %v17310_v5, %s18196_s28  ;;  %16624 = vmatprep.mubr.msk.f32.mxu1 %vm806_vm0, %v20814_v4  ;;  %v4408_v5 = vadd.f32 %v20563_v55, %v20379_v36  ;;  %v5090_v36 = vadd.f32 %v20657_v26, %v19846_v50  ;;  %v20877_v55 = vadd.f32 %v20761_v1, %v4639_v59  ;;  %v23508_v1 = vld [vmem:[#allocation61_spill] sm:$0xff] }
 0x2f9   : > { %v4841_v31 = vpop.f32.mrf.mxu1  ;;  %16656 = vmatprep.mubr.msk.f32.mxu0 %vm806_vm0, %v20820_v46  ;;  %23503 = vst [vmem:[#allocation78_spill] sm:$0xff] %v20847_v17  ;;  %17319 = vtanh.f32 %v20847_v17  ;;  %v5089_v26 = vadd.f32 %v20672_v30, %v23507_v60  ;;  %v4641_v59 = vadd.f32 %v23508_v1, %v4411_v19  ;;  %v23509_v50 = vld [vmem:[#allocation69_spill] sm:$0xff]  ;;  %v23514_v19 = vld [vmem:[#allocation63_spill] sm:$0xff] }
 0x2fa   : > { %v20842_v22 = vpop.f32.mrf.mxu0  ;;  %23504 = vst [vmem:[#allocation79_spill] sm:$0xff] %v20877_v55  ;;  %v4642_v17 = vadd.f32 %v23509_v50, %v4412_v57  ;;  %17321 = vtanh.f32 %v20877_v55  ;;  %v14362_v60 = vld [vmem:[%s18583_s16 + $0x81] sm:$0xff] }
 0x2fb   : > { %v20849_v39 = vpop.f32.mrf.mxu1  ;;  %16625 = vmatmul.mubr.msk.f32.gmra.mxu1 %vm806_vm0, %v20837_v37  ;;  %16657 = vmatmul.mubr.msk.f32.gmra.mxu0 %vm806_vm0, %v20840_v2 }
 0x2fc   : > { %v20851_v18 = vpop.f32.mrf.mxu0  ;;  %12261 = vrot.lane.b32.xlu1 %v17312_v3, %s18196_s28  ;;  %16667 = vmatprep.mubr.msk.f32.mxu1 %vm806_vm0, %v20417_v51  ;;  %v17314_v51 = vpop.eup %17313 }
 0x2fd   : > { %v20867_v61 = vpop.f32.mrf.mxu1  ;;  %16699 = vmatprep.mubr.msk.f32.mxu0 %vm806_vm0, %v20651_v35  ;;  %v4638_v35 = vadd.f32 %v23506_v47, %v4408_v5  ;;  %v17316_v50 = vpop.eup %17315  ;;  %v23517_v47 = vld [vmem:[#allocation46_spill] sm:$0xff] }
 0x2fe   : > { %v20869_v48 = vpop.f32.mrf.mxu0 }
 0x2ff   : > { %v16285_v42 = vpop.f32.mrf.mxu1  ;;  %16668 = vmatmul.mubr.msk.f32.vlgmr.msra.gmra.mxu1 %vm806_vm0, %v23505_v54  ;;  %16700 = vmatmul.mubr.msk.f32.vlgmr.msra.gmra.mxu0 %vm806_vm0, %v20670_v52  ;;  %v5092_v54 = vadd.f32 %v20684_v34, %v23510_v9  ;;  %v20897_v30 = vadd.f32 %v20778_v25, %v4638_v35  ;;  %v23513_v34 = vld [vmem:[#allocation32_spill] sm:$0xff]  ;;  %v20913_v35 = vadd.f32 %v4841_v31, %v4642_v17 }
 0x300   : > { %v16317_v53 = vpop.f32.mrf.mxu0  ;;  %v5320_v3 = vadd.f32 %v16285_v42, %v5090_v36  ;;  %16724 = vmatpush3.msra.mxu1 %v20737_v28  ;;  %12267 = vrot.lane.b32.xlu1 %v17314_v51, %s18196_s28  ;;  %v4410_v57 = vadd.f32 %v23514_v19, %v23513_v34  ;;  %v23515_v36 = vld [vmem:[#allocation41_spill] sm:$0xff]  ;;  %v20926_v31 = vadd.f32 %v20790_v49, %v4641_v59  ;;  %v9232_v49 = vld [vmem:[#allocation13 + $0xe8] sm:$0xff] }
 0x301   : > { %v5240_v7 = vpop.f32.mrf.mxu1  ;;  %16670 = vmatprep.mubr.msk.f32.mxu1 %vm806_vm0, %v23511_v14  ;;  %16756 = vmatpush3.msra.mxu0 %v20739_v33  ;;  %23512 = vst [vmem:[#allocation42_spill] sm:$0xff] %v20897_v30  ;;  %v4414_v14 = vadd.f32 %v20646_v21, %v23515_v36  ;;  %v23516_v33 = vld [vmem:[#allocation31_spill] sm:$0xff]  ;;  %23518 = vst [vmem:[#allocation59_spill] sm:$0xff] %v20913_v35  ;;  %v23519_v21 = vld [vmem:[#allocation53_spill] sm:$0xff]  ;;  %17323 = vtanh.f32 %v20897_v30 }
 0x302   : > { %v5470_v52 = vpop.f32.mrf.mxu0  ;;  %v20899_v28 = vadd.f32 %v16317_v53, %v5320_v3  ;;  %v5319_v5 = vadd.f32 %v5240_v7, %v5089_v26  ;;  %16702 = vmatprep.mubr.msk.f32.mxu0 %vm806_vm0, %v20678_v43  ;;  %16725 = vmatprep.subr.mxu1 %v9003_v16  ;;  %v5091_v51 = vadd.f32 %v20699_v45, %v23516_v33  ;;  %v9233_v7 = vld [vmem:[#allocation13 + $0xf0] sm:$0xff]  ;;  %v9002_v53 = vld [vmem:[#allocation13 + $0xc8] sm:$0xff]  ;;  %v23520_v45 = vld [vmem:[#allocation34_spill] sm:$0xff]  ;;  %17325 = vtanh.f32 %v20913_v35 }
 0x303   : > { %v16288_v42 = vpop.f32.mrf.mxu1  ;;  %16671 = vmatmul.mubr.msk.f32.gmra.mxu1 %vm806_vm0, %v23517_v47  ;;  %16703 = vmatmul.mubr.msk.f32.gmra.mxu0 %vm806_vm0, %v20695_v24  ;;  %v5094_v1 = vadd.f32 %v20707_v23, %v23520_v45  ;;  %23521 = vst [vmem:[#allocation61_spill] sm:$0xff] %v20926_v31  ;;  %v4644_v23 = vadd.f32 %v20648_v13, %v4414_v14  ;;  %v23523_v47 = vld [vmem:[#allocation54_spill] sm:$0xff]  ;;  %v23525_v13 = vld [vmem:[#allocation55_spill] sm:$0xff]  ;;  %17327 = vtanh.f32 %v20926_v31 }
 0x304   : > { %v16320_v25 = vpop.f32.mrf.mxu0  ;;  %v20915_v26 = vadd.f32 %v5470_v52, %v5319_v5  ;;  %v5322_v3 = vadd.f32 %v16288_v42, %v5092_v54  ;;  %12265 = vrot.lane.b32.xlu1 %v17316_v50, %s18196_s28  ;;  %16673 = vmatprep.mubr.msk.f32.mxu1 %vm806_vm0, %v23519_v21  ;;  %v17318_v52 = vpop.eup %17317  ;;  %v23522_v5 = vld [vmem:[#allocation64_spill] sm:$0xff]  ;;  %v23527_v14 = vld [vmem:[#allocation66_spill] sm:$0xff]  ;;  %v23528_v21 = vld [vmem:[#allocation39_spill] sm:$0xff] }
 0x305   : > { %v5250_v34 = vpop.f32.mrf.mxu1  ;;  %16705 = vmatprep.mubr.msk.f32.mxu0 %vm806_vm0, %v20702_v58  ;;  %16726 = vmatpush3.msra.mxu1 %v9003_v16  ;;  %v4640_v50 = vadd.f32 %v23522_v5, %v4410_v57  ;;  %v23524_v16 = vld [vmem:[#allocation36_spill] sm:$0xff]  ;;  %v23526_v57 = vld [vmem:[#allocation37_spill] sm:$0xff]  ;;  %v20949_v5 = vadd.f32 %v20867_v61, %v4644_v23 }
 0x306   : > { %v5480_v19 = vpop.f32.mrf.mxu0  ;;  %v20928_v17 = vadd.f32 %v16320_v25, %v5322_v3  ;;  %v5321_v54 = vadd.f32 %v5250_v34, %v5091_v51  ;;  %16757 = vmatprep.subr.mxu0 %v9233_v7  ;;  %16727 = vmatprep.subr.mxu1 %v9002_v53  ;;  %v5093_v59 = vadd.f32 %v20723_v44, %v23524_v16  ;;  %v23531_v23 = vld [vmem:[#allocation56_spill] sm:$0xff] }
 0x307   : > { %v16291_v36 = vpop.f32.mrf.mxu1  ;;  %16674 = vmatmul.mubr.msk.f32.gmra.mxu1 %vm806_vm0, %v23523_v47  ;;  %16706 = vmatmul.mubr.msk.f32.gmra.mxu0 %vm806_vm0, %v20719_v27  ;;  %v4413_v3 = vadd.f32 %v23527_v14, %v23526_v57  ;;  %v5096_v34 = vadd.f32 %v20731_v8, %v23528_v21  ;;  %23529 = vst [vmem:[#allocation69_spill] sm:$0xff] %v20949_v5  ;;  %v17320_v8 = vpop.eup %17319  ;;  %v23535_v57 = vld [vmem:[#allocation38_spill] sm:$0xff]  ;;  %17329 = vtanh.f32 %v20949_v5 }
 0x308   : > { %v16323_v42 = vpop.f32.mrf.mxu0  ;;  %v20939_v51 = vadd.f32 %v5480_v19, %v5321_v54  ;;  %v5324_v25 = vadd.f32 %v16291_v36, %v5094_v1  ;;  %12271 = vrot.lane.b32.xlu1 %v17318_v52, %s18196_s28  ;;  %16676 = vmatprep.mubr.msk.f32.mxu1 %vm806_vm0, %v23525_v13  ;;  %v20955_v1 = vadd.f32 %v20807_v62, %v4640_v50  ;;  %v9231_v36 = vld [vmem:[#allocation13 + $0xe0] sm:$0xff]  ;;  %v23532_v13 = vld [vmem:[#allocation40_spill] sm:$0xff] }
 0x309   : > { %v5260_v44 = vpop.f32.mrf.mxu1  ;;  %16758 = vmatpush3.msra.mxu0 %v9233_v7  ;;  %16708 = vmatprep.mubr.msk.f32.mxu0 %vm806_vm0, %v20726_v38  ;;  %v9001_v7 = vld [vmem:[#allocation13 + $0xc0] sm:$0xff]  ;;  %v5095_v62 = vadd.f32 %v20751_v41, %v23532_v13  ;;  %v4415_v14 = vadd.f32 %v20633_v40, %v23535_v57  ;;  %v23536_v41 = vld [vmem:[#allocation43_spill] sm:$0xff]  ;;  %v23551_v13 = vld [vmem:[#allocation52_spill] sm:$0xff] }
 0x30a   : > { %v5490_v47 = vpop.f32.mrf.mxu0  ;;  %23530 = vst [vmem:[#allocation45_spill] sm:$0xff] %v20955_v1  ;;  %v20957_v19 = vadd.f32 %v16323_v42, %v5324_v25  ;;  %v5323_v54 = vadd.f32 %v5260_v44, %v5093_v59  ;;  %16728 = vmatpush3.msra.mxu1 %v9002_v53  ;;  %16759 = vmatprep.subr.mxu0 %v9232_v49  ;;  %v23533_v53 = vld [vmem:[#allocation57_spill] sm:$0xff]  ;;  %v23534_v59 = vld [vmem:[#allocation67_spill] sm:$0xff]  ;;  %17331 = vtanh.f32 %v20955_v1 }
 0x30b   : > { %v16294_v52 = vpop.f32.mrf.mxu1  ;;  %16677 = vmatmul.mubr.msk.f32.gmra.mxu1 %vm806_vm0, %v23531_v23  ;;  %16709 = vmatmul.mubr.msk.f32.gmra.mxu0 %vm806_vm0, %v20747_v20  ;;  %v4643_v25 = vadd.f32 %v23534_v59, %v4413_v3  ;;  %v17322_v3 = vpop.eup %17321  ;;  %v23541_v59 = vld [vmem:[#allocation70_spill] sm:$0xff]  ;;  %v5103_v21 = vadd.f32 %v20869_v48, %v23551_v13 }
 0x30c   : > { %v16326_v61 = vpop.f32.mrf.mxu0  ;;  %v20965_v50 = vadd.f32 %v5490_v47, %v5323_v54  ;;  %v5326_v42 = vadd.f32 %v16294_v52, %v5096_v34  ;;  %12269 = vrot.lane.b32.xlu1 %v17320_v8, %s18196_s28  ;;  %16679 = vmatprep.mubr.msk.f32.mxu1 %vm806_vm0, %v23533_v53  ;;  %v5098_v34 = vadd.f32 %v20763_v12, %v23536_v41  ;;  %v23538_v53 = vld [vmem:[#allocation58_spill] sm:$0xff]  ;;  %v20988_v12 = vld [vmem:[#allocation13 + $0x118] sm:$0xff] }
 0x30d   : > { %v5270_v44 = vpop.f32.mrf.mxu1  ;;  %16711 = vmatprep.mubr.msk.f32.mxu0 %vm806_vm0, %v20754_v32  ;;  %16760 = vmatpush3.msra.mxu0 %v9232_v49  ;;  %v20982_v40 = vadd.f32 %v20822_v10, %v4643_v25  ;;  %v23539_v49 = vld [vmem:[#allocation44_spill] sm:$0xff]  ;;  %v4645_v25 = vadd.f32 %v23541_v59, %v4415_v14 }
 0x30e   : > { %v5500_v23 = vpop.f32.mrf.mxu0  ;;  %v20979_v47 = vadd.f32 %v16326_v61, %v5326_v42  ;;  %v5325_v54 = vadd.f32 %v5270_v44, %v5095_v62  ;;  %16729 = vmatprep.subr.mxu1 %v9001_v7  ;;  %16761 = vmatprep.subr.mxu0 %v9231_v36  ;;  %v5097_v61 = vadd.f32 %v20780_v6, %v23539_v49  ;;  %v23540_v10 = vld [vmem:[#allocation60_spill] sm:$0xff] }
 0x30f   : > { %23537 = vst [vmem:[#allocation32_spill] sm:$0xff] %v20982_v40  ;;  %v16297_v8 = vpop.f32.mrf.mxu1  ;;  %16680 = vmatmul.mubr.msk.f32.gmra.mxu1 %vm806_vm0, %v23538_v53  ;;  %16712 = vmatmul.mubr.msk.f32.gmra.mxu0 %vm806_vm0, %v20776_v56  ;;  %v23542_v53 = vld [vmem:[#allocation47_spill] sm:$0xff]  ;;  %17333 = vtanh.f32 %v20982_v40  ;;  %v21009_v14 = vadd.f32 %v20849_v39, %v4645_v25 }
 0x310   : > { %v16329_v52 = vpop.f32.mrf.mxu0  ;;  %v20992_v62 = vadd.f32 %v5500_v23, %v5325_v54  ;;  %v5328_v42 = vadd.f32 %v16297_v8, %v5098_v34  ;;  %12275 = vrot.lane.b32.xlu1 %v17322_v3, %s18196_s28  ;;  %16682 = vmatprep.mubr.msk.f32.mxu1 %vm806_vm0, %v23540_v10  ;;  %v5100_v41 = vadd.f32 %v20792_v29, %v23542_v53  ;;  %v21005_v34 = vld [vmem:[#allocation15 + $0x18] sm:$0xff]  ;;  %v17324_v54 = vpop.eup %17323  ;;  %v23544_v8 = vld [vmem:[#allocation62_spill] sm:$0xff]  ;;  %v23545_v29 = vld [vmem:[#allocation48_spill] sm:$0xff] }
 0x311   : > { %v5280_v57 = vpop.f32.mrf.mxu1  ;;  %16714 = vmatprep.mubr.msk.f32.mxu0 %vm806_vm0, %v20785_v15  ;;  %16730 = vmatpush3.msra.mxu1 %v9001_v7  ;;  %23543 = vst [vmem:[#allocation63_spill] sm:$0xff] %v21009_v14  ;;  %v17326_v39 = vpop.eup %17325  ;;  %v21025_v25 = vld [vmem:[%s18583_s16 + $0xc1] sm:$0xff]  ;;  %17335 = vtanh.f32 %v21009_v14  ;;  %v14361_v45 = vld [vmem:[%s18583_s16 + $0x79] sm:$0xff]  ;;  %v14331_v14 = vld [vmem:[%s18583_s16 + $0x90] sm:$0xff] }
 0x312   : > { %v5510_v44 = vpop.f32.mrf.mxu0  ;;  %v21002_v6 = vadd.f32 %v16329_v52, %v5328_v42  ;;  %v5327_v23 = vadd.f32 %v5280_v57, %v5097_v61  ;;  %16762 = vmatpush3.msra.mxu0 %v9231_v36  ;;  %16787 = vmatprep.subr.mxu1 %v20988_v12  ;;  %v5099_v36 = vadd.f32 %v20809_v0, %v23545_v29  ;;  %v23546_v42 = vld [vmem:[#allocation65_spill] sm:$0xff]  ;;  %v23550_v53 = vld [vmem:[#allocation51_spill] sm:$0xff] }
 0x313   : > { %v16300_v3 = vpop.f32.mrf.mxu1  ;;  %16683 = vmatmul.mubr.msk.f32.gmra.mxu1 %vm806_vm0, %v23544_v8  ;;  %16715 = vmatmul.mubr.msk.f32.gmra.mxu0 %vm806_vm0, %v20805_v63  ;;  %v23547_v57 = vld [vmem:[#allocation49_spill] sm:$0xff] }
 0x314   : > { %v16332_v7 = vpop.f32.mrf.mxu0  ;;  %v21017_v52 = vadd.f32 %v5510_v44, %v5327_v23  ;;  %v5330_v61 = vadd.f32 %v16300_v3, %v5100_v41  ;;  %12273 = vrot.lane.b32.xlu1 %v17324_v54, %s18196_s28  ;;  %16685 = vmatprep.mubr.msk.f32.mxu1 %vm806_vm0, %v23546_v42  ;;  %v5102_v0 = vadd.f32 %v20824_v11, %v23547_v57  ;;  %v21034_v23 = vld [vmem:[%s18583_s16 + $0xc2] sm:$0xff]  ;;  %v17328_v54 = vpop.eup %17327  ;;  %v21054_v57 = vld [vmem:[%s18583_s16 + $0xca] sm:$0xff]  ;;  %v9687_v40 = vld [vmem:[%s18589_s24 + $0x98] sm:$0xff] }
 0x315   : > { %v5290_v10 = vpop.f32.mrf.mxu1  ;;  %16717 = vmatprep.mubr.msk.f32.mxu0 %vm806_vm0, %v20814_v4  ;;  %16819 = vmatprep.subr.mxu0 %v21005_v34  ;;  %v23548_v42 = vld [vmem:[#allocation68_spill] sm:$0xff]  ;;  %v23549_v11 = vld [vmem:[#allocation50_spill] sm:$0xff]  ;;  %v17330_v29 = vpop.eup %17329 }
 0x316   : > { %v5520_v59 = vpop.f32.mrf.mxu0  ;;  %12281 = vrot.lane.b32.xlu0 %v17326_v39, %s18196_s28  ;;  %v21031_v41 = vadd.f32 %v16332_v7, %v5330_v61  ;;  %v5329_v44 = vadd.f32 %v5290_v10, %v5099_v36  ;;  %v5101_v7 = vadd.f32 %v20842_v22, %v23549_v11  ;;  %v21049_v39 = vld [vmem:[%s18583_s16 + $0xc9] sm:$0xff]  ;;  %v5104_v22 = vadd.f32 %v20851_v18, %v23550_v53  ;;  %v14329_v53 = vld [vmem:[%s18583_s16 + $0x78] sm:$0xff] }
 0x317   : > { %v16303_v3 = vpop.f32.mrf.mxu1  ;;  %16686 = vmatmul.mubr.msk.f32.gmra.mxu1 %vm806_vm0, %v23548_v42  ;;  %16718 = vmatmul.mubr.msk.f32.gmra.mxu0 %vm806_vm0, %v20837_v37 }
 0x318   : > { %v16335_v8 = vpop.f32.mrf.mxu0  ;;  %v21043_v36 = vadd.f32 %v5520_v59, %v5329_v44  ;;  %v5332_v61 = vadd.f32 %v16303_v3, %v5102_v0  ;;  %12279 = vrot.lane.b32.xlu1 %v17328_v54, %s18196_s28  ;;  %16688 = vmatprep.mubr.msk.f32.mxu1 %vm806_vm0, %v21025_v25  ;;  %v14323_v44 = vld [vmem:[%s18583_s16 + $0x30] sm:$0xff]  ;;  %v17332_v3 = vpop.eup %17331 }
 0x319   : > { %v5300_v10 = vpop.f32.mrf.mxu1  ;;  %16720 = vmatprep.mubr.msk.f32.mxu0 %vm806_vm0, %v21034_v23  ;;  %v14355_v54 = vld [vmem:[%s18583_s16 + $0x31] sm:$0xff] }
 0x31a   : > { %v5530_v42 = vpop.f32.mrf.mxu0  ;;  %v21058_v59 = vadd.f32 %v16335_v8, %v5332_v61  ;;  %v5331_v0 = vadd.f32 %v5300_v10, %v5101_v7  ;;  %12285 = vrot.lane.b32.xlu0 %v17330_v29, %s18196_s28  ;;  %v14324_v8 = vld [vmem:[%s18583_s16 + $0x38] sm:$0xff] }
 0x31b   : > { %v16306_v11 = vpop.f32.mrf.mxu1  ;;  %16689 = vmatmul.mubr.msk.f32.gmra.mxu1 %vm806_vm0, %v21049_v39  ;;  %16721 = vmatmul.mubr.msk.f32.gmra.mxu0 %vm806_vm0, %v21054_v57  ;;  %v14356_v61 = vld [vmem:[%s18583_s16 + $0x39] sm:$0xff] }
 0x31c   : > { %v16338_v49 = vpop.f32.mrf.mxu0  ;;  %v21067_v16 = vadd.f32 %v5530_v42, %v5331_v0  ;;  %v5334_v18 = vadd.f32 %v16306_v11, %v5104_v22  ;;  %12277 = vrot.lane.b32.xlu1 %v17332_v3, %s18196_s28  ;;  %16731 = vmatprep.mubr.msk.f32.mxu1 %vm806_vm0, %v14323_v44  ;;  %v14325_v42 = vld [vmem:[%s18583_s16 + $0x48] sm:$0xff]  ;;  %v17334_v3 = vpop.eup %17333 }
 0x31d   : > { %v5310_v29 = vpop.f32.mrf.mxu1  ;;  %16763 = vmatprep.mubr.msk.f32.mxu0 %vm806_vm0, %v14355_v54  ;;  %v14357_v0 = vld [vmem:[%s18583_s16 + $0x49] sm:$0xff] }
 0x31e   : > { %v5540_v7 = vpop.f32.mrf.mxu0  ;;  %v21076_v10 = vadd.f32 %v16338_v49, %v5334_v18  ;;  %v5333_v48 = vadd.f32 %v5310_v29, %v5103_v21  ;;  %v14326_v49 = vld [vmem:[%s18583_s16 + $0x50] sm:$0xff] }
 0x31f   : > { %v21079_v11 = vpop.f32.mrf.mxu1  ;;  %16732 = vmatmul.mubr.msk.f32.vlgmr.msra.gmra.mxu1 %vm806_vm0, %v14324_v8  ;;  %16764 = vmatmul.mubr.msk.f32.vlgmr.msra.gmra.mxu0 %vm806_vm0, %v14356_v61  ;;  %v9463_v21 = vld [vmem:[#allocation13 + $0x110] sm:$0xff] }
 0x320   : > { %v21081_v22 = vpop.f32.mrf.mxu0  ;;  %v21085_v13 = vadd.f32 %v5540_v7, %v5333_v48  ;;  %16788 = vmatpush3.msra.mxu1 %v20988_v12  ;;  %12283 = vrot.lane.b32.xlu1 %v17334_v3, %s18196_s28  ;;  %v14358_v18 = vld [vmem:[%s18583_s16 + $0x51] sm:$0xff]  ;;  %v14327_v8 = vld [vmem:[%s18583_s16 + $0x60] sm:$0xff]  ;;  %v17336_v48 = vpop.eup %17335  ;;  %v14360_v3 = vld [vmem:[%s18583_s16 + $0x69] sm:$0xff] }
 0x321   : > { %v21091_v44 = vpop.f32.mrf.mxu1  ;;  %16734 = vmatprep.mubr.msk.f32.mxu1 %vm806_vm0, %v14325_v42  ;;  %16820 = vmatpush3.msra.mxu0 %v21005_v34  ;;  %v14359_v12 = vld [vmem:[%s18583_s16 + $0x61] sm:$0xff] }
 0x322   : > { %v21093_v54 = vpop.f32.mrf.mxu0  ;;  %16766 = vmatprep.mubr.msk.f32.mxu0 %vm806_vm0, %v14357_v0  ;;  %16789 = vmatprep.subr.mxu1 %v9463_v21  ;;  %v9692_v61 = vld [vmem:[#allocation15 + $0x10] sm:$0xff]  ;;  %v14328_v34 = vld [vmem:[%s18583_s16 + $0x68] sm:$0xff]  ;;  %v5780_v5 = vadd.f32 %v21091_v44, %v20915_v26 }
 0x323   : > { %v21101_v29 = vpop.f32.mrf.mxu1  ;;  %16735 = vmatmul.mubr.msk.f32.gmra.mxu1 %vm806_vm0, %v14326_v49  ;;  %16767 = vmatmul.mubr.msk.f32.gmra.mxu0 %vm806_vm0, %v14358_v18  ;;  %v9462_v18 = vld [vmem:[#allocation13 + $0x108] sm:$0xff] }
 0x324   : > { %v21103_v7 = vpop.f32.mrf.mxu0  ;;  %16737 = vmatprep.mubr.msk.f32.mxu1 %vm806_vm0, %v14327_v8  ;;  %12287 = vrot.lane.b32.xlu1 %v17336_v48, %s18196_s28  ;;  %v9691_v48 = vld [vmem:[#allocation15 + $0x8] sm:$0xff] }
 0x325   : > { %v5711_v42 = vpop.f32.mrf.mxu1  ;;  %16769 = vmatprep.mubr.msk.f32.mxu0 %vm806_vm0, %v14359_v12  ;;  %16790 = vmatpush3.msra.mxu1 %v9463_v21 }
 0x326   : > { %v5941_v0 = vpop.f32.mrf.mxu0  ;;  %v5782_v49 = vadd.f32 %v5711_v42, %v20939_v51  ;;  %16821 = vmatprep.subr.mxu0 %v9692_v61  ;;  %v14330_v51 = vld [vmem:[%s18583_s16 + $0x80] sm:$0xff]  ;;  %16791 = vmatprep.subr.mxu1 %v9462_v18 }
 0x327   : > { %v16355_v33 = vpop.f32.mrf.mxu1  ;;  %16738 = vmatmul.mubr.msk.f32.gmra.mxu1 %vm806_vm0, %v14328_v34  ;;  %16822 = vmatpush3.msra.mxu0 %v9692_v61 }
 0x328   : > { %v16387_v8 = vpop.f32.mrf.mxu0  ;;  %v21116_v9 = vadd.f32 %v5941_v0, %v5782_v49  ;;  %v5785_v12 = vadd.f32 %v16355_v33, %v20957_v19  ;;  %16770 = vmatmul.mubr.msk.f32.gmra.mxu0 %vm806_vm0, %v14360_v3  ;;  %16740 = vmatprep.mubr.msk.f32.mxu1 %vm806_vm0, %v14329_v53  ;;  %v14363_v0 = vld [vmem:[%s18583_s16 + $0x91] sm:$0xff] }
 0x329   : > { %v5721_v21 = vpop.f32.mrf.mxu1  ;;  %16772 = vmatprep.mubr.msk.f32.mxu0 %vm806_vm0, %v14361_v45  ;;  %16792 = vmatpush3.msra.mxu1 %v9462_v18  ;;  %v9461_v33 = vld [vmem:[#allocation13 + $0x100] sm:$0xff] }
 0x32a   : > { %v5951_v42 = vpop.f32.mrf.mxu0  ;;  %v21125_v34 = vadd.f32 %v16387_v8, %v5785_v12  ;;  %v5784_v61 = vadd.f32 %v5721_v21, %v20965_v50  ;;  %16823 = vmatprep.subr.mxu0 %v9691_v48  ;;  %v9690_v45 = vld [vmem:[#allocation15] sm:$0xff]  ;;  %v14332_v50 = vld [vmem:[%s18583_s16 + $0x98] sm:$0xff]  ;;  %v14333_v21 = vld [vmem:[%s18583_s16 + $0xa8] sm:$0xff]  ;;  %16793 = vmatprep.subr.mxu1 %v9461_v33 }
 0x32b   : > { %v16358_v19 = vpop.f32.mrf.mxu1  ;;  %16741 = vmatmul.mubr.msk.f32.gmra.mxu1 %vm806_vm0, %v14330_v51  ;;  %16824 = vmatpush3.msra.mxu0 %v9691_v48  ;;  %v14364_v12 = vld [vmem:[%s18583_s16 + $0x99] sm:$0xff] }
 0x32c   : > { %v16390_v53 = vpop.f32.mrf.mxu0  ;;  %v21130_v3 = vadd.f32 %v5951_v42, %v5784_v61  ;;  %v5787_v49 = vadd.f32 %v16358_v19, %v20979_v47  ;;  %16773 = vmatmul.mubr.msk.f32.gmra.mxu0 %vm806_vm0, %v14362_v60  ;;  %16743 = vmatprep.mubr.msk.f32.mxu1 %vm806_vm0, %v14331_v14  ;;  %v14365_v42 = vld [vmem:[%s18583_s16 + $0xa9] sm:$0xff] }
 0x32d   : > { %v5731_v18 = vpop.f32.mrf.mxu1  ;;  %16775 = vmatprep.mubr.msk.f32.mxu0 %vm806_vm0, %v14363_v0  ;;  %16794 = vmatpush3.msra.mxu1 %v9461_v33  ;;  %v21143_v60 = vld [vmem:[#allocation15 + $0x38] sm:$0xff] }
 0x32e   : > { %v5961_v8 = vpop.f32.mrf.mxu0  ;;  %v21139_v51 = vadd.f32 %v16390_v53, %v5787_v49  ;;  %v5786_v48 = vadd.f32 %v5731_v18, %v20992_v62  ;;  %16825 = vmatprep.subr.mxu0 %v9690_v45  ;;  %v21146_v61 = vld [vmem:[#allocation15 + $0x58] sm:$0xff]  ;;  %v14334_v62 = vld [vmem:[%s18583_s16 + $0xb0] sm:$0xff]  ;;  %16851 = vmatprep.subr.mxu1 %v21143_v60 }
 0x32f   : > { %v16361_v47 = vpop.f32.mrf.mxu1  ;;  %16744 = vmatmul.mubr.msk.f32.gmra.mxu1 %vm806_vm0, %v14332_v50  ;;  %16826 = vmatpush3.msra.mxu0 %v9690_v45  ;;  %v14366_v49 = vld [vmem:[%s18583_s16 + $0xb1] sm:$0xff] }
 0x330   : > { %v16393_v14 = vpop.f32.mrf.mxu0  ;;  %v21148_v0 = vadd.f32 %v5961_v8, %v5786_v48  ;;  %v5789_v19 = vadd.f32 %v16361_v47, %v21002_v6  ;;  %16776 = vmatmul.mubr.msk.f32.gmra.mxu0 %vm806_vm0, %v14364_v12  ;;  %16746 = vmatprep.mubr.msk.f32.mxu1 %vm806_vm0, %v14333_v21 }
 0x331   : > { %v5741_v33 = vpop.f32.mrf.mxu1  ;;  %16778 = vmatprep.mubr.msk.f32.mxu0 %vm806_vm0, %v14365_v42  ;;  %16883 = vmatprep.subr.mxu0 %v21146_v61 }
 0x332   : > { %v5971_v53 = vpop.f32.mrf.mxu0  ;;  %v21157_v45 = vadd.f32 %v16393_v14, %v5789_v19  ;;  %v5788_v50 = vadd.f32 %v5741_v33, %v21017_v52  ;;  %v14337_v52 = vld [vmem:[%s18583_s16 + $0xd8] sm:$0xff] }
 0x333   : > { %v16364_v6 = vpop.f32.mrf.mxu1  ;;  %16747 = vmatmul.mubr.msk.f32.gmra.mxu1 %vm806_vm0, %v14334_v62  ;;  %v14369_v14 = vld [vmem:[%s18583_s16 + $0xd9] sm:$0xff] }
 0x334   : > { %v16396_v18 = vpop.f32.mrf.mxu0  ;;  %v21162_v8 = vadd.f32 %v5971_v53, %v5788_v50  ;;  %v5791_v12 = vadd.f32 %v16364_v6, %v21031_v41  ;;  %16779 = vmatmul.mubr.msk.f32.gmra.mxu0 %vm806_vm0, %v14366_v49  ;;  %16749 = vmatprep.mubr.msk.f32.mxu1 %vm806_vm0, %v20820_v46  ;;  %v9674_v50 = vld [vmem:[%s18589_s24] sm:$0xff] }
 0x335   : > { %v5751_v21 = vpop.f32.mrf.mxu1  ;;  %16781 = vmatprep.mubr.msk.f32.mxu0 %vm806_vm0, %v21025_v25  ;;  %v14338_v25 = vld [vmem:[%s18583_s16 + $0xe0] sm:$0xff] }
 0x336   : > { %v5981_v48 = vpop.f32.mrf.mxu0  ;;  %v21171_v42 = vadd.f32 %v16396_v18, %v5791_v12  ;;  %v5790_v47 = vadd.f32 %v5751_v21, %v21043_v36  ;;  %v14370_v36 = vld [vmem:[%s18583_s16 + $0xe1] sm:$0xff] }
 0x337   : > { %v16367_v41 = vpop.f32.mrf.mxu1  ;;  %16750 = vmatmul.mubr.msk.f32.gmra.mxu1 %vm806_vm0, %v20840_v2  ;;  %v23552_v12 = vld [vmem:[#allocation71_spill] sm:$0xff] }
 0x338   : > { %v16399_v19 = vpop.f32.mrf.mxu0  ;;  %v21177_v62 = vadd.f32 %v5981_v48, %v5790_v47  ;;  %v5793_v46 = vadd.f32 %v16367_v41, %v21058_v59  ;;  %16782 = vmatmul.mubr.msk.f32.gmra.mxu0 %vm806_vm0, %v21049_v39  ;;  %16752 = vmatprep.mubr.msk.f32.mxu1 %vm806_vm0, %v14337_v52  ;;  %v14116_v21 = vmul.f32 -1.442695, %v23552_v12 }
 0x339   : > { %v5761_v33 = vpop.f32.mrf.mxu1  ;;  %16784 = vmatprep.mubr.msk.f32.mxu0 %vm806_vm0, %v14369_v14 }
 0x33a   : > { %v5991_v53 = vpop.f32.mrf.mxu0  ;;  %v21186_v49 = vadd.f32 %v16399_v19, %v5793_v46  ;;  %v5792_v2 = vadd.f32 %v5761_v33, %v21067_v16  ;;  %v9675_v16 = vld [vmem:[%s18589_s24 + $0x8] sm:$0xff]  ;;  %v9922_v19 = vld [vmem:[#allocation15 + $0x30] sm:$0xff]  ;;  %17337 = vpow2.f32 %v14116_v21 }
 0x33b   : > { %v16370_v6 = vpop.f32.mrf.mxu1  ;;  %16753 = vmatmul.mubr.msk.f32.gmra.mxu1 %vm806_vm0, %v14338_v25  ;;  %v10152_v25 = vld [vmem:[#allocation15 + $0x50] sm:$0xff]  ;;  %v9680_v21 = vld [vmem:[%s18589_s24 + $0x48] sm:$0xff] }
 0x33c   : > { %v16402_v18 = vpop.f32.mrf.mxu0  ;;  %v21191_v39 = vadd.f32 %v5991_v53, %v5792_v2  ;;  %v5795_v59 = vadd.f32 %v16370_v6, %v21076_v10  ;;  %16785 = vmatmul.mubr.msk.f32.gmra.mxu0 %vm806_vm0, %v14370_v36  ;;  %16795 = vmatprep.mubr.msk.f32.mxu1 %vm806_vm0, %v20678_v43  ;;  %v9676_v43 = vld [vmem:[%s18589_s24 + $0x18] sm:$0xff]  ;;  %v9678_v53 = vld [vmem:[%s18589_s24 + $0x30] sm:$0xff] }
 0x33d   : > { %v5771_v48 = vpop.f32.mrf.mxu1  ;;  %16827 = vmatprep.mubr.msk.f32.mxu0 %vm806_vm0, %v9674_v50  ;;  %v23553_v36 = vld [vmem:[#allocation72_spill] sm:$0xff] }
 0x33e   : > { %v6001_v52 = vpop.f32.mrf.mxu0  ;;  %v21200_v47 = vadd.f32 %v16402_v18, %v5795_v59  ;;  %v5794_v14 = vadd.f32 %v5771_v48, %v21085_v13  ;;  %v9679_v59 = vld [vmem:[%s18589_s24 + $0x38] sm:$0xff] }
 0x33f   : > { %v21203_v41 = vpop.f32.mrf.mxu1  ;;  %16796 = vmatmul.mubr.msk.f32.vlgmr.msra.gmra.mxu1 %vm806_vm0, %v20695_v24  ;;  %v9677_v24 = vld [vmem:[%s18589_s24 + $0x20] sm:$0xff] }
 0x340   : > { %v21205_v10 = vpop.f32.mrf.mxu0  ;;  %v21210_v46 = vadd.f32 %v6001_v52, %v5794_v14  ;;  %16828 = vmatmul.mubr.msk.f32.vlgmr.msra.gmra.mxu0 %vm806_vm0, %v9675_v16  ;;  %16852 = vmatpush3.msra.mxu1 %v21143_v60  ;;  %v14115_v60 = vmul.f32 -1.442695, %v23553_v36  ;;  %v23554_v52 = vld [vmem:[#allocation73_spill] sm:$0xff]  ;;  %v10150_v14 = vld [vmem:[#allocation15 + $0x40] sm:$0xff] }
 0x341   : > { %v21214_v33 = vpop.f32.mrf.mxu1  ;;  %16798 = vmatprep.mubr.msk.f32.mxu1 %vm806_vm0, %v20702_v58  ;;  %16884 = vmatpush3.msra.mxu0 %v21146_v61  ;;  %v9921_v58 = vld [vmem:[#allocation15 + $0x28] sm:$0xff]  ;;  %v14118_v16 = vmul.f32 -1.442695, %v23554_v52  ;;  %v9686_v52 = vld [vmem:[%s18589_s24 + $0x90] sm:$0xff] }
 0x342   : > { %v21216_v13 = vpop.f32.mrf.mxu0  ;;  %16830 = vmatprep.mubr.msk.f32.mxu0 %vm806_vm0, %v9676_v43  ;;  %16853 = vmatprep.subr.mxu1 %v9922_v19  ;;  %v10151_v61 = vld [vmem:[#allocation15 + $0x48] sm:$0xff]  ;;  %17339 = vpow2.f32 %v14115_v60  ;;  %v23555_v43 = vld [vmem:[#allocation74_spill] sm:$0xff] }
 0x343   : > { %v21225_v2 = vpop.f32.mrf.mxu1  ;;  %16799 = vmatmul.mubr.msk.f32.gmra.mxu1 %vm806_vm0, %v20719_v27  ;;  %16885 = vmatprep.subr.mxu0 %v10152_v25  ;;  %17341 = vpow2.f32 %v14118_v16  ;;  %v9684_v16 = vld [vmem:[%s18589_s24 + $0x78] sm:$0xff] }
 0x344   : > { %v21227_v50 = vpop.f32.mrf.mxu0  ;;  %16831 = vmatmul.mubr.msk.f32.gmra.mxu0 %vm806_vm0, %v9677_v24  ;;  %16801 = vmatprep.mubr.msk.f32.mxu1 %vm806_vm0, %v20726_v38  ;;  %v9920_v38 = vld [vmem:[#allocation15 + $0x20] sm:$0xff] }
 0x345   : > { %v21234_v6 = vpop.f32.mrf.mxu1  ;;  %16833 = vmatprep.mubr.msk.f32.mxu0 %vm806_vm0, %v9678_v53  ;;  %16854 = vmatpush3.msra.mxu1 %v9922_v19  ;;  %v14117_v19 = vmul.f32 -1.442695, %v23555_v43  ;;  %v9681_v53 = vld [vmem:[%s18589_s24 + $0x50] sm:$0xff]  ;;  %v9683_v43 = vld [vmem:[%s18589_s24 + $0x68] sm:$0xff] }
 0x346   : > { %v21236_v18 = vpop.f32.mrf.mxu0  ;;  %16886 = vmatpush3.msra.mxu0 %v10152_v25  ;;  %16855 = vmatprep.subr.mxu1 %v9921_v58 }
 0x347   : > { %v21241_v27 = vpop.f32.mrf.mxu1  ;;  %16802 = vmatmul.mubr.msk.f32.gmra.mxu1 %vm806_vm0, %v20747_v20  ;;  %16887 = vmatprep.subr.mxu0 %v10151_v61  ;;  %v9682_v20 = vld [vmem:[%s18589_s24 + $0x60] sm:$0xff]  ;;  %17343 = vpow2.f32 %v14117_v19 }
 0x348   : > { %v21243_v48 = vpop.f32.mrf.mxu0  ;;  %16834 = vmatmul.mubr.msk.f32.gmra.mxu0 %vm806_vm0, %v9679_v59  ;;  %16804 = vmatprep.mubr.msk.f32.mxu1 %vm806_vm0, %v20754_v32  ;;  %v21265_v32 = vld [vmem:[#allocation15 + $0x78] sm:$0xff] }
 0x349   : > { %v21252_v25 = vpop.f32.mrf.mxu1  ;;  %16836 = vmatprep.mubr.msk.f32.mxu0 %vm806_vm0, %v9680_v21  ;;  %16856 = vmatpush3.msra.mxu1 %v9921_v58  ;;  %v21270_v58 = vld [vmem:[#allocation15 + $0x98] sm:$0xff] }
 0x34a   : > { %v21254_v24 = vpop.f32.mrf.mxu0  ;;  %16888 = vmatpush3.msra.mxu0 %v10151_v61  ;;  %16857 = vmatprep.subr.mxu1 %v9920_v38 }
 0x34b   : > { %v21259_v60 = vpop.f32.mrf.mxu1  ;;  %16805 = vmatmul.mubr.msk.f32.gmra.mxu1 %vm806_vm0, %v20776_v56  ;;  %16889 = vmatprep.subr.mxu0 %v10150_v14  ;;  %v17338_v56 = vpop.eup %17337 }
 0x34c   : > { %v21261_v59 = vpop.f32.mrf.mxu0  ;;  %16837 = vmatmul.mubr.msk.f32.gmra.mxu0 %vm806_vm0, %v9681_v53  ;;  %16807 = vmatprep.mubr.msk.f32.mxu1 %vm806_vm0, %v20785_v15 }
 0x34d   : > { %v21272_v61 = vpop.f32.mrf.mxu1  ;;  %16839 = vmatprep.mubr.msk.f32.mxu0 %vm806_vm0, %v9682_v20  ;;  %16858 = vmatpush3.msra.mxu1 %v9920_v38  ;;  %v6996_v38 = vadd.f32 1.0, %v17338_v56  ;;  %v9685_v20 = vld [vmem:[%s18589_s24 + $0x80] sm:$0xff] }
 0x34e   : > { %v21274_v21 = vpop.f32.mrf.mxu0  ;;  %16890 = vmatpush3.msra.mxu0 %v10150_v14  ;;  %16915 = vmatprep.subr.mxu1 %v21265_v32 }
 0x34f   : > { %v21280_v53 = vpop.f32.mrf.mxu1  ;;  %16808 = vmatmul.mubr.msk.f32.gmra.mxu1 %vm806_vm0, %v20805_v63  ;;  %16947 = vmatprep.subr.mxu0 %v21270_v58  ;;  %17345 = vrcp.f32 %v6996_v38 }
 0x350   : > { %v21282_v15 = vpop.f32.mrf.mxu0  ;;  %16840 = vmatmul.mubr.msk.f32.gmra.mxu0 %vm806_vm0, %v9683_v43  ;;  %16810 = vmatprep.mubr.msk.f32.mxu1 %vm806_vm0, %v20814_v4  ;;  %v17340_v43 = vpop.eup %17339  ;;  %v5781_v4 = vadd.f32 %v21079_v11, %v20899_v28  ;;  %v14401_v28 = vld [vmem:[%s18583_s16 + $0xda] sm:$0xff] }
 0x351   : > { %v21290_v19 = vpop.f32.mrf.mxu1  ;;  %16842 = vmatprep.mubr.msk.f32.mxu0 %vm806_vm0, %v9684_v16  ;;  %v23556_v16 = vld [vmem:[#allocation75_spill] sm:$0xff] }
 0x352   : > { %v21292_v14 = vpop.f32.mrf.mxu0  ;;  %v14120_v12 = vmul.f32 -1.442695, %v23556_v16  ;;  %v6011_v26 = vadd.f32 %v21081_v22, %v5781_v4  ;;  %v9903_v22 = vld [vmem:[%s18589_s24 + $0x1] sm:$0xff] }
 0x353   : > { %v16428_v36 = vpop.f32.mrf.mxu1  ;;  %16811 = vmatmul.mubr.msk.f32.gmra.mxu1 %vm806_vm0, %v20837_v37  ;;  %v21440_v16 = vld [vmem:[%s18589_s24 + $0x62] sm:$0xff] }
 0x354   : > { %v16460_v63 = vpop.f32.mrf.mxu0  ;;  %v6251_v56 = vadd.f32 %v16428_v36, %v21171_v42  ;;  %16843 = vmatmul.mubr.msk.f32.gmra.mxu0 %vm806_vm0, %v9685_v20  ;;  %16813 = vmatprep.mubr.msk.f32.mxu1 %vm806_vm0, %v21034_v23  ;;  %v9688_v36 = vld [vmem:[%s18589_s24 + $0xa8] sm:$0xff]  ;;  %v6995_v20 = vadd.f32 1.0, %v17340_v43  ;;  %17347 = vpow2.f32 %v14120_v12  ;;  %23565 = vst [vmem:[#allocation66_spill] sm:$0xff] %v21440_v16 }
 0x355   : > { %v6211_v35 = vpop.f32.mrf.mxu1  ;;  %16845 = vmatprep.mubr.msk.f32.mxu0 %vm806_vm0, %v9686_v52  ;;  %v10133_v12 = vld [vmem:[%s18589_s24 + $0x2] sm:$0xff] }
 0x356   : > { %v6442_v37 = vpop.f32.mrf.mxu0  ;;  %v21311_v11 = vadd.f32 %v16460_v63, %v6251_v56  ;;  %v6250_v42 = vadd.f32 %v6211_v35, %v21177_v62  ;;  %v14402_v35 = vld [vmem:[%s18583_s16 + $0xe2] sm:$0xff]  ;;  %v17342_v62 = vpop.eup %17341  ;;  %v6010_v63 = vadd.f32 %v21093_v54, %v5780_v5  ;;  %17349 = vrcp.f32 %v6995_v20  ;;  %s732_s16 = ssub.s32 0, %s23419_s17 }
 0x357   : > { %v16431_v23 = vpop.f32.mrf.mxu1  ;;  %16814 = vmatmul.mubr.msk.f32.gmra.mxu1 %vm806_vm0, %v21054_v57  ;;  %v9689_v57 = vld [vmem:[%s18589_s24 + $0xb0] sm:$0xff]  ;;  %v17344_v4 = vpop.eup %17343 }
 0x358   : > { %v16463_v38 = vpop.f32.mrf.mxu0  ;;  %v21318_v44 = vadd.f32 %v6442_v37, %v6250_v42  ;;  %v6253_v52 = vadd.f32 %v16431_v23, %v21186_v49  ;;  %16846 = vmatmul.mubr.msk.f32.gmra.mxu0 %vm806_vm0, %v9687_v40  ;;  %16816 = vmatprep.mubr.msk.f32.mxu1 %vm806_vm0, %v14401_v28  ;;  %v5783_v49 = vadd.f32 %v21101_v29, %v20928_v17  ;;  %v9904_v29 = vld [vmem:[%s18589_s24 + $0x9] sm:$0xff] }
 0x359   : > { %v6221_v43 = vpop.f32.mrf.mxu1  ;;  %16848 = vmatprep.mubr.msk.f32.mxu0 %vm806_vm0, %v9688_v36  ;;  %v6241_v40 = vadd.f32 %v21203_v41, %v6011_v26  ;;  %v6240_v5 = vadd.f32 %v21214_v33, %v6010_v63  ;;  %v6998_v36 = vadd.f32 1.0, %v17342_v62  ;;  %v23558_v41 = vld [vmem:[#allocation76_spill] sm:$0xff] }
 0x35a   : > { %v6452_v56 = vpop.f32.mrf.mxu0  ;;  %v21331_v37 = vadd.f32 %v16463_v38, %v6253_v52  ;;  %v6252_v28 = vadd.f32 %v6221_v43, %v21191_v39  ;;  %v6997_v39 = vadd.f32 1.0, %v17344_v4  ;;  %v14119_v20 = vmul.f32 -1.442695, %v23558_v41  ;;  %v10134_v26 = vld [vmem:[%s18589_s24 + $0xa] sm:$0xff]  ;;  %v21352_v63 = vld [vmem:[%s18589_s24 + $0x19] sm:$0xff] }
 0x35b   : > { %v16434_v54 = vpop.f32.mrf.mxu1  ;;  %16817 = vmatmul.mubr.msk.f32.gmra.mxu1 %vm806_vm0, %v14402_v35  ;;  %v6013_v52 = vadd.f32 %v21103_v7, %v5783_v49  ;;  %v6472_v35 = vadd.f32 %v21205_v10, %v6241_v40  ;;  %v6471_v43 = vadd.f32 %v21216_v13, %v6240_v5  ;;  %v10383_v7 = vld [vmem:[#allocation15 + $0x70] sm:$0xff]  ;;  %17351 = vrcp.f32 %v6998_v36 }
 0x35c   : > { %v16466_v42 = vpop.f32.mrf.mxu0  ;;  %v21337_v23 = vadd.f32 %v6452_v56, %v6252_v28  ;;  %v6255_v17 = vadd.f32 %v16434_v54, %v21200_v47  ;;  %16849 = vmatmul.mubr.msk.f32.gmra.mxu0 %vm806_vm0, %v9689_v57  ;;  %16859 = vmatprep.mubr.msk.f32.mxu1 %vm806_vm0, %v9903_v22  ;;  %v21357_v22 = vld [vmem:[%s18589_s24 + $0x1a] sm:$0xff]  ;;  %17353 = vpow2.f32 %v14119_v20  ;;  %v17346_v5 = vpop.eup %17345  ;;  %v21381_v36 = vld [vmem:[%s18589_s24 + $0x32] sm:$0xff]  ;;  %v6242_v20 = vadd.f32 %v21234_v6, %v21116_v9 }
 0x35d   : > { %v6231_v33 = vpop.f32.mrf.mxu1  ;;  %16891 = vmatprep.mubr.msk.f32.mxu0 %vm806_vm0, %v10133_v12  ;;  %v6243_v10 = vadd.f32 %v21225_v2, %v6013_v52  ;;  %v10613_v13 = vld [vmem:[#allocation15 + $0x90] sm:$0xff]  ;;  %17355 = vrcp.f32 %v6997_v39 }
 0x35e   : > { %23557 = vst [vmem:[#allocation41_spill] sm:$0xff] %v21337_v23  ;;  %v6462_v38 = vpop.f32.mrf.mxu0  ;;  %v21348_v47 = vadd.f32 %v16466_v42, %v6255_v17  ;;  %v6254_v62 = vadd.f32 %v6231_v33, %v21210_v46  ;;  %v21365_v46 = vld [vmem:[%s18589_s24 + $0x21] sm:$0xff]  ;;  %v21374_v12 = vld [vmem:[%s18589_s24 + $0x31] sm:$0xff]  ;;  %v21394_v33 = vld [vmem:[%s18589_s24 + $0x39] sm:$0xff] }
 0x35f   : > { %v16477_v56 = vpop.f32.mrf.mxu1  ;;  %16860 = vmatmul.mubr.msk.f32.vlgmr.msra.gmra.mxu1 %vm806_vm0, %v9904_v29  ;;  %v21371_v2 = vld [vmem:[%s18589_s24 + $0x22] sm:$0xff]  ;;  %v6474_v39 = vadd.f32 %v21227_v50, %v6243_v10  ;;  %v21402_v9 = vld [vmem:[%s18589_s24 + $0x3a] sm:$0xff] }
 0x360   : > { %23559 = vst [vmem:[#allocation46_spill] sm:$0xff] %v21348_v47  ;;  %v16509_v57 = vpop.f32.mrf.mxu0  ;;  %v21360_v4 = vadd.f32 %v6462_v38, %v6254_v62  ;;  %v6702_v49 = vadd.f32 %v16477_v56, %v6472_v35  ;;  %16892 = vmatmul.mubr.msk.f32.vlgmr.msra.gmra.mxu0 %vm806_vm0, %v10134_v26  ;;  %16916 = vmatpush3.msra.mxu1 %v21265_v32  ;;  %v10382_v38 = vld [vmem:[#allocation15 + $0x68] sm:$0xff] }
 0x361   : > { %v6622_v40 = vpop.f32.mrf.mxu1  ;;  %16948 = vmatpush3.msra.mxu0 %v21270_v58  ;;  %16862 = vmatprep.mubr.msk.f32.mxu1 %vm806_vm0, %v21352_v63  ;;  %v21405_v50 = vld [vmem:[%s18589_s24 + $0x49] sm:$0xff]  ;;  %v17348_v6 = vpop.eup %17347 }
 0x362   : > { %23560 = vst [vmem:[#allocation53_spill] sm:$0xff] %v21360_v4  ;;  %v6852_v28 = vpop.f32.mrf.mxu0  ;;  %v21376_v54 = vadd.f32 %v16509_v57, %v6702_v49  ;;  %v6701_v32 = vadd.f32 %v6622_v40, %v6471_v43  ;;  %v12260_v42 = vpop.permute.xlu1 %12259  ;;  %16894 = vmatprep.mubr.msk.f32.mxu0 %vm806_vm0, %v21357_v22  ;;  %16917 = vmatprep.subr.mxu1 %v10383_v7  ;;  %v21408_v56 = vld [vmem:[%s18589_s24 + $0x4a] sm:$0xff] }
 0x363   : > { %v12306_v58 = vmul.f32 %v17346_v5, %v12260_v42  ;;  %v16480_v17 = vpop.f32.mrf.mxu1  ;;  %16863 = vmatmul.mubr.msk.f32.gmra.mxu1 %vm806_vm0, %v21365_v46  ;;  %16949 = vmatprep.subr.mxu0 %v10613_v13  ;;  %v10612_v49 = vld [vmem:[#allocation15 + $0x88] sm:$0xff]  ;;  %v10381_v40 = vld [vmem:[#allocation15 + $0x60] sm:$0xff]  ;;  %v6473_v5 = vadd.f32 %v21236_v18, %v6242_v20 }
 0x364   : > { %23561 = vst [vmem:[#allocation64_spill] sm:$0xff] %v21376_v54  ;;  %v16512_v29 = vpop.f32.mrf.mxu0  ;;  %17357 = vtanh.f32 %v21376_v54  ;;  %16895 = vmatmul.mubr.msk.f32.gmra.mxu0 %vm806_vm0, %v21371_v2  ;;  %16865 = vmatprep.mubr.msk.f32.mxu1 %vm806_vm0, %v21374_v12  ;;  %v21396_v26 = vadd.f32 %v6852_v28, %v6701_v32  ;;  %v6704_v62 = vadd.f32 %v16480_v17, %v6474_v39  ;;  %v17350_v28 = vpop.eup %17349  ;;  %v21432_v18 = vld [vmem:[%s18589_s24 + $0x52] sm:$0xff]  ;;  %v21435_v39 = vld [vmem:[%s18589_s24 + $0x61] sm:$0xff] }
 0x365   : > { %v6632_v52 = vpop.f32.mrf.mxu1  ;;  %12339 = vrot.lane.b32.xlu1 %v12306_v58, %s18196_s28  ;;  %16897 = vmatprep.mubr.msk.f32.mxu0 %vm806_vm0, %v21381_v36  ;;  %v6245_v32 = vadd.f32 %v21241_v27, %v21125_v34  ;;  %23563 = vst [vmem:[#allocation55_spill] sm:$0xff] %v21432_v18 }
 0x366   : > { %23562 = vst [vmem:[#allocation54_spill] sm:$0xff] %v21396_v26  ;;  %v6862_v35 = vpop.f32.mrf.mxu0  ;;  %v12258_v43 = vpop.permute.xlu1 %12257  ;;  %16918 = vmatpush3.msra.mxu1 %v10383_v7  ;;  %16950 = vmatpush3.msra.mxu0 %v10613_v13  ;;  %17359 = vtanh.f32 %v21396_v26  ;;  %v21421_v7 = vld [vmem:[%s18589_s24 + $0x51] sm:$0xff]  ;;  %v7000_v13 = vadd.f32 1.0, %v17348_v6  ;;  %v21437_v20 = vadd.f32 %v16512_v29, %v6704_v62  ;;  %v6703_v6 = vadd.f32 %v6632_v52, %v6473_v5  ;;  %v21455_v52 = vld [vmem:[%s18589_s24 + $0x69] sm:$0xff] }
 0x367   : > { %v16483_v57 = vpop.f32.mrf.mxu1  ;;  %16866 = vmatmul.mubr.msk.f32.gmra.mxu1 %vm806_vm0, %v21394_v33  ;;  %16919 = vmatprep.subr.mxu1 %v10382_v38  ;;  %v12305_v42 = vmul.f32 %v17350_v28, %v12258_v43  ;;  %v10611_v43 = vld [vmem:[#allocation15 + $0x80] sm:$0xff]  ;;  %v6476_v28 = vadd.f32 %v21243_v48, %v6245_v32 }
 0x368   : > { %v21410_v10 = vpop.f32.mrf.mxu0  ;;  %16898 = vmatmul.mubr.msk.f32.gmra.mxu0 %vm806_vm0, %v21402_v9  ;;  %16868 = vmatprep.mubr.msk.f32.mxu1 %vm806_vm0, %v21405_v50  ;;  %23564 = vst [vmem:[#allocation37_spill] sm:$0xff] %v21437_v20  ;;  %v17352_v62 = vpop.eup %17351  ;;  %17361 = vrcp.f32 %v7000_v13  ;;  %v21468_v1 = vadd.f32 %v6862_v35, %v6703_v6  ;;  %v21471_v13 = vld [vmem:[%s18589_s24 + $0x79] sm:$0xff] }
 0x369   : > { %v21425_v58 = vpop.f32.mrf.mxu1  ;;  %16900 = vmatprep.mubr.msk.f32.mxu0 %vm806_vm0, %v21408_v56  ;;  %16920 = vmatpush3.msra.mxu1 %v10382_v38  ;;  %v23566_v38 = vld [vmem:[#allocation78_spill] sm:$0xff]  ;;  %v17354_v31 = vpop.eup %17353  ;;  %17363 = vtanh.f32 %v21437_v20  ;;  %v6706_v26 = vadd.f32 %v16483_v57, %v6476_v28 }
 0x36a   : > { %v21427_v17 = vpop.f32.mrf.mxu0  ;;  %v12264_v41 = vpop.permute.xlu1 %12263  ;;  %16951 = vmatprep.subr.mxu0 %v10612_v49  ;;  %16921 = vmatprep.subr.mxu1 %v10381_v40  ;;  %v14121_v29 = vmul.f32 -1.442695, %v23566_v38  ;;  %v21465_v38 = vld [vmem:[%s18589_s24 + $0x6a] sm:$0xff]  ;;  %23568 = vst [vmem:[#allocation57_spill] sm:$0xff] %v21468_v1  ;;  %v21474_v48 = vld [vmem:[%s18589_s24 + $0x7a] sm:$0xff] }
 0x36b   : > { %12337 = vrot.lane.b32.xlu1 %v12305_v42, %s18196_s28  ;;  %v21443_v34 = vpop.f32.mrf.mxu1  ;;  %16869 = vmatmul.mubr.msk.f32.gmra.mxu1 %vm806_vm0, %v21421_v7  ;;  %23567 = vst [vmem:[#allocation56_spill] sm:$0xff] %v21465_v38  ;;  %v12308_v55 = vmul.f32 %v17352_v62, %v12264_v41  ;;  %23569 = vst [vmem:[#allocation67_spill] sm:$0xff] %v21474_v48  ;;  %v17356_v32 = vpop.eup %17355  ;;  %v21482_v41 = vld [vmem:[#allocation15 + $0xb8] sm:$0xff]  ;;  %v21515_v20 = vadd.f32 %v21410_v10, %v6706_v26 }
 0x36c   : > { %v21445_v27 = vpop.f32.mrf.mxu0  ;;  %16901 = vmatmul.mubr.msk.f32.gmra.mxu0 %vm806_vm0, %v21432_v18  ;;  %16871 = vmatprep.mubr.msk.f32.mxu1 %vm806_vm0, %v21435_v39  ;;  %17365 = vpow2.f32 %v14121_v29  ;;  %v21488_v57 = vld [vmem:[%s18589_s24 + $0x81] sm:$0xff]  ;;  %v21508_v29 = vld [vmem:[%s18589_s24 + $0x91] sm:$0xff] }
 0x36d   : > { %v21458_v5 = vpop.f32.mrf.mxu1  ;;  %16903 = vmatprep.mubr.msk.f32.mxu0 %vm806_vm0, %v21440_v16  ;;  %16952 = vmatpush3.msra.mxu0 %v10612_v49  ;;  %23570 = vst [vmem:[#allocation38_spill] sm:$0xff] %v21488_v57  ;;  %17367 = vtanh.f32 %v21468_v1  ;;  %23573 = vst [vmem:[#allocation70_spill] sm:$0xff] %v21515_v20 }
 0x36e   : > { %v21460_v42 = vpop.f32.mrf.mxu0  ;;  %v12262_v30 = vpop.permute.xlu1 %12261  ;;  %16922 = vmatpush3.msra.mxu1 %v10381_v40  ;;  %16953 = vmatprep.subr.mxu0 %v10611_v43  ;;  %v21490_v40 = vld [vmem:[#allocation15 + $0xd8] sm:$0xff] }
 0x36f   : > { %v21476_v54 = vpop.f32.mrf.mxu1  ;;  %16872 = vmatmul.mubr.msk.f32.gmra.mxu1 %vm806_vm0, %v21455_v52  ;;  %16954 = vmatpush3.msra.mxu0 %v10611_v43  ;;  %v12307_v35 = vmul.f32 %v17356_v32, %v12262_v30  ;;  %v6999_v30 = vadd.f32 1.0, %v17354_v31  ;;  %v6244_v43 = vadd.f32 %v21252_v25, %v21130_v3  ;;  %v21511_v32 = vld [vmem:[%s18589_s24 + $0x92] sm:$0xff] }
 0x370   : > { %v21478_v49 = vpop.f32.mrf.mxu0  ;;  %12343 = vrot.lane.b32.xlu1 %v12308_v55, %s18196_s28  ;;  %16904 = vmatmul.mubr.msk.f32.gmra.mxu0 %vm806_vm0, %v21465_v38  ;;  %v21501_v55 = vld [vmem:[%s18589_s24 + $0x82] sm:$0xff]  ;;  %23572 = vst [vmem:[#allocation60_spill] sm:$0xff] %v21511_v32  ;;  %v21528_v3 = vld [vmem:[%s18589_s24 + $0x99] sm:$0xff] }
 0x371   : > { %v17358_v6 = vpop.eup %17357  ;;  %v21492_v62 = vpop.f32.mrf.mxu1  ;;  %16874 = vmatprep.mubr.msk.f32.mxu1 %vm806_vm0, %v21471_v13  ;;  %16906 = vmatprep.mubr.msk.f32.mxu0 %vm806_vm0, %v21474_v48  ;;  %23571 = vst [vmem:[#allocation58_spill] sm:$0xff] %v21501_v55  ;;  %17369 = vrcp.f32 %v6999_v30  ;;  %v6475_v1 = vadd.f32 %v21254_v24, %v6244_v43  ;;  %v21562_v24 = vld [vmem:[%s18589_s24 + $0xb1] sm:$0xff]  ;;  %v6247_v43 = vadd.f32 %v21259_v60, %v21139_v51 }
 0x372   : > { %v21494_v28 = vpop.f32.mrf.mxu0  ;;  %7493 = vrot.lane.b32.xlu0 %v17358_v6, %s18196_s28  ;;  %16979 = vmatprep.subr.mxu1 %v21482_v41  ;;  %v21539_v6 = vld [vmem:[%s18589_s24 + $0x9a] sm:$0xff]  ;;  %17371 = vtanh.f32 %v21515_v20  ;;  %v12268_v30 = vpop.permute.xlu1 %12267  ;;  %23577 = vst [vmem:[#allocation80_spill] sm:$0xff] %v21562_v24 }
 0x373   : > { %v21517_v4 = vpop.f32.mrf.mxu1  ;;  %16875 = vmatmul.mubr.msk.f32.gmra.mxu1 %vm806_vm0, %v21488_v57  ;;  %17011 = vmatprep.subr.mxu0 %v21490_v40  ;;  %v17360_v25 = vpop.eup %17359  ;;  %23574 = vst [vmem:[#allocation62_spill] sm:$0xff] %v21539_v6 }
 0x374   : > { %v21519_v31 = vpop.f32.mrf.mxu0  ;;  %12341 = vrot.lane.b32.xlu1 %v12307_v35, %s18196_s28  ;;  %16907 = vmatmul.mubr.msk.f32.gmra.mxu0 %vm806_vm0, %v21501_v55  ;;  %v21542_v35 = vld [vmem:[%s18589_s24 + $0xa9] sm:$0xff] }
 0x375   : > { %v21530_v26 = vpop.f32.mrf.mxu1  ;;  %16877 = vmatprep.mubr.msk.f32.mxu1 %vm806_vm0, %v21508_v29  ;;  %16909 = vmatprep.mubr.msk.f32.mxu0 %vm806_vm0, %v21511_v32  ;;  %23575 = vst [vmem:[#allocation65_spill] sm:$0xff] %v21542_v35  ;;  %v21547_v55 = vld [vmem:[%s18589_s24 + $0xaa] sm:$0xff]  ;;  %v6705_v32 = vadd.f32 %v21425_v58, %v6475_v1  ;;  %v21573_v1 = vld [vmem:[%s18589_s24 + $0xb2] sm:$0xff]  ;;  %v17362_v58 = vpop.eup %17361 }
 0x376   : > { %v21532_v10 = vpop.f32.mrf.mxu0  ;;  %7491 = vrot.lane.b32.xlu0 %v17360_v25, %s18196_s28  ;;  %23576 = vst [vmem:[#allocation68_spill] sm:$0xff] %v21547_v55  ;;  %v17364_v38 = vpop.eup %17363  ;;  %v12310_v60 = vmul.f32 %v17362_v58, %v12268_v30 }
 0x377   : > { %v21550_v48 = vpop.f32.mrf.mxu1  ;;  %16878 = vmatmul.mubr.msk.f32.gmra.mxu1 %vm806_vm0, %v21528_v3  ;;  %v21583_v51 = vadd.f32 %v21427_v17, %v6705_v32  ;;  %v6246_v17 = vadd.f32 %v21272_v61, %v21148_v0  ;;  %v21614_v0 = vld [vmem:[%s18589_s24 + $0x38] sm:$0xff]  ;;  %v10843_v61 = vld [vmem:[#allocation15 + $0xb0] sm:$0xff] }
 0x378   : > { %v21552_v47 = vpop.f32.mrf.mxu0  ;;  %16910 = vmatmul.mubr.msk.f32.gmra.mxu0 %vm806_vm0, %v21539_v6  ;;  %16880 = vmatprep.mubr.msk.f32.mxu1 %vm806_vm0, %v21542_v35  ;;  %v14467_v6 = vld [vmem:[%s18589_s24 + $0x18] sm:$0xff] }
 0x379   : > { %v21566_v25 = vpop.f32.mrf.mxu1  ;;  %16912 = vmatprep.mubr.msk.f32.mxu0 %vm806_vm0, %v21547_v55  ;;  %23581 = vst [vmem:[#allocation84_spill] sm:$0xff] %v21583_v51  ;;  %v14468_v55 = vld [vmem:[%s18589_s24 + $0x20] sm:$0xff]  ;;  %12347 = vrot.lane.b32.xlu1 %v12310_v60, %s18196_s28  ;;  %17373 = vtanh.f32 %v21583_v51 }
 0x37a   : > { %23578 = vst [vmem:[#allocation81_spill] sm:$0xff] %v21566_v25  ;;  %v21568_v20 = vpop.f32.mrf.mxu0  ;;  %7497 = vrot.lane.b32.xlu0 %v17364_v38, %s18196_s28  ;;  %v6478_v25 = vadd.f32 %v21261_v59, %v6247_v43  ;;  %v21601_v38 = vld [vmem:[%s18589_s24 + $0x30] sm:$0xff] }
 0x37b   : > { %23579 = vst [vmem:[#allocation82_spill] sm:$0xff] %v21568_v20  ;;  %v21576_v16 = vpop.f32.mrf.mxu1  ;;  %16881 = vmatmul.mubr.msk.f32.gmra.mxu1 %vm806_vm0, %v21562_v24  ;;  %v17366_v20 = vpop.eup %17365 }
 0x37c   : > { %23580 = vst [vmem:[#allocation83_spill] sm:$0xff] %v21576_v16  ;;  %v21578_v23 = vpop.f32.mrf.mxu0  ;;  %16913 = vmatmul.mubr.msk.f32.gmra.mxu0 %vm806_vm0, %v21573_v1  ;;  %16923 = vmatprep.mubr.msk.f32.mxu1 %vm806_vm0, %v14467_v6  ;;  %v17368_v32 = vpop.eup %17367  ;;  %v6708_v59 = vadd.f32 %v21443_v34, %v6478_v25  ;;  %v7001_v6 = vadd.f32 1.0, %v17366_v20  ;;  %v21624_v20 = vld [vmem:[%s18589_s24 + $0x48] sm:$0xff] }
 0x37d   : > { %v21590_v16 = vpop.f32.mrf.mxu1  ;;  %16955 = vmatprep.mubr.msk.f32.mxu0 %vm806_vm0, %v21352_v63  ;;  %v12266_v63 = vpop.permute.xlu1 %12265 }
 0x37e   : > { %v21592_v18 = vpop.f32.mrf.mxu0  ;;  %7495 = vrot.lane.b32.xlu0 %v17368_v32, %s18196_s28  ;;  %v21633_v58 = vadd.f32 %v21445_v27, %v6708_v59  ;;  %17375 = vrcp.f32 %v7001_v6 }
 0x37f   : > { %23582 = vst [vmem:[#allocation85_spill] sm:$0xff] %v21592_v18  ;;  %v21604_v30 = vpop.f32.mrf.mxu1  ;;  %16924 = vmatmul.mubr.msk.f32.vlgmr.msra.gmra.mxu1 %vm806_vm0, %v14468_v55  ;;  %v6477_v55 = vadd.f32 %v21274_v21, %v6246_v17 }
 0x380   : > { %v21606_v43 = vpop.f32.mrf.mxu0  ;;  %16956 = vmatmul.mubr.msk.f32.vlgmr.msra.gmra.mxu0 %vm806_vm0, %v21365_v46  ;;  %16980 = vmatpush3.msra.mxu1 %v21482_v41  ;;  %v17370_v46 = vpop.eup %17369  ;;  %v6249_v41 = vadd.f32 %v21280_v53, %v21157_v45  ;;  %23583 = vst [vmem:[#allocation86_spill] sm:$0xff] %v21633_v58  ;;  %v21647_v45 = vld [vmem:[%s18589_s24 + $0x50] sm:$0xff]  ;;  %17377 = vtanh.f32 %v21633_v58 }
 0x381   : > { %v21617_v34 = vpop.f32.mrf.mxu1  ;;  %16926 = vmatprep.mubr.msk.f32.mxu1 %vm806_vm0, %v21601_v38  ;;  %17012 = vmatpush3.msra.mxu0 %v21490_v40  ;;  %v17372_v21 = vpop.eup %17371  ;;  %v12309_v40 = vmul.f32 %v17370_v46, %v12266_v63  ;;  %v11074_v53 = vld [vmem:[#allocation15 + $0xd0] sm:$0xff]  ;;  %v11073_v63 = vld [vmem:[#allocation15 + $0xc8] sm:$0xff] }
 0x382   : > { %v21619_v25 = vpop.f32.mrf.mxu0  ;;  %16958 = vmatprep.mubr.msk.f32.mxu0 %vm806_vm0, %v21374_v12  ;;  %16981 = vmatprep.subr.mxu1 %v10843_v61  ;;  %v6707_v12 = vadd.f32 %v21458_v5, %v6477_v55  ;;  %v21657_v5 = vld [vmem:[%s18589_s24 + $0x60] sm:$0xff]  ;;  %v21671_v46 = vpop.permute.xlu1 %12271 }
 0x383   : > { %v21635_v60 = vpop.f32.mrf.mxu1  ;;  %16927 = vmatmul.mubr.msk.f32.gmra.mxu1 %vm806_vm0, %v21614_v0  ;;  %7501 = vrot.lane.b32.xlu0 %v17372_v21, %s18196_s28  ;;  %23585 = vst [vmem:[#allocation88_spill] sm:$0xff] %v21671_v46  ;;  %v21740_v46 = vld [vmem:[%s18589_s24 + $0xa8] sm:$0xff] }
 0x384   : > { %v21637_v32 = vpop.f32.mrf.mxu0  ;;  %16959 = vmatmul.mubr.msk.f32.gmra.mxu0 %vm806_vm0, %v21394_v33  ;;  %16929 = vmatprep.mubr.msk.f32.mxu1 %vm806_vm0, %v21624_v20  ;;  %v6480_v33 = vadd.f32 %v21282_v15, %v6249_v41  ;;  %v21669_v55 = vadd.f32 %v21460_v42, %v6707_v12  ;;  %v21678_v15 = vld [vmem:[%s18589_s24 + $0x68] sm:$0xff] }
 0x385   : > { %v21650_v27 = vpop.f32.mrf.mxu1  ;;  %16961 = vmatprep.mubr.msk.f32.mxu0 %vm806_vm0, %v21405_v50  ;;  %12345 = vrot.lane.b32.xlu1 %v12309_v40, %s18196_s28  ;;  %v10842_v50 = vld [vmem:[#allocation15 + $0xa8] sm:$0xff] }
 0x386   : > { %v21652_v17 = vpop.f32.mrf.mxu0  ;;  %16982 = vmatpush3.msra.mxu1 %v10843_v61  ;;  %17013 = vmatprep.subr.mxu0 %v11074_v53  ;;  %23584 = vst [vmem:[#allocation87_spill] sm:$0xff] %v21669_v55  ;;  %v6248_v61 = vadd.f32 %v21290_v19, %v21162_v8  ;;  %v6710_v41 = vadd.f32 %v21476_v54, %v6480_v33  ;;  %v10841_v8 = vld [vmem:[#allocation15 + $0xa0] sm:$0xff]  ;;  %17379 = vtanh.f32 %v21669_v55  ;;  %v12270_v51 = vpop.permute.xlu1 %12269 }
 0x387   : > { %v21662_v59 = vpop.f32.mrf.mxu1  ;;  %16930 = vmatmul.mubr.msk.f32.gmra.mxu1 %vm806_vm0, %v21647_v45  ;;  %17014 = vmatpush3.msra.mxu0 %v11074_v53  ;;  %v21704_v19 = vld [vmem:[%s18589_s24 + $0x80] sm:$0xff] }
 0x388   : > { %v21664_v6 = vpop.f32.mrf.mxu0  ;;  %16962 = vmatmul.mubr.msk.f32.gmra.mxu0 %vm806_vm0, %v21421_v7  ;;  %16932 = vmatprep.mubr.msk.f32.mxu1 %vm806_vm0, %v21657_v5  ;;  %v21690_v7 = vld [vmem:[%s18589_s24 + $0x78] sm:$0xff]  ;;  %v11072_v54 = vld [vmem:[#allocation15 + $0xc0] sm:$0xff]  ;;  %v6479_v53 = vadd.f32 %v21292_v14, %v6248_v61  ;;  %v21708_v33 = vadd.f32 %v21478_v49, %v6710_v41 }
 0x389   : > { %v21683_v21 = vpop.f32.mrf.mxu1  ;;  %16964 = vmatprep.mubr.msk.f32.mxu0 %vm806_vm0, %v21435_v39  ;;  %16983 = vmatprep.subr.mxu1 %v10842_v50  ;;  %v17374_v39 = vpop.eup %17373  ;;  %v21721_v49 = vld [vmem:[#allocation15 + $0xf8] sm:$0xff] }
 0x38a   : > { %v21685_v42 = vpop.f32.mrf.mxu0  ;;  %17015 = vmatprep.subr.mxu0 %v11073_v63  ;;  %23586 = vst [vmem:[#allocation89_spill] sm:$0xff] %v21708_v33  ;;  %16984 = vmatpush3.msra.mxu1 %v10842_v50  ;;  %v6709_v55 = vadd.f32 %v21492_v62, %v6479_v53  ;;  %v21730_v50 = vld [vmem:[#allocation15 + $0x118] sm:$0xff]  ;;  %17381 = vtanh.f32 %v21708_v33  ;;  %v21737_v53 = vadd.f32 %v21606_v43, %v21604_v30  ;;  %v21753_v43 = vld [vmem:[%s18589_s24 + $0xb0] sm:$0xff] }
 0x38b   : > { %v21692_v12 = vpop.f32.mrf.mxu1  ;;  %16933 = vmatmul.mubr.msk.f32.gmra.mxu1 %vm806_vm0, %v21678_v15  ;;  %17016 = vmatpush3.msra.mxu0 %v11073_v63  ;;  %v17376_v62 = vpop.eup %17375 }
 0x38c   : > { %v21694_v40 = vpop.f32.mrf.mxu0  ;;  %16965 = vmatmul.mubr.msk.f32.gmra.mxu0 %vm806_vm0, %v21455_v52  ;;  %16935 = vmatprep.mubr.msk.f32.mxu1 %vm806_vm0, %v21690_v7  ;;  %v21715_v52 = vld [vmem:[%s18589_s24 + $0x90] sm:$0xff]  ;;  %v21744_v33 = vadd.f32 %v21494_v28, %v6709_v55  ;;  %v21757_v28 = vadd.f32 %v21619_v25, %v21617_v34  ;;  %v21775_v34 = vadd.f32 %v21637_v32, %v21635_v60  ;;  %v21792_v60 = vld [vmem:[%s18589_s24 + $0xc8] sm:$0xff] }
 0x38d   : > { %v21710_v58 = vpop.f32.mrf.mxu1  ;;  %16967 = vmatprep.mubr.msk.f32.mxu0 %vm806_vm0, %v21471_v13  ;;  %7499 = vrot.lane.b32.xlu0 %v17374_v39, %s18196_s28  ;;  %v21728_v13 = vld [vmem:[%s18589_s24 + $0x98] sm:$0xff]  ;;  %v12311_v39 = vmul.f32 %v17376_v62, %v12270_v51  ;;  %v17378_v51 = vpop.eup %17377  ;;  %v21779_v25 = vadd.f32 %v21652_v17, %v21650_v27  ;;  %v21796_v27 = vadd.f32 %v21685_v42, %v21683_v21 }
 0x38e   : > { %v8013_v63 = vpop.f32.mrf.mxu0  ;;  %16985 = vmatprep.subr.mxu1 %v10841_v8  ;;  %17017 = vmatprep.subr.mxu0 %v11072_v54  ;;  %23587 = vst [vmem:[#allocation90_spill] sm:$0xff] %v21744_v33  ;;  %17383 = vtanh.f32 %v21744_v33  ;;  %v21808_v33 = vadd.f32 %v21694_v40, %v21692_v12 }
 0x38f   : > { %v16553_v14 = vpop.f32.mrf.mxu1  ;;  %16936 = vmatmul.mubr.msk.f32.gmra.mxu1 %vm806_vm0, %v21704_v19  ;;  %17018 = vmatpush3.msra.mxu0 %v11072_v54  ;;  %v6712_v54 = vadd.f32 %v21517_v4, %v21311_v11  ;;  %v21785_v11 = vadd.f32 %v21664_v6, %v21662_v59  ;;  %v21801_v59 = vld [vmem:[%s18589_s24 + $0xc9] sm:$0xff] }
 0x390   : > { %v16585_v61 = vpop.f32.mrf.mxu0  ;;  %16968 = vmatmul.mubr.msk.f32.gmra.mxu0 %vm806_vm0, %v21488_v57  ;;  %16938 = vmatprep.mubr.msk.f32.mxu1 %vm806_vm0, %v21715_v52 }
 0x391   : > { %v7830_v41 = vpop.f32.mrf.mxu1  ;;  %16970 = vmatprep.mubr.msk.f32.mxu0 %vm806_vm0, %v21508_v29  ;;  %16986 = vmatpush3.msra.mxu1 %v10841_v8  ;;  %v21763_v8 = vld [vmem:[%s18589_s24 + $0xc0] sm:$0xff]  ;;  %v21804_v6 = vadd.f32 %v21519_v31, %v6712_v54  ;;  %v21814_v42 = vadd.f32 %v16585_v61, %v16553_v14  ;;  %v6711_v31 = vadd.f32 %v21530_v26, %v21318_v44  ;;  %v23590_v14 = vld [vmem:[#allocation77_spill] sm:$0xff] }
 0x392   : > { %v8023_v57 = vpop.f32.mrf.mxu0  ;;  %17043 = vmatprep.subr.mxu1 %v21721_v49  ;;  %17075 = vmatprep.subr.mxu0 %v21730_v50  ;;  %v14122_v61 = vmul.f32 -1.442695, %v23590_v14 }
 0x393   : > { %v16556_v18 = vpop.f32.mrf.mxu1  ;;  %16939 = vmatmul.mubr.msk.f32.gmra.mxu1 %vm806_vm0, %v21728_v13  ;;  %12349 = vrot.lane.b32.xlu1 %v12311_v39, %s18196_s28  ;;  %v21770_v39 = vld [vmem:[%s18589_s24 + $0xc1] sm:$0xff]  ;;  %v17380_v32 = vpop.eup %17379  ;;  %23589 = vst [vmem:[#allocation92_spill] sm:$0xff] %v21804_v6  ;;  %17385 = vtanh.f32 %v21804_v6 }
 0x394   : > { %v16588_v30 = vpop.f32.mrf.mxu0  ;;  %16971 = vmatmul.mubr.msk.f32.gmra.mxu0 %vm806_vm0, %v21528_v3  ;;  %7505 = vrot.lane.b32.xlu0 %v17378_v51, %s18196_s28  ;;  %23588 = vst [vmem:[#allocation91_spill] sm:$0xff] %v21770_v39  ;;  %17387 = vpow2.f32 %v14122_v61  ;;  %v21894_v61 = vpop.permute.xlu0 %7411 }
 0x395   : > { %v7840_v55 = vpop.f32.mrf.mxu1  ;;  %16941 = vmatprep.mubr.msk.f32.mxu1 %vm806_vm0, %v21740_v46  ;;  %16973 = vmatprep.mubr.msk.f32.mxu0 %vm806_vm0, %v21542_v35  ;;  %v21816_v35 = vadd.f32 %v8023_v57, %v7830_v41  ;;  %v21822_v54 = vadd.f32 %v16588_v30, %v16556_v18  ;;  %v11304_v30 = vld [vmem:[#allocation15 + $0xf0] sm:$0xff] }
 0x396   : > { %v8033_v62 = vpop.f32.mrf.mxu0 }
 0x397   : > { %v16559_v51 = vpop.f32.mrf.mxu1  ;;  %16942 = vmatmul.mubr.msk.f32.gmra.mxu1 %vm806_vm0, %v21753_v43  ;;  %v21824_v12 = vadd.f32 %v8033_v62, %v7840_v55  ;;  %v17382_v44 = vpop.eup %17381  ;;  %v21846_v55 = vadd.f32 %v21532_v10, %v6711_v31  ;;  %v23594_v31 = vld [vmem:[#allocation41_spill] sm:$0xff] }
 0x398   : > { %v16591_v4 = vpop.f32.mrf.mxu0  ;;  %16974 = vmatmul.mubr.msk.f32.gmra.mxu0 %vm806_vm0, %v21562_v24  ;;  %16944 = vmatprep.mubr.msk.f32.mxu1 %vm806_vm0, %v21763_v8  ;;  %v21811_v24 = vadd.f32 %v8013_v63, %v21710_v58 }
 0x399   : > { %v7850_v17 = vpop.f32.mrf.mxu1  ;;  %16976 = vmatprep.mubr.msk.f32.mxu0 %vm806_vm0, %v21770_v39  ;;  %7503 = vrot.lane.b32.xlu0 %v17380_v32, %s18196_s28  ;;  %v21830_v57 = vadd.f32 %v16591_v4, %v16559_v51  ;;  %23591 = vst [vmem:[#allocation93_spill] sm:$0xff] %v21846_v55  ;;  %17389 = vtanh.f32 %v21846_v55 }
 0x39a   : > { %v8043_v21 = vpop.f32.mrf.mxu0 }
 0x39b   : > { %v16562_v39 = vpop.f32.mrf.mxu1  ;;  %16945 = vmatmul.mubr.msk.f32.gmra.mxu1 %vm806_vm0, %v21792_v60  ;;  %v21832_v40 = vadd.f32 %v8043_v21, %v7850_v17  ;;  %v23593_v17 = vld [vmem:[#allocation55_spill] sm:$0xff]  ;;  %v11302_v21 = vld [vmem:[#allocation15 + $0xe0] sm:$0xff] }
 0x39c   : > { %v16594_v58 = vpop.f32.mrf.mxu0  ;;  %16977 = vmatmul.mubr.msk.f32.gmra.mxu0 %vm806_vm0, %v21801_v59  ;;  %16987 = vmatprep.mubr.msk.f32.mxu1 %vm806_vm0, %v21357_v22  ;;  %23597 = vst [vmem:[#allocation55_spill] sm:$0xff] %v21894_v61 }
 0x39d   : > { %v7860_v63 = vpop.f32.mrf.mxu1  ;;  %17019 = vmatprep.mubr.msk.f32.mxu0 %vm806_vm0, %v21601_v38  ;;  %v21837_v18 = vadd.f32 %v16594_v58, %v16562_v39  ;;  %7509 = vrot.lane.b32.xlu0 %v17382_v44, %s18196_s28  ;;  %v11534_v39 = vld [vmem:[#allocation15 + $0x110] sm:$0xff]  ;;  %v23595_v58 = vld [vmem:[#allocation81_spill] sm:$0xff] }
 0x39e   : > { %v8053_v26 = vpop.f32.mrf.mxu0 }
 0x39f   : > { %v21841_v41 = vadd.f32 %v8053_v26, %v7860_v63  ;;  %v16605_v22 = vpop.f32.mrf.mxu1  ;;  %16988 = vmatmul.mubr.msk.f32.vlgmr.msra.gmra.mxu1 %vm806_vm0, %v21371_v2  ;;  %v6714_v2 = vadd.f32 %v21550_v48, %v21331_v37 }
 0x3a0   : > { %v8277_v38 = vadd.f32 %v16605_v22, %v21737_v53  ;;  %v16637_v62 = vpop.f32.mrf.mxu0  ;;  %17020 = vmatmul.mubr.msk.f32.vlgmr.msra.gmra.mxu0 %vm806_vm0, %v21614_v0  ;;  %17044 = vmatpush3.msra.mxu1 %v21721_v49 }
 0x3a1   : > { %v8197_v51 = vpop.f32.mrf.mxu1  ;;  %16990 = vmatprep.mubr.msk.f32.mxu1 %vm806_vm0, %v21381_v36  ;;  %17076 = vmatpush3.msra.mxu0 %v21730_v50  ;;  %v17384_v36 = vpop.eup %17383 }
 0x3a2   : > { %v21857_v10 = vadd.f32 %v16637_v62, %v8277_v38  ;;  %v8276_v53 = vadd.f32 %v8197_v51, %v21757_v28  ;;  %v8428_v4 = vpop.f32.mrf.mxu0  ;;  %17022 = vmatprep.mubr.msk.f32.mxu0 %vm806_vm0, %v21624_v20  ;;  %17045 = vmatprep.subr.mxu1 %v11304_v30  ;;  %v11303_v20 = vld [vmem:[#allocation15 + $0xe8] sm:$0xff]  ;;  %v23598_v62 = vld [vmem:[#allocation56_spill] sm:$0xff] }
 0x3a3   : > { %v16608_v0 = vpop.f32.mrf.mxu1  ;;  %16991 = vmatmul.mubr.msk.f32.gmra.mxu1 %vm806_vm0, %v21402_v9  ;;  %17077 = vmatprep.subr.mxu0 %v11534_v39  ;;  %v21876_v9 = vadd.f32 %v21552_v47, %v6714_v2 }
 0x3a4   : > { %v21865_v49 = vadd.f32 %v8428_v4, %v8276_v53  ;;  %v8279_v37 = vadd.f32 %v16608_v0, %v21775_v34  ;;  %v16640_v48 = vpop.f32.mrf.mxu0  ;;  %17023 = vmatmul.mubr.msk.f32.gmra.mxu0 %vm806_vm0, %v21647_v45  ;;  %16993 = vmatprep.mubr.msk.f32.mxu1 %vm806_vm0, %v21408_v56  ;;  %v11533_v56 = vld [vmem:[#allocation15 + $0x108] sm:$0xff]  ;;  %v23601_v4 = vld [vmem:[#allocation46_spill] sm:$0xff] }
 0x3a5   : > { %7507 = vrot.lane.b32.xlu0 %v17384_v36, %s18196_s28  ;;  %v8207_v50 = vpop.f32.mrf.mxu1  ;;  %17025 = vmatprep.mubr.msk.f32.mxu0 %vm806_vm0, %v21657_v5  ;;  %23592 = vst [vmem:[#allocation94_spill] sm:$0xff] %v21876_v9  ;;  %v6713_v5 = vadd.f32 %v23595_v58, %v23594_v31  ;;  %17391 = vtanh.f32 %v21876_v9  ;;  %v23602_v0 = vld [vmem:[#allocation83_spill] sm:$0xff] }
 0x3a6   : > { %v21878_v28 = vadd.f32 %v16640_v48, %v8279_v37  ;;  %v8278_v34 = vadd.f32 %v8207_v50, %v21779_v25  ;;  %v8438_v32 = vpop.f32.mrf.mxu0  ;;  %17046 = vmatpush3.msra.mxu1 %v11304_v30  ;;  %17078 = vmatpush3.msra.mxu0 %v11534_v39  ;;  %v23596_v25 = vld [vmem:[#allocation66_spill] sm:$0xff]  ;;  %v6716_v36 = vadd.f32 %v23602_v0, %v23601_v4  ;;  %v23603_v48 = vld [vmem:[#allocation67_spill] sm:$0xff] }
 0x3a7   : > { %v16611_v45 = vpop.f32.mrf.mxu1  ;;  %16994 = vmatmul.mubr.msk.f32.gmra.mxu1 %vm806_vm0, %v23593_v17  ;;  %17047 = vmatprep.subr.mxu1 %v11303_v20  ;;  %v11532_v39 = vld [vmem:[#allocation15 + $0x100] sm:$0xff] }
 0x3a8   : > { %v21885_v63 = vadd.f32 %v8438_v32, %v8278_v34  ;;  %v8281_v47 = vadd.f32 %v16611_v45, %v21785_v11  ;;  %v16643_v44 = vpop.f32.mrf.mxu0  ;;  %17026 = vmatmul.mubr.msk.f32.gmra.mxu0 %vm806_vm0, %v21678_v15  ;;  %16996 = vmatprep.mubr.msk.f32.mxu1 %vm806_vm0, %v23596_v25  ;;  %v17386_v15 = vpop.eup %17385  ;;  %v23604_v32 = vld [vmem:[#allocation58_spill] sm:$0xff]  ;;  %v21933_v31 = vadd.f32 %v21578_v23, %v6716_v36  ;;  %v23609_v23 = vld [vmem:[#allocation53_spill] sm:$0xff] }
 0x3a9   : > { %v8217_v26 = vpop.f32.mrf.mxu1  ;;  %17028 = vmatprep.mubr.msk.f32.mxu0 %vm806_vm0, %v21690_v7  ;;  %17048 = vmatpush3.msra.mxu1 %v11303_v20  ;;  %v23599_v7 = vld [vmem:[#allocation82_spill] sm:$0xff]  ;;  %v21922_v45 = vpop.permute.xlu0 %7413 }
 0x3aa   : > { %v21897_v22 = vadd.f32 %v16643_v44, %v8281_v47  ;;  %v8280_v11 = vadd.f32 %v8217_v26, %v21796_v27  ;;  %v8448_v30 = vpop.f32.mrf.mxu0  ;;  %17079 = vmatprep.subr.mxu0 %v11533_v56  ;;  %17049 = vmatprep.subr.mxu1 %v11302_v21  ;;  %v21903_v51 = vadd.f32 %v23599_v7, %v6713_v5  ;;  %v23608_v25 = vld [vmem:[#allocation62_spill] sm:$0xff] }
 0x3ab   : > { %v16614_v38 = vpop.f32.mrf.mxu1  ;;  %16997 = vmatmul.mubr.msk.f32.gmra.mxu1 %vm806_vm0, %v23598_v62  ;;  %17080 = vmatpush3.msra.mxu0 %v11533_v56  ;;  %23605 = vst [vmem:[#allocation81_spill] sm:$0xff] %v21922_v45  ;;  %23607 = vst [vmem:[#allocation66_spill] sm:$0xff] %v21933_v31  ;;  %v6715_v26 = vadd.f32 %v21590_v16, %v23609_v23  ;;  %v21976_v36 = vld [vmem:[%s18589_s24 + $0xca] sm:$0xff] }
 0x3ac   : > { %23600 = vst [vmem:[#allocation41_spill] sm:$0xff] %v21903_v51  ;;  %7513 = vrot.lane.b32.xlu0 %v17386_v15, %s18196_s28  ;;  %v21906_v2 = vadd.f32 %v8448_v30, %v8280_v11  ;;  %v8283_v53 = vadd.f32 %v16614_v38, %v21808_v33  ;;  %v16646_v27 = vpop.f32.mrf.mxu0  ;;  %17029 = vmatmul.mubr.msk.f32.gmra.mxu0 %vm806_vm0, %v21704_v19  ;;  %v17388_v19 = vpop.eup %17387  ;;  %17393 = vtanh.f32 %v21903_v51  ;;  %v14597_v23 = vld [vmem:[%s18589_s24 + $0x49] sm:$0xff] }
 0x3ad   : > { %v8227_v37 = vpop.f32.mrf.mxu1  ;;  %16999 = vmatprep.mubr.msk.f32.mxu1 %vm806_vm0, %v23603_v48  ;;  %17031 = vmatprep.mubr.msk.f32.mxu0 %vm806_vm0, %v21715_v52  ;;  %v7002_v44 = vadd.f32 1.0, %v17388_v19  ;;  %17395 = vtanh.f32 %v21933_v31  ;;  %v21955_v38 = vpop.permute.xlu0 %7415 }
 0x3ae   : > { %v21917_v20 = vadd.f32 %v16646_v27, %v8283_v53  ;;  %v8282_v50 = vadd.f32 %v8227_v37, %v21811_v24  ;;  %v8458_v34 = vpop.f32.mrf.mxu0  ;;  %17050 = vmatpush3.msra.mxu1 %v11302_v21  ;;  %17081 = vmatprep.subr.mxu0 %v11532_v39  ;;  %v23606_v24 = vld [vmem:[#allocation60_spill] sm:$0xff]  ;;  %v17390_v21 = vpop.eup %17389  ;;  %23611 = vst [vmem:[#allocation56_spill] sm:$0xff] %v21955_v38 }
 0x3af   : > { %v16617_v33 = vpop.f32.mrf.mxu1  ;;  %17000 = vmatmul.mubr.msk.f32.gmra.mxu1 %vm806_vm0, %v23604_v32  ;;  %17082 = vmatpush3.msra.mxu0 %v11532_v39  ;;  %v21961_v39 = vld [vmem:[%s18589_s24 + $0xc2] sm:$0xff]  ;;  %17397 = vrcp.f32 %v7002_v44 }
 0x3b0   : > { %v21925_v17 = vadd.f32 %v8458_v34, %v8282_v50  ;;  %v8285_v52 = vadd.f32 %v16617_v33, %v21814_v42  ;;  %v16649_v56 = vpop.f32.mrf.mxu0  ;;  %17032 = vmatmul.mubr.msk.f32.gmra.mxu0 %vm806_vm0, %v21728_v13  ;;  %17002 = vmatprep.mubr.msk.f32.mxu1 %vm806_vm0, %v23606_v24  ;;  %v14578_v50 = vld [vmem:[%s18589_s24 + $0xe0] sm:$0xff]  ;;  %v14595_v34 = vld [vmem:[%s18589_s24 + $0x31] sm:$0xff] }
 0x3b1   : > { %v8237_v58 = vpop.f32.mrf.mxu1  ;;  %17034 = vmatprep.mubr.msk.f32.mxu0 %vm806_vm0, %v21740_v46  ;;  %7511 = vrot.lane.b32.xlu0 %v17390_v21, %s18196_s28 }
 0x3b2   : > { %v21938_v5 = vadd.f32 %v16649_v56, %v8285_v52  ;;  %v8284_v42 = vadd.f32 %v8237_v58, %v21816_v35  ;;  %v8468_v47 = vpop.f32.mrf.mxu0  ;;  %v23610_v35 = vld [vmem:[#allocation68_spill] sm:$0xff]  ;;  %v17392_v7 = vpop.eup %17391 }
 0x3b3   : > { %v16620_v13 = vpop.f32.mrf.mxu1  ;;  %17003 = vmatmul.mubr.msk.f32.gmra.mxu1 %vm806_vm0, %v23608_v25  ;;  %7517 = vrot.lane.b32.xlu1 %v17392_v7, %s18196_s28  ;;  %v14627_v52 = vld [vmem:[%s18589_s24 + $0x32] sm:$0xff]  ;;  %v21989_v56 = vpop.permute.xlu0 %7417 }
 0x3b4   : > { %v21945_v11 = vadd.f32 %v8468_v47, %v8284_v42  ;;  %v8287_v46 = vadd.f32 %v16620_v13, %v21822_v54  ;;  %v16652_v30 = vpop.f32.mrf.mxu0  ;;  %17035 = vmatmul.mubr.msk.f32.gmra.mxu0 %vm806_vm0, %v21753_v43  ;;  %17005 = vmatprep.mubr.msk.f32.mxu1 %vm806_vm0, %v23610_v35  ;;  %v14577_v43 = vld [vmem:[%s18589_s24 + $0xd8] sm:$0xff]  ;;  %23614 = vst [vmem:[#allocation46_spill] sm:$0xff] %v21989_v56 }
 0x3b5   : > { %v8247_v15 = vpop.f32.mrf.mxu1  ;;  %17037 = vmatprep.mubr.msk.f32.mxu0 %vm806_vm0, %v21763_v8  ;;  %v23612_v8 = vld [vmem:[#allocation85_spill] sm:$0xff] }
 0x3b6   : > { %v21957_v16 = vadd.f32 %v16652_v30, %v8287_v46  ;;  %v8286_v54 = vadd.f32 %v8247_v15, %v21824_v12  ;;  %v8478_v62 = vpop.f32.mrf.mxu0  ;;  %v21967_v27 = vadd.f32 %v23612_v8, %v6715_v26  ;;  %v14628_v13 = vld [vmem:[%s18589_s24 + $0x3a] sm:$0xff]  ;;  %v14629_v30 = vld [vmem:[%s18589_s24 + $0x4a] sm:$0xff] }
 0x3b7   : > { %v16623_v53 = vpop.f32.mrf.mxu1  ;;  %17006 = vmatmul.mubr.msk.f32.gmra.mxu1 %vm806_vm0, %v21573_v1  ;;  %v23615_v15 = vld [vmem:[#allocation64_spill] sm:$0xff] }
 0x3b8   : > { %23613 = vst [vmem:[#allocation82_spill] sm:$0xff] %v21967_v27  ;;  %v21970_v4 = vadd.f32 %v8478_v62, %v8286_v54  ;;  %v8289_v12 = vadd.f32 %v16623_v53, %v21830_v57  ;;  %v16655_v0 = vpop.f32.mrf.mxu0  ;;  %17038 = vmatmul.mubr.msk.f32.gmra.mxu0 %vm806_vm0, %v21792_v60  ;;  %17008 = vmatprep.mubr.msk.f32.mxu1 %vm806_vm0, %v21961_v39  ;;  %17399 = vtanh.f32 %v21967_v27  ;;  %v14132_v54 = vmul.f32 -1.442695, %v23615_v15  ;;  %v14598_v8 = vld [vmem:[%s18589_s24 + $0x51] sm:$0xff] }
 0x3b9   : > { %v8257_v37 = vpop.f32.mrf.mxu1  ;;  %17040 = vmatprep.mubr.msk.f32.mxu0 %vm806_vm0, %v14577_v43  ;;  %v17394_v47 = vpop.eup %17393 }
 0x3ba   : > { %v21983_v33 = vadd.f32 %v16655_v0, %v8289_v12  ;;  %v8288_v19 = vadd.f32 %v8257_v37, %v21832_v40  ;;  %v8488_v57 = vpop.f32.mrf.mxu0  ;;  %v14596_v40 = vld [vmem:[%s18589_s24 + $0x39] sm:$0xff]  ;;  %7515 = vrot.lane.b32.xlu0 %v17394_v47, %s18196_s28  ;;  %v14599_v0 = vld [vmem:[%s18589_s24 + $0x61] sm:$0xff]  ;;  %v17396_v37 = vpop.eup %17395  ;;  %17401 = vpow2.f32 %v14132_v54  ;;  %v14600_v47 = vld [vmem:[%s18589_s24 + $0x69] sm:$0xff] }
 0x3bb   : > { %v16626_v60 = vpop.f32.mrf.mxu1  ;;  %17009 = vmatmul.mubr.msk.f32.gmra.mxu1 %vm806_vm0, %v21976_v36  ;;  %7521 = vrot.lane.b32.xlu1 %v17396_v37, %s18196_s28 }
 0x3bc   : > { %v21992_v21 = vadd.f32 %v8488_v57, %v8288_v19  ;;  %v8291_v58 = vadd.f32 %v16626_v60, %v21837_v18  ;;  %v16658_v42 = vpop.f32.mrf.mxu0  ;;  %17041 = vmatmul.mubr.msk.f32.gmra.mxu0 %vm806_vm0, %v14578_v50  ;;  %17051 = vmatprep.mubr.msk.f32.mxu1 %vm806_vm0, %v14595_v34  ;;  %v22019_v50 = vpop.permute.xlu0 %7419  ;;  %v23617_v57 = vld [vmem:[#allocation54_spill] sm:$0xff] }
 0x3bd   : > { %v8267_v44 = vpop.f32.mrf.mxu1  ;;  %17083 = vmatprep.mubr.msk.f32.mxu0 %vm806_vm0, %v14627_v52  ;;  %23616 = vst [vmem:[#allocation83_spill] sm:$0xff] %v22019_v50  ;;  %v14131_v52 = vmul.f32 -1.442695, %v23617_v57 }
 0x3be   : > { %v22002_v26 = vadd.f32 %v16658_v42, %v8291_v58  ;;  %v8290_v18 = vadd.f32 %v8267_v44, %v21841_v41  ;;  %v8498_v46 = vpop.f32.mrf.mxu0  ;;  %v14630_v41 = vld [vmem:[%s18589_s24 + $0x52] sm:$0xff]  ;;  %v17398_v58 = vpop.eup %17397 }
 0x3bf   : > { %v16669_v62 = vpop.f32.mrf.mxu1  ;;  %17052 = vmatmul.mubr.msk.f32.vlgmr.msra.gmra.mxu1 %vm806_vm0, %v14596_v40  ;;  %v23618_v44 = vld [vmem:[#allocation88_spill] sm:$0xff]  ;;  %17403 = vpow2.f32 %v14131_v52 }
 0x3c0   : > { %v22008_v43 = vadd.f32 %v8498_v46, %v8290_v18  ;;  %v8738_v7 = vadd.f32 %v16669_v62, %v21857_v10  ;;  %v16701_v53 = vpop.f32.mrf.mxu0  ;;  %17084 = vmatmul.mubr.msk.f32.vlgmr.msra.gmra.mxu0 %vm806_vm0, %v14628_v13  ;;  %17054 = vmatprep.mubr.msk.f32.mxu1 %vm806_vm0, %v14597_v23  ;;  %v14631_v10 = vld [vmem:[%s18589_s24 + $0x62] sm:$0xff]  ;;  %v12312_v13 = vmul.f32 %v17398_v58, %v23618_v44  ;;  %v14632_v18 = vld [vmem:[%s18589_s24 + $0x6a] sm:$0xff]  ;;  %v14601_v46 = vld [vmem:[%s18589_s24 + $0x79] sm:$0xff]  ;;  %v22045_v62 = vpop.permute.xlu0 %7421 }
 0x3c1   : > { %v22014_v12 = vpop.f32.mrf.mxu1  ;;  %17086 = vmatprep.mubr.msk.f32.mxu0 %vm806_vm0, %v14629_v30  ;;  %23619 = vst [vmem:[#allocation67_spill] sm:$0xff] %v22045_v62 }
 0x3c2   : > { %v22021_v34 = vadd.f32 %v16701_v53, %v8738_v7  ;;  %v22023_v19 = vpop.f32.mrf.mxu0  ;;  %12351 = vrot.lane.b32.xlu1 %v12312_v13, %s18196_s28 }
 0x3c3   : > { %v16672_v60 = vpop.f32.mrf.mxu1  ;;  %17055 = vmatmul.mubr.msk.f32.gmra.mxu1 %vm806_vm0, %v14598_v8 }
 0x3c4   : > { %v8740_v42 = vadd.f32 %v16672_v60, %v21878_v28  ;;  %v16704_v40 = vpop.f32.mrf.mxu0  ;;  %17087 = vmatmul.mubr.msk.f32.gmra.mxu0 %vm806_vm0, %v14630_v41  ;;  %17057 = vmatprep.mubr.msk.f32.mxu1 %vm806_vm0, %v14599_v0  ;;  %v23620_v41 = vld [vmem:[#allocation37_spill] sm:$0xff]  ;;  %v23621_v60 = vld [vmem:[#allocation38_spill] sm:$0xff]  ;;  %v22072_v44 = vpop.permute.xlu0 %7423 }
 0x3c5   : > { %v22034_v23 = vpop.f32.mrf.mxu1  ;;  %17089 = vmatprep.mubr.msk.f32.mxu0 %vm806_vm0, %v14631_v10  ;;  %v17400_v8 = vpop.eup %17399  ;;  %v14134_v0 = vmul.f32 -1.442695, %v23620_v41  ;;  %23623 = vst [vmem:[#allocation58_spill] sm:$0xff] %v22072_v44 }
 0x3c6   : > { %v22039_v30 = vadd.f32 %v16704_v40, %v8740_v42  ;;  %v22041_v54 = vpop.f32.mrf.mxu0  ;;  %7519 = vrot.lane.b32.xlu0 %v17400_v8, %s18196_s28 }
 0x3c7   : > { %v16675_v28 = vpop.f32.mrf.mxu1  ;;  %17058 = vmatmul.mubr.msk.f32.gmra.mxu1 %vm806_vm0, %v14600_v47  ;;  %17405 = vpow2.f32 %v14134_v0 }
 0x3c8   : > { %v8742_v7 = vadd.f32 %v16675_v28, %v21897_v22  ;;  %v16707_v53 = vpop.f32.mrf.mxu0  ;;  %17090 = vmatmul.mubr.msk.f32.gmra.mxu0 %vm806_vm0, %v14632_v18  ;;  %17060 = vmatprep.mubr.msk.f32.mxu1 %vm806_vm0, %v14601_v46  ;;  %v23624_v28 = vld [vmem:[#allocation65_spill] sm:$0xff] }
 0x3c9   : > { %v22051_v37 = vpop.f32.mrf.mxu1  ;;  %17092 = vmatprep.mubr.msk.f32.mxu0 %vm806_vm0, %v23603_v48  ;;  %v23622_v48 = vld [vmem:[#allocation57_spill] sm:$0xff] }
 0x3ca   : > { %v22056_v10 = vadd.f32 %v16707_v53, %v8742_v7  ;;  %v22058_v52 = vpop.f32.mrf.mxu0  ;;  %v14133_v40 = vmul.f32 -1.442695, %v23622_v48  ;;  %v23625_v7 = vld [vmem:[#allocation70_spill] sm:$0xff] }
 0x3cb   : > { %v16678_v22 = vpop.f32.mrf.mxu1  ;;  %17061 = vmatmul.mubr.msk.f32.gmra.mxu1 %vm806_vm0, %v23621_v60  ;;  %v14136_v53 = vmul.f32 -1.442695, %v23625_v7  ;;  %v22096_v60 = vpop.permute.xlu0 %7425 }
 0x3cc   : > { %v8744_v58 = vadd.f32 %v16678_v22, %v21917_v20  ;;  %v16710_v42 = vpop.f32.mrf.mxu0  ;;  %17093 = vmatmul.mubr.msk.f32.gmra.mxu0 %vm806_vm0, %v23604_v32  ;;  %17063 = vmatprep.mubr.msk.f32.mxu1 %vm806_vm0, %v21508_v29  ;;  %v17402_v32 = vpop.eup %17401  ;;  %17407 = vpow2.f32 %v14133_v40  ;;  %23627 = vst [vmem:[#allocation60_spill] sm:$0xff] %v22096_v60 }
 0x3cd   : > { %v22068_v47 = vpop.f32.mrf.mxu1  ;;  %17095 = vmatprep.mubr.msk.f32.mxu0 %vm806_vm0, %v23606_v24  ;;  %v17404_v22 = vpop.eup %17403  ;;  %17409 = vpow2.f32 %v14136_v53 }
 0x3ce   : > { %v22074_v13 = vadd.f32 %v16710_v42, %v8744_v58  ;;  %v22076_v20 = vpop.f32.mrf.mxu0 }
 0x3cf   : > { %v16681_v18 = vpop.f32.mrf.mxu1  ;;  %17064 = vmatmul.mubr.msk.f32.gmra.mxu1 %vm806_vm0, %v21528_v3 }
 0x3d0   : > { %v8746_v29 = vadd.f32 %v16681_v18, %v21938_v5  ;;  %v16713_v46 = vpop.f32.mrf.mxu0  ;;  %17096 = vmatmul.mubr.msk.f32.gmra.mxu0 %vm806_vm0, %v23608_v25  ;;  %17066 = vmatprep.mubr.msk.f32.mxu1 %vm806_vm0, %v23624_v28  ;;  %v7108_v5 = vadd.f32 1.0, %v17402_v32  ;;  %v23626_v25 = vld [vmem:[#allocation80_spill] sm:$0xff] }
 0x3d1   : > { %v22085_v24 = vpop.f32.mrf.mxu1  ;;  %17098 = vmatprep.mubr.msk.f32.mxu0 %vm806_vm0, %v23610_v35  ;;  %v23628_v35 = vld [vmem:[#allocation91_spill] sm:$0xff] }
 0x3d2   : > { %v22090_v3 = vadd.f32 %v16713_v46, %v8746_v29  ;;  %v22092_v8 = vpop.f32.mrf.mxu0  ;;  %v14609_v18 = vld [vmem:[%s18589_s24 + $0xd9] sm:$0xff]  ;;  %17411 = vrcp.f32 %v7108_v5  ;;  %v7107_v46 = vadd.f32 1.0, %v17404_v22  ;;  %v22124_v22 = vpop.permute.xlu0 %12281 }
 0x3d3   : > { %v16684_v0 = vpop.f32.mrf.mxu1  ;;  %17067 = vmatmul.mubr.msk.f32.gmra.mxu1 %vm806_vm0, %v23626_v25  ;;  %v14642_v25 = vld [vmem:[%s18589_s24 + $0xe2] sm:$0xff]  ;;  %23629 = vst [vmem:[#allocation62_spill] sm:$0xff] %v22124_v22 }
 0x3d4   : > { %v8748_v58 = vadd.f32 %v16684_v0, %v21957_v16  ;;  %v16716_v42 = vpop.f32.mrf.mxu0  ;;  %17099 = vmatmul.mubr.msk.f32.gmra.mxu0 %vm806_vm0, %v21573_v1  ;;  %17069 = vmatprep.mubr.msk.f32.mxu1 %vm806_vm0, %v23628_v35  ;;  %v14641_v16 = vld [vmem:[%s18589_s24 + $0xda] sm:$0xff]  ;;  %v17406_v5 = vpop.eup %17405  ;;  %17413 = vrcp.f32 %v7107_v46 }
 0x3d5   : > { %v22103_v40 = vpop.f32.mrf.mxu1  ;;  %17101 = vmatprep.mubr.msk.f32.mxu0 %vm806_vm0, %v21961_v39  ;;  %v14610_v39 = vld [vmem:[%s18589_s24 + $0xe1] sm:$0xff]  ;;  %s13356_s24 = smin.u32 %s23419_s17, %s732_s16  ;;  %s23766_s17 = smov (!%p760_p0, %s23419_s17), 3 }
 0x3d6   : > { %v22108_v32 = vadd.f32 %v16716_v42, %v8748_v58  ;;  %v22110_v29 = vpop.f32.mrf.mxu0  ;;  %v22142_v44 = vpop.permute.xlu0 %12285  ;;  %s734_s20 = sand.u32 1, %s13356_s24   ;;  %s14726_s25 = sshll.u32 %s23766_s17, 7 }
 0x3d7   : > { %v16687_v1 = vpop.f32.mrf.mxu1  ;;  %17070 = vmatmul.mubr.msk.f32.gmra.mxu1 %vm806_vm0, %v21801_v59  ;;  %23631 = vst [vmem:[#allocation53_spill] sm:$0xff] %v22142_v44  ;;  %s735_s6 = ssub.s32 0, %s734_s20  ;;  %s23102_s22 = scalar_lea.vmem %s23753_s15, %s14726_s25 }
 0x3d8   : > { %v8750_v28 = vadd.f32 %v16687_v1, %v21983_v33  ;;  %v16719_v0 = vpop.f32.mrf.mxu0  ;;  %17102 = vmatmul.mubr.msk.f32.gmra.mxu0 %vm806_vm0, %v21976_v36  ;;  %17072 = vmatprep.mubr.msk.f32.mxu1 %vm806_vm0, %v14609_v18  ;;  %v23630_v33 = vld [vmem:[#allocation84_spill] sm:$0xff]  ;;  %v8737_v36 = vadd.f32 %v22014_v12, %v21865_v49  ;;  %v7110_v1 = vadd.f32 1.0, %v17406_v5  ;;  %v8739_v49 = vadd.f32 %v22034_v23, %v21885_v63  ;;  %s23760_s6 = smov (!%p731_p7, %s735_s6), %s734_s20 }
 0x3d9   : > { %v22120_v53 = vpop.f32.mrf.mxu1  ;;  %17104 = vmatprep.mubr.msk.f32.mxu0 %vm806_vm0, %v14641_v16  ;;  %v14135_v42 = vmul.f32 -1.442695, %v23630_v33  ;;  %p13358_p11 = scmp.lt.s32.totalorder %s23760_s6, 0  ;;  %s741_s29 = sadd.s32 2, %s23760_s6 }
 0x3da   : > { %v22126_v58 = vadd.f32 %v16719_v0, %v8750_v28  ;;  %v22128_v59 = vpop.f32.mrf.mxu0  ;;  %v17408_v28 = vpop.eup %17407  ;;  %v8969_v56 = vadd.f32 %v22041_v54, %v8739_v49 }
 0x3db   : > { %v16690_v35 = vpop.f32.mrf.mxu1  ;;  %17073 = vmatmul.mubr.msk.f32.gmra.mxu1 %vm806_vm0, %v14610_v39  ;;  %17415 = vpow2.f32 %v14135_v42  ;;  %v8967_v39 = vadd.f32 %v22023_v19, %v8737_v36  ;;  %v17410_v62 = vpop.eup %17409  ;;  %v8741_v19 = vadd.f32 %v22051_v37, %v21906_v2  ;;  %s23762_s29 = smov (!%p13358_p11, %s741_s29), %s23760_s6 }
 0x3dc   : > { %v8752_v18 = vadd.f32 %v16690_v35, %v22002_v26  ;;  %v16722_v16 = vpop.f32.mrf.mxu0  ;;  %17105 = vmatmul.mubr.msk.f32.gmra.mxu0 %vm806_vm0, %v14642_v25  ;;  %17417 = vrcp.f32 %v7110_v1  ;;  %v7109_v25 = vadd.f32 1.0, %v17408_v28  ;;  %v7112_v28 = vadd.f32 1.0, %v17410_v62  ;;  %p743_p8 = scmp.lt.s32.totalorder %s23762_s29, 1 }
 0x3dd   : > { %v22136_v14 = vpop.f32.mrf.mxu1  ;;  %v8971_v37 = vadd.f32 %v22058_v52, %v8741_v19 }
 0x3de   : > { %v22138_v0 = vadd.f32 %v16722_v16, %v8752_v18  ;;  %v22140_v46 = vpop.f32.mrf.mxu0  ;;  %17419 = vrcp.f32 %v7109_v25  ;;  %s23764_s29 = smov (!%p743_p8, %s23762_s29), 1 }
 0x3df   : > { %v16733_v60 = vpop.f32.mrf.mxu1  ;;  %v17412_v50 = vpop.eup %17411  ;;  %17421 = vrcp.f32 %v7112_v28  ;;  %s14725_s27 = sshll.u32 %s23764_s29, 7 }
 0x3e0   : > { %v9199_v26 = vadd.f32 %v16733_v60, %v22021_v34  ;;  %v16765_v12 = vpop.f32.mrf.mxu0  ;;  %s22584_s18 = scalar_lea.vmem %s23674_s1, %s14725_s27 }
 0x3e1   : > { %v9119_v5 = vpop.f32.mrf.mxu1  ;;  %v17414_v2 = vpop.eup %17413 }
 0x3e2   : > { %v22148_v35 = vadd.f32 %v16765_v12, %v9199_v26  ;;  %v9198_v18 = vadd.f32 %v9119_v5, %v8967_v39  ;;  %v9349_v16 = vpop.f32.mrf.mxu0  ;;  %v23632_v5 = vld [vmem:[#allocation87_spill] sm:$0xff] }
 0x3e3   : > { %v16736_v42 = vpop.f32.mrf.mxu1  ;;  %v14137_v38 = vmul.f32 -1.442695, %v23632_v5 }
 0x3e4   : > { %v22153_v36 = vadd.f32 %v9349_v16, %v9198_v18  ;;  %v9201_v63 = vadd.f32 %v16736_v42, %v22039_v30  ;;  %v16768_v34 = vpop.f32.mrf.mxu0  ;;  %v7494_v23 = vpop.permute.xlu0 %7493  ;;  %v8743_v30 = vadd.f32 %v22068_v47, %v21925_v17  ;;  %v8745_v47 = vadd.f32 %v22085_v24, %v21945_v11 }
 0x3e5   : > { %v7540_v60 = vmul.f32 %v17412_v50, %v7494_v23  ;;  %v9129_v1 = vpop.f32.mrf.mxu1  ;;  %17423 = vpow2.f32 %v14137_v38  ;;  %v8747_v11 = vadd.f32 %v22103_v40, %v21970_v4 }
 0x3e6   : > { %v22156_v39 = vadd.f32 %v16768_v34, %v9201_v63  ;;  %v9200_v26 = vadd.f32 %v9129_v1, %v8969_v56  ;;  %v9359_v12 = vpop.f32.mrf.mxu0  ;;  %v8973_v17 = vadd.f32 %v22076_v20, %v8743_v30  ;;  %v8975_v20 = vadd.f32 %v22092_v8, %v8745_v47 }
 0x3e7   : > { %v16739_v54 = vpop.f32.mrf.mxu1  ;;  %7573 = vrot.lane.b32.xlu0 %v7540_v60, %s18195_s21  ;;  %v8749_v8 = vadd.f32 %v22120_v53, %v21992_v21  ;;  %v8977_v40 = vadd.f32 %v22110_v29, %v8747_v11  ;;  %v8751_v29 = vadd.f32 %v22136_v14, %v22008_v43 }
 0x3e8   : > { %v22163_v49 = vadd.f32 %v9359_v12, %v9200_v26  ;;  %v9203_v50 = vadd.f32 %v16739_v54, %v22056_v10  ;;  %v16771_v62 = vpop.f32.mrf.mxu0  ;;  %v7492_v25 = vpop.permute.xlu0 %7491 }
 0x3e9   : > { %v7539_v18 = vmul.f32 %v17414_v2, %v7492_v25  ;;  %v9139_v56 = vpop.f32.mrf.mxu1  ;;  %v17416_v52 = vpop.eup %17415 }
 0x3ea   : > { %v22166_v16 = vadd.f32 %v16771_v62, %v9203_v50  ;;  %v9202_v42 = vadd.f32 %v9139_v56, %v8971_v37  ;;  %v9369_v63 = vpop.f32.mrf.mxu0  ;;  %v17418_v1 = vpop.eup %17417  ;;  %v7111_v54 = vadd.f32 1.0, %v17416_v52 }
 0x3eb   : > { %v16742_v34 = vpop.f32.mrf.mxu1  ;;  %7571 = vrot.lane.b32.xlu0 %v7539_v18, %s18195_s21  ;;  %v17420_v62 = vpop.eup %17419 }
 0x3ec   : > { %v22172_v10 = vadd.f32 %v9369_v63, %v9202_v42  ;;  %v9205_v19 = vadd.f32 %v16742_v34, %v22074_v13  ;;  %v16774_v23 = vpop.f32.mrf.mxu0  ;;  %v7498_v26 = vpop.permute.xlu0 %7497  ;;  %17425 = vrcp.f32 %v7111_v54 }
 0x3ed   : > { %v9149_v60 = vpop.f32.mrf.mxu1  ;;  %v7542_v2 = vmul.f32 %v17418_v1, %v7498_v26  ;;  %v8979_v1 = vadd.f32 %v22128_v59, %v8749_v8 }
 0x3ee   : > { %v22175_v28 = vadd.f32 %v16774_v23, %v9205_v19  ;;  %v9204_v38 = vadd.f32 %v9149_v60, %v8973_v17  ;;  %v9379_v12 = vpop.f32.mrf.mxu0  ;;  %v17422_v60 = vpop.eup %17421 }
 0x3ef   : > { %v16745_v37 = vpop.f32.mrf.mxu1  ;;  %7577 = vrot.lane.b32.xlu0 %v7542_v2, %s18195_s21 }
 0x3f0   : > { %v22180_v24 = vadd.f32 %v9379_v12, %v9204_v38  ;;  %v9207_v13 = vadd.f32 %v16745_v37, %v22090_v3  ;;  %v16777_v30 = vpop.f32.mrf.mxu0  ;;  %v7496_v18 = vpop.permute.xlu0 %7495 }
 0x3f1   : > { %v9159_v50 = vpop.f32.mrf.mxu1  ;;  %v7541_v63 = vmul.f32 %v17420_v62, %v7496_v18 }
 0x3f2   : > { %v22184_v25 = vadd.f32 %v16777_v30, %v9207_v13  ;;  %v9206_v56 = vadd.f32 %v9159_v50, %v8975_v20  ;;  %v9389_v42 = vpop.f32.mrf.mxu0  ;;  %v17424_v26 = vpop.eup %17423  ;;  %v8981_v30 = vadd.f32 %v22140_v46, %v8751_v29 }
 0x3f3   : > { %v16748_v4 = vpop.f32.mrf.mxu1  ;;  %7575 = vrot.lane.b32.xlu0 %v7541_v63, %s18195_s21  ;;  %v7113_v59 = vadd.f32 1.0, %v17424_v26 }
 0x3f4   : > { %v22189_v34 = vadd.f32 %v9389_v42, %v9206_v56  ;;  %v9209_v3 = vadd.f32 %v16748_v4, %v22108_v32  ;;  %v16780_v52 = vpop.f32.mrf.mxu0 }
 0x3f5   : > { %v9169_v17 = vpop.f32.mrf.mxu1  ;;  %v7502_v21 = vpop.permute.xlu0 %7501  ;;  %17427 = vrcp.f32 %v7113_v59 }
 0x3f6   : > { %v22193_v47 = vadd.f32 %v16780_v52, %v9209_v3  ;;  %v9208_v19 = vadd.f32 %v9169_v17, %v8977_v40  ;;  %v9399_v23 = vpop.f32.mrf.mxu0  ;;  %v7544_v38 = vmul.f32 %v17422_v60, %v7502_v21 }
 0x3f7   : > { %v16751_v53 = vpop.f32.mrf.mxu1 }
 0x3f8   : > { %v22198_v12 = vadd.f32 %v9399_v23, %v9208_v19  ;;  %v9211_v32 = vadd.f32 %v16751_v53, %v22126_v58  ;;  %v16783_v54 = vpop.f32.mrf.mxu0  ;;  %7581 = vrot.lane.b32.xlu0 %v7544_v38, %s18195_s21 }
 0x3f9   : > { %v9179_v2 = vpop.f32.mrf.mxu1  ;;  %v17426_v8 = vpop.eup %17425 }
 0x3fa   : > { %v22202_v37 = vadd.f32 %v16783_v54, %v9211_v32  ;;  %v9210_v20 = vadd.f32 %v9179_v2, %v8979_v1  ;;  %v9409_v11 = vpop.f32.mrf.mxu0 }
 0x3fb   : > { %v16754_v13 = vpop.f32.mrf.mxu1 }
 0x3fc   : > { %v22205_v50 = vadd.f32 %v9409_v11, %v9210_v20  ;;  %v9213_v14 = vadd.f32 %v16754_v13, %v22138_v0  ;;  %v16786_v43 = vpop.f32.mrf.mxu0 }
 0x3fd   : > { %v9189_v62 = vpop.f32.mrf.mxu1 }
 0x3fe   : > { %v22208_v18 = vadd.f32 %v16786_v43, %v9213_v14  ;;  %v9212_v58 = vadd.f32 %v9189_v62, %v8981_v30  ;;  %v9419_v56 = vpop.f32.mrf.mxu0 }
 0x3ff   : > { %v16797_v42 = vpop.f32.mrf.mxu1  ;;  %v7500_v63 = vpop.permute.xlu0 %7499 }
 0x400   : > { %v22210_v4 = vadd.f32 %v9419_v56, %v9212_v58  ;;  %v9659_v40 = vadd.f32 %v16797_v42, %v22148_v35  ;;  %v16829_v3 = vpop.f32.mrf.mxu0  ;;  %v7543_v46 = vmul.f32 %v17426_v8, %v7500_v63 }
 0x401   : > { %v9579_v52 = vpop.f32.mrf.mxu1 }
 0x402   : > { %v22213_v17 = vadd.f32 %v16829_v3, %v9659_v40  ;;  %v9658_v0 = vadd.f32 %v9579_v52, %v22153_v36  ;;  %v9808_v19 = vpop.f32.mrf.mxu0  ;;  %7579 = vrot.lane.b32.xlu0 %v7543_v46, %s18195_s21  ;;  %v17428_v30 = vpop.eup %17427 }
 0x403   : > { %v16800_v23 = vpop.f32.mrf.mxu1 }
 0x404   : > { %v22217_v60 = vadd.f32 %v9808_v19, %v9658_v0  ;;  %v9661_v1 = vadd.f32 %v16800_v23, %v22156_v39  ;;  %v16832_v21 = vpop.f32.mrf.mxu0 }
 0x405   : > { %v9589_v53 = vpop.f32.mrf.mxu1 }
 0x406   : > { %v22220_v26 = vadd.f32 %v16832_v21, %v9661_v1  ;;  %v9660_v35 = vadd.f32 %v9589_v53, %v22163_v49  ;;  %v9818_v29 = vpop.f32.mrf.mxu0  ;;  %v22223_v38 = vpop.permute.xlu0 %7505 }
 0x407   : > { %23633 = vst [vmem:[#allocation68_spill] sm:$0xff] %v22223_v38  ;;  %v16803_v32 = vpop.f32.mrf.mxu1 }
 0x408   : > { %v22225_v54 = vadd.f32 %v9818_v29, %v9660_v35  ;;  %v9663_v36 = vadd.f32 %v16803_v32, %v22166_v16  ;;  %v16835_v2 = vpop.f32.mrf.mxu0 }
 0x409   : > { %v9599_v20 = vpop.f32.mrf.mxu1 }
 0x40a   : > { %v22228_v11 = vadd.f32 %v16835_v2, %v9663_v36  ;;  %v9662_v39 = vadd.f32 %v9599_v20, %v22172_v10  ;;  %v9828_v59 = vpop.f32.mrf.mxu0 }
 0x40b   : > { %v16806_v13 = vpop.f32.mrf.mxu1  ;;  %v7504_v14 = vpop.permute.xlu0 %7503 }
 0x40c   : > { %v22231_v43 = vadd.f32 %v9828_v59, %v9662_v39  ;;  %v9665_v49 = vadd.f32 %v16806_v13, %v22175_v28  ;;  %v16838_v62 = vpop.f32.mrf.mxu0  ;;  %v7545_v58 = vmul.f32 %v17428_v30, %v7504_v14 }
 0x40d   : > { %v9609_v56 = vpop.f32.mrf.mxu1 }
 0x40e   : > { %v9894_v42 = vadd.f32 %v16838_v62, %v9665_v49  ;;  %v9664_v16 = vadd.f32 %v9609_v56, %v22180_v24  ;;  %v9838_v8 = vpop.f32.mrf.mxu0  ;;  %7583 = vrot.lane.b32.xlu0 %v7545_v58, %s18195_s21 }
 0x40f   : > { %v16809_v63 = vpop.f32.mrf.mxu1 }
 0x410   : > { %v9893_v40 = vadd.f32 %v9838_v8, %v9664_v16  ;;  %v9667_v10 = vadd.f32 %v16809_v63, %v22184_v25  ;;  %v16841_v3 = vpop.f32.mrf.mxu0 }
 0x411   : > { %v9619_v46 = vpop.f32.mrf.mxu1 }
 0x412   : > { %v9896_v52 = vadd.f32 %v16841_v3, %v9667_v10  ;;  %v9666_v0 = vadd.f32 %v9619_v46, %v22189_v34  ;;  %v9848_v19 = vpop.f32.mrf.mxu0 }
 0x413   : > { %v16812_v28 = vpop.f32.mrf.mxu1 }
 0x414   : > { %v9895_v23 = vadd.f32 %v9848_v19, %v9666_v0  ;;  %v9669_v1 = vadd.f32 %v16812_v28, %v22193_v47  ;;  %v16844_v21 = vpop.f32.mrf.mxu0 }
 0x415   : > { %v9629_v53 = vpop.f32.mrf.mxu1 }
 0x416   : > { %v9898_v24 = vadd.f32 %v16844_v21, %v9669_v1  ;;  %v9668_v35 = vadd.f32 %v9629_v53, %v22198_v12  ;;  %v9858_v29 = vpop.f32.mrf.mxu0 }
 0x417   : > { %v16815_v32 = vpop.f32.mrf.mxu1 }
 0x418   : > { %v9897_v36 = vadd.f32 %v9858_v29, %v9668_v35  ;;  %v9671_v25 = vadd.f32 %v16815_v32, %v22202_v37  ;;  %v16847_v2 = vpop.f32.mrf.mxu0 }
 0x419   : > { %v9639_v20 = vpop.f32.mrf.mxu1 }
 0x41a   : > { %v9900_v39 = vadd.f32 %v16847_v2, %v9671_v25  ;;  %v9670_v34 = vadd.f32 %v9639_v20, %v22205_v50  ;;  %v9868_v59 = vpop.f32.mrf.mxu0 }
 0x41b   : > { %v16818_v13 = vpop.f32.mrf.mxu1 }
 0x41c   : > { %v9899_v30 = vadd.f32 %v9868_v59, %v9670_v34  ;;  %v9673_v47 = vadd.f32 %v16818_v13, %v22208_v18  ;;  %v16850_v14 = vpop.f32.mrf.mxu0 }
 0x41d   : > { %v9649_v49 = vpop.f32.mrf.mxu1 }
 0x41e   : > { %v9902_v62 = vadd.f32 %v16850_v14, %v9673_v47  ;;  %v9672_v12 = vadd.f32 %v9649_v49, %v22210_v4  ;;  %v9878_v58 = vpop.f32.mrf.mxu0 }
 0x41f   : > { %v16861_v56 = vpop.f32.mrf.mxu1 }
 0x420   : > { %v9901_v16 = vadd.f32 %v9878_v58, %v9672_v12  ;;  %v10118_v37 = vadd.f32 %v16861_v56, %v22213_v17  ;;  %v16893_v8 = vpop.f32.mrf.mxu0 }
 0x421   : > { %v10038_v63 = vpop.f32.mrf.mxu1 }
 0x422   : > { %v22245_v10 = vadd.f32 %v16893_v8, %v10118_v37  ;;  %v10117_v50 = vadd.f32 %v10038_v63, %v22217_v60  ;;  %v10268_v3 = vpop.f32.mrf.mxu0 }
 0x423   : > { %v16864_v46 = vpop.f32.mrf.mxu1 }
 0x424   : > { %v22248_v0 = vadd.f32 %v10268_v3, %v10117_v50  ;;  %v10120_v18 = vadd.f32 %v16864_v46, %v22220_v26  ;;  %v16896_v19 = vpop.f32.mrf.mxu0 }
 0x425   : > { %v10048_v28 = vpop.f32.mrf.mxu1 }
 0x426   : > { %v22251_v4 = vadd.f32 %v16896_v19, %v10120_v18  ;;  %v10119_v1 = vadd.f32 %v10048_v28, %v22225_v54  ;;  %v10278_v21 = vpop.f32.mrf.mxu0 }
 0x427   : > { %v16867_v17 = vpop.f32.mrf.mxu1 }
 0x428   : > { %v22254_v53 = vadd.f32 %v10278_v21, %v10119_v1  ;;  %v10122_v35 = vadd.f32 %v16867_v17, %v22228_v11  ;;  %v16899_v29 = vpop.f32.mrf.mxu0 }
 0x429   : > { %v10058_v60 = vpop.f32.mrf.mxu1 }
 0x42a   : > { %v22257_v32 = vadd.f32 %v16899_v29, %v10122_v35  ;;  %v10121_v25 = vadd.f32 %v10058_v60, %v22231_v43  ;;  %v10288_v2 = vpop.f32.mrf.mxu0 }
 0x42b   : > { %v16870_v26 = vpop.f32.mrf.mxu1 }
 0x42c   : > { %v22260_v20 = vadd.f32 %v10288_v2, %v10121_v25  ;;  %v10124_v34 = vadd.f32 %v16870_v26, %v9894_v42  ;;  %v16902_v59 = vpop.f32.mrf.mxu0 }
 0x42d   : > { %v10068_v13 = vpop.f32.mrf.mxu1 }
 0x42e   : > { %v22262_v54 = vadd.f32 %v16902_v59, %v10124_v34  ;;  %v10123_v47 = vadd.f32 %v10068_v13, %v9893_v40  ;;  %v10298_v14 = vpop.f32.mrf.mxu0 }
 0x42f   : > { %v16873_v49 = vpop.f32.mrf.mxu1 }
 0x430   : > { %v22264_v12 = vadd.f32 %v10298_v14, %v10123_v47  ;;  %v10126_v11 = vadd.f32 %v16873_v49, %v9896_v52  ;;  %v16905_v58 = vpop.f32.mrf.mxu0 }
 0x431   : > { %v10078_v56 = vpop.f32.mrf.mxu1 }
 0x432   : > { %v22266_v37 = vadd.f32 %v16905_v58, %v10126_v11  ;;  %v10125_v43 = vadd.f32 %v10078_v56, %v9895_v23  ;;  %v10308_v8 = vpop.f32.mrf.mxu0 }
 0x433   : > { %v16876_v63 = vpop.f32.mrf.mxu1 }
 0x434   : > { %v22268_v50 = vadd.f32 %v10308_v8, %v10125_v43  ;;  %v10128_v42 = vadd.f32 %v16876_v63, %v9898_v24  ;;  %v16908_v3 = vpop.f32.mrf.mxu0 }
 0x435   : > { %v10088_v46 = vpop.f32.mrf.mxu1 }
 0x436   : > { %v22270_v18 = vadd.f32 %v16908_v3, %v10128_v42  ;;  %v10127_v40 = vadd.f32 %v10088_v46, %v9897_v36  ;;  %v10318_v19 = vpop.f32.mrf.mxu0 }
 0x437   : > { %v16879_v28 = vpop.f32.mrf.mxu1 }
 0x438   : > { %v22272_v1 = vadd.f32 %v10318_v19, %v10127_v40  ;;  %v10130_v52 = vadd.f32 %v16879_v28, %v9900_v39  ;;  %v16911_v21 = vpop.f32.mrf.mxu0 }
 0x439   : > { %v10098_v17 = vpop.f32.mrf.mxu1 }
 0x43a   : > { %v10360_v35 = vadd.f32 %v16911_v21, %v10130_v52  ;;  %v10129_v29 = vadd.f32 %v10098_v17, %v9899_v30  ;;  %v10328_v23 = vpop.f32.mrf.mxu0 }
 0x43b   : > { %v16882_v60 = vpop.f32.mrf.mxu1 }
 0x43c   : > { %v10359_v25 = vadd.f32 %v10328_v23, %v10129_v29  ;;  %v10132_v2 = vadd.f32 %v16882_v60, %v9902_v62  ;;  %v16914_v26 = vpop.f32.mrf.mxu0 }
 0x43d   : > { %v10108_v24 = vpop.f32.mrf.mxu1 }
 0x43e   : > { %v10362_v34 = vadd.f32 %v16914_v26, %v10132_v2  ;;  %v10131_v59 = vadd.f32 %v10108_v24, %v9901_v16  ;;  %v10338_v13 = vpop.f32.mrf.mxu0 }
 0x43f   : > { %v22274_v47 = vpop.f32.mrf.mxu1 }
 0x440   : > { %v10361_v36 = vadd.f32 %v10338_v13, %v10131_v59  ;;  %v22276_v14 = vpop.f32.mrf.mxu0 }
 0x441   : > { %v22278_v49 = vpop.f32.mrf.mxu1 }
 0x442   : > { %v22280_v39 = vpop.f32.mrf.mxu0  ;;  %v10578_v38 = vadd.f32 %v22278_v49, %v22248_v0 }
 0x443   : > { %v22282_v11 = vpop.f32.mrf.mxu1 }
 0x444   : > { %v22284_v30 = vpop.f32.mrf.mxu0 }
 0x445   : > { %v22286_v58 = vpop.f32.mrf.mxu1 }
 0x446   : > { %v22288_v62 = vpop.f32.mrf.mxu0 }
 0x447   : > { %v22290_v56 = vpop.f32.mrf.mxu1 }
 0x448   : > { %v22292_v16 = vpop.f32.mrf.mxu0 }
 0x449   : > { %v22294_v43 = vpop.f32.mrf.mxu1 }
 0x44a   : > { %v22296_v8 = vpop.f32.mrf.mxu0 }
 0x44b   : > { %v22298_v63 = vpop.f32.mrf.mxu1 }
 0x44c   : > { %v22300_v42 = vpop.f32.mrf.mxu0 }
 0x44d   : > { %v22302_v3 = vpop.f32.mrf.mxu1 }
 0x44e   : > { %v22304_v46 = vpop.f32.mrf.mxu0 }
 0x44f   : > { %v22306_v40 = vpop.f32.mrf.mxu1 }
 0x450   : > { %v22308_v19 = vpop.f32.mrf.mxu0 }
 0x451   : > { %v22310_v28 = vpop.f32.mrf.mxu1 }
 0x452   : > { %v22312_v52 = vpop.f32.mrf.mxu0 }
 0x453   : > { %v22314_v21 = vpop.f32.mrf.mxu1 }
 0x454   : > { %v22316_v17 = vpop.f32.mrf.mxu0 }
 0x455   : > { %v22318_v29 = vpop.f32.mrf.mxu1 }
 0x456   : > { %v22320_v23 = vpop.f32.mrf.mxu0 }
 0x457   : > { %23634 = vst [vmem:[#allocation85_spill] sm:$0xff] %v22320_v23  ;;  %v16943_v60 = vpop.f32.mrf.mxu1 }
 0x458   : > { %v10591_v2 = vadd.f32 %v16943_v60, %v10360_v35  ;;  %v16975_v26 = vpop.f32.mrf.mxu0 }
 0x459   : > { %v10559_v24 = vpop.f32.mrf.mxu1 }
 0x45a   : > { %v22322_v59 = vadd.f32 %v16975_v26, %v10591_v2  ;;  %v10590_v13 = vadd.f32 %v10559_v24, %v10359_v25  ;;  %v10789_v44 = vpop.f32.mrf.mxu0 }
 0x45b   : > { %v16946_v45 = vpop.f32.mrf.mxu1 }
 0x45c   : > { %23635 = vst [vmem:[#allocation88_spill] sm:$0xff] %v22322_v59  ;;  %v22324_v61 = vadd.f32 %v10789_v44, %v10590_v13  ;;  %v10593_v22 = vadd.f32 %v16946_v45, %v10362_v34  ;;  %v16978_v5 = vpop.f32.mrf.mxu0  ;;  %v23639_v13 = vld [vmem:[#allocation86_spill] sm:$0xff] }
 0x45d   : > { %v10569_v7 = vpop.f32.mrf.mxu1  ;;  %v14138_v9 = vmul.f32 -1.442695, %v23639_v13 }
 0x45e   : > { %23636 = vst [vmem:[#allocation38_spill] sm:$0xff] %v22324_v61  ;;  %v22326_v33 = vadd.f32 %v16978_v5, %v10593_v22  ;;  %v10592_v41 = vadd.f32 %v10569_v7, %v10361_v36  ;;  %v10799_v48 = vpop.f32.mrf.mxu0 }
 0x45f   : > { %v16989_v31 = vpop.f32.mrf.mxu1  ;;  %17429 = vpow2.f32 %v14138_v9 }
 0x460   : > { %23637 = vst [vmem:[#allocation65_spill] sm:$0xff] %v22326_v33  ;;  %v22328_v15 = vadd.f32 %v10799_v48, %v10592_v41  ;;  %v17021_v35 = vpop.f32.mrf.mxu0 }
 0x461   : > { %v10959_v60 = vpop.f32.mrf.mxu1 }
 0x462   : > { %23638 = vst [vmem:[#allocation80_spill] sm:$0xff] %v22328_v15  ;;  %v11190_v27 = vpop.f32.mrf.mxu0  ;;  %v10579_v15 = vadd.f32 %v22274_v47, %v22245_v10  ;;  %v10580_v10 = vadd.f32 %v22286_v58, %v22254_v53  ;;  %v10808_v47 = vadd.f32 %v22280_v39, %v10578_v38  ;;  %v10582_v53 = vadd.f32 %v22294_v43, %v22260_v20 }
 0x463   : > { %v16992_v2 = vpop.f32.mrf.mxu1 }
 0x464   : > { %v17024_v26 = vpop.f32.mrf.mxu0  ;;  %v10809_v23 = vadd.f32 %v22276_v14, %v10579_v15  ;;  %v11038_v15 = vadd.f32 %v10959_v60, %v10808_v47 }
 0x465   : > { %v10969_v25 = vpop.f32.mrf.mxu1 }
 0x466   : > { %v11200_v24 = vpop.f32.mrf.mxu0 }
 0x467   : > { %v16995_v57 = vpop.f32.mrf.mxu1 }
 0x468   : > { %v22330_v44 = vpop.f32.mrf.mxu0 }
 0x469   : > { %v10979_v45 = vpop.f32.mrf.mxu1 }
 0x46a   : > { %v22332_v34 = vpop.f32.mrf.mxu0 }
 0x46b   : > { %v22334_v22 = vpop.f32.mrf.mxu1 }
 0x46c   : > { %v22336_v7 = vpop.f32.mrf.mxu0  ;;  %v17430_v20 = vpop.eup %17429 }
 0x46d   : > { %v22338_v5 = vpop.f32.mrf.mxu1 }
 0x46e   : > { %v22340_v41 = vpop.f32.mrf.mxu0 }
 0x46f   : > { %v22342_v48 = vpop.f32.mrf.mxu1 }
 0x470   : > { %v22344_v36 = vpop.f32.mrf.mxu0 }
 0x471   : > { %v22347_v51 = vpop.f32.mrf.mxu1 }
 0x472   : > { %v22349_v6 = vpop.f32.mrf.mxu0 }
 0x473   : > { %23640 = vst [vmem:[#allocation91_spill] sm:$0xff] %v22349_v6  ;;  %v22351_v55 = vpop.f32.mrf.mxu1  ;;  %v10581_v6 = vadd.f32 %v22282_v11, %v22251_v4  ;;  %v10810_v4 = vadd.f32 %v22288_v62, %v10580_v10  ;;  %v10583_v11 = vadd.f32 %v22290_v56, %v22257_v32  ;;  %v10812_v62 = vadd.f32 %v22296_v8, %v10582_v53 }
 0x474   : > { %23641 = vst [vmem:[#allocation95_spill] sm:$0xff] %v22351_v55  ;;  %v22355_v33 = vpop.f32.mrf.mxu0  ;;  %v10585_v32 = vadd.f32 %v22298_v63, %v22262_v54 }
 0x475   : > { %v22357_v61 = vpop.f32.mrf.mxu1  ;;  %v10813_v47 = vadd.f32 %v22292_v16, %v10583_v11  ;;  %v11042_v8 = vadd.f32 %v10979_v45, %v10812_v62  ;;  %v10588_v62 = vadd.f32 %v22318_v29, %v22272_v1 }
 0x476   : > { %23642 = vst [vmem:[#allocation96_spill] sm:$0xff] %v22357_v61  ;;  %v22361_v59 = vpop.f32.mrf.mxu0  ;;  %v11039_v61 = vadd.f32 %v16989_v31, %v10809_v23  ;;  %v11040_v23 = vadd.f32 %v10969_v25, %v10810_v4  ;;  %v10586_v4 = vadd.f32 %v22310_v28, %v22268_v50 }
 0x477   : > { %v22363_v13 = vpop.f32.mrf.mxu1  ;;  %v11043_v16 = vadd.f32 %v16995_v57, %v10813_v47 }
 0x478   : > { %23643 = vst [vmem:[#allocation97_spill] sm:$0xff] %v22363_v13  ;;  %v22368_v55 = vpop.f32.mrf.mxu0  ;;  %v10811_v13 = vadd.f32 %v22284_v30, %v10581_v6  ;;  %v11270_v31 = vadd.f32 %v17021_v35, %v11039_v61  ;;  %v11269_v6 = vadd.f32 %v11190_v27, %v11038_v15  ;;  %v10584_v61 = vadd.f32 %v22302_v3, %v22264_v12 }
 0x479   : > { %v22372_v9 = vpop.f32.mrf.mxu1  ;;  %v10587_v27 = vadd.f32 %v22306_v40, %v22266_v37  ;;  %v7114_v15 = vadd.f32 1.0, %v17430_v20  ;;  %v10815_v12 = vadd.f32 %v22300_v42, %v10585_v32  ;;  %v11274_v45 = vadd.f32 %v22330_v44, %v11043_v16 }
 0x47a   : > { %v22375_v0 = vpop.f32.mrf.mxu0  ;;  %v11041_v38 = vadd.f32 %v16992_v2, %v10811_v13  ;;  %v11271_v13 = vadd.f32 %v11200_v24, %v11040_v23  ;;  %v10589_v42 = vadd.f32 %v22314_v21, %v22270_v18  ;;  %v10816_v44 = vadd.f32 %v22312_v52, %v10586_v4 }
 0x47b   : > { %23644 = vst [vmem:[#allocation98_spill] sm:$0xff] %v22375_v0  ;;  %v22377_v49 = vpop.f32.mrf.mxu1  ;;  %v10817_v24 = vadd.f32 %v22308_v19, %v10587_v27  ;;  %v11045_v11 = vadd.f32 %v22334_v22, %v10815_v12  ;;  %v23645_v20 = vld [vmem:[#allocation95_spill] sm:$0xff]  ;;  %v23647_v27 = vld [vmem:[#allocation85_spill] sm:$0xff] }
 0x47c   : > { %v22380_v14 = vpop.f32.mrf.mxu0  ;;  %v11272_v43 = vadd.f32 %v17024_v26, %v11041_v38  ;;  %v10814_v26 = vadd.f32 %v22304_v46, %v10584_v61 }
 0x47d   : > { %v22387_v58 = vpop.f32.mrf.mxu1  ;;  %v11047_v22 = vadd.f32 %v22342_v48, %v10817_v24  ;;  %v11276_v21 = vadd.f32 %v22336_v7, %v11045_v11  ;;  %v23649_v12 = vld [vmem:[#allocation96_spill] sm:$0xff] }
 0x47e   : > { %v22389_v39 = vpop.f32.mrf.mxu0  ;;  %v11044_v46 = vadd.f32 %v22338_v5, %v10814_v26  ;;  %v10819_v5 = vadd.f32 %v22316_v17, %v10589_v42 }
 0x47f   : > { %v17053_v0 = vpop.f32.mrf.mxu1  ;;  %v11278_v7 = vadd.f32 %v22344_v36, %v11047_v22 }
 0x480   : > { %v11500_v30 = vadd.f32 %v17053_v0, %v11270_v31  ;;  %v17085_v60 = vpop.f32.mrf.mxu0  ;;  %v11273_v31 = vadd.f32 %v22332_v34, %v11042_v8 }
 0x481   : > { %v11420_v56 = vpop.f32.mrf.mxu1 }
 0x482   : > { %v22397_v35 = vadd.f32 %v17085_v60, %v11500_v30  ;;  %v11499_v2 = vadd.f32 %v11420_v56, %v11269_v6  ;;  %v11650_v25 = vpop.f32.mrf.mxu0  ;;  %v11275_v6 = vadd.f32 %v22340_v41, %v11044_v46  ;;  %v11046_v30 = vadd.f32 %v22347_v51, %v10816_v44  ;;  %v23646_v51 = vld [vmem:[#allocation91_spill] sm:$0xff]  ;;  %v23651_v46 = vld [vmem:[#allocation88_spill] sm:$0xff] }
 0x483   : > { %v17056_v10 = vpop.f32.mrf.mxu1  ;;  %v11049_v41 = vadd.f32 %v23645_v20, %v10819_v5  ;;  %v23653_v44 = vld [vmem:[#allocation79_spill] sm:$0xff] }
 0x484   : > { %17431 = vtanh.f32 %v22397_v35  ;;  %v22402_v54 = vadd.f32 %v11650_v25, %v11499_v2  ;;  %v11502_v63 = vadd.f32 %v17056_v10, %v11272_v43  ;;  %v17088_v0 = vpop.f32.mrf.mxu0  ;;  %v11277_v43 = vadd.f32 %v23646_v51, %v11046_v30 }
 0x485   : > { %v11430_v3 = vpop.f32.mrf.mxu1  ;;  %v14124_v22 = vmul.f32 -1.442695, %v23653_v44 }
 0x486   : > { %v22408_v37 = vadd.f32 %v17088_v0, %v11502_v63  ;;  %v11501_v57 = vadd.f32 %v11430_v3, %v11271_v13  ;;  %v11660_v40 = vpop.f32.mrf.mxu0  ;;  %17433 = vtanh.f32 %v22402_v54  ;;  %v10818_v13 = vadd.f32 %v23647_v27, %v10588_v62  ;;  %v23648_v63 = vld [vmem:[#allocation42_spill] sm:$0xff] }
 0x487   : > { %v17059_v53 = vpop.f32.mrf.mxu1  ;;  %v14123_v0 = vmul.f32 -1.442695, %v23648_v63 }
 0x488   : > { %v17091_v50 = vpop.f32.mrf.mxu0  ;;  %17435 = vtanh.f32 %v22408_v37  ;;  %v22419_v28 = vadd.f32 %v11660_v40, %v11501_v57  ;;  %v11504_v19 = vadd.f32 %v17059_v53, %v11274_v45  ;;  %v11048_v3 = vadd.f32 %v23649_v12, %v10818_v13 }
 0x489   : > { %v11440_v38 = vpop.f32.mrf.mxu1  ;;  %17437 = vrcp.f32 %v7114_v15  ;;  %v11280_v15 = vadd.f32 %v22355_v33, %v11049_v41 }
 0x48a   : > { %v11503_v23 = vadd.f32 %v11440_v38, %v11273_v31  ;;  %v11670_v18 = vpop.f32.mrf.mxu0  ;;  %17439 = vtanh.f32 %v22419_v28  ;;  %v22432_v52 = vadd.f32 %v17091_v50, %v11504_v19  ;;  %v11279_v31 = vadd.f32 %v22361_v59, %v11048_v3  ;;  %v23652_v50 = vld [vmem:[#allocation97_spill] sm:$0xff] }
 0x48b   : > { %v17062_v34 = vpop.f32.mrf.mxu1  ;;  %v11051_v19 = vadd.f32 %v23652_v50, %v23651_v46  ;;  %v23664_v3 = vld [vmem:[#allocation89_spill] sm:$0xff] }
 0x48c   : > { %v22427_v60 = vadd.f32 %v11670_v18, %v11503_v23  ;;  %v17094_v47 = vpop.f32.mrf.mxu0  ;;  %v11506_v48 = vadd.f32 %v17062_v34, %v11276_v21  ;;  %v23654_v23 = vld [vmem:[#allocation68_spill] sm:$0xff] }
 0x48d   : > { %v11450_v32 = vpop.f32.mrf.mxu1  ;;  %v11282_v62 = vadd.f32 %v22368_v55, %v11051_v19  ;;  %v23661_v55 = vld [vmem:[#allocation90_spill] sm:$0xff] }
 0x48e   : > { %v11505_v56 = vadd.f32 %v11450_v32, %v11275_v6  ;;  %v11680_v17 = vpop.f32.mrf.mxu0  ;;  %17441 = vtanh.f32 %v22427_v60  ;;  %v22442_v16 = vadd.f32 %v17094_v47, %v11506_v48  ;;  %v23656_v6 = vld [vmem:[#allocation38_spill] sm:$0xff]  ;;  %v23657_v48 = vld [vmem:[#allocation45_spill] sm:$0xff] }
 0x48f   : > { %v17065_v61 = vpop.f32.mrf.mxu1  ;;  %17443 = vtanh.f32 %v22432_v52  ;;  %v11050_v59 = vadd.f32 %v22372_v9, %v23656_v6  ;;  %v14125_v32 = vmul.f32 -1.442695, %v23657_v48  ;;  %v23676_v48 = vld [vmem:[#allocation92_spill] sm:$0xff] }
 0x490   : > { %v11508_v2 = vadd.f32 %v17065_v61, %v11278_v7  ;;  %v22438_v25 = vadd.f32 %v11680_v17, %v11505_v56  ;;  %v17097_v1 = vpop.f32.mrf.mxu0  ;;  %v23658_v7 = vld [vmem:[#allocation65_spill] sm:$0xff]  ;;  %v23660_v61 = vld [vmem:[#allocation98_spill] sm:$0xff]  ;;  %v14142_v63 = vmul.f32 -1.442695, %v23676_v48 }
 0x491   : > { %v17432_v29 = vpop.eup %17431  ;;  %v11460_v36 = vpop.f32.mrf.mxu1  ;;  %v11053_v56 = vadd.f32 %v22377_v49, %v23658_v7  ;;  %v11281_v51 = vadd.f32 %v23660_v61, %v11050_v59 }
 0x492   : > { %v11507_v10 = vadd.f32 %v11460_v36, %v11277_v43  ;;  %11875 = vrot.lane.b32.xlu0 %v17432_v29, %s18196_s28  ;;  %v11690_v8 = vpop.f32.mrf.mxu0  ;;  %17445 = vtanh.f32 %v22438_v25  ;;  %v22449_v4 = vadd.f32 %v17097_v1, %v11508_v2  ;;  %v14139_v1 = vmul.f32 -1.442695, %v23661_v55  ;;  %v23662_v29 = vld [vmem:[#allocation80_spill] sm:$0xff]  ;;  %v7510_v61 = vpop.permute.xlu0 %7509 }
 0x493   : > { %v17068_v26 = vpop.f32.mrf.mxu1  ;;  %v17434_v40 = vpop.eup %17433  ;;  %17447 = vtanh.f32 %v22442_v16  ;;  %v11052_v27 = vadd.f32 %v22387_v58, %v23662_v29  ;;  %v11284_v49 = vadd.f32 %v22380_v14, %v11053_v56 }
 0x494   : > { %v17100_v57 = vpop.f32.mrf.mxu0  ;;  %v11510_v24 = vadd.f32 %v17068_v26, %v11280_v15  ;;  %v22452_v45 = vadd.f32 %v11690_v8, %v11507_v10  ;;  %17449 = vpow2.f32 %v14123_v0  ;;  %v14140_v26 = vmul.f32 -1.442695, %v23664_v3 }
 0x495   : > { %v11470_v11 = vpop.f32.mrf.mxu1  ;;  %v17436_v53 = vpop.eup %17435  ;;  %17451 = vtanh.f32 %v22449_v4  ;;  %v11283_v58 = vadd.f32 %v22389_v39, %v11052_v27 }
 0x496   : > { %23650 = vst [vmem:[#allocation95_spill] sm:$0xff] %v22452_v45  ;;  %11873 = vrot.lane.b32.xlu0 %v17434_v40, %s18196_s28  ;;  %v11700_v42 = vpop.f32.mrf.mxu0  ;;  %v17438_v33 = vpop.eup %17437  ;;  %11879 = vrot.lane.b32.xlu1 %v17436_v53, %s18196_s28  ;;  %17453 = vtanh.f32 %v22452_v45  ;;  %v11509_v21 = vadd.f32 %v11470_v11, %v11279_v31  ;;  %v22463_v34 = vadd.f32 %v17100_v57, %v11510_v24 }
 0x497   : > { %v17071_v38 = vpop.f32.mrf.mxu1  ;;  %v7546_v18 = vmul.f32 %v17438_v33, %v23654_v23  ;;  %v17440_v5 = vpop.eup %17439  ;;  %17455 = vpow2.f32 %v14124_v22  ;;  %v23668_v23 = vld [vmem:[#allocation93_spill] sm:$0xff] }
 0x498   : > { %23655 = vst [vmem:[#allocation91_spill] sm:$0xff] %v22463_v34  ;;  %v17103_v47 = vpop.f32.mrf.mxu0  ;;  %17457 = vtanh.f32 %v22463_v34  ;;  %v11512_v20 = vadd.f32 %v17071_v38, %v11282_v62  ;;  %v22474_v41 = vadd.f32 %v11700_v42, %v11509_v21  ;;  %v12276_v38 = vpop.permute.xlu1 %12275 }
 0x499   : > { %v11480_v30 = vpop.f32.mrf.mxu1  ;;  %17459 = vpow2.f32 %v14125_v32 }
 0x49a   : > { %7585 = vrot.lane.b32.xlu0 %v7546_v18, %s18195_s21  ;;  %11877 = vrot.lane.b32.xlu1 %v17440_v5, %s18196_s28  ;;  %23659 = vst [vmem:[#allocation85_spill] sm:$0xff] %v22474_v41  ;;  %v11710_v2 = vpop.f32.mrf.mxu0  ;;  %v11511_v13 = vadd.f32 %v11480_v30, %v11281_v51  ;;  %17461 = vtanh.f32 %v22474_v41  ;;  %v22484_v10 = vadd.f32 %v17103_v47, %v11512_v20  ;;  %v14141_v18 = vmul.f32 -1.442695, %v23668_v23 }
 0x49b   : > { %v17442_v17 = vpop.eup %17441  ;;  %v17074_v43 = vpop.f32.mrf.mxu1  ;;  %17463 = vpow2.f32 %v14139_v1  ;;  %v17849_v1 = vld [vmem:[%s18575_s26 + $0x79] sm:$0xff] }
 0x49c   : > { %v17444_v9 = vpop.eup %17443  ;;  %23663 = vst [vmem:[#allocation96_spill] sm:$0xff] %v22484_v10  ;;  %v11514_v0 = vadd.f32 %v17074_v43, %v11284_v49  ;;  %v17106_v12 = vpop.f32.mrf.mxu0  ;;  %v22490_v57 = vadd.f32 %v11710_v2, %v11511_v13  ;;  %17465 = vtanh.f32 %v22484_v10 }
 0x49d   : > { %v11490_v15 = vpop.f32.mrf.mxu1  ;;  %17467 = vpow2.f32 %v14140_v26  ;;  %v12274_v30 = vpop.permute.xlu1 %12273 }
 0x49e   : > { %11881 = vrot.lane.b32.xlu0 %v17442_v17, %s18196_s28  ;;  %11883 = vrot.lane.b32.xlu1 %v17444_v9, %s18196_s28  ;;  %23665 = vst [vmem:[#allocation88_spill] sm:$0xff] %v22490_v57  ;;  %v11513_v24 = vadd.f32 %v11490_v15, %v11283_v58  ;;  %v22493_v53 = vadd.f32 %v17106_v12, %v11514_v0  ;;  %v11720_v42 = vpop.f32.mrf.mxu0  ;;  %17469 = vtanh.f32 %v22490_v57  ;;  %v7508_v13 = vpop.permute.xlu0 %7507 }
 0x49f   : > { %v17446_v36 = vpop.eup %17445 }
 0x4a0   : > { %v17448_v8 = vpop.eup %17447  ;;  %23666 = vst [vmem:[#allocation97_spill] sm:$0xff] %v22493_v53  ;;  %v22498_v31 = vadd.f32 %v11720_v42, %v11513_v24  ;;  %17471 = vtanh.f32 %v22493_v53 }
 0x4a1   : > { %v17450_v14 = vpop.eup %17449  ;;  %v22508_v17 = vpop.permute.xlu1 %12279 }
 0x4a2   : > { %11885 = vrot.lane.b32.xlu0 %v17446_v36, %s18196_s28  ;;  %11887 = vrot.lane.b32.xlu1 %v17448_v8, %s18196_s28  ;;  %v17452_v40 = vpop.eup %17451  ;;  %v7003_v33 = vadd.f32 1.0, %v17450_v14  ;;  %23667 = vst [vmem:[#allocation68_spill] sm:$0xff] %v22498_v31  ;;  %v17850_v8 = vld [vmem:[%s18575_s26 + $0x81] sm:$0xff]  ;;  %v22519_v26 = vpop.permute.xlu0 %7513 }
 0x4a3   : > { %v17454_v11 = vpop.eup %17453 }
 0x4a4   : > { %v17456_v39 = vpop.eup %17455  ;;  %17473 = vrcp.f32 %v7003_v33  ;;  %v17852_v33 = vld [vmem:[%s18575_s26 + $0x99] sm:$0xff] }
 0x4a5   : > { %v17458_v46 = vpop.eup %17457  ;;  %v7004_v50 = vadd.f32 1.0, %v17456_v39  ;;  %17475 = vtanh.f32 %v22498_v31  ;;  %v12278_v2 = vpop.permute.xlu1 %12277 }
 0x4a6   : > { %11889 = vrot.lane.b32.xlu0 %v17454_v11, %s18196_s28  ;;  %11891 = vrot.lane.b32.xlu1 %v17452_v40, %s18196_s28  ;;  %v17460_v19 = vpop.eup %17459  ;;  %v7512_v40 = vpop.permute.xlu0 %7511  ;;  %v17851_v11 = vld [vmem:[%s18575_s26 + $0x91] sm:$0xff] }
 0x4a7   : > { %v17462_v22 = vpop.eup %17461  ;;  %17477 = vrcp.f32 %v7004_v50  ;;  %v7005_v5 = vadd.f32 1.0, %v17460_v19 }
 0x4a8   : > { %v17464_v21 = vpop.eup %17463  ;;  %17479 = vpow2.f32 %v14141_v18 }
 0x4a9   : > { %v17466_v6 = vpop.eup %17465  ;;  %v7115_v59 = vadd.f32 1.0, %v17464_v21  ;;  %17481 = vrcp.f32 %v7005_v5  ;;  %v22521_v58 = vpop.permute.xlu1 %12283  ;;  %v14660_v21 = vmul.f32 -1.442695, %v22397_v35  ;;  %v14659_v5 = vmul.f32 -1.442695, %v22402_v54 }
 0x4aa   : > { %11895 = vrot.lane.b32.xlu1 %v17458_v46, %s18196_s28  ;;  %11893 = vrot.lane.b32.xlu0 %v17462_v22, %s18196_s28  ;;  %v17468_v47 = vpop.eup %17467  ;;  %v22532_v46 = vpop.permute.xlu0 %7515 }
 0x4ab   : > { %v17470_v62 = vpop.eup %17469  ;;  %v7116_v7 = vadd.f32 1.0, %v17468_v47  ;;  %17483 = vrcp.f32 %v7115_v59  ;;  %v14662_v59 = vmul.f32 -1.442695, %v22408_v37  ;;  %v14661_v47 = vmul.f32 -1.442695, %v22419_v28 }
 0x4ad   : > { %v17472_v32 = vpop.eup %17471  ;;  %17485 = vrcp.f32 %v7116_v7  ;;  %v22524_v24 = vpop.permute.xlu1 %12287  ;;  %v14663_v7 = vmul.f32 -1.442695, %v22427_v60 }
 0x4ae   : > { %11899 = vrot.lane.b32.xlu1 %v17466_v6, %s18196_s28  ;;  %11897 = vrot.lane.b32.xlu0 %v17470_v62, %s18196_s28 }
 0x4b1   : > { %v17474_v56 = vpop.eup %17473  ;;  %v22528_v42 = vpop.permute.xlu1 %12339 }
 0x4b2   : > { %11903 = vrot.lane.b32.xlu1 %v17472_v32, %s18196_s28  ;;  %v17476_v20 = vpop.eup %17475  ;;  %v12313_v9 = vmul.f32 %v17474_v56, %v12274_v30  ;;  %v14664_v56 = vmul.f32 -1.442695, %v22432_v52 }
 0x4b3   : > { %11901 = vrot.lane.b32.xlu0 %v17476_v20, %s18196_s28  ;;  %v14665_v20 = vmul.f32 -1.442695, %v22438_v25 }
 0x4b4   : > { %v17478_v51 = vpop.eup %17477 }
 0x4b5   : > { %v12314_v43 = vmul.f32 %v17478_v51, %v12276_v38  ;;  %v17480_v29 = vpop.eup %17479  ;;  %v22535_v19 = vpop.permute.xlu1 %12337  ;;  %v14666_v51 = vmul.f32 -1.442695, %v22442_v16 }
 0x4b6   : > { %12353 = vrot.lane.b32.xlu1 %v12313_v9, %s18196_s28  ;;  %v17482_v27 = vpop.eup %17481  ;;  %v7117_v36 = vadd.f32 1.0, %v17480_v29  ;;  %v22537_v38 = vpop.permute.xlu0 %7519  ;;  %v14667_v29 = vmul.f32 -1.442695, %v22452_v45  ;;  %v11948_v45 = vld [vmem:[%s22584_s18 + $0x58] sm:$0xff] }
 0x4b7   : > { %7427 = vrot.lane.b32.xlu0 %v17849_v1, %s18195_s21  ;;  %v12315_v49 = vmul.f32 %v17482_v27, %v12278_v2 }
 0x4b8   : > { %v17484_v0 = vpop.eup %17483  ;;  %17487 = vrcp.f32 %v7117_v36 }
 0x4b9   : > { %v7547_v15 = vmul.f32 %v17484_v0, %v7508_v13  ;;  %v22542_v18 = vpop.permute.xlu1 %12343  ;;  %17489 = vpow2.f32 %v14660_v21 }
 0x4ba   : > { %12355 = vrot.lane.b32.xlu1 %v12314_v43, %s18196_s28  ;;  %v17486_v12 = vpop.eup %17485  ;;  %v22539_v22 = vpop.permute.xlu0 %7573  ;;  %23669 = vst [vmem:[#allocation38_spill] sm:$0xff] %v22542_v18  ;;  %17491 = vpow2.f32 %v14659_v5 }
 0x4bb   : > { %7429 = vrot.lane.b32.xlu0 %v17850_v8, %s18195_s21  ;;  %v7548_v14 = vmul.f32 %v17486_v12, %v7510_v61  ;;  %17493 = vpow2.f32 %v14662_v59  ;;  %v14668_v12 = vmul.f32 -1.442695, %v22449_v4 }
 0x4bc   : > { %17495 = vpow2.f32 %v14661_v47 }
 0x4bd   : > { %v22550_v30 = vpop.permute.xlu1 %12341  ;;  %17497 = vpow2.f32 %v14663_v7 }
 0x4be   : > { %12357 = vrot.lane.b32.xlu1 %v12315_v49, %s18196_s28  ;;  %v22547_v6 = vpop.permute.xlu0 %7571  ;;  %23670 = vst [vmem:[#allocation65_spill] sm:$0xff] %v22550_v30  ;;  %17499 = vpow2.f32 %v14664_v56 }
 0x4bf   : > { %7587 = vrot.lane.b32.xlu0 %v7547_v15, %s18195_s21  ;;  %17501 = vpow2.f32 %v14665_v20  ;;  %v14671_v20 = vmul.f32 -1.442695, %v22490_v57 }
 0x4c0   : > { %17503 = vpow2.f32 %v14666_v51 }
 0x4c1   : > { %v22556_v32 = vpop.permute.xlu1 %12347 }
 0x4c2   : > { %v22554_v62 = vpop.permute.xlu0 %7577  ;;  %23671 = vst [vmem:[#allocation98_spill] sm:$0xff] %v22556_v32  ;;  %v23685_v32 = vld [vmem:[#allocation66_spill] sm:$0xff] }
 0x4c3   : > { %7589 = vrot.lane.b32.xlu0 %v7548_v14, %s18195_s21  ;;  %v14669_v14 = vmul.f32 -1.442695, %v22474_v41 }
 0x4c5   : > { %v17488_v39 = vpop.eup %17487  ;;  %v22564_v43 = vpop.permute.xlu1 %12345 }
 0x4c6   : > { %v7549_v50 = vmul.f32 %v17488_v39, %v7512_v40  ;;  %v17490_v9 = vpop.eup %17489  ;;  %v22561_v61 = vpop.permute.xlu0 %7575  ;;  %23672 = vst [vmem:[#allocation90_spill] sm:$0xff] %v22564_v43 }
 0x4c7   : > { %7431 = vrot.lane.b32.xlu0 %v17851_v11, %s18195_s21  ;;  %v11810_v2 = vadd.f32 1.0, %v17490_v9  ;;  %v17492_v1 = vpop.eup %17491 }
 0x4c8   : > { %v17494_v27 = vpop.eup %17493  ;;  %v11809_v36 = vadd.f32 1.0, %v17492_v1 }
 0x4c9   : > { %v22567_v49 = vpop.permute.xlu1 %12349  ;;  %17505 = vrcp.f32 %v11810_v2  ;;  %v11812_v8 = vadd.f32 1.0, %v17494_v27  ;;  %v17496_v0 = vpop.eup %17495  ;;  %v11938_v2 = vld [vmem:[%s22584_s18 + $0x8] sm:$0xff] }
 0x4ca   : > { %23673 = vst [vmem:[#allocation80_spill] sm:$0xff] %v22567_v49  ;;  %v22569_v13 = vpop.permute.xlu0 %7581  ;;  %17507 = vpow2.f32 %v14667_v29  ;;  %v17498_v40 = vpop.eup %17497  ;;  %v23677_v49 = vld [vmem:[#allocation41_spill] sm:$0xff] }
 0x4cb   : > { %7433 = vrot.lane.b32.xlu0 %v17852_v33, %s18195_s21  ;;  %17509 = vrcp.f32 %v11809_v36  ;;  %v11811_v33 = vadd.f32 1.0, %v17496_v0  ;;  %v17500_v39 = vpop.eup %17499  ;;  %v11813_v5 = vadd.f32 1.0, %v17498_v40  ;;  %v14673_v0 = vmul.f32 -1.442695, %v22498_v31  ;;  %v11942_v31 = vld [vmem:[%s22584_s18 + $0x28] sm:$0xff] }
 0x4cc   : > { %17511 = vrcp.f32 %v11812_v8  ;;  %v11814_v47 = vadd.f32 1.0, %v17500_v39  ;;  %v14670_v8 = vmul.f32 -1.442695, %v22463_v34 }
 0x4cd   : > { %v22571_v15 = vpop.permute.xlu1 %7517  ;;  %17513 = vpow2.f32 %v14668_v12 }
 0x4ce   : > { %v22575_v11 = vpop.permute.xlu0 %7579  ;;  %17515 = vpow2.f32 %v14669_v14 }
 0x4cf   : > { %7591 = vrot.lane.b32.xlu0 %v7549_v50, %s18195_s21  ;;  %v17502_v50 = vpop.eup %17501  ;;  %17517 = vrcp.f32 %v11811_v33  ;;  %v11937_v33 = vld [vmem:[%s22584_s18] sm:$0xff] }
 0x4d0   : > { %v17504_v7 = vpop.eup %17503  ;;  %v11815_v56 = vadd.f32 1.0, %v17502_v50  ;;  %17519 = vrcp.f32 %v11813_v5 }
 0x4d1   : > { %v22577_v21 = vpop.permute.xlu1 %7521  ;;  %17521 = vrcp.f32 %v11814_v47  ;;  %v11816_v51 = vadd.f32 1.0, %v17504_v7  ;;  %v11940_v47 = vld [vmem:[%s22584_s18 + $0x18] sm:$0xff] }
 0x4d2   : > { %v22579_v59 = vpop.permute.xlu0 %7583  ;;  %17523 = vrcp.f32 %v11815_v56 }
 0x4d3   : > { %17525 = vpow2.f32 %v14671_v20 }
 0x4d4   : > { %17527 = vrcp.f32 %v11816_v51 }
 0x4d5   : > { %v22588_v27 = vpop.permute.xlu1 %12351  ;;  %17529 = vpow2.f32 %v14670_v8 }
 0x4d6   : > { %v17506_v9 = vpop.eup %17505  ;;  %23675 = vst [vmem:[#allocation89_spill] sm:$0xff] %v22588_v27  ;;  %17531 = vpow2.f32 %v14673_v0 }
 0x4d7   : > { %v17508_v29 = vpop.eup %17507 }
 0x4d8   : > { %v17510_v14 = vpop.eup %17509  ;;  %v11817_v40 = vadd.f32 1.0, %v17508_v29 }
 0x4d9   : > { %v17512_v50 = vpop.eup %17511 }
 0x4da   : > { %17533 = vrcp.f32 %v11817_v40  ;;  %v11941_v40 = vld [vmem:[%s22584_s18 + $0x20] sm:$0xff] }
 0x504   : > { %v11876_v1 = vpop.permute.xlu0 %11875 }
 0x505   : > { %v11922_v36 = vmul.f32 %v17506_v9, %v11876_v1  ;;  %v17514_v9 = vpop.eup %17513 }
 0x506   : > { %v17516_v1 = vpop.eup %17515 }
 0x507   : > { %v11954_v12 = vmul.f32 %v11938_v2, %v11922_v36  ;;  %v17518_v29 = vpop.eup %17517  ;;  %v11819_v0 = vadd.f32 1.0, %v17516_v1  ;;  %17535 = vtanh.f32 %v11922_v36 }
 0x508   : > { %v11874_v39 = vpop.permute.xlu0 %11873  ;;  %v11880_v7 = vpop.permute.xlu1 %11879  ;;  %17537 = vpow2.f32 %v14142_v63 }
 0x509   : > { %v11921_v5 = vmul.f32 %v17510_v14, %v11874_v39  ;;  %11987 = vrot.lane.b32.xlu0 %v11954_v12, %s18196_s28  ;;  %v11924_v56 = vmul.f32 %v17512_v50, %v11880_v7  ;;  %v11939_v14 = vld [vmem:[%s22584_s18 + $0x10] sm:$0xff]  ;;  %v11818_v12 = vadd.f32 1.0, %v17514_v9  ;;  %v14672_v9 = vmul.f32 -1.442695, %v22484_v10 }
 0x50b   : > { %v11953_v20 = vmul.f32 %v11937_v33, %v11921_v5  ;;  %v11956_v2 = vmul.f32 %v11940_v47, %v11924_v56  ;;  %v17520_v33 = vpop.eup %17519  ;;  %17539 = vrcp.f32 %v11818_v12  ;;  %v11944_v12 = vld [vmem:[%s22584_s18 + $0x38] sm:$0xff] }
 0x50c   : > { %v22595_v51 = vpop.permute.xlu0 %7585  ;;  %v11878_v39 = vpop.permute.xlu1 %11877  ;;  %17541 = vrcp.f32 %v11819_v0 }
 0x50d   : > { %11985 = vrot.lane.b32.xlu1 %v11953_v20, %s18196_s28  ;;  %v11923_v8 = vmul.f32 %v17518_v29, %v11878_v39  ;;  %11991 = vrot.lane.b32.xlu0 %v11956_v2, %s18196_s28  ;;  %v17522_v7 = vpop.eup %17521  ;;  %17543 = vtanh.f32 %v11921_v5  ;;  %v11943_v29 = vld [vmem:[%s22584_s18 + $0x30] sm:$0xff] }
 0x50e   : > { %v17524_v1 = vpop.eup %17523  ;;  %17545 = vpow2.f32 %v14672_v9 }
 0x50f   : > { %v11955_v50 = vmul.f32 %v11939_v14, %v11923_v8  ;;  %v17526_v2 = vpop.eup %17525 }
 0x510   : > { %v11882_v47 = vpop.permute.xlu0 %11881  ;;  %v11884_v57 = vpop.permute.xlu1 %11883 }
 0x511   : > { %v22602_v44 = vmul.f32 %v17520_v33, %v11882_v47  ;;  %v22606_v20 = vmul.f32 %v17522_v7, %v11884_v57  ;;  %11989 = vrot.lane.b32.xlu1 %v11955_v50, %s18196_s28  ;;  %v17528_v39 = vpop.eup %17527  ;;  %v11821_v50 = vadd.f32 1.0, %v17526_v2 }
 0x512   : > { %v17530_v0 = vpop.eup %17529 }
 0x513   : > { %v11957_v36 = vmul.f32 %v11941_v40, %v22602_v44  ;;  %v11958_v63 = vmul.f32 %v11942_v31, %v22606_v20  ;;  %v17532_v31 = vpop.eup %17531  ;;  %17547 = vrcp.f32 %v11821_v50 }
 0x514   : > { %v11886_v14 = vpop.permute.xlu0 %11885  ;;  %v11888_v47 = vpop.permute.xlu1 %11887  ;;  %17549 = vtanh.f32 %v11924_v56 }
 0x515   : > { %v22612_v33 = vmul.f32 %v17524_v1, %v11886_v14  ;;  %11993 = vrot.lane.b32.xlu0 %v11957_v36, %s18196_s28  ;;  %v22616_v57 = vmul.f32 %v17528_v39, %v11888_v47  ;;  %11995 = vrot.lane.b32.xlu1 %v11958_v63, %s18196_s28  ;;  %v17534_v7 = vpop.eup %17533  ;;  %v14143_v1 = vmul.f32 -1.442695, %v23677_v49  ;;  %v11945_v14 = vld [vmem:[%s22584_s18 + $0x40] sm:$0xff]  ;;  %v11820_v36 = vadd.f32 1.0, %v17530_v0 }
 0x516   : > { %v11823_v63 = vadd.f32 1.0, %v17532_v31  ;;  %v23678_v39 = vld [vmem:[#allocation94_spill] sm:$0xff]  ;;  %v14674_v0 = vmul.f32 -1.442695, %v22493_v53  ;;  %v11946_v31 = vld [vmem:[%s22584_s18 + $0x48] sm:$0xff] }
 0x517   : > { %v11959_v5 = vmul.f32 %v11943_v29, %v22612_v33  ;;  %v11960_v40 = vmul.f32 %v11944_v12, %v22616_v57  ;;  %v17536_v29 = vpop.eup %17535  ;;  %v14144_v12 = vmul.f32 -1.442695, %v23678_v39  ;;  %17551 = vpow2.f32 %v14143_v1 }
 0x518   : > { %v11890_v10 = vpop.permute.xlu0 %11889  ;;  %v11892_v47 = vpop.permute.xlu1 %11891  ;;  %17553 = vrcp.f32 %v11820_v36 }
 0x519   : > { %11997 = vrot.lane.b32.xlu0 %v11959_v5, %s18196_s28  ;;  %v22624_v9 = vmul.f32 %v17534_v7, %v11890_v10  ;;  %11999 = vrot.lane.b32.xlu1 %v11960_v40, %s18196_s28  ;;  %v17538_v27 = vpop.eup %17537  ;;  %17555 = vrcp.f32 %v11823_v63  ;;  %v11947_v40 = vld [vmem:[%s22584_s18 + $0x50] sm:$0xff] }
 0x51a   : > { %v17540_v10 = vpop.eup %17539  ;;  %17557 = vtanh.f32 %v11923_v8  ;;  %v7118_v1 = vadd.f32 1.0, %v17538_v27  ;;  %v23680_v27 = vld [vmem:[#allocation54_spill] sm:$0xff] }
 0x51b   : > { %v11961_v2 = vmul.f32 %v11945_v14, %v22624_v9  ;;  %v17542_v56 = vpop.eup %17541  ;;  %v22632_v50 = vmul.f32 %v17540_v10, %v11892_v47  ;;  %17559 = vpow2.f32 %v14144_v12  ;;  %v11949_v10 = vld [vmem:[%s22584_s18 + $0x60] sm:$0xff] }
 0x51c   : > { %v17544_v5 = vpop.eup %17543  ;;  %v11894_v7 = vpop.permute.xlu0 %11893  ;;  %17561 = vpow2.f32 %v14674_v0  ;;  %v7171_v0 = vadd.f32 1.0, %v23680_v27  ;;  %v23684_v27 = vld [vmem:[#allocation64_spill] sm:$0xff] }
 0x51d   : > { %12001 = vrot.lane.b32.xlu0 %v11961_v2, %s18196_s28  ;;  %12179 = vrot.lane.b32.xlu1 %v17536_v29, %s18196_s28  ;;  %v22636_v14 = vmul.f32 %v17542_v56, %v11894_v7  ;;  %v17546_v36 = vpop.eup %17545  ;;  %v11962_v2 = vmul.f32 %v11946_v31, %v22632_v50  ;;  %17563 = vrcp.f32 %v7118_v1  ;;  %v23679_v29 = vld [vmem:[#allocation61_spill] sm:$0xff]  ;;  %v23681_v7 = vld [vmem:[#allocation32_spill] sm:$0xff]  ;;  %v11896_v53 = vpop.permute.xlu1 %11895  ;;  %v7172_v41 = vadd.f32 1.0, %v23684_v27 }
 0x51e   : > { %v11822_v8 = vadd.f32 1.0, %v17546_v36  ;;  %v14126_v12 = vmul.f32 -1.442695, %v23679_v29  ;;  %17565 = vtanh.f32 %v22606_v20  ;;  %v14128_v31 = vmul.f32 -1.442695, %v23681_v7  ;;  %v23682_v36 = vld [vmem:[#allocation82_spill] sm:$0xff] }
 0x51f   : > { %v11963_v63 = vmul.f32 %v11947_v40, %v22636_v14  ;;  %v23683_v29 = vld [vmem:[#allocation59_spill] sm:$0xff]  ;;  %v14147_v34 = vmul.f32 -1.442695, %v7171_v0 }
 0x520   : > { %v17548_v47 = vpop.eup %17547  ;;  %v11898_v56 = vpop.permute.xlu0 %11897  ;;  %17567 = vrcp.f32 %v11822_v8  ;;  %v14127_v20 = vmul.f32 -1.442695, %v23683_v29  ;;  %v14146_v8 = vmul.f32 -1.442695, %v23685_v32 }
 0x521   : > { %12177 = vrot.lane.b32.xlu1 %v17544_v5, %s18196_s28  ;;  %12005 = vrot.lane.b32.xlu0 %v11963_v63, %s18196_s28  ;;  %v17550_v5 = vpop.eup %17549  ;;  %v22648_v40 = vmul.f32 %v17548_v47, %v11898_v56  ;;  %v14145_v63 = vmul.f32 -1.442695, %v23682_v36  ;;  %17569 = vpow2.f32 %v14126_v12 }
 0x522   : > { %17571 = vtanh.f32 %v22602_v44  ;;  %v14148_v44 = vmul.f32 -1.442695, %v7172_v41 }
 0x523   : > { %v11965_v43 = vmul.f32 %v11949_v10, %v22648_v40  ;;  %17573 = vpow2.f32 %v14128_v31  ;;  %v23686_v31 = vld [vmem:[#allocation57_spill] sm:$0xff] }
 0x524   : > { %v17552_v1 = vpop.eup %17551  ;;  %17575 = vpow2.f32 %v14145_v63  ;;  %v11900_v63 = vpop.permute.xlu1 %11899 }
 0x525   : > { %12003 = vrot.lane.b32.xlu1 %v11962_v2, %s18196_s28  ;;  %v17554_v2 = vpop.eup %17553  ;;  %v11902_v30 = vpop.permute.xlu0 %11901  ;;  %12009 = vrot.lane.b32.xlu0 %v11965_v43, %s18196_s28  ;;  %v7119_v29 = vadd.f32 1.0, %v17552_v1  ;;  %17577 = vpow2.f32 %v14127_v20  ;;  %v23688_v20 = vld [vmem:[#allocation37_spill] sm:$0xff] }
 0x526   : > { %v17556_v7 = vpop.eup %17555  ;;  %v22656_v47 = vmul.f32 %v17554_v2, %v11896_v53  ;;  %17579 = vpow2.f32 %v14147_v34  ;;  %v7173_v2 = vadd.f32 1.0, %v23686_v31 }
 0x527   : > { %v17558_v56 = vpop.eup %17557  ;;  %v22662_v27 = vmul.f32 %v17556_v7, %v11902_v30  ;;  %17581 = vpow2.f32 %v14146_v8  ;;  %v23687_v7 = vld [vmem:[#allocation69_spill] sm:$0xff] }
 0x528   : > { %v17560_v12 = vpop.eup %17559  ;;  %v11964_v53 = vmul.f32 %v11948_v45, %v22656_v47  ;;  %17583 = vrcp.f32 %v7119_v29  ;;  %v14129_v1 = vmul.f32 -1.442695, %v23687_v7  ;;  %v14149_v41 = vmul.f32 -1.442695, %v7173_v2  ;;  %v17853_v2 = vld [vmem:[%s18575_s26 + $0xa9] sm:$0xff] }
 0x529   : > { %12183 = vrot.lane.b32.xlu1 %v17550_v5, %s18196_s28  ;;  %v11951_v5 = vld [vmem:[%s22584_s18 + $0x70] sm:$0xff]  ;;  %v17562_v0 = vpop.eup %17561  ;;  %v7120_v18 = vadd.f32 1.0, %v17560_v12  ;;  %17585 = vpow2.f32 %v14148_v44  ;;  %v7174_v29 = vadd.f32 1.0, %v23688_v20  ;;  %v11950_v44 = vld [vmem:[%s22584_s18 + $0x68] sm:$0xff] }
 0x52a   : > { %v11967_v10 = vmul.f32 %v11951_v5, %v22662_v27  ;;  %v11824_v43 = vadd.f32 1.0, %v17562_v0  ;;  %v17564_v30 = vpop.eup %17563  ;;  %17587 = vtanh.f32 %v22616_v57  ;;  %v23689_v5 = vld [vmem:[#allocation63_spill] sm:$0xff] }
 0x52b   : > { %v7550_v34 = vmul.f32 %v17564_v30, %v22519_v26  ;;  %v17566_v45 = vpop.eup %17565  ;;  %17589 = vrcp.f32 %v7120_v18  ;;  %v14130_v12 = vmul.f32 -1.442695, %v23689_v5  ;;  %v23690_v18 = vld [vmem:[#allocation84_spill] sm:$0xff] }
 0x52c   : > { %12013 = vrot.lane.b32.xlu0 %v11967_v10, %s18196_s28  ;;  %17591 = vrcp.f32 %v11824_v43  ;;  %v7175_v0 = vadd.f32 1.0, %v23690_v18  ;;  %v14150_v10 = vmul.f32 -1.442695, %v7174_v29  ;;  %v17854_v5 = vld [vmem:[%s18575_s26 + $0xb1] sm:$0xff] }
 0x52d   : > { %12181 = vrot.lane.b32.xlu1 %v17558_v56, %s18196_s28  ;;  %v17568_v56 = vpop.eup %17567  ;;  %17593 = vpow2.f32 %v14129_v1  ;;  %v23691_v1 = vld [vmem:[#allocation70_spill] sm:$0xff] }
 0x52e   : > { %v17570_v8 = vpop.eup %17569  ;;  %17595 = vtanh.f32 %v22612_v33  ;;  %v22677_v26 = vmul.f32 %v17568_v56, %v11900_v63 }
 0x52f   : > { %v17572_v57 = vpop.eup %17571  ;;  %17597 = vpow2.f32 %v14149_v41  ;;  %v7006_v30 = vadd.f32 1.0, %v17570_v8  ;;  %v14151_v41 = vmul.f32 -1.442695, %v7175_v0  ;;  %v11904_v0 = vpop.permute.xlu1 %11903 }
 0x530   : > { %7593 = vrot.lane.b32.xlu0 %v7550_v34, %s18195_s21  ;;  %v7176_v34 = vadd.f32 1.0, %v23691_v1  ;;  %17599 = vpow2.f32 %v14130_v12 }
 0x531   : > { %12007 = vrot.lane.b32.xlu1 %v11964_v53, %s18196_s28  ;;  %v17574_v53 = vpop.eup %17573  ;;  %17601 = vpow2.f32 %v14150_v10 }
 0x532   : > { %v17576_v43 = vpop.eup %17575  ;;  %17603 = vrcp.f32 %v7006_v30 }
 0x533   : > { %v17578_v33 = vpop.eup %17577  ;;  %v7121_v7 = vadd.f32 1.0, %v17576_v43  ;;  %17605 = vtanh.f32 %v22632_v50  ;;  %v23692_v43 = vld [vmem:[#allocation87_spill] sm:$0xff] }
 0x534   : > { %7435 = vrot.lane.b32.xlu0 %v17853_v2, %s18195_s21  ;;  %v17580_v63 = vpop.eup %17579  ;;  %v14152_v2 = vmul.f32 -1.442695, %v7176_v34  ;;  %17607 = vpow2.f32 %v14151_v41  ;;  %v7177_v1 = vadd.f32 1.0, %v23692_v43  ;;  %v11952_v41 = vld [vmem:[%s22584_s18 + $0x78] sm:$0xff] }
 0x535   : > { %12187 = vrot.lane.b32.xlu1 %v17566_v45, %s18196_s28  ;;  %v11966_v45 = vmul.f32 %v11950_v44, %v22677_v26  ;;  %v17582_v56 = vpop.eup %17581  ;;  %v7235_v12 = vadd.f32 1.0, %v17580_v63  ;;  %17609 = vrcp.f32 %v7121_v7  ;;  %v23693_v7 = vld [vmem:[#allocation86_spill] sm:$0xff] }
 0x536   : > { %v17584_v29 = vpop.eup %17583 }
 0x537   : > { %v17586_v8 = vpop.eup %17585  ;;  %v7551_v18 = vmul.f32 %v17584_v29, %v22532_v46  ;;  %v7008_v46 = vadd.f32 1.0, %v17574_v53  ;;  %v7178_v29 = vadd.f32 1.0, %v23693_v7 }
 0x538   : > { %7437 = vrot.lane.b32.xlu0 %v17854_v5, %s18195_s21  ;;  %v17588_v44 = vpop.eup %17587  ;;  %v7122_v5 = vadd.f32 1.0, %v17582_v56  ;;  %v7236_v63 = vadd.f32 1.0, %v17586_v8 }
 0x539   : > { %12185 = vrot.lane.b32.xlu1 %v17572_v57, %s18196_s28  ;;  %v7007_v57 = vadd.f32 1.0, %v17578_v33  ;;  %v17590_v10 = vpop.eup %17589  ;;  %v14154_v8 = vmul.f32 -1.442695, %v7178_v29 }
 0x53a   : > { %v17592_v30 = vpop.eup %17591  ;;  %v7552_v50 = vmul.f32 %v17590_v10, %v22571_v15 }
 0x53b   : > { %17611 = vrcp.f32 %v7007_v57  ;;  %v17594_v33 = vpop.eup %17593  ;;  %v22696_v34 = vmul.f32 %v17592_v30, %v11904_v0 }
 0x53c   : > { %7595 = vrot.lane.b32.xlu0 %v7551_v18, %s18195_s21  ;;  %17613 = vpow2.f32 %v14152_v2  ;;  %v14153_v18 = vmul.f32 -1.442695, %v7177_v1  ;;  %v7009_v53 = vadd.f32 1.0, %v17594_v33 }
 0x53d   : > { %12011 = vrot.lane.b32.xlu1 %v11966_v45, %s18196_s28  ;;  %v17596_v45 = vpop.eup %17595  ;;  %17615 = vrcp.f32 %v7235_v12  ;;  %v11968_v15 = vmul.f32 %v11952_v41, %v22696_v34  ;;  %v7179_v12 = vadd.f32 1.0, %v23661_v55 }
 0x53e   : > { %v17598_v56 = vpop.eup %17597  ;;  %17617 = vrcp.f32 %v7122_v5 }
 0x53f   : > { %17619 = vrcp.f32 %v7008_v46  ;;  %v7237_v57 = vadd.f32 1.0, %v17598_v56  ;;  %v17600_v2 = vpop.eup %17599  ;;  %v17856_v46 = vld [vmem:[%s18575_s26 + $0xc9] sm:$0xff] }
 0x540   : > { %7597 = vrot.lane.b32.xlu0 %v7552_v50, %s18195_s21  ;;  %17621 = vrcp.f32 %v7236_v63  ;;  %v17602_v1 = vpop.eup %17601  ;;  %v7010_v5 = vadd.f32 1.0, %v17600_v2  ;;  %v14155_v63 = vmul.f32 -1.442695, %v7179_v12  ;;  %v12408_v2 = vld [vmem:[#allocation16 + $0x30] sm:$0xff]  ;;  %v22716_v12 = vpop.permute.xlu0 %7427 }
 0x541   : > { %12191 = vrot.lane.b32.xlu1 %v17588_v44, %s18196_s28  ;;  %17623 = vpow2.f32 %v14153_v18  ;;  %v17855_v44 = vld [vmem:[%s18575_s26 + $0xc1] sm:$0xff]  ;;  %v17604_v0 = vpop.eup %17603  ;;  %v7238_v33 = vadd.f32 1.0, %v17602_v1  ;;  %v7181_v1 = vadd.f32 1.0, %v23668_v23  ;;  %s18197_s26 = smov 32  }
 0x542   : > { %17625 = vrcp.f32 %v7009_v53  ;;  %v17606_v10 = vpop.eup %17605  ;;  %v12316_v56 = vmul.f32 %v17604_v0, %v22508_v17  ;;  %v12409_v53 = vld [vmem:[#allocation16 + $0x38] sm:$0xff]  ;;  %v23694_v17 = vld [vmem:[#allocation62_spill] sm:$0xff] }
 0x543   : > { %17627 = vrcp.f32 %v7237_v57  ;;  %v17608_v30 = vpop.eup %17607  ;;  %17107 = vmatprep.subr.mxu1 %v12409_v53 }
 0x544   : > { %7439 = vrot.lane.b32.xlu0 %v17855_v44, %s18195_s21  ;;  %17629 = vpow2.f32 %v14154_v8  ;;  %v17610_v50 = vpop.eup %17609  ;;  %v7239_v57 = vadd.f32 1.0, %v17608_v30  ;;  %17108 = vmatpush3.msra.mxu1 %v12409_v53 }
 0x545   : > { %12189 = vrot.lane.b32.xlu1 %v17596_v45, %s18196_s28  ;;  %v7180_v45 = vadd.f32 1.0, %v23664_v3  ;;  %v7553_v29 = vmul.f32 %v17610_v50, %v22537_v38  ;;  %17631 = vrcp.f32 %v7010_v5  ;;  %17109 = vmatprep.subr.mxu1 %v12408_v2  ;;  %v12407_v5 = vld [vmem:[#allocation16 + $0x28] sm:$0xff] }
 0x546   : > { %17633 = vrcp.f32 %v7238_v33  ;;  %17110 = vmatpush3.msra.mxu1 %v12408_v2 }
 0x547   : > { %v14156_v44 = vmul.f32 -1.442695, %v7180_v45  ;;  %17635 = vpow2.f32 %v14155_v63  ;;  %v14157_v63 = vmul.f32 -1.442695, %v7181_v1  ;;  %17111 = vmatprep.subr.mxu1 %v12407_v5 }
 0x548   : > { %7441 = vrot.lane.b32.xlu0 %v17856_v46, %s18195_s21  ;;  %v17612_v41 = vpop.eup %17611  ;;  %17637 = vrcp.f32 %v7239_v57  ;;  %v23695_v46 = vld [vmem:[#allocation55_spill] sm:$0xff]  ;;  %17112 = vmatpush3.msra.mxu1 %v12407_v5 }
 0x549   : > { %12015 = vrot.lane.b32.xlu1 %v11968_v15, %s18196_s28  ;;  %v17614_v18 = vpop.eup %17613  ;;  %v12317_v38 = vmul.f32 %v17612_v41, %v23694_v17  ;;  %17639 = vpow2.f32 %v14156_v44  ;;  %v23698_v17 = vld [vmem:[#allocation56_spill] sm:$0xff] }
 0x54a   : > { %v17616_v15 = vpop.eup %17615  ;;  %v7240_v33 = vadd.f32 1.0, %v17614_v18  ;;  %17641 = vtanh.f32 %v22624_v9  ;;  %v22728_v18 = vpop.permute.xlu0 %7429 }
 0x54b   : > { %v17618_v8 = vpop.eup %17617  ;;  %v7459_v50 = vmul.f32 %v17616_v15, %v23695_v46  ;;  %v23696_v15 = vld [vmem:[#allocation81_spill] sm:$0xff] }
 0x54c   : > { %7599 = vrot.lane.b32.xlu0 %v7553_v29, %s18195_s21  ;;  %v7554_v0 = vmul.f32 %v17618_v8, %v22577_v21  ;;  %17643 = vrcp.f32 %v7240_v33 }
 0x54d   : > { %12195 = vrot.lane.b32.xlu1 %v17606_v10, %s18196_s28  ;;  %v17620_v10 = vpop.eup %17619  ;;  %v22725_v21 = vadd.f32 %v22547_v6, %v7459_v50  ;;  %17645 = vpow2.f32 %v14157_v63  ;;  %v23697_v6 = vld [vmem:[#allocation53_spill] sm:$0xff] }
 0x54e   : > { %v17622_v30 = vpop.eup %17621  ;;  %v12318_v41 = vmul.f32 %v17620_v10, %v22521_v58  ;;  %17647 = vtanh.f32 %v22656_v47  ;;  %v7588_v10 = vpop.permute.xlu0 %7587  ;;  %v23699_v47 = vld [vmem:[#allocation46_spill] sm:$0xff] }
 0x54f   : > { %v17624_v45 = vpop.eup %17623  ;;  %v7460_v57 = vmul.f32 %v17622_v30, %v23696_v15 }
 0x550   : > { %7601 = vrot.lane.b32.xlu0 %v7554_v0, %s18195_s21  ;;  %v17626_v29 = vpop.eup %17625  ;;  %v7241_v8 = vadd.f32 1.0, %v17624_v45 }
 0x551   : > { %12359 = vrot.lane.b32.xlu1 %v12316_v56, %s18196_s28  ;;  %v12406_v56 = vld [vmem:[#allocation16 + $0x20] sm:$0xff]  ;;  %v17628_v53 = vpop.eup %17627  ;;  %v12319_v9 = vmul.f32 %v17626_v29, %v23697_v6  ;;  %v22736_v2 = vadd.f32 %v22539_v22, %v7460_v57 }
 0x552   : > { %v17630_v58 = vpop.eup %17629  ;;  %17113 = vmatprep.subr.mxu1 %v12406_v56  ;;  %17649 = vrcp.f32 %v7241_v8 }
 0x553   : > { %17114 = vmatpush3.msra.mxu1 %v12406_v56  ;;  %v17632_v44 = vpop.eup %17631  ;;  %v7242_v1 = vadd.f32 1.0, %v17630_v58  ;;  %17651 = vtanh.f32 %v22636_v14 }
 0x554   : > { %12426 = vrot.lane.b32.xlu0 %v22725_v21, %s18195_s21  ;;  %v17634_v0 = vpop.eup %17633  ;;  %v12320_v30 = vmul.f32 %v17632_v44, %v22524_v24  ;;  %v23702_v44 = vld [vmem:[#allocation58_spill] sm:$0xff] }
 0x555   : > { %12361 = vrot.lane.b32.xlu1 %v12317_v38, %s18196_s28  ;;  %v7461_v38 = vmul.f32 %v17628_v53, %v23698_v17  ;;  %v17636_v5 = vpop.eup %17635  ;;  %v7462_v33 = vmul.f32 %v17634_v0, %v23699_v47  ;;  %17653 = vrcp.f32 %v7242_v1  ;;  %v22776_v17 = vpop.permute.xlu1 %12353 }
 0x556   : > { %v17638_v46 = vpop.eup %17637  ;;  %v7243_v50 = vadd.f32 1.0, %v17636_v5  ;;  %17655 = vtanh.f32 %v22677_v26  ;;  %v23701_v26 = vld [vmem:[#allocation67_spill] sm:$0xff] }
 0x557   : > { %v22745_v22 = vadd.f32 %v22561_v61, %v7461_v38  ;;  %v17640_v45 = vpop.eup %17639  ;;  %v22753_v63 = vadd.f32 %v22554_v62, %v7462_v33  ;;  %v7590_v61 = vpop.permute.xlu0 %7589 }
 0x558   : > { %12428 = vrot.lane.b32.xlu0 %v22736_v2, %s18195_s21  ;;  %v17642_v24 = vpop.eup %17641  ;;  %v7244_v29 = vadd.f32 1.0, %v17640_v45  ;;  %17657 = vrcp.f32 %v7243_v50 }
 0x559   : > { %12363 = vrot.lane.b32.xlu1 %v12318_v41, %s18196_s28  ;;  %v23700_v41 = vld [vmem:[#allocation83_spill] sm:$0xff]  ;;  %v17644_v56 = vpop.eup %17643  ;;  %17659 = vtanh.f32 %v22648_v40 }
 0x55a   : > { %v7463_v14 = vmul.f32 %v17638_v46, %v23700_v41  ;;  %v17646_v53 = vpop.eup %17645  ;;  %v7464_v57 = vmul.f32 %v17644_v56, %v23701_v26  ;;  %17661 = vrcp.f32 %v7244_v29  ;;  %v22791_v46 = vpop.permute.xlu1 %12355 }
 0x55b   : > { %v17648_v62 = vpop.eup %17647  ;;  %v7245_v58 = vadd.f32 1.0, %v17646_v53  ;;  %v7432_v6 = vpop.permute.xlu0 %7431  ;;  %17663 = vtanh.f32 %v22696_v34  ;;  %v23703_v34 = vld [vmem:[#allocation60_spill] sm:$0xff] }
 0x55c   : > { %12430 = vrot.lane.b32.xlu0 %v22745_v22, %s18195_s21  ;;  %v22761_v15 = vadd.f32 %v22575_v11, %v7463_v14 }
 0x55d   : > { %12365 = vrot.lane.b32.xlu1 %v12319_v9, %s18196_s28  ;;  %v22769_v9 = vadd.f32 %v22569_v13, %v7464_v57  ;;  %17665 = vrcp.f32 %v7245_v58  ;;  %v12403_v57 = vld [vmem:[#allocation16 + $0x10] sm:$0xff] }
 0x55e   : > { %17667 = vtanh.f32 %v22662_v27 }
 0x55f   : > { %v17650_v8 = vpop.eup %17649  ;;  %v22782_v0 = vpop.permute.xlu0 %7433 }
 0x560   : > { %12432 = vrot.lane.b32.xlu0 %v22753_v63, %s18195_s21  ;;  %v17652_v11 = vpop.eup %17651  ;;  %v7465_v40 = vmul.f32 %v17650_v8, %v23702_v44 }
 0x561   : > { %12367 = vrot.lane.b32.xlu1 %v12320_v30, %s18196_s28 }
 0x562   : > { %v17654_v1 = vpop.eup %17653  ;;  %v22779_v38 = vadd.f32 %v22579_v59, %v7465_v40 }
 0x563   : > { %v17656_v13 = vpop.eup %17655  ;;  %v7466_v5 = vmul.f32 %v17654_v1, %v23703_v34  ;;  %v7592_v27 = vpop.permute.xlu0 %7591 }
 0x564   : > { %12434 = vrot.lane.b32.xlu0 %v22761_v15, %s18195_s21 }
 0x565   : > { %12193 = vrot.lane.b32.xlu1 %v17642_v24, %s18196_s28  ;;  %v17658_v30 = vpop.eup %17657  ;;  %v22789_v47 = vadd.f32 %v22595_v51, %v7466_v5  ;;  %v7182_v51 = vadd.f32 1.0, %v23676_v48 }
 0x566   : > { %v17660_v33 = vpop.eup %17659  ;;  %v7467_v59 = vmul.f32 %v17658_v30, %v22716_v12  ;;  %v22804_v12 = vpop.permute.xlu1 %12357 }
 0x567   : > { %v17662_v50 = vpop.eup %17661  ;;  %v14158_v8 = vmul.f32 -1.442695, %v7182_v51 }
 0x568   : > { %12436 = vrot.lane.b32.xlu0 %v22769_v9, %s18195_s21  ;;  %v22797_v45 = vadd.f32 %v7588_v10, %v7467_v59  ;;  %v17664_v24 = vpop.eup %17663  ;;  %v7468_v41 = vmul.f32 %v17662_v50, %v22728_v18  ;;  %v7184_v59 = vadd.f32 1.0, %v23678_v39 }
 0x569   : > { %12199 = vrot.lane.b32.xlu1 %v17648_v62, %s18196_s28  ;;  %v12404_v62 = vld [vmem:[#allocation16 + $0x18] sm:$0xff] }
 0x56a   : > { %v17666_v56 = vpop.eup %17665  ;;  %v22806_v29 = vadd.f32 %v7590_v61, %v7468_v41  ;;  %17139 = vmatprep.subr.mxu0 %v12404_v62 }
 0x56b   : > { %v17668_v10 = vpop.eup %17667  ;;  %v7469_v26 = vmul.f32 %v17666_v56, %v7432_v6  ;;  %17140 = vmatpush3.msra.mxu0 %v12404_v62  ;;  %v14160_v56 = vmul.f32 -1.442695, %v7184_v59 }
 0x56c   : > { %12438 = vrot.lane.b32.xlu0 %v22779_v38, %s18195_s21  ;;  %17141 = vmatprep.subr.mxu0 %v12403_v57 }
 0x56d   : > { %12197 = vrot.lane.b32.xlu1 %v17652_v11, %s18196_s28  ;;  %v22812_v11 = vadd.f32 %v7592_v27, %v7469_v26  ;;  %17142 = vmatpush3.msra.mxu0 %v12403_v57 }
 0x570   : > { %12440 = vrot.lane.b32.xlu0 %v22789_v47, %s18195_s21 }
 0x571   : > { %12203 = vrot.lane.b32.xlu1 %v17656_v13, %s18196_s28 }
 0x574   : > { %12442 = vrot.lane.b32.xlu0 %v22797_v45, %s18195_s21 }
 0x575   : > { %12201 = vrot.lane.b32.xlu1 %v17660_v33, %s18196_s28 }
 0x578   : > { %12444 = vrot.lane.b32.xlu0 %v22806_v29, %s18195_s21 }
 0x579   : > { %12207 = vrot.lane.b32.xlu1 %v17664_v24, %s18196_s28 }
 0x57b   : > { %v11988_v14 = vpop.permute.xlu0 %11987 }
 0x57c   : > { %v12034_v53 = vadd.f32 %v11988_v14, %v22397_v35  ;;  %12446 = vrot.lane.b32.xlu0 %v22812_v11, %s18195_s21 }
 0x57d   : > { %12205 = vrot.lane.b32.xlu1 %v17668_v10, %s18196_s28 }
 0x57e   : > { %v14676_v18 = vmul.f32 -1.442695, %v12034_v53 }
 0x57f   : > { %v11986_v58 = vpop.permute.xlu1 %11985  ;;  %v11992_v61 = vpop.permute.xlu0 %11991 }
 0x580   : > { %17669 = vpow2.f32 %v14676_v18  ;;  %v12033_v44 = vadd.f32 %v11986_v58, %v22402_v54  ;;  %v12036_v35 = vadd.f32 %v11992_v61, %v22408_v37  ;;  %v7183_v37 = vadd.f32 1.0, %v23677_v49 }
 0x581   : > { %17671 = vpow2.f32 %v14158_v8 }
 0x582   : > { %v14675_v6 = vmul.f32 -1.442695, %v12033_v44  ;;  %v14678_v40 = vmul.f32 -1.442695, %v12036_v35  ;;  %v14159_v14 = vmul.f32 -1.442695, %v7183_v37 }
 0x583   : > { %v11990_v1 = vpop.permute.xlu1 %11989  ;;  %v7186_v37 = vadd.f32 1.0, %v23685_v32 }
 0x584   : > { %17673 = vpow2.f32 %v14675_v6  ;;  %v12035_v13 = vadd.f32 %v11990_v1, %v22419_v28 }
 0x585   : > { %17675 = vpow2.f32 %v14678_v40  ;;  %v7185_v40 = vadd.f32 1.0, %v23682_v36 }
 0x586   : > { %v14677_v34 = vmul.f32 -1.442695, %v12035_v13 }
 0x587   : > { %v11994_v5 = vpop.permute.xlu0 %11993  ;;  %v11996_v30 = vpop.permute.xlu1 %11995 }
 0x588   : > { %v12037_v54 = vadd.f32 %v11994_v5, %v22427_v60  ;;  %17677 = vpow2.f32 %v14677_v34  ;;  %v12038_v33 = vadd.f32 %v11996_v30, %v22432_v52 }
 0x58a   : > { %v14679_v27 = vmul.f32 -1.442695, %v12037_v54  ;;  %v14680_v50 = vmul.f32 -1.442695, %v12038_v33 }
 0x58b   : > { %v11998_v24 = vpop.permute.xlu0 %11997  ;;  %v12000_v41 = vpop.permute.xlu1 %11999 }
 0x58c   : > { %17679 = vpow2.f32 %v14680_v50  ;;  %v12040_v28 = vadd.f32 %v12000_v41, %v22442_v16  ;;  %v12039_v60 = vadd.f32 %v11998_v24, %v22438_v25 }
 0x58d   : > { %v17670_v51 = vpop.eup %17669  ;;  %17681 = vpow2.f32 %v14679_v27  ;;  %v14161_v27 = vmul.f32 -1.442695, %v7185_v40 }
 0x58e   : > { %v12098_v53 = vadd.f32 1.0, %v17670_v51  ;;  %v14682_v10 = vmul.f32 -1.442695, %v12040_v28  ;;  %v17672_v62 = vpop.eup %17671  ;;  %v14681_v58 = vmul.f32 -1.442695, %v12039_v60  ;;  %v12402_v51 = vld [vmem:[#allocation16 + $0x8] sm:$0xff] }
 0x58f   : > { %v12180_v52 = vpop.permute.xlu1 %12179  ;;  %v22825_v61 = vpop.permute.xlu0 %12001  ;;  %v7246_v16 = vadd.f32 1.0, %v17672_v62  ;;  %17143 = vmatprep.subr.mxu0 %v12402_v51 }
 0x590   : > { %17683 = vrcp.f32 %v12098_v53  ;;  %v14162_v53 = vmul.f32 -1.442695, %v7186_v37  ;;  %17144 = vmatpush3.msra.mxu0 %v12402_v51 }
 0x591   : > { %v17674_v26 = vpop.eup %17673  ;;  %17685 = vpow2.f32 %v14159_v14  ;;  %v12401_v14 = vld [vmem:[#allocation16] sm:$0xff] }
 0x592   : > { %v17676_v18 = vpop.eup %17675  ;;  %17687 = vpow2.f32 %v14160_v56  ;;  %v12097_v57 = vadd.f32 1.0, %v17674_v26  ;;  %17145 = vmatprep.subr.mxu0 %v12401_v14 }
 0x593   : > { %v12100_v8 = vadd.f32 1.0, %v17676_v18  ;;  %17689 = vpow2.f32 %v14682_v10  ;;  %v12178_v44 = vpop.permute.xlu1 %12177  ;;  %v22828_v1 = vpop.permute.xlu0 %12005  ;;  %17146 = vmatpush3.msra.mxu0 %v12401_v14 }
 0x594   : > { %17691 = vrcp.f32 %v12097_v57 }
 0x595   : > { %17693 = vrcp.f32 %v12100_v8  ;;  %v17678_v35 = vpop.eup %17677 }
 0x596   : > { %v12099_v25 = vadd.f32 1.0, %v17678_v35  ;;  %17695 = vpow2.f32 %v14681_v58 }
 0x597   : > { %17697 = vrcp.f32 %v7246_v16  ;;  %v12004_v6 = vpop.permute.xlu1 %12003  ;;  %v22832_v56 = vpop.permute.xlu0 %12009 }
 0x598   : > { %17699 = vrcp.f32 %v12099_v25  ;;  %v12042_v13 = vadd.f32 %v12004_v6, %v22449_v4 }
 0x599   : > { %v17680_v34 = vpop.eup %17679 }
 0x59a   : > { %v17682_v5 = vpop.eup %17681  ;;  %v12102_v54 = vadd.f32 1.0, %v17680_v34  ;;  %v14684_v30 = vmul.f32 -1.442695, %v12042_v13  ;;  %v23704_v34 = vld [vmem:[#allocation38_spill] sm:$0xff] }
 0x59b   : > { %v12184_v33 = vpop.permute.xlu1 %12183  ;;  %v12101_v24 = vadd.f32 1.0, %v17682_v5 }
 0x59c   : > { %17701 = vrcp.f32 %v12102_v54 }
 0x59d   : > { %v17684_v59 = vpop.eup %17683  ;;  %17703 = vpow2.f32 %v14684_v30 }
 0x59e   : > { %v17686_v50 = vpop.eup %17685  ;;  %v12226_v41 = vmul.f32 %v17684_v59, %v12180_v52  ;;  %17705 = vpow2.f32 %v14161_v27  ;;  %v22842_v58 = vpop.permute.xlu0 %12013  ;;  %v23705_v59 = vld [vmem:[#allocation65_spill] sm:$0xff] }
 0x59f   : > { %v17688_v28 = vpop.eup %17687  ;;  %v12182_v10 = vpop.permute.xlu1 %12181  ;;  %v7247_v26 = vadd.f32 1.0, %v17686_v50  ;;  %17707 = vrcp.f32 %v12101_v24 }
 0x5a0   : > { %v17690_v4 = vpop.eup %17689  ;;  %v22835_v60 = vadd.f32 %v22528_v42, %v12226_v41  ;;  %17709 = vpow2.f32 %v14162_v53  ;;  %v7248_v6 = vadd.f32 1.0, %v17688_v28  ;;  %v23706_v28 = vld [vmem:[#allocation95_spill] sm:$0xff] }
 0x5a1   : > { %v17692_v62 = vpop.eup %17691  ;;  %v12104_v57 = vadd.f32 1.0, %v17690_v4  ;;  %17711 = vrcp.f32 %v7247_v26  ;;  %v12041_v4 = vadd.f32 %v22825_v61, %v23706_v28  ;;  %v23711_v28 = vld [vmem:[#allocation89_spill] sm:$0xff] }
 0x5a2   : > { %v17694_v18 = vpop.eup %17693  ;;  %v12225_v52 = vmul.f32 %v17692_v62, %v12178_v44  ;;  %12653 = vrot.lane.b32.xlu1 %v22835_v60, %s18197_s26  ;;  %v23707_v62 = vld [vmem:[#allocation98_spill] sm:$0xff] }
 0x5a3   : > { %v17696_v8 = vpop.eup %17695  ;;  %v12228_v16 = vmul.f32 %v17694_v18, %v12184_v33  ;;  %v12008_v35 = vpop.permute.xlu1 %12007  ;;  %17713 = vrcp.f32 %v12104_v57 }
 0x5a4   : > { %v22840_v42 = vadd.f32 %v22535_v19, %v12225_v52  ;;  %v17698_v25 = vpop.eup %17697  ;;  %v12103_v13 = vadd.f32 1.0, %v17696_v8  ;;  %v7594_v19 = vpop.permute.xlu0 %7593  ;;  %17715 = vrcp.f32 %v7248_v6 }
 0x5a5   : > { %v17700_v40 = vpop.eup %17699  ;;  %v7470_v44 = vmul.f32 %v17698_v25, %v22782_v0  ;;  %v22848_v5 = vadd.f32 %v23704_v34, %v12228_v16  ;;  %v14683_v25 = vmul.f32 -1.442695, %v12041_v4  ;;  %v23709_v34 = vld [vmem:[#allocation90_spill] sm:$0xff] }
 0x5a6   : > { %12651 = vrot.lane.b32.xlu1 %v22840_v42, %s18197_s26  ;;  %v12227_v54 = vmul.f32 %v17700_v40, %v12182_v10  ;;  %17717 = vrcp.f32 %v12103_v13  ;;  %v23708_v40 = vld [vmem:[#allocation91_spill] sm:$0xff] }
 0x5a7   : > { %v12188_v30 = vpop.permute.xlu1 %12187  ;;  %v22850_v37 = vadd.f32 %v7594_v19, %v7470_v44  ;;  %v12044_v44 = vadd.f32 %v12008_v35, %v23708_v40  ;;  %v23714_v40 = vld [vmem:[#allocation88_spill] sm:$0xff] }
 0x5a8   : > { %v22857_v27 = vadd.f32 %v23705_v59, %v12227_v54  ;;  %v7436_v50 = vpop.permute.xlu0 %7435 }
 0x5a9   : > { %v17702_v33 = vpop.eup %17701  ;;  %12448 = vrot.lane.b32.xlu0 %v22850_v37, %s18195_s21  ;;  %v14686_v35 = vmul.f32 -1.442695, %v12044_v44  ;;  %v12045_v44 = vadd.f32 %v22832_v56, %v23714_v40 }
 0x5aa   : > { %12657 = vrot.lane.b32.xlu1 %v22848_v5, %s18197_s26  ;;  %v17704_v0 = vpop.eup %17703  ;;  %v12230_v24 = vmul.f32 %v17702_v33, %v12188_v30 }
 0x5ab   : > { %v12186_v41 = vpop.permute.xlu1 %12185  ;;  %v17706_v51 = vpop.eup %17705  ;;  %v12106_v53 = vadd.f32 1.0, %v17704_v0 }
 0x5ac   : > { %v17708_v14 = vpop.eup %17707  ;;  %v7438_v10 = vpop.permute.xlu0 %7437  ;;  %v22864_v26 = vadd.f32 %v23707_v62, %v12230_v24  ;;  %v7249_v8 = vadd.f32 1.0, %v17706_v51  ;;  %v23710_v24 = vld [vmem:[#allocation85_spill] sm:$0xff] }
 0x5ad   : > { %v12229_v18 = vmul.f32 %v17708_v14, %v12186_v41  ;;  %v17710_v57 = vpop.eup %17709  ;;  %17719 = vrcp.f32 %v12106_v53 }
 0x5ae   : > { %12655 = vrot.lane.b32.xlu1 %v22857_v27, %s18197_s26  ;;  %v17712_v16 = vpop.eup %17711  ;;  %v7250_v30 = vadd.f32 1.0, %v17710_v57  ;;  %17721 = vrcp.f32 %v7249_v8 }
 0x5af   : > { %v12012_v52 = vpop.permute.xlu1 %12011  ;;  %v7471_v6 = vmul.f32 %v17712_v16, %v7436_v50  ;;  %v22870_v19 = vadd.f32 %v23709_v34, %v12229_v18  ;;  %17723 = vpow2.f32 %v14683_v25  ;;  %v12043_v50 = vadd.f32 %v22828_v1, %v23710_v24  ;;  %v23712_v1 = vld [vmem:[#allocation96_spill] sm:$0xff] }
 0x5b0   : > { %v17714_v13 = vpop.eup %17713  ;;  %v7596_v61 = vpop.permute.xlu0 %7595  ;;  %17725 = vrcp.f32 %v7250_v30  ;;  %v23713_v16 = vld [vmem:[#allocation80_spill] sm:$0xff] }
 0x5b1   : > { %v22872_v33 = vadd.f32 %v7596_v61, %v7471_v6  ;;  %v17716_v59 = vpop.eup %17715  ;;  %v14685_v57 = vmul.f32 -1.442695, %v12043_v50  ;;  %17727 = vpow2.f32 %v14686_v35 }
 0x5b2   : > { %12661 = vrot.lane.b32.xlu1 %v22864_v26, %s18197_s26  ;;  %v7472_v41 = vmul.f32 %v17716_v59, %v7438_v10  ;;  %v12046_v10 = vadd.f32 %v12012_v52, %v23712_v1 }
 0x5b3   : > { %v12192_v54 = vpop.permute.xlu1 %12191  ;;  %12450 = vrot.lane.b32.xlu0 %v22872_v33, %s18195_s21  ;;  %v17718_v51 = vpop.eup %17717  ;;  %17729 = vpow2.f32 %v14685_v57 }
 0x5b4   : > { %v12232_v0 = vmul.f32 %v17714_v13, %v12192_v54  ;;  %v7598_v14 = vpop.permute.xlu0 %7597  ;;  %v14688_v13 = vmul.f32 -1.442695, %v12046_v10  ;;  %v23716_v10 = vld [vmem:[#allocation97_spill] sm:$0xff] }
 0x5b5   : > { %v22883_v62 = vadd.f32 %v7598_v14, %v7472_v41  ;;  %v23715_v14 = vld [vmem:[#allocation68_spill] sm:$0xff] }
 0x5b6   : > { %12659 = vrot.lane.b32.xlu1 %v22870_v19, %s18197_s26  ;;  %v22881_v4 = vadd.f32 %v23711_v28, %v12232_v0  ;;  %v14687_v0 = vmul.f32 -1.442695, %v12045_v44  ;;  %17731 = vpow2.f32 %v14688_v13  ;;  %v12047_v28 = vadd.f32 %v22842_v58, %v23715_v14 }
 0x5b7   : > { %v12190_v53 = vpop.permute.xlu1 %12189  ;;  %12452 = vrot.lane.b32.xlu0 %v22883_v62, %s18195_s21 }
 0x5b8   : > { %v12231_v18 = vmul.f32 %v17718_v51, %v12190_v53  ;;  %v7440_v8 = vpop.permute.xlu0 %7439  ;;  %17733 = vpow2.f32 %v14687_v0  ;;  %v14689_v40 = vmul.f32 -1.442695, %v12047_v28 }
 0x5ba   : > { %12665 = vrot.lane.b32.xlu1 %v22881_v4, %s18197_s26  ;;  %v22891_v25 = vadd.f32 %v23713_v16, %v12231_v18  ;;  %v17720_v61 = vpop.eup %17719 }
 0x5bb   : > { %v12016_v6 = vpop.permute.xlu1 %12015  ;;  %v17722_v30 = vpop.eup %17721 }
 0x5bc   : > { %v7442_v34 = vpop.permute.xlu0 %7441  ;;  %v7473_v59 = vmul.f32 %v17722_v30, %v7440_v8  ;;  %v17724_v50 = vpop.eup %17723  ;;  %v12048_v8 = vadd.f32 %v12016_v6, %v23716_v10 }
 0x5bd   : > { %v17726_v56 = vpop.eup %17725  ;;  %v12105_v53 = vadd.f32 1.0, %v17724_v50 }
 0x5be   : > { %12663 = vrot.lane.b32.xlu1 %v22891_v25, %s18197_s26  ;;  %v7474_v18 = vmul.f32 %v17726_v56, %v7442_v34  ;;  %v14690_v34 = vmul.f32 -1.442695, %v12048_v8 }
 0x5bf   : > { %v12196_v54 = vpop.permute.xlu1 %12195  ;;  %17735 = vrcp.f32 %v12105_v53 }
 0x5c0   : > { %v12234_v52 = vmul.f32 %v17720_v61, %v12196_v54  ;;  %v7600_v35 = vpop.permute.xlu0 %7599  ;;  %17737 = vpow2.f32 %v14689_v40 }
 0x5c1   : > { %v22900_v51 = vadd.f32 %v7600_v35, %v7473_v59 }
 0x5c2   : > { %v22898_v24 = vadd.f32 %v22791_v46, %v12234_v52  ;;  %v17728_v46 = vpop.eup %17727 }
 0x5c3   : > { %v12360_v41 = vpop.permute.xlu1 %12359  ;;  %12454 = vrot.lane.b32.xlu0 %v22900_v51, %s18195_s21  ;;  %v12108_v44 = vadd.f32 1.0, %v17728_v46  ;;  %v17730_v58 = vpop.eup %17729 }
 0x5c4   : > { %12669 = vrot.lane.b32.xlu1 %v22898_v24, %s18197_s26  ;;  %v7602_v57 = vpop.permute.xlu0 %7601  ;;  %v12107_v54 = vadd.f32 1.0, %v17730_v58  ;;  %v17732_v6 = vpop.eup %17731 }
 0x5c5   : > { %v22911_v16 = vadd.f32 %v7602_v57, %v7474_v18  ;;  %17739 = vrcp.f32 %v12108_v44  ;;  %v12110_v0 = vadd.f32 1.0, %v17732_v6  ;;  %v17734_v59 = vpop.eup %17733 }
 0x5c6   : > { %17741 = vpow2.f32 %v14690_v34  ;;  %v12109_v56 = vadd.f32 1.0, %v17734_v59 }
 0x5c7   : > { %v22908_v1 = vpop.permute.xlu1 %12361  ;;  %12456 = vrot.lane.b32.xlu0 %v22911_v16, %s18195_s21  ;;  %17743 = vrcp.f32 %v12107_v54 }
 0x5c8   : > { %v12427_v13 = vpop.permute.xlu0 %12426  ;;  %17745 = vrcp.f32 %v12110_v0 }
 0x5c9   : > { %17115 = vmatprep.mubr.msk.f32.mxu1 %vm806_vm0, %v12427_v13  ;;  %17747 = vrcp.f32 %v12109_v56 }
 0x5cb   : > { %v12364_v61 = vpop.permute.xlu1 %12363  ;;  %13020 = vrot.lane.b32.xlu0 %v22840_v42, %s18195_s21 }
 0x5cc   : > { %v12429_v52 = vpop.permute.xlu0 %12428  ;;  %v17736_v14 = vpop.eup %17735 }
 0x5cd   : > { %17116 = vmatmul.mubr.msk.f32.vlgmr.msra.gmra.mxu1 %vm806_vm0, %v12429_v52  ;;  %v17738_v18 = vpop.eup %17737 }
 0x5ce   : > { %v12111_v58 = vadd.f32 1.0, %v17738_v18 }
 0x5cf   : > { %v22918_v30 = vpop.permute.xlu1 %12365 }
 0x5d0   : > { %v12431_v50 = vpop.permute.xlu0 %12430  ;;  %17749 = vrcp.f32 %v12111_v58 }
 0x5d1   : > { %17118 = vmatprep.mubr.msk.f32.mxu1 %vm806_vm0, %v12431_v50 }
 0x5d2   : > { %v17740_v57 = vpop.eup %17739 }
 0x5d3   : > { %v12368_v35 = vpop.permute.xlu1 %12367  ;;  %v17742_v44 = vpop.eup %17741 }
 0x5d4   : > { %v12433_v28 = vpop.permute.xlu0 %12432  ;;  %v17744_v34 = vpop.eup %17743  ;;  %v12112_v52 = vadd.f32 1.0, %v17742_v44 }
 0x5d5   : > { %17119 = vmatmul.mubr.msk.f32.gmra.mxu1 %vm806_vm0, %v12433_v28  ;;  %v17746_v59 = vpop.eup %17745 }
 0x5d6   : > { %17751 = vrcp.f32 %v12112_v52  ;;  %v17748_v28 = vpop.eup %17747 }
 0x5d7   : > { %v12194_v53 = vpop.permute.xlu1 %12193 }
 0x5d8   : > { %v12233_v42 = vmul.f32 %v17736_v14, %v12194_v53  ;;  %v12435_v10 = vpop.permute.xlu0 %12434 }
 0x5d9   : > { %17121 = vmatprep.mubr.msk.f32.mxu1 %vm806_vm0, %v12435_v10 }
 0x5da   : > { %v22924_v46 = vadd.f32 %v22776_v17, %v12233_v42 }
 0x5db   : > { %v12200_v8 = vpop.permute.xlu1 %12199 }
 0x5dc   : > { %v12236_v40 = vmul.f32 %v17740_v57, %v12200_v8  ;;  %12667 = vrot.lane.b32.xlu1 %v22924_v46, %s18197_s26  ;;  %v12437_v54 = vpop.permute.xlu0 %12436 }
 0x5dd   : > { %17122 = vmatmul.mubr.msk.f32.gmra.mxu1 %vm806_vm0, %v12437_v54 }
 0x5de   : > { %v22929_v13 = vadd.f32 %v12360_v41, %v12236_v40 }
 0x5df   : > { %v12198_v6 = vpop.permute.xlu1 %12197 }
 0x5e0   : > { %v12235_v17 = vmul.f32 %v17744_v34, %v12198_v6  ;;  %12673 = vrot.lane.b32.xlu1 %v22929_v13, %s18197_s26  ;;  %v12439_v50 = vpop.permute.xlu0 %12438 }
 0x5e1   : > { %17124 = vmatprep.mubr.msk.f32.mxu1 %vm806_vm0, %v12439_v50 }
 0x5e2   : > { %v22935_v0 = vadd.f32 %v22804_v12, %v12235_v17 }
 0x5e3   : > { %v12204_v56 = vpop.permute.xlu1 %12203 }
 0x5e4   : > { %v12238_v41 = vmul.f32 %v17746_v59, %v12204_v56  ;;  %12671 = vrot.lane.b32.xlu1 %v22935_v0, %s18197_s26  ;;  %v12441_v53 = vpop.permute.xlu0 %12440 }
 0x5e5   : > { %17125 = vmatmul.mubr.msk.f32.gmra.mxu1 %vm806_vm0, %v12441_v53 }
 0x5e6   : > { %v22940_v14 = vadd.f32 %v12364_v61, %v12238_v41  ;;  %v17750_v61 = vpop.eup %17749 }
 0x5e7   : > { %v12202_v42 = vpop.permute.xlu1 %12201  ;;  %v17752_v58 = vpop.eup %17751 }
 0x5e8   : > { %v12237_v18 = vmul.f32 %v17748_v28, %v12202_v42  ;;  %12677 = vrot.lane.b32.xlu1 %v22940_v14, %s18197_s26  ;;  %v12443_v57 = vpop.permute.xlu0 %12442 }
 0x5e9   : > { %17127 = vmatprep.mubr.msk.f32.mxu1 %vm806_vm0, %v12443_v57 }
 0x5ea   : > { %v22946_v12 = vadd.f32 %v22908_v1, %v12237_v18 }
 0x5eb   : > { %v12208_v10 = vpop.permute.xlu1 %12207 }
 0x5ec   : > { %12675 = vrot.lane.b32.xlu1 %v22946_v12, %s18197_s26  ;;  %v12445_v8 = vpop.permute.xlu0 %12444  ;;  %v12240_v34 = vmul.f32 %v17752_v58, %v12208_v10 }
 0x5ed   : > { %17128 = vmatmul.mubr.msk.f32.gmra.mxu1 %vm806_vm0, %v12445_v8 }
 0x5ee   : > { %v22958_v6 = vadd.f32 %v12368_v35, %v12240_v34 }
 0x5ef   : > { %v12206_v40 = vpop.permute.xlu1 %12205 }
 0x5f0   : > { %v12239_v44 = vmul.f32 %v17750_v61, %v12206_v40  ;;  %v12447_v1 = vpop.permute.xlu0 %12446 }
 0x5f1   : > { %17130 = vmatprep.mubr.msk.f32.mxu1 %vm806_vm0, %v12447_v1 }
 0x5f2   : > { %v22953_v54 = vadd.f32 %v22918_v30, %v12239_v44 }
 0x5f4   : > { %12679 = vrot.lane.b32.xlu1 %v22953_v54, %s18197_s26 }
 0x5f8   : > { %12681 = vrot.lane.b32.xlu1 %v22958_v6, %s18197_s26 }
 0x5fc   : > { %13022 = vrot.lane.b32.xlu1 %v22835_v60, %s18195_s21 }
 0x614   : > { %v12654_v52 = vpop.permute.xlu1 %12653 }
 0x618   : > { %v12652_v17 = vpop.permute.xlu1 %12651 }
 0x619   : > { %17147 = vmatprep.mubr.msk.f32.mxu0 %vm806_vm0, %v12652_v17 }
 0x61a   : > { %17148 = vmatmul.mubr.msk.f32.vlgmr.msra.gmra.mxu0 %vm806_vm0, %v12654_v52 }
 0x61b   : > { %v12449_v59 = vpop.permute.xlu0 %12448 }
 0x61c   : > { %v12658_v30 = vpop.permute.xlu1 %12657  ;;  %17131 = vmatmul.mubr.msk.f32.gmra.mxu1 %vm806_vm0, %v12449_v59 }
 0x620   : > { %v12656_v50 = vpop.permute.xlu1 %12655 }
 0x621   : > { %17150 = vmatprep.mubr.msk.f32.mxu0 %vm806_vm0, %v12656_v50 }
 0x622   : > { %17151 = vmatmul.mubr.msk.f32.gmra.mxu0 %vm806_vm0, %v12658_v30 }
 0x624   : > { %v12662_v35 = vpop.permute.xlu1 %12661 }
 0x625   : > { %v12451_v41 = vpop.permute.xlu0 %12450 }
 0x626   : > { %17133 = vmatprep.mubr.msk.f32.mxu1 %vm806_vm0, %v12451_v41 }
 0x628   : > { %v12660_v56 = vpop.permute.xlu1 %12659 }
 0x629   : > { %17153 = vmatprep.mubr.msk.f32.mxu0 %vm806_vm0, %v12660_v56  ;;  %v12453_v28 = vpop.permute.xlu0 %12452 }
 0x62a   : > { %17154 = vmatmul.mubr.msk.f32.gmra.mxu0 %vm806_vm0, %v12662_v35  ;;  %17134 = vmatmul.mubr.msk.f32.gmra.mxu1 %vm806_vm0, %v12453_v28 }
 0x62c   : > { %v12666_v60 = vpop.permute.xlu1 %12665 }
 0x630   : > { %v12664_v53 = vpop.permute.xlu1 %12663 }
 0x631   : > { %17156 = vmatprep.mubr.msk.f32.mxu0 %vm806_vm0, %v12664_v53 }
 0x632   : > { %17157 = vmatmul.mubr.msk.f32.gmra.mxu0 %vm806_vm0, %v12666_v60 }
 0x635   : > { %v12455_v42 = vpop.permute.xlu0 %12454 }
 0x636   : > { %17136 = vmatprep.mubr.msk.f32.mxu1 %vm806_vm0, %v12455_v42  ;;  %v12670_v57 = vpop.permute.xlu1 %12669 }
 0x639   : > { %v12457_v18 = vpop.permute.xlu0 %12456 }
 0x63a   : > { %17137 = vmatmul.mubr.msk.f32.gmra.mxu1 %vm806_vm0, %v12457_v18 }
 0x64e   : > { %v12668_v10 = vpop.permute.xlu1 %12667 }
 0x64f   : > { %17159 = vmatprep.mubr.msk.f32.mxu0 %vm806_vm0, %v12668_v10 }
 0x650   : > { %17160 = vmatmul.mubr.msk.f32.gmra.mxu0 %vm806_vm0, %v12670_v57 }
 0x652   : > { %v12674_v61 = vpop.permute.xlu1 %12673 }
 0x656   : > { %v12672_v8 = vpop.permute.xlu1 %12671 }
 0x657   : > { %17162 = vmatprep.mubr.msk.f32.mxu0 %vm806_vm0, %v12672_v8 }
 0x658   : > { %17163 = vmatmul.mubr.msk.f32.gmra.mxu0 %vm806_vm0, %v12674_v61 }
 0x65a   : > { %v12678_v40 = vpop.permute.xlu1 %12677 }
 0x65e   : > { %v12676_v44 = vpop.permute.xlu1 %12675 }
 0x65f   : > { %17165 = vmatprep.mubr.msk.f32.mxu0 %vm806_vm0, %v12676_v44 }
 0x660   : > { %17166 = vmatmul.mubr.msk.f32.gmra.mxu0 %vm806_vm0, %v12678_v40 }
 0x666   : > { %v12680_v58 = vpop.permute.xlu1 %12679 }
 0x667   : > { %17168 = vmatprep.mubr.msk.f32.mxu0 %vm806_vm0, %v12680_v58 }
 0x66a   : > { %v12682_v34 = vpop.permute.xlu1 %12681 }
 0x66b   : > { %17169 = vmatmul.mubr.msk.f32.gmra.mxu0 %vm806_vm0, %v12682_v34 }
 0x68d   : > { %v17117_v1 = vpop.f32.mrf.mxu1 }
 0x68f   : > { %v12556_v30 = vpop.f32.mrf.mxu1 }
 0x695   : > { %v17120_v35 = vpop.f32.mrf.mxu1 }
 0x697   : > { %v12566_v60 = vpop.f32.mrf.mxu1 }
 0x69d   : > { %v17123_v42 = vpop.f32.mrf.mxu1 }
 0x69f   : > { %v12576_v8 = vpop.f32.mrf.mxu1 }
 0x6a5   : > { %v17126_v58 = vpop.f32.mrf.mxu1 }
 0x6da   : > { %v17149_v52 = vpop.f32.mrf.mxu0 }
 0x6db   : > { %v12787_v17 = vadd.f32 %v17149_v52, %v17117_v1 }
 0x6dc   : > { %v12781_v59 = vpop.f32.mrf.mxu0 }
 0x6dd   : > { %17753 = vtanh.f32 %v12787_v17  ;;  %v12782_v50 = vadd.f32 %v12781_v59, %v12556_v30  ;;  %v12586_v30 = vpop.f32.mrf.mxu1 }
 0x6df   : > { %17755 = vtanh.f32 %v12782_v50 }
 0x6e2   : > { %v17152_v56 = vpop.f32.mrf.mxu0 }
 0x6e3   : > { %v12797_v41 = vadd.f32 %v17152_v56, %v17120_v35 }
 0x6e4   : > { %v12791_v28 = vpop.f32.mrf.mxu0 }
 0x6e5   : > { %17757 = vtanh.f32 %v12797_v41  ;;  %v12792_v53 = vadd.f32 %v12791_v28, %v12566_v60  ;;  %v17129_v28 = vpop.f32.mrf.mxu1 }
 0x6e7   : > { %17759 = vtanh.f32 %v12792_v53 }
 0x6ea   : > { %v17754_v18 = vpop.eup %17753  ;;  %v17155_v57 = vpop.f32.mrf.mxu0 }
 0x6eb   : > { %v12807_v10 = vadd.f32 %v17155_v57, %v17123_v42  ;;  %12894 = vrot.lane.b32.xlu1 %v17754_v18, %s18196_s28  ;;  %v12596_v18 = vpop.f32.mrf.mxu1 }
 0x6ec   : > { %v17756_v61 = vpop.eup %17755  ;;  %v12801_v40 = vpop.f32.mrf.mxu0 }
 0x6ed   : > { %17761 = vtanh.f32 %v12807_v10  ;;  %v12802_v44 = vadd.f32 %v12801_v40, %v12576_v8  ;;  %12892 = vrot.lane.b32.xlu0 %v17756_v61, %s18196_s28  ;;  %v17132_v61 = vpop.f32.mrf.mxu1 }
 0x6ef   : > { %17763 = vtanh.f32 %v12802_v44  ;;  %v12606_v44 = vpop.f32.mrf.mxu1 }
 0x6f2   : > { %v17758_v34 = vpop.eup %17757  ;;  %v17158_v1 = vpop.f32.mrf.mxu0 }
 0x6f3   : > { %v12817_v52 = vadd.f32 %v17158_v1, %v17126_v58  ;;  %12898 = vrot.lane.b32.xlu1 %v17758_v34, %s18196_s28  ;;  %v17135_v1 = vpop.f32.mrf.mxu1 }
 0x6f4   : > { %v17760_v17 = vpop.eup %17759  ;;  %v12811_v59 = vpop.f32.mrf.mxu0 }
 0x6f5   : > { %17765 = vtanh.f32 %v12817_v52  ;;  %v12812_v50 = vadd.f32 %v12811_v59, %v12586_v30  ;;  %12896 = vrot.lane.b32.xlu0 %v17760_v17, %s18196_s28 }
 0x6f7   : > { %17767 = vtanh.f32 %v12812_v50  ;;  %v12616_v50 = vpop.f32.mrf.mxu1 }
 0x6fa   : > { %v17762_v35 = vpop.eup %17761 }
 0x6fb   : > { %12902 = vrot.lane.b32.xlu1 %v17762_v35, %s18196_s28 }
 0x6fc   : > { %v17764_v56 = vpop.eup %17763 }
 0x6fd   : > { %12900 = vrot.lane.b32.xlu0 %v17764_v56, %s18196_s28 }
 0x702   : > { %v17766_v41 = vpop.eup %17765 }
 0x703   : > { %12906 = vrot.lane.b32.xlu1 %v17766_v41, %s18196_s28 }
 0x704   : > { %v17768_v60 = vpop.eup %17767 }
 0x705   : > { %12904 = vrot.lane.b32.xlu0 %v17768_v60, %s18196_s28  ;;  %v17138_v60 = vpop.f32.mrf.mxu1 }
 0x710   : > { %v17161_v53 = vpop.f32.mrf.mxu0 }
 0x711   : > { %v12827_v42 = vadd.f32 %v17161_v53, %v17129_v28 }
 0x712   : > { %v12821_v57 = vpop.f32.mrf.mxu0 }
 0x713   : > { %17769 = vtanh.f32 %v12827_v42  ;;  %v12822_v10 = vadd.f32 %v12821_v57, %v12596_v18  ;;  %v12626_v18 = vpop.f32.mrf.mxu1 }
 0x715   : > { %17771 = vtanh.f32 %v12822_v10 }
 0x718   : > { %v17164_v8 = vpop.f32.mrf.mxu0 }
 0x719   : > { %v12837_v40 = vadd.f32 %v17164_v8, %v17132_v61  ;;  %v23717_v61 = vld [vmem:[#allocation71_spill] sm:$0xff]  ;;  %v23718_v8 = vld [vmem:[#allocation64_spill] sm:$0xff] }
 0x71a   : > { %v12831_v58 = vpop.f32.mrf.mxu0 }
 0x71b   : > { %17773 = vtanh.f32 %v12837_v40  ;;  %v12832_v34 = vadd.f32 %v12831_v58, %v12606_v44  ;;  %v7284_v40 = vadd.f32 %v23718_v8, %v23717_v61  ;;  %v23719_v58 = vld [vmem:[#allocation72_spill] sm:$0xff]  ;;  %v23726_v61 = vld [vmem:[#allocation31_spill] sm:$0xff] }
 0x71d   : > { %17775 = vtanh.f32 %v12832_v34  ;;  %v23720_v34 = vld [vmem:[#allocation54_spill] sm:$0xff] }
 0x720   : > { %v17770_v52 = vpop.eup %17769  ;;  %v17167_v17 = vpop.f32.mrf.mxu0 }
 0x721   : > { %v12847_v30 = vadd.f32 %v17167_v17, %v17135_v1  ;;  %12910 = vrot.lane.b32.xlu1 %v17770_v52, %s18196_s28  ;;  %v7283_v1 = vadd.f32 %v23720_v34, %v23719_v58  ;;  %v23721_v17 = vld [vmem:[#allocation30_spill] sm:$0xff]  ;;  %v23729_v34 = vld [vmem:[#allocation76_spill] sm:$0xff] }
 0x722   : > { %v17772_v59 = vpop.eup %17771  ;;  %v12841_v35 = vpop.f32.mrf.mxu0  ;;  %v23728_v58 = vld [vmem:[#allocation70_spill] sm:$0xff] }
 0x723   : > { %17777 = vtanh.f32 %v12847_v30  ;;  %v12842_v56 = vadd.f32 %v12841_v35, %v12616_v50  ;;  %12908 = vrot.lane.b32.xlu0 %v17772_v59, %s18196_s28  ;;  %v7300_v30 = vsub.f32 %v7284_v40, %v23721_v17  ;;  %v23722_v59 = vld [vmem:[#allocation33_spill] sm:$0xff]  ;;  %v23731_v17 = vld [vmem:[#allocation34_spill] sm:$0xff] }
 0x724   : > { %v7299_v50 = vsub.f32 %v7283_v1, %v23722_v59  ;;  %v23730_v1 = vld [vmem:[#allocation84_spill] sm:$0xff] }
 0x725   : > { %17779 = vtanh.f32 %v12842_v56  ;;  %v14164_v35 = vmul.f32 -1.442695, %v7300_v30  ;;  %v23723_v56 = vld [vmem:[#allocation73_spill] sm:$0xff]  ;;  %v23732_v59 = vld [vmem:[#allocation36_spill] sm:$0xff] }
 0x728   : > { %v17774_v41 = vpop.eup %17773 }
 0x729   : > { %12914 = vrot.lane.b32.xlu1 %v17774_v41, %s18196_s28  ;;  %v7286_v41 = vadd.f32 %v23688_v20, %v23723_v56 }
 0x72a   : > { %v17776_v28 = vpop.eup %17775 }
 0x72b   : > { %12912 = vrot.lane.b32.xlu0 %v17776_v28, %s18196_s28  ;;  %v17170_v53 = vpop.f32.mrf.mxu0  ;;  %v23724_v28 = vld [vmem:[#allocation74_spill] sm:$0xff] }
 0x72c   : > { %v12857_v42 = vadd.f32 %v17170_v53, %v17138_v60  ;;  %v14163_v60 = vmul.f32 -1.442695, %v7299_v50  ;;  %v7285_v53 = vadd.f32 %v23686_v31, %v23724_v28 }
 0x72d   : > { %v12851_v57 = vpop.f32.mrf.mxu0 }
 0x72e   : > { %17781 = vtanh.f32 %v12857_v42  ;;  %v12852_v10 = vadd.f32 %v12851_v57, %v12626_v18  ;;  %v23725_v18 = vld [vmem:[#allocation35_spill] sm:$0xff]  ;;  %v7301_v8 = vsub.f32 %v7285_v53, %v23726_v61 }
 0x72f   : > { %v7302_v57 = vsub.f32 %v7286_v41, %v23725_v18 }
 0x730   : > { %v17778_v44 = vpop.eup %17777  ;;  %17783 = vtanh.f32 %v12852_v10  ;;  %v14165_v31 = vmul.f32 -1.442695, %v7301_v8  ;;  %v23049_v8 = vpop.permute.xlu1 %13022 }
 0x731   : > { %12918 = vrot.lane.b32.xlu1 %v17778_v44, %s18196_s28  ;;  %17785 = vpow2.f32 %v14164_v35  ;;  %v14166_v40 = vmul.f32 -1.442695, %v7302_v57  ;;  %v23727_v44 = vld [vmem:[#allocation75_spill] sm:$0xff]  ;;  %v23733_v35 = vld [vmem:[#allocation77_spill] sm:$0xff] }
 0x732   : > { %v17780_v52 = vpop.eup %17779  ;;  %17787 = vpow2.f32 %v14163_v60  ;;  %v7288_v20 = vadd.f32 %v23728_v58, %v23727_v44  ;;  %v7290_v56 = vadd.f32 %v23693_v7, %v23733_v35  ;;  %v23734_v60 = vld [vmem:[#allocation78_spill] sm:$0xff]  ;;  %v23736_v7 = vld [vmem:[#allocation40_spill] sm:$0xff] }
 0x733   : > { %12916 = vrot.lane.b32.xlu0 %v17780_v52, %s18196_s28  ;;  %v7287_v52 = vadd.f32 %v23730_v1, %v23729_v34  ;;  %17789 = vpow2.f32 %v14166_v40  ;;  %v7289_v28 = vadd.f32 %v23692_v43, %v23734_v60  ;;  %v23051_v40 = vpop.permute.xlu0 %13020 }
 0x734   : > { %v7304_v30 = vsub.f32 %v7288_v20, %v23731_v17  ;;  %17791 = vpow2.f32 %v14165_v31 }
 0x735   : > { %v7303_v50 = vsub.f32 %v7287_v52, %v23732_v59  ;;  %v7305_v18 = vsub.f32 %v7289_v28, %v23736_v7  ;;  %v23738_v28 = vld [vmem:[#allocation42_spill] sm:$0xff]  ;;  %v23740_v7 = vld [vmem:[#allocation44_spill] sm:$0xff] }
 0x73b   : > { %v17782_v42 = vpop.eup %17781 }
 0x73c   : > { %12922 = vrot.lane.b32.xlu1 %v17782_v42, %s18196_s28 }
 0x73d   : > { %v17784_v10 = vpop.eup %17783 }
 0x73e   : > { %12920 = vrot.lane.b32.xlu0 %v17784_v10, %s18196_s28  ;;  %v17786_v41 = vpop.eup %17785 }
 0x73f   : > { %v17788_v53 = vpop.eup %17787 }
 0x740   : > { %13026 = vrot.lane.b32.xlu1 %v22848_v5, %s18195_s21  ;;  %v14168_v5 = vmul.f32 -1.442695, %v7304_v30  ;;  %v7363_v57 = vadd.f32 1.0, %v17788_v53  ;;  %v17790_v43 = vpop.eup %17789  ;;  %v7291_v53 = vadd.f32 %v23661_v55, %v23738_v28 }
 0x741   : > { %v17792_v10 = vpop.eup %17791 }
 0x742   : > { %13024 = vrot.lane.b32.xlu0 %v22857_v27, %s18195_s21  ;;  %v14167_v27 = vmul.f32 -1.442695, %v7303_v50  ;;  %17793 = vpow2.f32 %v14168_v5  ;;  %v7365_v61 = vadd.f32 1.0, %v17792_v10 }
 0x744   : > { %13030 = vrot.lane.b32.xlu1 %v22864_v26, %s18195_s21  ;;  %v23735_v26 = vld [vmem:[#allocation39_spill] sm:$0xff]  ;;  %17795 = vpow2.f32 %v14167_v27 }
 0x745   : > { %v7306_v42 = vsub.f32 %v7290_v56, %v23735_v26  ;;  %v23737_v56 = vld [vmem:[#allocation79_spill] sm:$0xff] }
 0x746   : > { %13028 = vrot.lane.b32.xlu0 %v22870_v19, %s18195_s21  ;;  %v7364_v19 = vadd.f32 1.0, %v17786_v41  ;;  %v7292_v41 = vadd.f32 %v23664_v3, %v23737_v56  ;;  %v23739_v26 = vld [vmem:[#allocation43_spill] sm:$0xff]  ;;  %v23748_v56 = vld [vmem:[#allocation50_spill] sm:$0xff] }
 0x748   : > { %13034 = vrot.lane.b32.xlu1 %v22881_v4, %s18195_s21  ;;  %v14170_v4 = vmul.f32 -1.442695, %v7306_v42  ;;  %17797 = vrcp.f32 %v7364_v19  ;;  %v7308_v42 = vsub.f32 %v7292_v41, %v23739_v26 }
 0x749   : > { %17799 = vrcp.f32 %v7363_v57 }
 0x74a   : > { %13032 = vrot.lane.b32.xlu0 %v22891_v25, %s18195_s21  ;;  %v14169_v25 = vmul.f32 -1.442695, %v7305_v18  ;;  %17801 = vpow2.f32 %v14170_v4  ;;  %v7307_v18 = vsub.f32 %v7291_v53, %v23740_v7  ;;  %v14172_v3 = vmul.f32 -1.442695, %v7308_v42  ;;  %v23749_v53 = vld [vmem:[#allocation63_spill] sm:$0xff] }
 0x74b   : > { %v7298_v26 = vadd.f32 %v23685_v32, %v23749_v53 }
 0x74c   : > { %13038 = vrot.lane.b32.xlu1 %v22898_v24, %s18195_s21  ;;  %v7366_v24 = vadd.f32 1.0, %v17790_v43  ;;  %17803 = vpow2.f32 %v14169_v25  ;;  %v23741_v25 = vld [vmem:[#allocation61_spill] sm:$0xff]  ;;  %v14171_v55 = vmul.f32 -1.442695, %v7307_v18  ;;  %v23751_v18 = vld [vmem:[#allocation51_spill] sm:$0xff] }
 0x74d   : > { %v7294_v10 = vadd.f32 %v23676_v48, %v23741_v25 }
 0x74e   : > { %13036 = vrot.lane.b32.xlu0 %v22924_v46, %s18195_s21  ;;  %17805 = vrcp.f32 %v7366_v24 }
 0x74f   : > { %v17794_v46 = vpop.eup %17793  ;;  %17807 = vrcp.f32 %v7365_v61 }
 0x750   : > { %13042 = vrot.lane.b32.xlu1 %v22929_v13, %s18195_s21  ;;  %v7368_v44 = vadd.f32 1.0, %v17794_v46  ;;  %v23742_v46 = vld [vmem:[#allocation45_spill] sm:$0xff] }
 0x751   : > { %v17796_v13 = vpop.eup %17795 }
 0x752   : > { %13040 = vrot.lane.b32.xlu0 %v22935_v0, %s18195_s21  ;;  %v7367_v31 = vadd.f32 1.0, %v17796_v13  ;;  %17809 = vrcp.f32 %v7368_v44  ;;  %v7293_v13 = vadd.f32 %v23668_v23, %v23742_v46  ;;  %v23743_v44 = vld [vmem:[#allocation47_spill] sm:$0xff] }
 0x754   : > { %13046 = vrot.lane.b32.xlu1 %v22940_v14, %s18195_s21  ;;  %17811 = vrcp.f32 %v7367_v31 }
 0x755   : > { %v17798_v0 = vpop.eup %17797 }
 0x756   : > { %13044 = vrot.lane.b32.xlu0 %v22946_v12, %s18195_s21  ;;  %v17800_v34 = vpop.eup %17799 }
 0x757   : > { %v17802_v12 = vpop.eup %17801 }
 0x758   : > { %v7370_v17 = vadd.f32 1.0, %v17802_v12  ;;  %v23745_v12 = vld [vmem:[#allocation32_spill] sm:$0xff] }
 0x759   : > { %v17804_v52 = vpop.eup %17803 }
 0x75a   : > { %v7369_v5 = vadd.f32 1.0, %v17804_v52  ;;  %17813 = vrcp.f32 %v7370_v17  ;;  %v7296_v52 = vadd.f32 %v23678_v39, %v23745_v12 }
 0x75b   : > { %v17806_v30 = vpop.eup %17805 }
 0x75c   : > { %v17808_v35 = vpop.eup %17807  ;;  %17815 = vrcp.f32 %v7369_v5  ;;  %v23747_v5 = vld [vmem:[#allocation49_spill] sm:$0xff] }
 0x75d   : > { %v12895_v58 = vpop.permute.xlu1 %12894  ;;  %17817 = vpow2.f32 %v14172_v3 }
 0x75e   : > { %v12941_v20 = vmul.f32 %v17798_v0, %v12895_v58  ;;  %v7310_v0 = vsub.f32 %v7294_v10, %v23743_v44  ;;  %17819 = vpow2.f32 %v14171_v55 }
 0x75f   : > { %v12893_v14 = vpop.permute.xlu0 %12892  ;;  %v17810_v19 = vpop.eup %17809 }
 0x760   : > { %v12940_v1 = vmul.f32 %v17800_v34, %v12893_v14  ;;  %12974 = vrot.lane.b32.xlu1 %v12941_v20, %s18197_s26  ;;  %v23744_v20 = vld [vmem:[#allocation48_spill] sm:$0xff] }
 0x761   : > { %v17812_v43 = vpop.eup %17811  ;;  %v7309_v31 = vsub.f32 %v7293_v13, %v23744_v20 }
 0x762   : > { %12972 = vrot.lane.b32.xlu0 %v12940_v1, %s18197_s26  ;;  %v14174_v1 = vmul.f32 -1.442695, %v7310_v0 }
 0x763   : > { %v14173_v23 = vmul.f32 -1.442695, %v7309_v31 }
 0x764   : > { %17821 = vpow2.f32 %v14174_v1 }
 0x765   : > { %v12899_v59 = vpop.permute.xlu1 %12898  ;;  %17823 = vpow2.f32 %v14173_v23 }
 0x766   : > { %v12943_v50 = vmul.f32 %v17806_v30, %v12899_v59  ;;  %v23746_v59 = vld [vmem:[#allocation59_spill] sm:$0xff] }
 0x767   : > { %v12897_v27 = vpop.permute.xlu0 %12896  ;;  %v17814_v58 = vpop.eup %17813 }
 0x768   : > { %v12942_v60 = vmul.f32 %v17808_v35, %v12897_v27  ;;  %12978 = vrot.lane.b32.xlu1 %v12943_v50, %s18197_s26  ;;  %v7295_v50 = vadd.f32 %v23677_v49, %v23746_v59  ;;  %v7312_v35 = vsub.f32 %v7296_v52, %v23747_v5 }
 0x769   : > { %v17816_v48 = vpop.eup %17815 }
 0x76a   : > { %12976 = vrot.lane.b32.xlu0 %v12942_v60, %s18197_s26  ;;  %v7311_v41 = vsub.f32 %v7295_v50, %v23748_v56  ;;  %v14176_v27 = vmul.f32 -1.442695, %v7312_v35  ;;  %v17818_v60 = vpop.eup %17817 }
 0x76b   : > { %v17820_v39 = vpop.eup %17819  ;;  %v7372_v42 = vadd.f32 1.0, %v17818_v60 }
 0x76c   : > { %v14175_v28 = vmul.f32 -1.442695, %v7311_v41  ;;  %17825 = vpow2.f32 %v14176_v27  ;;  %v7371_v7 = vadd.f32 1.0, %v17820_v39 }
 0x76d   : > { %v12903_v57 = vpop.permute.xlu1 %12902 }
 0x76e   : > { %v12945_v4 = vmul.f32 %v17810_v19, %v12903_v57  ;;  %v23750_v19 = vld [vmem:[#allocation69_spill] sm:$0xff]  ;;  %17827 = vpow2.f32 %v14175_v28  ;;  %v7314_v57 = vsub.f32 %v7298_v26, %v23751_v18 }
 0x76f   : > { %v12901_v24 = vpop.permute.xlu0 %12900  ;;  %v7297_v49 = vadd.f32 %v23682_v36, %v23750_v19  ;;  %17829 = vrcp.f32 %v7372_v42 }
 0x770   : > { %v12944_v61 = vmul.f32 %v17812_v43, %v12901_v24  ;;  %12982 = vrot.lane.b32.xlu1 %v12945_v4, %s18197_s26  ;;  %v23752_v43 = vld [vmem:[#allocation52_spill] sm:$0xff]  ;;  %17831 = vrcp.f32 %v7371_v7  ;;  %v14178_v10 = vmul.f32 -1.442695, %v7314_v57 }
 0x771   : > { %v17822_v4 = vpop.eup %17821  ;;  %v7313_v3 = vsub.f32 %v7297_v49, %v23752_v43 }
 0x772   : > { %12980 = vrot.lane.b32.xlu0 %v12944_v61, %s18197_s26  ;;  %v17824_v25 = vpop.eup %17823  ;;  %v7374_v24 = vadd.f32 1.0, %v17822_v4  ;;  %17833 = vpow2.f32 %v14178_v10 }
 0x773   : > { %v14177_v61 = vmul.f32 -1.442695, %v7313_v3  ;;  %v7373_v55 = vadd.f32 1.0, %v17824_v25 }
 0x774   : > { %17835 = vrcp.f32 %v7374_v24 }
 0x775   : > { %v12907_v34 = vpop.permute.xlu1 %12906  ;;  %17837 = vpow2.f32 %v14177_v61 }
 0x776   : > { %v12947_v14 = vmul.f32 %v17814_v58, %v12907_v34  ;;  %17839 = vrcp.f32 %v7373_v55 }
 0x777   : > { %v12905_v17 = vpop.permute.xlu0 %12904 }
 0x778   : > { %v12946_v30 = vmul.f32 %v17816_v48, %v12905_v17  ;;  %12986 = vrot.lane.b32.xlu1 %v12947_v14, %s18197_s26 }
 0x779   : > { %v17826_v32 = vpop.eup %17825 }
 0x77a   : > { %12984 = vrot.lane.b32.xlu0 %v12946_v30, %s18197_s26  ;;  %v7376_v46 = vadd.f32 1.0, %v17826_v32 }
 0x77b   : > { %v17828_v36 = vpop.eup %17827 }
 0x77c   : > { %v17830_v13 = vpop.eup %17829  ;;  %v7375_v58 = vadd.f32 1.0, %v17828_v36  ;;  %17841 = vrcp.f32 %v7376_v46 }
 0x77d   : > { %v17832_v20 = vpop.eup %17831 }
 0x77e   : > { %17843 = vrcp.f32 %v7375_v58 }
 0x77f   : > { %v17834_v14 = vpop.eup %17833 }
 0x780   : > { %v7378_v23 = vadd.f32 1.0, %v17834_v14 }
 0x781   : > { %v17836_v48 = vpop.eup %17835 }
 0x782   : > { %v17838_v12 = vpop.eup %17837  ;;  %17845 = vrcp.f32 %v7378_v23 }
 0x783   : > { %v17840_v17 = vpop.eup %17839  ;;  %v7377_v50 = vadd.f32 1.0, %v17838_v12 }
 0x785   : > { %17847 = vrcp.f32 %v7377_v50 }
 0x789   : > { %v17842_v5 = vpop.eup %17841 }
 0x78b   : > { %v17844_v41 = vpop.eup %17843 }
 0x78f   : > { %v17846_v28 = vpop.eup %17845 }
 0x792   : > { %v17848_v26 = vpop.eup %17847 }
 0x793   : > { %v12911_v44 = vpop.permute.xlu1 %12910 }
 0x794   : > { %v12949_v0 = vmul.f32 %v17830_v13, %v12911_v44 }
 0x795   : > { %v12909_v31 = vpop.permute.xlu0 %12908 }
 0x796   : > { %v12948_v34 = vmul.f32 %v17832_v20, %v12909_v31  ;;  %12990 = vrot.lane.b32.xlu1 %v12949_v0, %s18197_s26 }
 0x798   : > { %12988 = vrot.lane.b32.xlu0 %v12948_v34, %s18197_s26 }
 0x79b   : > { %v12915_v1 = vpop.permute.xlu1 %12914 }
 0x79c   : > { %v12951_v52 = vmul.f32 %v17836_v48, %v12915_v1 }
 0x79d   : > { %v12913_v30 = vpop.permute.xlu0 %12912 }
 0x79e   : > { %v12950_v59 = vmul.f32 %v17840_v17, %v12913_v30  ;;  %12994 = vrot.lane.b32.xlu1 %v12951_v52, %s18197_s26 }
 0x7a0   : > { %12992 = vrot.lane.b32.xlu0 %v12950_v59, %s18197_s26 }
 0x7a3   : > { %v12919_v35 = vpop.permute.xlu1 %12918 }
 0x7a4   : > { %v12953_v56 = vmul.f32 %v17842_v5, %v12919_v35 }
 0x7a5   : > { %v12917_v27 = vpop.permute.xlu0 %12916 }
 0x7a6   : > { %v12952_v60 = vmul.f32 %v17844_v41, %v12917_v27  ;;  %12998 = vrot.lane.b32.xlu1 %v12953_v56, %s18197_s26 }
 0x7a8   : > { %12996 = vrot.lane.b32.xlu0 %v12952_v60, %s18197_s26 }
 0x7ae   : > { %v12923_v39 = vpop.permute.xlu1 %12922 }
 0x7af   : > { %v12955_v53 = vmul.f32 %v17846_v28, %v12923_v39 }
 0x7b0   : > { %v12921_v42 = vpop.permute.xlu0 %12920 }
 0x7b1   : > { %v12954_v19 = vmul.f32 %v17848_v26, %v12921_v42  ;;  %13002 = vrot.lane.b32.xlu1 %v12955_v53, %s18197_s26 }
 0x7b2   : > { %v13027_v49 = vpop.permute.xlu1 %13026 }
 0x7b3   : > { %13000 = vrot.lane.b32.xlu0 %v12954_v19, %s18197_s26 }
 0x7b4   : > { %v13025_v7 = vpop.permute.xlu0 %13024 }
 0x7b5   : > { %13050 = vrot.lane.b32.xlu1 %v22958_v6, %s18195_s21 }
 0x7b6   : > { %v13031_v18 = vpop.permute.xlu1 %13030 }
 0x7b7   : > { %13048 = vrot.lane.b32.xlu0 %v22953_v54, %s18195_s21 }
 0x7b8   : > { %v13029_v57 = vpop.permute.xlu0 %13028 }
 0x7ba   : > { %v13035_v4 = vpop.permute.xlu1 %13034 }
 0x7bc   : > { %v13033_v43 = vpop.permute.xlu0 %13032 }
 0x7be   : > { %v13039_v3 = vpop.permute.xlu1 %13038 }
 0x7c0   : > { %v13037_v25 = vpop.permute.xlu0 %13036 }
 0x7c2   : > { %v13043_v10 = vpop.permute.xlu1 %13042 }
 0x7c4   : > { %v13041_v24 = vpop.permute.xlu0 %13040 }
 0x7c6   : > { %v13047_v61 = vpop.permute.xlu1 %13046 }
 0x7c8   : > { %v13045_v55 = vpop.permute.xlu0 %13044 }
 0x7d2   : > { %v12975_v54 = vpop.permute.xlu1 %12974 }
 0x7d3   : > { %v13069_v6 = vsel %vm806_vm0, %v12975_v54, %v23049_v8 }
 0x7d4   : > { %v13086_v32 = vsel %vm13084_vm1, %v13069_v6, %v22736_v2  ;;  %v12973_v36 = vpop.permute.xlu0 %12972 }
 0x7d5   : > { %13103 = vst.msk [vmem:[%s23102_s22 + $0x8] sm:$0xff] %vm13101_vm2, %v13086_v32  ;;  %v13068_v46 = vsel %vm806_vm0, %v12973_v36, %v23051_v40 }
 0x7d6   : > { %v13085_v13 = vsel %vm13084_vm1, %v13068_v46, %v22725_v21 }
 0x7d7   : > { %13102 = vst.msk [vmem:[%s23102_s22] sm:$0xff] %vm13101_vm2, %v13085_v13 }
 0x7da   : > { %v12979_v44 = vpop.permute.xlu1 %12978 }
 0x7db   : > { %v13071_v0 = vsel %vm806_vm0, %v12979_v44, %v13027_v49 }
 0x7dc   : > { %v13088_v8 = vsel %vm13084_vm1, %v13071_v0, %v22753_v63  ;;  %v12977_v2 = vpop.permute.xlu0 %12976 }
 0x7dd   : > { %13105 = vst.msk [vmem:[%s23102_s22 + $0x18] sm:$0xff] %vm13101_vm2, %v13088_v8  ;;  %v13070_v58 = vsel %vm806_vm0, %v12977_v2, %v13025_v7 }
 0x7de   : > { %v13087_v40 = vsel %vm13084_vm1, %v13070_v58, %v22745_v22 }
 0x7df   : > { %13104 = vst.msk [vmem:[%s23102_s22 + $0x10] sm:$0xff] %vm13101_vm2, %v13087_v40 }
 0x7e2   : > { %v12983_v21 = vpop.permute.xlu1 %12982 }
 0x7e3   : > { %v13073_v20 = vsel %vm806_vm0, %v12983_v21, %v13031_v18 }
 0x7e4   : > { %v13090_v31 = vsel %vm13084_vm1, %v13073_v20, %v22769_v9  ;;  %v12981_v34 = vpop.permute.xlu0 %12980 }
 0x7e5   : > { %13107 = vst.msk [vmem:[%s23102_s22 + $0x28] sm:$0xff] %vm13101_vm2, %v13090_v31  ;;  %v13072_v63 = vsel %vm806_vm0, %v12981_v34, %v13029_v57 }
 0x7e6   : > { %v13089_v14 = vsel %vm13084_vm1, %v13072_v63, %v22761_v15 }
 0x7e7   : > { %13106 = vst.msk [vmem:[%s23102_s22 + $0x20] sm:$0xff] %vm13101_vm2, %v13089_v14 }
 0x7ea   : > { %v12987_v22 = vpop.permute.xlu1 %12986 }
 0x7eb   : > { %v13075_v48 = vsel %vm806_vm0, %v12987_v22, %v13035_v4 }
 0x7ec   : > { %v13092_v1 = vsel %vm13084_vm1, %v13075_v48, %v22789_v47  ;;  %v12985_v12 = vpop.permute.xlu0 %12984 }
 0x7ed   : > { %13109 = vst.msk [vmem:[%s23102_s22 + $0x38] sm:$0xff] %vm13101_vm2, %v13092_v1  ;;  %v13074_v9 = vsel %vm806_vm0, %v12985_v12, %v13033_v43 }
 0x7ee   : > { %v13091_v52 = vsel %vm13084_vm1, %v13074_v9, %v22779_v38 }
 0x7ef   : > { %13108 = vst.msk [vmem:[%s23102_s22 + $0x30] sm:$0xff] %vm13101_vm2, %v13091_v52 }
 0x808   : > { %v12991_v15 = vpop.permute.xlu1 %12990 }
 0x809   : > { %v13077_v17 = vsel %vm806_vm0, %v12991_v15, %v13039_v3 }
 0x80a   : > { %v13094_v30 = vsel %vm13084_vm1, %v13077_v17, %v22806_v29  ;;  %v12989_v23 = vpop.permute.xlu0 %12988 }
 0x80b   : > { %13111 = vst.msk [vmem:[%s23102_s22 + $0x48] sm:$0xff] %vm13101_vm2, %v13094_v30  ;;  %v13076_v47 = vsel %vm806_vm0, %v12989_v23, %v13037_v25 }
 0x80c   : > { %v13093_v59 = vsel %vm13084_vm1, %v13076_v47, %v22797_v45 }
 0x80d   : > { %13110 = vst.msk [vmem:[%s23102_s22 + $0x40] sm:$0xff] %vm13101_vm2, %v13093_v59 }
 0x810   : > { %v12995_v38 = vpop.permute.xlu1 %12994 }
 0x811   : > { %v13079_v50 = vsel %vm806_vm0, %v12995_v38, %v13043_v10 }
 0x812   : > { %v13096_v5 = vsel %vm13084_vm1, %v13079_v50, %v22850_v37  ;;  %v12993_v35 = vpop.permute.xlu0 %12992 }
 0x813   : > { %13113 = vst.msk [vmem:[%s23102_s22 + $0x58] sm:$0xff] %vm13101_vm2, %v13096_v5  ;;  %v13078_v29 = vsel %vm806_vm0, %v12993_v35, %v13041_v24 }
 0x814   : > { %v13095_v56 = vsel %vm13084_vm1, %v13078_v29, %v22812_v11 }
 0x815   : > { %13112 = vst.msk [vmem:[%s23102_s22 + $0x50] sm:$0xff] %vm13101_vm2, %v13095_v56 }
 0x818   : > { %v12999_v45 = vpop.permute.xlu1 %12998 }
 0x819   : > { %v13081_v41 = vsel %vm806_vm0, %v12999_v45, %v13047_v61 }
 0x81a   : > { %v13098_v27 = vsel %vm13084_vm1, %v13081_v41, %v22883_v62  ;;  %v12997_v60 = vpop.permute.xlu0 %12996 }
 0x81b   : > { %13115 = vst.msk [vmem:[%s23102_s22 + $0x68] sm:$0xff] %vm13101_vm2, %v13098_v27  ;;  %v13080_v37 = vsel %vm806_vm0, %v12997_v60, %v13045_v55 }
 0x81c   : > { %v13097_v28 = vsel %vm13084_vm1, %v13080_v37, %v22872_v33 }
 0x81d   : > { %13114 = vst.msk [vmem:[%s23102_s22 + $0x60] sm:$0xff] %vm13101_vm2, %v13097_v28 }
 0x823   : > { %v13003_v11 = vpop.permute.xlu1 %13002 }
 0x825   : > { %v13001_v39 = vpop.permute.xlu0 %13000 }
 0x827   : > { %v13051_v53 = vpop.permute.xlu1 %13050 }
 0x828   : > { %v13083_v26 = vsel %vm806_vm0, %v13003_v11, %v13051_v53 }
 0x829   : > { %v13100_v42 = vsel %vm13084_vm1, %v13083_v26, %v22911_v16  ;;  %v13049_v19 = vpop.permute.xlu0 %13048 }
 0x82a   : > { %13117 = vst.msk [vmem:[%s23102_s22 + $0x78] sm:$0xff] %vm13101_vm2, %v13100_v42  ;;  %v13082_v62 = vsel %vm806_vm0, %v13001_v39, %v13049_v19 }
 0x82b   : > { %v13099_v49 = vsel %vm13084_vm1, %v13082_v62, %v22900_v51 }
 0x82c   : > { %13116 = vst.msk [vmem:[%s23102_s22 + $0x70] sm:$0xff] %vm13101_vm2, %v13099_v49 }
 0x82d PF: > { %s23754_s24 = sld [smem:[#allocation28_spill]]  ;;  %s23757_s22 = smov %s18177_s23 }
 0x82e   : > { %s23755_s21 = sld [smem:[#allocation24_spill]] }
 0x82f   : > { %s23756_s17 = sld [smem:[#allocation29_spill]] }
 0x833   : > { %p31_p2 = scmp.ge.s32.totalorder %s23754_s24, 6  }
 0x835   : > { %s23758_s23 = smov %s23756_s17  ;;  %33 = sbr.rel (!%p31_p2) target bundleno = 17 (0x11), region = 230 }
 0x83a   :  { %13139 = vsyncpa [#allocation3], 1 }
 0x83b   :  { %13141 = vsyncpa [#allocation3 + $0x1], 1 }
 0x83c   :  { %13142 = vsyncpa [#allocation5], 1 }
 0x83d   :  { %13144 = vsyncpa [#allocation5 + $0x1], 1 }
 0x83e   :  { %13145 = vsyncpa [#allocation8], 1 }
 0x83f   :  { %13147 = vsyncpa [#allocation8 + $0x1], 1 }
 0x840   :  { %13148 = vsyncpa [#allocation11], 1 }
 0x841   :  { %13149 = vsyncpa [#allocation14], 1 }
 0x842   :  { %13150 = vsyncpa [#allocation17], 1 }

</bundles_post_ra>
